<compile_context>
chip_gen: v7x
topology: tpu7x:2x2x1
jax: 0.10.0
libtpu: 0.0.40
codegen_flags: <defaults>
</compile_context>

<pallas_src>
import jax
import jax.numpy as jnp
import numpy as np
from jax.experimental import pallas as pl
from jax.experimental.pallas import tpu as pltpu

EPS = 1e-5
LANE = 128   # lane tile: pad all channel axes to a multiple of this

# Sub-pixel tap table for ConvTranspose2d(k=4, s=2, p=1).
# Output row parity ph uses padded-input row offsets ro with kernel rows kh:
#   oh = 2*ih - 1 + kh  ->  ph=0: (ro=1, kh=1), (ro=0, kh=3)
#                           ph=1: (ro=2, kh=0), (ro=1, kh=2)
# (same table applies to columns / kw).
_TAPS = {0: ((1, 1), (0, 3)), 1: ((2, 0), (1, 2))}

_VMEM_LIMIT_CACHE = None


def _vmem_limit():
    """Generation-aware scoped-VMEM limit (leave ~1/8 headroom, cap at 112 MiB)."""
    global _VMEM_LIMIT_CACHE
    if _VMEM_LIMIT_CACHE is None:
        try:
            cap = int(pltpu.get_tpu_info().vmem_capacity_bytes)
        except Exception:
            cap = 64 * 1024 * 1024          # conservative (v7x physical)
        _VMEM_LIMIT_CACHE = min((cap * 7) // 8, 112 * 1024 * 1024)
    return _VMEM_LIMIT_CACHE


def _round_up(n, m):
    return ((n + m - 1) // m) * m


def _pad_axis(a, axis, to):
    pad = to - a.shape[axis]
    if pad == 0:
        return a
    widths = [(0, 0)] * a.ndim
    widths[axis] = (0, pad)
    return jnp.pad(a, widths)


def _pad2d(a, shape):
    return jnp.pad(a, ((0, shape[0] - a.shape[0]), (0, shape[1] - a.shape[1])))


def _pick_tile(m, target=512, align=16):
    """Largest divisor of m that is a multiple of `align` and <= target (else m).

    512-1024 row tiles reach ~85% of HBM BW on v6e; align=16 matches bf16
    sublane packing.
    """
    for cand in range(min(target, m), align - 1, -1):
        if m % cand == 0 and cand % align == 0:
            return cand
    return m


# ----------------------------------------------------------------------------
# Pass 1a: 1x1 conv matmul + per-tile partial sum / sum-of-squares
# ----------------------------------------------------------------------------
def _pw_matmul_stats_kernel(x_ref, w_ref, y_ref, sum_ref, ssq_ref):
    y = jnp.dot(x_ref[...], w_ref[...], preferred_element_type=jnp.float32)
    y_ref[...] = y.astype(y_ref.dtype)                     # bf16 intermediate
    s = jnp.sum(y, axis=0, keepdims=True)
    q = jnp.sum(y * y, axis=0, keepdims=True)
    # Broadcast over the 8-row (sublane-aligned) stats block; wrapper reads row 0.
    sum_ref[...] = jnp.broadcast_to(s, sum_ref.shape)
    ssq_ref[...] = jnp.broadcast_to(q, ssq_ref.shape)


def pointwise_matmul_stats(x2d, w):
    # x2d: [M, K] bf16, w: [K, C] bf16 (K, C both 128-multiples)
    M, K = x2d.shape
    C = w.shape[1]
    tm = _pick_tile(M)
    nt = M // tm
    return pl.pallas_call(
        _pw_matmul_stats_kernel,
        out_shape=(jax.ShapeDtypeStruct((M, C), jnp.bfloat16),
                   jax.ShapeDtypeStruct((8 * nt, C), jnp.float32),
                   jax.ShapeDtypeStruct((8 * nt, C), jnp.float32)),
        grid=(nt,),
        in_specs=[pl.BlockSpec((tm, K), lambda i: (i, 0)),
                  pl.BlockSpec((K, C), lambda i: (0, 0))],
        out_specs=(pl.BlockSpec((tm, C), lambda i: (i, 0)),
                   pl.BlockSpec((8, C), lambda i: (i, 0)),
                   pl.BlockSpec((8, C), lambda i: (i, 0))),
        compiler_params=pltpu.CompilerParams(
            dimension_semantics=("parallel",),
            vmem_limit_bytes=_vmem_limit()),
    )(x2d, w)


# ----------------------------------------------------------------------------
# Pass 1b: ConvTranspose2d(k4,s2,p1) matmul + per-image partial stats
# ----------------------------------------------------------------------------
def _make_deconv_kernel(H, W, C):
    def kernel(xp_ref, w_ref, subs_ref, sum_ref, ssq_ref):
        xp = xp_ref[0]                                     # [H+2, W+2, C] bf16
        # 9 distinct shifted windows, hoisted out of the parity loops.
        win = {(ro, co): xp[ro:ro + H, co:co + W, :]
               for ro in (0, 1, 2) for co in (0, 1, 2)}
        s_sum = jnp.zeros((1, C), jnp.float32)
        s_ssq = jnp.zeros((1, C), jnp.float32)
        for ph in (0, 1):
            for pw in (0, 1):
                # 4 contributing windows concatenated on the (lane-aligned)
                # channel axis -> one K=4C matmul per sub-pixel parity.
                xcat = jnp.concatenate(
                    [win[(ro, co)]
                     for (ro, _kh) in _TAPS[ph]
                     for (co, _kw) in _TAPS[pw]],
                    axis=-1).reshape(H * W, 4 * C)
                plane = jnp.dot(xcat, w_ref[2 * ph + pw],
                                preferred_element_type=jnp.float32)  # [H*W, C]
                subs_ref[2 * ph + pw, 0] = plane.astype(subs_ref.dtype)
                s_sum = s_sum + jnp.sum(plane, axis=0, keepdims=True)
                s_ssq = s_ssq + jnp.sum(plane * plane, axis=0, keepdims=True)
        sum_ref[...] = jnp.broadcast_to(s_sum, sum_ref.shape)
        ssq_ref[...] = jnp.broadcast_to(s_ssq, ssq_ref.shape)
    return kernel


def _build_deconv_weights(w2_torch, cp):
    # w2_torch: PyTorch ConvTranspose2d weight [Cin, Cout, 4, 4]
    cin, cout = w2_torch.shape[0], w2_torch.shape[1]
    wp = jnp.pad(w2_torch, ((0, cp - cin), (0, cp - cout), (0, 0), (0, 0)))
    w = jnp.transpose(wp, (2, 3, 0, 1))                    # [kh, kw, cp, cp]
    planes = []
    for ph in (0, 1):
        for pw in (0, 1):
            blocks = [w[kh, kw]
                      for (_ro, kh) in _TAPS[ph]
                      for (_co, kw) in _TAPS[pw]]
            planes.append(jnp.concatenate(blocks, axis=0))  # [4*cp, cp]
    return jnp.stack(planes, axis=0)                        # [4, 4*cp, cp]


def deconv_matmul_stats(xp, wcat):
    # xp: [N, H+2, W+2, C] bf16 (zero-padded input), wcat: [4, 4C, C] bf16
    N, Hp, Wp, C = xp.shape
    H, W = Hp - 2, Wp - 2
    HW = H * W
    return pl.pallas_call(
        _make_deconv_kernel(H, W, C),
        out_shape=(jax.ShapeDtypeStruct((4, N, HW, C), jnp.bfloat16),
                   jax.ShapeDtypeStruct((8 * N, C), jnp.float32),
                   jax.ShapeDtypeStruct((8 * N, C), jnp.float32)),
        grid=(N,),
        in_specs=[pl.BlockSpec((1, Hp, Wp, C), lambda n: (n, 0, 0, 0)),
                  pl.BlockSpec((4, 4 * C, C), lambda n: (0, 0, 0))],
        out_specs=(pl.BlockSpec((4, 1, HW, C), lambda n: (0, n, 0, 0)),
                   pl.BlockSpec((8, C), lambda n: (n, 0)),
                   pl.BlockSpec((8, C), lambda n: (n, 0))),
        compiler_params=pltpu.CompilerParams(
            dimension_semantics=("parallel",),
            vmem_limit_bytes=_vmem_limit()),
    )(xp, wcat)


# ----------------------------------------------------------------------------
# Stats reduction + per-channel scale/shift (tiny, done in the wrapper)
# ----------------------------------------------------------------------------
def _finalize_stats(psum, pssq, gamma, beta, count):
    c = psum.shape[-1]
    s = jnp.sum(psum.reshape(-1, 8, c)[:, 0, :], axis=0)     # (C,)
    q = jnp.sum(pssq.reshape(-1, 8, c)[:, 0, :], axis=0)     # (C,)
    mean = s / count
    var = jnp.maximum(q / count - mean * mean, 0.0)
    scale = gamma * jax.lax.rsqrt(var + EPS)
    shift = beta - mean * scale
    return scale.reshape(1, c).astype(jnp.float32), shift.reshape(1, c).astype(jnp.float32)


# ----------------------------------------------------------------------------
# Pass 2 (shared): y*scale + shift, ReLU, tiled over rows
# ----------------------------------------------------------------------------
def _bn_relu_kernel(y_ref, scale_ref, shift_ref, o_ref):
    y = y_ref[...].astype(jnp.float32)
    o_ref[...] = jnp.maximum(y * scale_ref[...] + shift_ref[...], 0.0).astype(o_ref.dtype)


def bn_relu(y_pre, scale, shift, out_dtype):
    M, C = y_pre.shape
    tm = _pick_tile(M)
    return pl.pallas_call(
        _bn_relu_kernel,
        out_shape=jax.ShapeDtypeStruct((M, C), out_dtype),
        grid=(M // tm,),
        in_specs=[pl.BlockSpec((tm, C), lambda i: (i, 0)),
                  pl.BlockSpec((1, C), lambda i: (0, 0)),
                  pl.BlockSpec((1, C), lambda i: (0, 0))],
        out_specs=pl.BlockSpec((tm, C), lambda i: (i, 0)),
        compiler_params=pltpu.CompilerParams(
            dimension_semantics=("parallel",),
            vmem_limit_bytes=_vmem_limit()),
    )(y_pre, scale, shift)


# ----------------------------------------------------------------------------
# Full forward (wrapper glue: layout, lane padding, final sub-pixel interleave)
# ----------------------------------------------------------------------------
def decoder_block_forward(x_nchw, p):
    N, Cin, H, W = x_nchw.shape
    mid = p["w1"].shape[0]
    nf = p["w3"].shape[0]
    cin_p = _round_up(Cin, LANE)
    mid_p = _round_up(mid, LANE)
    nf_p = _round_up(nf, LANE)
    M = N * H * W
    M2 = 4 * N * H * W

    x2d = jnp.transpose(x_nchw, (0, 2, 3, 1)).reshape(M, Cin)
    x2d = _pad_axis(x2d, 1, cin_p).astype(jnp.bfloat16)

    # ---- conv1 (1x1) + norm1 + relu  (bias dropped: cancelled by batch-stat BN)
    w1p = _pad2d(jnp.transpose(p["w1"]), (cin_p, mid_p)).astype(jnp.bfloat16)
    y1_pre, s1, q1 = pointwise_matmul_stats(x2d, w1p)
    sc1, sh1 = _finalize_stats(s1, q1, _pad_axis(p["g1"], 0, mid_p),
                               _pad_axis(p["be1"], 0, mid_p), M)
    y1 = bn_relu(y1_pre, sc1, sh1, jnp.bfloat16)                     # [M, mid_p]

    # ---- deconv2 (k4, s2, p1) + norm2 + relu, kept in sub-pixel-parity layout
    yp = jnp.pad(y1.reshape(N, H, W, mid_p), ((0, 0), (1, 1), (1, 1), (0, 0)))
    wcat = _build_deconv_weights(p["w2"], mid_p).astype(jnp.bfloat16)  # [4,4*mid_p,mid_p]
    subs, s2, q2 = deconv_matmul_stats(yp, wcat)                       # [4,N,H*W,mid_p]
    sc2, sh2 = _finalize_stats(s2, q2, _pad_axis(p["g2"], 0, mid_p),
                               _pad_axis(p["be2"], 0, mid_p), M2)
    y2 = bn_relu(subs.reshape(M2, mid_p), sc2, sh2, jnp.bfloat16)      # [M2, mid_p]

    # ---- conv3 (1x1) + norm3 + relu -- fed in parity-major row order (row-order
    # invariant); the sub-pixel interleave is folded into the final transpose.
    w3p = _pad2d(jnp.transpose(p["w3"]), (mid_p, nf_p)).astype(jnp.bfloat16)
    y3_pre, s3, q3 = pointwise_matmul_stats(y2, w3p)
    sc3, sh3 = _finalize_stats(s3, q3, _pad_axis(p["g3"], 0, nf_p),
                               _pad_axis(p["be3"], 0, nf_p), M2)
    y3 = bn_relu(y3_pre, sc3, sh3, jnp.float32)                        # [M2, nf_p]

    # out[n, c, 2h+ph, 2w+pw] = y3[(ph, pw, n, h, w), c]
    y3 = y3[:, :nf].reshape(2, 2, N, H, W, nf)
    return y3.transpose(2, 5, 3, 0, 4, 1).reshape(N, nf, 2 * H, 2 * W)  # NCHW


# ----------------------------------------------------------------------------
# Pure-JAX reference (PyTorch semantics, NCHW, f32, with biases)
# ----------------------------------------------------------------------------
def reference_forward(x, p):
    hi = jax.lax.Precision.HIGHEST

    def bn_train(z, gamma, beta):
        mean = jnp.mean(z, axis=(0, 2, 3), keepdims=True)
        var = jnp.mean((z - mean) ** 2, axis=(0, 2, 3), keepdims=True)
        return ((z - mean) / jnp.sqrt(var + EPS)
                * gamma[None, :, None, None] + beta[None, :, None, None])

    y = jnp.einsum("nchw,oc->nohw", x, p["w1"], precision=hi) \
        + p["b1"][None, :, None, None]
    y = jax.nn.relu(bn_train(y, p["g1"], p["be1"]))

    N, C, H, W = y.shape
    Co = p["w2"].shape[1]
    out_full = jnp.zeros((N, Co, 2 * H + 2, 2 * W + 2), jnp.float32)
    for kh in range(4):
        for kw in range(4):
            contrib = jnp.einsum("nchw,cd->ndhw", y, p["w2"][:, :, kh, kw],
                                 precision=hi)
            out_full = out_full.at[:, :, kh:kh + 2 * H:2, kw:kw + 2 * W:2].add(contrib)
    y = out_full[:, :, 1:2 * H + 1, 1:2 * W + 1] + p["b2"][None, :, None, None]
    y = jax.nn.relu(bn_train(y, p["g2"], p["be2"]))

    y = jnp.einsum("nchw,oc->nohw", y, p["w3"], precision=hi) \
        + p["b3"][None, :, None, None]
    y = jax.nn.relu(bn_train(y, p["g3"], p["be3"]))
    return y


if __name__ == "__main__":
    in_channels, n_filters = 16, 8
    mid = in_channels // 4
    key = jax.random.PRNGKey(0)
    ks = jax.random.split(key, 13)

    def u(k, shape, lo=-0.5, hi=0.5):
        return jax.random.uniform(k, shape, jnp.float32, lo, hi)

    params = dict(
        # conv1: weight [mid, in] (1x1 kernel squeezed), bias [mid]
        w1=u(ks[0], (mid, in_channels)), b1=u(ks[1], (mid,)),
        g1=u(ks[2], (mid,), 0.5, 1.5), be1=u(ks[3], (mid,)),
        # deconv2: PyTorch ConvTranspose2d weight [in, out, 4, 4], bias [out]
        w2=u(ks[4], (mid, mid, 4, 4)), b2=u(ks[5], (mid,)),
        g2=u(ks[6], (mid,), 0.5, 1.5), be2=u(ks[7], (mid,)),
        # conv3: weight [n_filters, mid], bias [n_filters]
        w3=u(ks[8], (n_filters, mid)), b3=u(ks[9], (n_filters,)),
        g3=u(ks[10], (n_filters,), 0.5, 1.5), be3=u(ks[11], (n_filters,)),
    )

    x = jax.random.normal(ks[12], (2, in_channels, 16, 16), jnp.float32)

    out = jax.jit(decoder_block_forward)(x, params)
    out = jax.block_until_ready(out)

    ref = np.asarray(reference_forward(x, params))
    out_np = np.asarray(out)
    assert out_np.shape == (2, n_filters, 32, 32), out_np.shape
    # bf16 matmul operands AND bf16 intermediates across 3 stacked BN stages.
    err = np.max(np.abs(out_np - ref))
    assert np.allclose(out_np, ref, atol=5e-2, rtol=5e-2), f"max abs err {err}"

    print("KERNEL_OK")
</pallas_src>

<mosaic_0001>
module attributes {stable_mosaic.version = 11 : i64} {
  func.func @_pw_matmul_stats_kernel(%arg0: i32, %arg1: memref<512x128xbf16, #tpu.memory_space<vmem>>, %arg2: memref<128x128xbf16, #tpu.memory_space<vmem>>, %arg3: memref<512x128xbf16, #tpu.memory_space<vmem>>, %arg4: memref<8x128xf32, #tpu.memory_space<vmem>>, %arg5: memref<8x128xf32, #tpu.memory_space<vmem>>) attributes {dimension_semantics = [#tpu.dimension_semantics<parallel>], iteration_bounds = array<i64: 1>, scalar_prefetch = 0 : i64, scratch_operands = 0 : i64, tpu.core_type = #tpu.core_type<tc>, window_params = [{transform_indices = @transform_0, window_bounds = array<i64: 512, 128>}, {pipeline_mode = #tpu.pipeline_mode<synchronous>, transform_indices = @transform_1, window_bounds = array<i64: 128, 128>}, {transform_indices = @transform_2, window_bounds = array<i64: 512, 128>}, {transform_indices = @transform_3, window_bounds = array<i64: 8, 128>}, {transform_indices = @transform_4, window_bounds = array<i64: 8, 128>}]} {
    %c0 = arith.constant 0 : index
    %c0_0 = arith.constant 0 : index
    %0 = vector.load %arg1[%c0, %c0_0] : memref<512x128xbf16, #tpu.memory_space<vmem>>, vector<512x128xbf16>
    %c0_1 = arith.constant 0 : index
    %c0_2 = arith.constant 0 : index
    %1 = vector.load %arg2[%c0_1, %c0_2] : memref<128x128xbf16, #tpu.memory_space<vmem>>, vector<128x128xbf16>
    %cst = arith.constant dense<0.000000e+00> : vector<512x128xf32>
    %2 = tpu.matmul %0, %1, %cst {dimension_numbers = #tpu.dot_dimension_numbers<[1], [0], [0], [1], [0, 0, 1, 1], [], []>} : vector<512x128xbf16>, vector<128x128xbf16>, vector<512x128xf32> -> vector<512x128xf32>
    %3 = arith.truncf %2 : vector<512x128xf32> to vector<512x128xbf16>
    %c0_3 = arith.constant 0 : index
    %c0_4 = arith.constant 0 : index
    %4 = vector.load %arg3[%c0_3, %c0_4] : memref<512x128xbf16, #tpu.memory_space<vmem>>, vector<512x128xbf16>
    tpu.vector_store %arg3[%c0_3, %c0_4], %3 {strides = array<i32>} : memref<512x128xbf16, #tpu.memory_space<vmem>>, vector<512x128xbf16>,
    %cst_5 = arith.constant dense<0.000000e+00> : vector<128xf32>
    %5 = vector.multi_reduction <add>, %2, %cst_5 [0] : vector<512x128xf32> to vector<128xf32>
    %6 = vector.shape_cast %5 : vector<128xf32> to vector<1x128xf32>
    %7 = arith.mulf %2, %2 : vector<512x128xf32>
    %cst_6 = arith.constant dense<0.000000e+00> : vector<128xf32>
    %8 = vector.multi_reduction <add>, %7, %cst_6 [0] : vector<512x128xf32> to vector<128xf32>
    %9 = vector.shape_cast %8 : vector<128xf32> to vector<1x128xf32>
    %10 = vector.shape_cast %6 : vector<1x128xf32> to vector<1x128xf32>
    %11 = vector.broadcast %10 : vector<1x128xf32> to vector<8x128xf32>
    %c0_7 = arith.constant 0 : index
    %c0_8 = arith.constant 0 : index
    %12 = vector.load %arg4[%c0_7, %c0_8] : memref<8x128xf32, #tpu.memory_space<vmem>>, vector<8x128xf32>
    tpu.vector_store %arg4[%c0_7, %c0_8], %11 {strides = array<i32>} : memref<8x128xf32, #tpu.memory_space<vmem>>, vector<8x128xf32>,
    %13 = vector.shape_cast %9 : vector<1x128xf32> to vector<1x128xf32>
    %14 = vector.broadcast %13 : vector<1x128xf32> to vector<8x128xf32>
    %c0_9 = arith.constant 0 : index
    %c0_10 = arith.constant 0 : index
    %15 = vector.load %arg5[%c0_9, %c0_10] : memref<8x128xf32, #tpu.memory_space<vmem>>, vector<8x128xf32>
    tpu.vector_store %arg5[%c0_9, %c0_10], %14 {strides = array<i32>} : memref<8x128xf32, #tpu.memory_space<vmem>>, vector<8x128xf32>,
    return
  }
  func.func @transform_0(%arg0: i32) -> (i32, i32) {
    %c0_i32 = arith.constant 0 : i32
    %c0_i32_0 = arith.constant 0 : i32
    return %arg0, %c0_i32 : i32, i32
  }
  func.func @transform_1(%arg0: i32) -> (i32, i32) {
    %c0_i32 = arith.constant 0 : i32
    %c0_i32_0 = arith.constant 0 : i32
    %c0_i32_1 = arith.constant 0 : i32
    return %c0_i32, %c0_i32_0 : i32, i32
  }
  func.func @transform_2(%arg0: i32) -> (i32, i32) {
    %c0_i32 = arith.constant 0 : i32
    %c0_i32_0 = arith.constant 0 : i32
    return %arg0, %c0_i32 : i32, i32
  }
  func.func @transform_3(%arg0: i32) -> (i32, i32) {
    %c0_i32 = arith.constant 0 : i32
    %c0_i32_0 = arith.constant 0 : i32
    return %arg0, %c0_i32 : i32, i32
  }
  func.func @transform_4(%arg0: i32) -> (i32, i32) {
    %c0_i32 = arith.constant 0 : i32
    %c0_i32_0 = arith.constant 0 : i32
    return %arg0, %c0_i32 : i32, i32
  }
}

module attributes {stable_mosaic.version = 11 : i64} {
  func.func @_bn_relu_kernel(%arg0: i32, %arg1: memref<512x128xbf16, #tpu.memory_space<vmem>>, %arg2: memref<1x128xf32, #tpu.memory_space<vmem>>, %arg3: memref<1x128xf32, #tpu.memory_space<vmem>>, %arg4: memref<512x128xbf16, #tpu.memory_space<vmem>>) attributes {dimension_semantics = [#tpu.dimension_semantics<parallel>], iteration_bounds = array<i64: 1>, scalar_prefetch = 0 : i64, scratch_operands = 0 : i64, tpu.core_type = #tpu.core_type<tc>, window_params = [{transform_indices = @transform_0, window_bounds = array<i64: 512, 128>}, {pipeline_mode = #tpu.pipeline_mode<synchronous>, transform_indices = @transform_1, window_bounds = array<i64: 1, 128>}, {pipeline_mode = #tpu.pipeline_mode<synchronous>, transform_indices = @transform_2, window_bounds = array<i64: 1, 128>}, {transform_indices = @transform_3, window_bounds = array<i64: 512, 128>}]} {
    %c0 = arith.constant 0 : index
    %c0_0 = arith.constant 0 : index
    %0 = vector.load %arg1[%c0, %c0_0] : memref<512x128xbf16, #tpu.memory_space<vmem>>, vector<512x128xbf16>
    %1 = arith.extf %0 : vector<512x128xbf16> to vector<512x128xf32>
    %c0_1 = arith.constant 0 : index
    %c0_2 = arith.constant 0 : index
    %2 = vector.load %arg2[%c0_1, %c0_2] : memref<1x128xf32, #tpu.memory_space<vmem>>, vector<1x128xf32>
    %3 = vector.broadcast %2 : vector<1x128xf32> to vector<512x128xf32>
    %4 = arith.mulf %1, %3 : vector<512x128xf32>
    %c0_3 = arith.constant 0 : index
    %c0_4 = arith.constant 0 : index
    %5 = vector.load %arg3[%c0_3, %c0_4] : memref<1x128xf32, #tpu.memory_space<vmem>>, vector<1x128xf32>
    %6 = vector.broadcast %5 : vector<1x128xf32> to vector<512x128xf32>
    %7 = arith.addf %4, %6 : vector<512x128xf32>
    %cst = arith.constant 0.000000e+00 : f32
    %8 = vector.broadcast %cst : f32 to vector<512x128xf32>
    %9 = arith.maximumf %7, %8 : vector<512x128xf32>
    %10 = arith.truncf %9 : vector<512x128xf32> to vector<512x128xbf16>
    %c0_5 = arith.constant 0 : index
    %c0_6 = arith.constant 0 : index
    %11 = vector.load %arg4[%c0_5, %c0_6] : memref<512x128xbf16, #tpu.memory_space<vmem>>, vector<512x128xbf16>
    tpu.vector_store %arg4[%c0_5, %c0_6], %10 {strides = array<i32>} : memref<512x128xbf16, #tpu.memory_space<vmem>>, vector<512x128xbf16>,
    return
  }
  func.func @transform_0(%arg0: i32) -> (i32, i32) {
    %c0_i32 = arith.constant 0 : i32
    %c0_i32_0 = arith.constant 0 : i32
    return %arg0, %c0_i32 : i32, i32
  }
  func.func @transform_1(%arg0: i32) -> (i32, i32) {
    %c0_i32 = arith.constant 0 : i32
    %c0_i32_0 = arith.constant 0 : i32
    %c0_i32_1 = arith.constant 0 : i32
    return %c0_i32, %c0_i32_0 : i32, i32
  }
  func.func @transform_2(%arg0: i32) -> (i32, i32) {
    %c0_i32 = arith.constant 0 : i32
    %c0_i32_0 = arith.constant 0 : i32
    %c0_i32_1 = arith.constant 0 : i32
    return %c0_i32, %c0_i32_0 : i32, i32
  }
  func.func @transform_3(%arg0: i32) -> (i32, i32) {
    %c0_i32 = arith.constant 0 : i32
    %c0_i32_0 = arith.constant 0 : i32
    return %arg0, %c0_i32 : i32, i32
  }
}

module attributes {stable_mosaic.version = 11 : i64} {
  func.func @kernel(%arg0: i32, %arg1: memref<1x18x18x128xbf16, #tpu.memory_space<vmem>>, %arg2: memref<4x512x128xbf16, #tpu.memory_space<vmem>>, %arg3: memref<4x1x256x128xbf16, #tpu.memory_space<vmem>>, %arg4: memref<8x128xf32, #tpu.memory_space<vmem>>, %arg5: memref<8x128xf32, #tpu.memory_space<vmem>>) attributes {dimension_semantics = [#tpu.dimension_semantics<parallel>], iteration_bounds = array<i64: 2>, scalar_prefetch = 0 : i64, scratch_operands = 0 : i64, tpu.core_type = #tpu.core_type<tc>, window_params = [{transform_indices = @transform_0, window_bounds = array<i64: 1, 18, 18, 128>}, {pipeline_mode = #tpu.pipeline_mode<synchronous>, transform_indices = @transform_1, window_bounds = array<i64: 4, 512, 128>}, {transform_indices = @transform_2, window_bounds = array<i64: 4, 1, 256, 128>}, {transform_indices = @transform_3, window_bounds = array<i64: 8, 128>}, {transform_indices = @transform_4, window_bounds = array<i64: 8, 128>}]} {
    %c0 = arith.constant 0 : index
    %c0_0 = arith.constant 0 : index
    %c0_1 = arith.constant 0 : index
    %c0_2 = arith.constant 0 : index
    %0 = vector.load %arg1[%c0, %c0_0, %c0_1, %c0_2] : memref<1x18x18x128xbf16, #tpu.memory_space<vmem>>, vector<1x18x18x128xbf16>
    %1 = vector.shape_cast %0 : vector<1x18x18x128xbf16> to vector<18x18x128xbf16>
    %2 = vector.extract_strided_slice %1 {offsets = [0, 0, 0], sizes = [16, 16, 128], strides = [1, 1, 1]} : vector<18x18x128xbf16> to vector<16x16x128xbf16>
    %3 = vector.extract_strided_slice %1 {offsets = [0, 1, 0], sizes = [16, 16, 128], strides = [1, 1, 1]} : vector<18x18x128xbf16> to vector<16x16x128xbf16>
    %4 = vector.extract_strided_slice %1 {offsets = [0, 2, 0], sizes = [16, 16, 128], strides = [1, 1, 1]} : vector<18x18x128xbf16> to vector<16x16x128xbf16>
    %5 = vector.extract_strided_slice %1 {offsets = [1, 0, 0], sizes = [16, 16, 128], strides = [1, 1, 1]} : vector<18x18x128xbf16> to vector<16x16x128xbf16>
    %6 = vector.extract_strided_slice %1 {offsets = [1, 1, 0], sizes = [16, 16, 128], strides = [1, 1, 1]} : vector<18x18x128xbf16> to vector<16x16x128xbf16>
    %7 = vector.extract_strided_slice %1 {offsets = [1, 2, 0], sizes = [16, 16, 128], strides = [1, 1, 1]} : vector<18x18x128xbf16> to vector<16x16x128xbf16>
    %8 = vector.extract_strided_slice %1 {offsets = [2, 0, 0], sizes = [16, 16, 128], strides = [1, 1, 1]} : vector<18x18x128xbf16> to vector<16x16x128xbf16>
    %9 = vector.extract_strided_slice %1 {offsets = [2, 1, 0], sizes = [16, 16, 128], strides = [1, 1, 1]} : vector<18x18x128xbf16> to vector<16x16x128xbf16>
    %10 = vector.extract_strided_slice %1 {offsets = [2, 2, 0], sizes = [16, 16, 128], strides = [1, 1, 1]} : vector<18x18x128xbf16> to vector<16x16x128xbf16>
    %cst = arith.constant 0.000000e+00 : f32
    %11 = vector.broadcast %cst : f32 to vector<1x128xf32>
    %cst_3 = arith.constant 0.000000e+00 : f32
    %12 = vector.broadcast %cst_3 : f32 to vector<1x128xf32>
    %13 = tpu.concatenate %6, %5, %3, %2 in 2 : vector<16x16x128xbf16>, vector<16x16x128xbf16>, vector<16x16x128xbf16>, vector<16x16x128xbf16> -> vector<16x16x512xbf16>
    %14 = vector.shape_cast %13 : vector<16x16x512xbf16> to vector<256x512xbf16>
    %c0_4 = arith.constant 0 : index
    %c0_5 = arith.constant 0 : index
    %c0_6 = arith.constant 0 : index
    %15 = vector.load %arg2[%c0_4, %c0_5, %c0_6] : memref<4x512x128xbf16, #tpu.memory_space<vmem>>, vector<1x512x128xbf16>
    %16 = vector.shape_cast %15 : vector<1x512x128xbf16> to vector<512x128xbf16>
    %cst_7 = arith.constant dense<0.000000e+00> : vector<256x128xf32>
    %17 = tpu.matmul %14, %16, %cst_7 {dimension_numbers = #tpu.dot_dimension_numbers<[1], [0], [0], [1], [0, 0, 1, 1], [], []>} : vector<256x512xbf16>, vector<512x128xbf16>, vector<256x128xf32> -> vector<256x128xf32>
    %18 = arith.truncf %17 : vector<256x128xf32> to vector<256x128xbf16>
    %c0_8 = arith.constant 0 : index
    %c0_9 = arith.constant 0 : index
    %c0_10 = arith.constant 0 : index
    %c0_11 = arith.constant 0 : index
    %19 = vector.load %arg3[%c0_8, %c0_9, %c0_10, %c0_11] : memref<4x1x256x128xbf16, #tpu.memory_space<vmem>>, vector<1x1x256x128xbf16>
    %20 = vector.shape_cast %19 : vector<1x1x256x128xbf16> to vector<256x128xbf16>
    %21 = vector.shape_cast %18 : vector<256x128xbf16> to vector<1x1x256x128xbf16>
    tpu.vector_store %arg3[%c0_8, %c0_9, %c0_10, %c0_11], %21 {strides = array<i32>} : memref<4x1x256x128xbf16, #tpu.memory_space<vmem>>, vector<1x1x256x128xbf16>,
    %cst_12 = arith.constant dense<0.000000e+00> : vector<128xf32>
    %22 = vector.multi_reduction <add>, %17, %cst_12 [0] : vector<256x128xf32> to vector<128xf32>
    %23 = vector.shape_cast %22 : vector<128xf32> to vector<1x128xf32>
    %24 = arith.addf %11, %23 : vector<1x128xf32>
    %25 = arith.mulf %17, %17 : vector<256x128xf32>
    %cst_13 = arith.constant dense<0.000000e+00> : vector<128xf32>
    %26 = vector.multi_reduction <add>, %25, %cst_13 [0] : vector<256x128xf32> to vector<128xf32>
    %27 = vector.shape_cast %26 : vector<128xf32> to vector<1x128xf32>
    %28 = arith.addf %12, %27 : vector<1x128xf32>
    %29 = tpu.concatenate %7, %6, %4, %3 in 2 : vector<16x16x128xbf16>, vector<16x16x128xbf16>, vector<16x16x128xbf16>, vector<16x16x128xbf16> -> vector<16x16x512xbf16>
    %30 = vector.shape_cast %29 : vector<16x16x512xbf16> to vector<256x512xbf16>
    %c1 = arith.constant 1 : index
    %c0_14 = arith.constant 0 : index
    %c0_15 = arith.constant 0 : index
    %31 = vector.load %arg2[%c1, %c0_14, %c0_15] : memref<4x512x128xbf16, #tpu.memory_space<vmem>>, vector<1x512x128xbf16>
    %32 = vector.shape_cast %31 : vector<1x512x128xbf16> to vector<512x128xbf16>
    %cst_16 = arith.constant dense<0.000000e+00> : vector<256x128xf32>
    %33 = tpu.matmul %30, %32, %cst_16 {dimension_numbers = #tpu.dot_dimension_numbers<[1], [0], [0], [1], [0, 0, 1, 1], [], []>} : vector<256x512xbf16>, vector<512x128xbf16>, vector<256x128xf32> -> vector<256x128xf32>
    %34 = arith.truncf %33 : vector<256x128xf32> to vector<256x128xbf16>
    %c1_17 = arith.constant 1 : index
    %c0_18 = arith.constant 0 : index
    %c0_19 = arith.constant 0 : index
    %c0_20 = arith.constant 0 : index
    %35 = vector.load %arg3[%c1_17, %c0_18, %c0_19, %c0_20] : memref<4x1x256x128xbf16, #tpu.memory_space<vmem>>, vector<1x1x256x128xbf16>
    %36 = vector.shape_cast %35 : vector<1x1x256x128xbf16> to vector<256x128xbf16>
    %37 = vector.shape_cast %34 : vector<256x128xbf16> to vector<1x1x256x128xbf16>
    tpu.vector_store %arg3[%c1_17, %c0_18, %c0_19, %c0_20], %37 {strides = array<i32>} : memref<4x1x256x128xbf16, #tpu.memory_space<vmem>>, vector<1x1x256x128xbf16>,
    %cst_21 = arith.constant dense<0.000000e+00> : vector<128xf32>
    %38 = vector.multi_reduction <add>, %33, %cst_21 [0] : vector<256x128xf32> to vector<128xf32>
    %39 = vector.shape_cast %38 : vector<128xf32> to vector<1x128xf32>
    %40 = arith.addf %24, %39 : vector<1x128xf32>
    %41 = arith.mulf %33, %33 : vector<256x128xf32>
    %cst_22 = arith.constant dense<0.000000e+00> : vector<128xf32>
    %42 = vector.multi_reduction <add>, %41, %cst_22 [0] : vector<256x128xf32> to vector<128xf32>
    %43 = vector.shape_cast %42 : vector<128xf32> to vector<1x128xf32>
    %44 = arith.addf %28, %43 : vector<1x128xf32>
    %45 = tpu.concatenate %9, %8, %6, %5 in 2 : vector<16x16x128xbf16>, vector<16x16x128xbf16>, vector<16x16x128xbf16>, vector<16x16x128xbf16> -> vector<16x16x512xbf16>
    %46 = vector.shape_cast %45 : vector<16x16x512xbf16> to vector<256x512xbf16>
    %c2 = arith.constant 2 : index
    %c0_23 = arith.constant 0 : index
    %c0_24 = arith.constant 0 : index
    %47 = vector.load %arg2[%c2, %c0_23, %c0_24] : memref<4x512x128xbf16, #tpu.memory_space<vmem>>, vector<1x512x128xbf16>
    %48 = vector.shape_cast %47 : vector<1x512x128xbf16> to vector<512x128xbf16>
    %cst_25 = arith.constant dense<0.000000e+00> : vector<256x128xf32>
    %49 = tpu.matmul %46, %48, %cst_25 {dimension_numbers = #tpu.dot_dimension_numbers<[1], [0], [0], [1], [0, 0, 1, 1], [], []>} : vector<256x512xbf16>, vector<512x128xbf16>, vector<256x128xf32> -> vector<256x128xf32>
    %50 = arith.truncf %49 : vector<256x128xf32> to vector<256x128xbf16>
    %c2_26 = arith.constant 2 : index
    %c0_27 = arith.constant 0 : index
    %c0_28 = arith.constant 0 : index
    %c0_29 = arith.constant 0 : index
    %51 = vector.load %arg3[%c2_26, %c0_27, %c0_28, %c0_29] : memref<4x1x256x128xbf16, #tpu.memory_space<vmem>>, vector<1x1x256x128xbf16>
    %52 = vector.shape_cast %51 : vector<1x1x256x128xbf16> to vector<256x128xbf16>
    %53 = vector.shape_cast %50 : vector<256x128xbf16> to vector<1x1x256x128xbf16>
    tpu.vector_store %arg3[%c2_26, %c0_27, %c0_28, %c0_29], %53 {strides = array<i32>} : memref<4x1x256x128xbf16, #tpu.memory_space<vmem>>, vector<1x1x256x128xbf16>,
    %cst_30 = arith.constant dense<0.000000e+00> : vector<128xf32>
    %54 = vector.multi_reduction <add>, %49, %cst_30 [0] : vector<256x128xf32> to vector<128xf32>
    %55 = vector.shape_cast %54 : vector<128xf32> to vector<1x128xf32>
    %56 = arith.addf %40, %55 : vector<1x128xf32>
    %57 = arith.mulf %49, %49 : vector<256x128xf32>
    %cst_31 = arith.constant dense<0.000000e+00> : vector<128xf32>
    %58 = vector.multi_reduction <add>, %57, %cst_31 [0] : vector<256x128xf32> to vector<128xf32>
    %59 = vector.shape_cast %58 : vector<128xf32> to vector<1x128xf32>
    %60 = arith.addf %44, %59 : vector<1x128xf32>
    %61 = tpu.concatenate %10, %9, %7, %6 in 2 : vector<16x16x128xbf16>, vector<16x16x128xbf16>, vector<16x16x128xbf16>, vector<16x16x128xbf16> -> vector<16x16x512xbf16>
    %62 = vector.shape_cast %61 : vector<16x16x512xbf16> to vector<256x512xbf16>
    %c3 = arith.constant 3 : index
    %c0_32 = arith.constant 0 : index
    %c0_33 = arith.constant 0 : index
    %63 = vector.load %arg2[%c3, %c0_32, %c0_33] : memref<4x512x128xbf16, #tpu.memory_space<vmem>>, vector<1x512x128xbf16>
    %64 = vector.shape_cast %63 : vector<1x512x128xbf16> to vector<512x128xbf16>
    %cst_34 = arith.constant dense<0.000000e+00> : vector<256x128xf32>
    %65 = tpu.matmul %62, %64, %cst_34 {dimension_numbers = #tpu.dot_dimension_numbers<[1], [0], [0], [1], [0, 0, 1, 1], [], []>} : vector<256x512xbf16>, vector<512x128xbf16>, vector<256x128xf32> -> vector<256x128xf32>
    %66 = arith.truncf %65 : vector<256x128xf32> to vector<256x128xbf16>
    %c3_35 = arith.constant 3 : index
    %c0_36 = arith.constant 0 : index
    %c0_37 = arith.constant 0 : index
    %c0_38 = arith.constant 0 : index
    %67 = vector.load %arg3[%c3_35, %c0_36, %c0_37, %c0_38] : memref<4x1x256x128xbf16, #tpu.memory_space<vmem>>, vector<1x1x256x128xbf16>
    %68 = vector.shape_cast %67 : vector<1x1x256x128xbf16> to vector<256x128xbf16>
    %69 = vector.shape_cast %66 : vector<256x128xbf16> to vector<1x1x256x128xbf16>
    tpu.vector_store %arg3[%c3_35, %c0_36, %c0_37, %c0_38], %69 {strides = array<i32>} : memref<4x1x256x128xbf16, #tpu.memory_space<vmem>>, vector<1x1x256x128xbf16>,
    %cst_39 = arith.constant dense<0.000000e+00> : vector<128xf32>
    %70 = vector.multi_reduction <add>, %65, %cst_39 [0] : vector<256x128xf32> to vector<128xf32>
    %71 = vector.shape_cast %70 : vector<128xf32> to vector<1x128xf32>
    %72 = arith.addf %56, %71 : vector<1x128xf32>
    %73 = arith.mulf %65, %65 : vector<256x128xf32>
    %cst_40 = arith.constant dense<0.000000e+00> : vector<128xf32>
    %74 = vector.multi_reduction <add>, %73, %cst_40 [0] : vector<256x128xf32> to vector<128xf32>
    %75 = vector.shape_cast %74 : vector<128xf32> to vector<1x128xf32>
    %76 = arith.addf %60, %75 : vector<1x128xf32>
    %77 = vector.shape_cast %72 : vector<1x128xf32> to vector<1x128xf32>
    %78 = vector.broadcast %77 : vector<1x128xf32> to vector<8x128xf32>
    %c0_41 = arith.constant 0 : index
    %c0_42 = arith.constant 0 : index
    %79 = vector.load %arg4[%c0_41, %c0_42] : memref<8x128xf32, #tpu.memory_space<vmem>>, vector<8x128xf32>
    tpu.vector_store %arg4[%c0_41, %c0_42], %78 {strides = array<i32>} : memref<8x128xf32, #tpu.memory_space<vmem>>, vector<8x128xf32>,
    %80 = vector.shape_cast %76 : vector<1x128xf32> to vector<1x128xf32>
    %81 = vector.broadcast %80 : vector<1x128xf32> to vector<8x128xf32>
    %c0_43 = arith.constant 0 : index
    %c0_44 = arith.constant 0 : index
    %82 = vector.load %arg5[%c0_43, %c0_44] : memref<8x128xf32, #tpu.memory_space<vmem>>, vector<8x128xf32>
    tpu.vector_store %arg5[%c0_43, %c0_44], %81 {strides = array<i32>} : memref<8x128xf32, #tpu.memory_space<vmem>>, vector<8x128xf32>,
    return
  }
  func.func @transform_0(%arg0: i32) -> (i32, i32, i32, i32) {
    %c0_i32 = arith.constant 0 : i32
    %c0_i32_0 = arith.constant 0 : i32
    %c0_i32_1 = arith.constant 0 : i32
    %c0_i32_2 = arith.constant 0 : i32
    return %arg0, %c0_i32, %c0_i32_0, %c0_i32_1 : i32, i32, i32, i32
  }
  func.func @transform_1(%arg0: i32) -> (i32, i32, i32) {
    %c0_i32 = arith.constant 0 : i32
    %c0_i32_0 = arith.constant 0 : i32
    %c0_i32_1 = arith.constant 0 : i32
    %c0_i32_2 = arith.constant 0 : i32
    return %c0_i32, %c0_i32_0, %c0_i32_1 : i32, i32, i32
  }
  func.func @transform_2(%arg0: i32) -> (i32, i32, i32, i32) {
    %c0_i32 = arith.constant 0 : i32
    %c0_i32_0 = arith.constant 0 : i32
    %c0_i32_1 = arith.constant 0 : i32
    %c0_i32_2 = arith.constant 0 : i32
    return %c0_i32, %arg0, %c0_i32_0, %c0_i32_1 : i32, i32, i32, i32
  }
  func.func @transform_3(%arg0: i32) -> (i32, i32) {
    %c0_i32 = arith.constant 0 : i32
    %c0_i32_0 = arith.constant 0 : i32
    return %arg0, %c0_i32 : i32, i32
  }
  func.func @transform_4(%arg0: i32) -> (i32, i32) {
    %c0_i32 = arith.constant 0 : i32
    %c0_i32_0 = arith.constant 0 : i32
    return %arg0, %c0_i32 : i32, i32
  }
}

module attributes {stable_mosaic.version = 11 : i64} {
  func.func @_pw_matmul_stats_kernel(%arg0: i32, %arg1: memref<512x128xbf16, #tpu.memory_space<vmem>>, %arg2: memref<128x128xbf16, #tpu.memory_space<vmem>>, %arg3: memref<512x128xbf16, #tpu.memory_space<vmem>>, %arg4: memref<8x128xf32, #tpu.memory_space<vmem>>, %arg5: memref<8x128xf32, #tpu.memory_space<vmem>>) attributes {dimension_semantics = [#tpu.dimension_semantics<parallel>], iteration_bounds = array<i64: 4>, scalar_prefetch = 0 : i64, scratch_operands = 0 : i64, tpu.core_type = #tpu.core_type<tc>, window_params = [{transform_indices = @transform_0, window_bounds = array<i64: 512, 128>}, {pipeline_mode = #tpu.pipeline_mode<synchronous>, transform_indices = @transform_1, window_bounds = array<i64: 128, 128>}, {transform_indices = @transform_2, window_bounds = array<i64: 512, 128>}, {transform_indices = @transform_3, window_bounds = array<i64: 8, 128>}, {transform_indices = @transform_4, window_bounds = array<i64: 8, 128>}]} {
    %c0 = arith.constant 0 : index
    %c0_0 = arith.constant 0 : index
    %0 = vector.load %arg1[%c0, %c0_0] : memref<512x128xbf16, #tpu.memory_space<vmem>>, vector<512x128xbf16>
    %c0_1 = arith.constant 0 : index
    %c0_2 = arith.constant 0 : index
    %1 = vector.load %arg2[%c0_1, %c0_2] : memref<128x128xbf16, #tpu.memory_space<vmem>>, vector<128x128xbf16>
    %cst = arith.constant dense<0.000000e+00> : vector<512x128xf32>
    %2 = tpu.matmul %0, %1, %cst {dimension_numbers = #tpu.dot_dimension_numbers<[1], [0], [0], [1], [0, 0, 1, 1], [], []>} : vector<512x128xbf16>, vector<128x128xbf16>, vector<512x128xf32> -> vector<512x128xf32>
    %3 = arith.truncf %2 : vector<512x128xf32> to vector<512x128xbf16>
    %c0_3 = arith.constant 0 : index
    %c0_4 = arith.constant 0 : index
    %4 = vector.load %arg3[%c0_3, %c0_4] : memref<512x128xbf16, #tpu.memory_space<vmem>>, vector<512x128xbf16>
    tpu.vector_store %arg3[%c0_3, %c0_4], %3 {strides = array<i32>} : memref<512x128xbf16, #tpu.memory_space<vmem>>, vector<512x128xbf16>,
    %cst_5 = arith.constant dense<0.000000e+00> : vector<128xf32>
    %5 = vector.multi_reduction <add>, %2, %cst_5 [0] : vector<512x128xf32> to vector<128xf32>
    %6 = vector.shape_cast %5 : vector<128xf32> to vector<1x128xf32>
    %7 = arith.mulf %2, %2 : vector<512x128xf32>
    %cst_6 = arith.constant dense<0.000000e+00> : vector<128xf32>
    %8 = vector.multi_reduction <add>, %7, %cst_6 [0] : vector<512x128xf32> to vector<128xf32>
    %9 = vector.shape_cast %8 : vector<128xf32> to vector<1x128xf32>
    %10 = vector.shape_cast %6 : vector<1x128xf32> to vector<1x128xf32>
    %11 = vector.broadcast %10 : vector<1x128xf32> to vector<8x128xf32>
    %c0_7 = arith.constant 0 : index
    %c0_8 = arith.constant 0 : index
    %12 = vector.load %arg4[%c0_7, %c0_8] : memref<8x128xf32, #tpu.memory_space<vmem>>, vector<8x128xf32>
    tpu.vector_store %arg4[%c0_7, %c0_8], %11 {strides = array<i32>} : memref<8x128xf32, #tpu.memory_space<vmem>>, vector<8x128xf32>,
    %13 = vector.shape_cast %9 : vector<1x128xf32> to vector<1x128xf32>
    %14 = vector.broadcast %13 : vector<1x128xf32> to vector<8x128xf32>
    %c0_9 = arith.constant 0 : index
    %c0_10 = arith.constant 0 : index
    %15 = vector.load %arg5[%c0_9, %c0_10] : memref<8x128xf32, #tpu.memory_space<vmem>>, vector<8x128xf32>
    tpu.vector_store %arg5[%c0_9, %c0_10], %14 {strides = array<i32>} : memref<8x128xf32, #tpu.memory_space<vmem>>, vector<8x128xf32>,
    return
  }
  func.func @transform_0(%arg0: i32) -> (i32, i32) {
    %c0_i32 = arith.constant 0 : i32
    %c0_i32_0 = arith.constant 0 : i32
    return %arg0, %c0_i32 : i32, i32
  }
  func.func @transform_1(%arg0: i32) -> (i32, i32) {
    %c0_i32 = arith.constant 0 : i32
    %c0_i32_0 = arith.constant 0 : i32
    %c0_i32_1 = arith.constant 0 : i32
    return %c0_i32, %c0_i32_0 : i32, i32
  }
  func.func @transform_2(%arg0: i32) -> (i32, i32) {
    %c0_i32 = arith.constant 0 : i32
    %c0_i32_0 = arith.constant 0 : i32
    return %arg0, %c0_i32 : i32, i32
  }
  func.func @transform_3(%arg0: i32) -> (i32, i32) {
    %c0_i32 = arith.constant 0 : i32
    %c0_i32_0 = arith.constant 0 : i32
    return %arg0, %c0_i32 : i32, i32
  }
  func.func @transform_4(%arg0: i32) -> (i32, i32) {
    %c0_i32 = arith.constant 0 : i32
    %c0_i32_0 = arith.constant 0 : i32
    return %arg0, %c0_i32 : i32, i32
  }
}

module attributes {stable_mosaic.version = 11 : i64} {
  func.func @_bn_relu_kernel(%arg0: i32, %arg1: memref<512x128xbf16, #tpu.memory_space<vmem>>, %arg2: memref<1x128xf32, #tpu.memory_space<vmem>>, %arg3: memref<1x128xf32, #tpu.memory_space<vmem>>, %arg4: memref<512x128xbf16, #tpu.memory_space<vmem>>) attributes {dimension_semantics = [#tpu.dimension_semantics<parallel>], iteration_bounds = array<i64: 4>, scalar_prefetch = 0 : i64, scratch_operands = 0 : i64, tpu.core_type = #tpu.core_type<tc>, window_params = [{transform_indices = @transform_0, window_bounds = array<i64: 512, 128>}, {pipeline_mode = #tpu.pipeline_mode<synchronous>, transform_indices = @transform_1, window_bounds = array<i64: 1, 128>}, {pipeline_mode = #tpu.pipeline_mode<synchronous>, transform_indices = @transform_2, window_bounds = array<i64: 1, 128>}, {transform_indices = @transform_3, window_bounds = array<i64: 512, 128>}]} {
    %c0 = arith.constant 0 : index
    %c0_0 = arith.constant 0 : index
    %0 = vector.load %arg1[%c0, %c0_0] : memref<512x128xbf16, #tpu.memory_space<vmem>>, vector<512x128xbf16>
    %1 = arith.extf %0 : vector<512x128xbf16> to vector<512x128xf32>
    %c0_1 = arith.constant 0 : index
    %c0_2 = arith.constant 0 : index
    %2 = vector.load %arg2[%c0_1, %c0_2] : memref<1x128xf32, #tpu.memory_space<vmem>>, vector<1x128xf32>
    %3 = vector.broadcast %2 : vector<1x128xf32> to vector<512x128xf32>
    %4 = arith.mulf %1, %3 : vector<512x128xf32>
    %c0_3 = arith.constant 0 : index
    %c0_4 = arith.constant 0 : index
    %5 = vector.load %arg3[%c0_3, %c0_4] : memref<1x128xf32, #tpu.memory_space<vmem>>, vector<1x128xf32>
    %6 = vector.broadcast %5 : vector<1x128xf32> to vector<512x128xf32>
    %7 = arith.addf %4, %6 : vector<512x128xf32>
    %cst = arith.constant 0.000000e+00 : f32
    %8 = vector.broadcast %cst : f32 to vector<512x128xf32>
    %9 = arith.maximumf %7, %8 : vector<512x128xf32>
    %10 = arith.truncf %9 : vector<512x128xf32> to vector<512x128xbf16>
    %c0_5 = arith.constant 0 : index
    %c0_6 = arith.constant 0 : index
    %11 = vector.load %arg4[%c0_5, %c0_6] : memref<512x128xbf16, #tpu.memory_space<vmem>>, vector<512x128xbf16>
    tpu.vector_store %arg4[%c0_5, %c0_6], %10 {strides = array<i32>} : memref<512x128xbf16, #tpu.memory_space<vmem>>, vector<512x128xbf16>,
    return
  }
  func.func @transform_0(%arg0: i32) -> (i32, i32) {
    %c0_i32 = arith.constant 0 : i32
    %c0_i32_0 = arith.constant 0 : i32
    return %arg0, %c0_i32 : i32, i32
  }
  func.func @transform_1(%arg0: i32) -> (i32, i32) {
    %c0_i32 = arith.constant 0 : i32
    %c0_i32_0 = arith.constant 0 : i32
    %c0_i32_1 = arith.constant 0 : i32
    return %c0_i32, %c0_i32_0 : i32, i32
  }
  func.func @transform_2(%arg0: i32) -> (i32, i32) {
    %c0_i32 = arith.constant 0 : i32
    %c0_i32_0 = arith.constant 0 : i32
    %c0_i32_1 = arith.constant 0 : i32
    return %c0_i32, %c0_i32_0 : i32, i32
  }
  func.func @transform_3(%arg0: i32) -> (i32, i32) {
    %c0_i32 = arith.constant 0 : i32
    %c0_i32_0 = arith.constant 0 : i32
    return %arg0, %c0_i32 : i32, i32
  }
}

module attributes {stable_mosaic.version = 11 : i64} {
  func.func @_bn_relu_kernel(%arg0: i32, %arg1: memref<512x128xbf16, #tpu.memory_space<vmem>>, %arg2: memref<1x128xf32, #tpu.memory_space<vmem>>, %arg3: memref<1x128xf32, #tpu.memory_space<vmem>>, %arg4: memref<512x128xf32, #tpu.memory_space<vmem>>) attributes {dimension_semantics = [#tpu.dimension_semantics<parallel>], iteration_bounds = array<i64: 4>, scalar_prefetch = 0 : i64, scratch_operands = 0 : i64, tpu.core_type = #tpu.core_type<tc>, window_params = [{transform_indices = @transform_0, window_bounds = array<i64: 512, 128>}, {pipeline_mode = #tpu.pipeline_mode<synchronous>, transform_indices = @transform_1, window_bounds = array<i64: 1, 128>}, {pipeline_mode = #tpu.pipeline_mode<synchronous>, transform_indices = @transform_2, window_bounds = array<i64: 1, 128>}, {transform_indices = @transform_3, window_bounds = array<i64: 512, 128>}]} {
    %c0 = arith.constant 0 : index
    %c0_0 = arith.constant 0 : index
    %0 = vector.load %arg1[%c0, %c0_0] : memref<512x128xbf16, #tpu.memory_space<vmem>>, vector<512x128xbf16>
    %1 = arith.extf %0 : vector<512x128xbf16> to vector<512x128xf32>
    %c0_1 = arith.constant 0 : index
    %c0_2 = arith.constant 0 : index
    %2 = vector.load %arg2[%c0_1, %c0_2] : memref<1x128xf32, #tpu.memory_space<vmem>>, vector<1x128xf32>
    %3 = vector.broadcast %2 : vector<1x128xf32> to vector<512x128xf32>
    %4 = arith.mulf %1, %3 : vector<512x128xf32>
    %c0_3 = arith.constant 0 : index
    %c0_4 = arith.constant 0 : index
    %5 = vector.load %arg3[%c0_3, %c0_4] : memref<1x128xf32, #tpu.memory_space<vmem>>, vector<1x128xf32>
    %6 = vector.broadcast %5 : vector<1x128xf32> to vector<512x128xf32>
    %7 = arith.addf %4, %6 : vector<512x128xf32>
    %cst = arith.constant 0.000000e+00 : f32
    %8 = vector.broadcast %cst : f32 to vector<512x128xf32>
    %9 = arith.maximumf %7, %8 : vector<512x128xf32>
    %c0_5 = arith.constant 0 : index
    %c0_6 = arith.constant 0 : index
    %10 = vector.load %arg4[%c0_5, %c0_6] : memref<512x128xf32, #tpu.memory_space<vmem>>, vector<512x128xf32>
    tpu.vector_store %arg4[%c0_5, %c0_6], %9 {strides = array<i32>} : memref<512x128xf32, #tpu.memory_space<vmem>>, vector<512x128xf32>,
    return
  }
  func.func @transform_0(%arg0: i32) -> (i32, i32) {
    %c0_i32 = arith.constant 0 : i32
    %c0_i32_0 = arith.constant 0 : i32
    return %arg0, %c0_i32 : i32, i32
  }
  func.func @transform_1(%arg0: i32) -> (i32, i32) {
    %c0_i32 = arith.constant 0 : i32
    %c0_i32_0 = arith.constant 0 : i32
    %c0_i32_1 = arith.constant 0 : i32
    return %c0_i32, %c0_i32_0 : i32, i32
  }
  func.func @transform_2(%arg0: i32) -> (i32, i32) {
    %c0_i32 = arith.constant 0 : i32
    %c0_i32_0 = arith.constant 0 : i32
    %c0_i32_1 = arith.constant 0 : i32
    return %c0_i32, %c0_i32_0 : i32, i32
  }
  func.func @transform_3(%arg0: i32) -> (i32, i32) {
    %c0_i32 = arith.constant 0 : i32
    %c0_i32_0 = arith.constant 0 : i32
    return %arg0, %c0_i32 : i32, i32
  }
}

</mosaic_0001>

<bundles_post_ra>
// kernel: decoder_block_forward.7
= control target key start
LH: loop header
LB: loop body
LE: loop exit
PB: predicated region body
PF: predicated region fallthrough
CT: control target
= control target key end

     0   :  { %s1502_s0 = inlined_call_operand.vmem [shape: bf16[512,128], index: 0, kind: input, shape index: {}]   ;;  %s1503_s1 = inlined_call_operand.vmem [shape: f32[1,128], index: 1, kind: input, shape index: {}]   ;;  %s1504_s2 = inlined_call_operand.vmem [shape: f32[1,128], index: 2, kind: input, shape index: {}]   ;;  %s1505_s3 = inlined_call_operand.vmem [shape: bf16[512,128], index: 3, kind: output, shape index: {}]  }
   0x1   :  { %v803_v0 = vld [vmem:[%s1502_s0] sm:$0xff]   ;;  %v1090_v4 = vld [vmem:[%s1502_s0 + $0x8] sm:$0xff]   ;;  %v1091_v5 = vld [vmem:[%s1502_s0 + $0x10] sm:$0xff]  }
   0x2   :  { %v1178_v1 = vld [vmem:[%s1503_s1] ss:$0 sm:$0xff]  ;;  %v804_v2 = vunpack.c.l.bf16 %v803_v0  ;;  %v805_v3 = vunpack.c.h.bf16 %v803_v0  ;;  %v1092_v6 = vld [vmem:[%s1502_s0 + $0x18] sm:$0xff]   ;;  %v808_v8 = vunpack.c.l.bf16 %v1090_v4  ;;  %v809_v9 = vunpack.c.h.bf16 %v1090_v4  ;;  %v1094_v33 = vld [vmem:[%s1502_s0 + $0x28] sm:$0xff]  }
   0x3   :  { %v1192_v7 = vld [vmem:[%s1504_s2] ss:$0 sm:$0xff]  ;;  %v812_v10 = vunpack.c.l.bf16 %v1091_v5  ;;  %v813_v11 = vunpack.c.h.bf16 %v1091_v5  ;;  %v816_v14 = vunpack.c.l.bf16 %v1092_v6  ;;  %v817_v15 = vunpack.c.h.bf16 %v1092_v6  ;;  %v1095_v38 = vld [vmem:[%s1502_s0 + $0x30] sm:$0xff]   ;;  %v1096_v43 = vld [vmem:[%s1502_s0 + $0x38] sm:$0xff]  }
   0x4   :  { %v149_v12 = vmul.f32 %v804_v2, %v1178_v1  ;;  %v150_v13 = vmul.f32 %v805_v3, %v1178_v1  ;;  %v151_v16 = vmul.f32 %v808_v8, %v1178_v1  ;;  %v152_v17 = vmul.f32 %v809_v9, %v1178_v1  ;;  %v1093_v28 = vld [vmem:[%s1502_s0 + $0x20] sm:$0xff]  }
   0x5   :  { %v153_v18 = vmul.f32 %v812_v10, %v1178_v1  ;;  %v154_v19 = vmul.f32 %v813_v11, %v1178_v1  ;;  %v155_v22 = vmul.f32 %v816_v14, %v1178_v1  ;;  %v156_v23 = vmul.f32 %v817_v15, %v1178_v1  ;;  %v1097_v0 = vld [vmem:[%s1502_s0 + $0x40] sm:$0xff]   ;;  %v1098_v11 = vld [vmem:[%s1502_s0 + $0x48] sm:$0xff]  }
   0x6   :  { %v220_v20 = vadd.f32 %v1192_v7, %v149_v12  ;;  %v221_v21 = vadd.f32 %v1192_v7, %v150_v13  ;;  %v222_v24 = vadd.f32 %v1192_v7, %v151_v16  ;;  %v223_v25 = vadd.f32 %v1192_v7, %v152_v17  ;;  %v1099_v16 = vld [vmem:[%s1502_s0 + $0x50] sm:$0xff]  }
   0x7   :  { %v224_v26 = vadd.f32 %v1192_v7, %v153_v18  ;;  %v225_v27 = vadd.f32 %v1192_v7, %v154_v19  ;;  %v226_v31 = vadd.f32 %v1192_v7, %v155_v22  ;;  %v227_v32 = vadd.f32 %v1192_v7, %v156_v23 }
   0x8   :  { %v284_v29 = vmax.f32 %v220_v20, 0.0  ;;  %v285_v30 = vmax.f32 %v221_v21, 0.0  ;;  %v286_v34 = vmax.f32 %v222_v24, 0.0  ;;  %v287_v35 = vmax.f32 %v223_v25, 0.0  ;;  %v1100_v25 = vld [vmem:[%s1502_s0 + $0x58] sm:$0xff]  }
   0x9   :  { %v288_v36 = vmax.f32 %v224_v26, 0.0  ;;  %v289_v37 = vmax.f32 %v225_v27, 0.0  ;;  %v290_v40 = vmax.f32 %v226_v31, 0.0  ;;  %v291_v41 = vmax.f32 %v227_v32, 0.0 }
   0xa   :  { %v933_v39 = vpack.c.bf16 %v285_v30, %v284_v29  ;;  %v820_v42 = vunpack.c.l.bf16 %v1093_v28  ;;  %v938_v44 = vpack.c.bf16 %v287_v35, %v286_v34  ;;  %v821_v46 = vunpack.c.h.bf16 %v1093_v28 }
   0xb   :  { %v943_v45 = vpack.c.bf16 %v289_v37, %v288_v36  ;;  %v824_v47 = vunpack.c.l.bf16 %v1094_v33  ;;  %v948_v48 = vpack.c.bf16 %v291_v41, %v290_v40  ;;  %v825_v50 = vunpack.c.h.bf16 %v1094_v33 }
   0xc   :  { %934 = vst [vmem:[%s1505_s3] sm:$0xff] %v933_v39   ;;  %v157_v49 = vmul.f32 %v820_v42, %v1178_v1  ;;  %v828_v51 = vunpack.c.l.bf16 %v1095_v38  ;;  %1121 = vst [vmem:[%s1505_s3 + $0x8] sm:$0xff] %v938_v44   ;;  %v158_v52 = vmul.f32 %v821_v46, %v1178_v1  ;;  %v829_v54 = vunpack.c.h.bf16 %v1095_v38  ;;  %v1101_v38 = vld [vmem:[%s1502_s0 + $0x60] sm:$0xff]  }
   0xd   :  { %1122 = vst [vmem:[%s1505_s3 + $0x10] sm:$0xff] %v943_v45   ;;  %v159_v53 = vmul.f32 %v824_v47, %v1178_v1  ;;  %v832_v55 = vunpack.c.l.bf16 %v1096_v43  ;;  %1123 = vst [vmem:[%s1505_s3 + $0x18] sm:$0xff] %v948_v48   ;;  %v160_v57 = vmul.f32 %v825_v50, %v1178_v1  ;;  %v833_v59 = vunpack.c.h.bf16 %v1096_v43 }
   0xe   :  { %v228_v56 = vadd.f32 %v1192_v7, %v157_v49  ;;  %v161_v58 = vmul.f32 %v828_v51, %v1178_v1  ;;  %v229_v60 = vadd.f32 %v1192_v7, %v158_v52  ;;  %v162_v62 = vmul.f32 %v829_v54, %v1178_v1  ;;  %v1102_v51 = vld [vmem:[%s1502_s0 + $0x68] sm:$0xff]  }
   0xf   :  { %v230_v61 = vadd.f32 %v1192_v7, %v159_v53  ;;  %v163_v63 = vmul.f32 %v832_v55, %v1178_v1  ;;  %v231_v3 = vadd.f32 %v1192_v7, %v160_v57  ;;  %v164_v5 = vmul.f32 %v833_v59, %v1178_v1 }
  0x10   :  { %v292_v2 = vmax.f32 %v228_v56, 0.0  ;;  %v232_v4 = vadd.f32 %v1192_v7, %v161_v58  ;;  %v293_v6 = vmax.f32 %v229_v60, 0.0  ;;  %v233_v9 = vadd.f32 %v1192_v7, %v162_v62  ;;  %v1103_v60 = vld [vmem:[%s1502_s0 + $0x70] sm:$0xff]  }
  0x11   :  { %v294_v8 = vmax.f32 %v230_v61, 0.0  ;;  %v234_v10 = vadd.f32 %v1192_v7, %v163_v63  ;;  %v295_v12 = vmax.f32 %v231_v3, 0.0  ;;  %v235_v14 = vadd.f32 %v1192_v7, %v164_v5 }
  0x12   :  { %v296_v13 = vmax.f32 %v232_v4, 0.0  ;;  %v836_v15 = vunpack.c.l.bf16 %v1097_v0  ;;  %v953_v17 = vpack.c.bf16 %v293_v6, %v292_v2  ;;  %v297_v18 = vmax.f32 %v233_v9, 0.0  ;;  %v1104_v2 = vld [vmem:[%s1502_s0 + $0x78] sm:$0xff]  }
  0x13   :  { %v298_v19 = vmax.f32 %v234_v10, 0.0  ;;  %v837_v20 = vunpack.c.h.bf16 %v1097_v0  ;;  %v958_v21 = vpack.c.bf16 %v295_v12, %v294_v8  ;;  %v299_v22 = vmax.f32 %v235_v14, 0.0  ;;  %v1105_v12 = vld [vmem:[%s1502_s0 + $0x80] sm:$0xff]  }
  0x14   :  { %v165_v23 = vmul.f32 %v836_v15, %v1178_v1  ;;  %v840_v24 = vunpack.c.l.bf16 %v1098_v11  ;;  %1124 = vst [vmem:[%s1505_s3 + $0x20] sm:$0xff] %v953_v17   ;;  %v963_v26 = vpack.c.bf16 %v297_v18, %v296_v13  ;;  %v841_v28 = vunpack.c.h.bf16 %v1098_v11 }
  0x15   :  { %v166_v27 = vmul.f32 %v837_v20, %v1178_v1  ;;  %v844_v29 = vunpack.c.l.bf16 %v1099_v16  ;;  %1125 = vst [vmem:[%s1505_s3 + $0x28] sm:$0xff] %v958_v21   ;;  %v968_v30 = vpack.c.bf16 %v299_v22, %v298_v19  ;;  %v845_v33 = vunpack.c.h.bf16 %v1099_v16 }
  0x16   :  { %v236_v31 = vadd.f32 %v1192_v7, %v165_v23  ;;  %v167_v32 = vmul.f32 %v840_v24, %v1178_v1  ;;  %1126 = vst [vmem:[%s1505_s3 + $0x30] sm:$0xff] %v963_v26   ;;  %v168_v35 = vmul.f32 %v841_v28, %v1178_v1  ;;  %v848_v37 = vunpack.c.l.bf16 %v1100_v25 }
  0x17   :  { %v237_v34 = vadd.f32 %v1192_v7, %v166_v27  ;;  %v169_v36 = vmul.f32 %v844_v29, %v1178_v1  ;;  %1127 = vst [vmem:[%s1505_s3 + $0x38] sm:$0xff] %v968_v30   ;;  %v170_v41 = vmul.f32 %v845_v33, %v1178_v1  ;;  %v849_v42 = vunpack.c.h.bf16 %v1100_v25  ;;  %v1106_v29 = vld [vmem:[%s1502_s0 + $0x88] sm:$0xff]  }
  0x18   :  { %v300_v39 = vmax.f32 %v236_v31, 0.0  ;;  %v238_v40 = vadd.f32 %v1192_v7, %v167_v32  ;;  %v239_v44 = vadd.f32 %v1192_v7, %v168_v35  ;;  %v171_v46 = vmul.f32 %v848_v37, %v1178_v1 }
  0x19   :  { %v301_v43 = vmax.f32 %v237_v34, 0.0  ;;  %v240_v45 = vadd.f32 %v1192_v7, %v169_v36  ;;  %v241_v48 = vadd.f32 %v1192_v7, %v170_v41  ;;  %v172_v49 = vmul.f32 %v849_v42, %v1178_v1  ;;  %v1107_v34 = vld [vmem:[%s1502_s0 + $0x90] sm:$0xff]  }
  0x1a   :  { %v302_v47 = vmax.f32 %v238_v40, 0.0  ;;  %v852_v50 = vunpack.c.l.bf16 %v1101_v38  ;;  %v303_v53 = vmax.f32 %v239_v44, 0.0  ;;  %v242_v55 = vadd.f32 %v1192_v7, %v171_v46 }
  0x1b   :  { %v973_v52 = vpack.c.bf16 %v301_v43, %v300_v39  ;;  %v304_v54 = vmax.f32 %v240_v45, 0.0  ;;  %v305_v56 = vmax.f32 %v241_v48, 0.0  ;;  %v243_v57 = vadd.f32 %v1192_v7, %v172_v49  ;;  %v1108_v43 = vld [vmem:[%s1502_s0 + $0x98] sm:$0xff]  }
  0x1c   :  { %v853_v58 = vunpack.c.h.bf16 %v1101_v38  ;;  %v173_v59 = vmul.f32 %v852_v50, %v1178_v1  ;;  %v978_v61 = vpack.c.bf16 %v303_v53, %v302_v47  ;;  %v306_v62 = vmax.f32 %v242_v55, 0.0 }
  0x1d   :  { %1128 = vst [vmem:[%s1505_s3 + $0x40] sm:$0xff] %v973_v52   ;;  %v856_v63 = vunpack.c.l.bf16 %v1102_v51  ;;  %v857_v0 = vunpack.c.h.bf16 %v1102_v51  ;;  %v983_v3 = vpack.c.bf16 %v305_v56, %v304_v54  ;;  %v307_v4 = vmax.f32 %v243_v57, 0.0  ;;  %v1109_v56 = vld [vmem:[%s1502_s0 + $0xa0] sm:$0xff]  }
  0x1e   :  { %v174_v5 = vmul.f32 %v853_v58, %v1178_v1  ;;  %v244_v6 = vadd.f32 %v1192_v7, %v173_v59  ;;  %1129 = vst [vmem:[%s1505_s3 + $0x48] sm:$0xff] %v978_v61   ;;  %v860_v10 = vunpack.c.l.bf16 %v1103_v60  ;;  %v861_v11 = vunpack.c.h.bf16 %v1103_v60 }
  0x1f   :  { %v175_v8 = vmul.f32 %v856_v63, %v1178_v1  ;;  %v176_v9 = vmul.f32 %v857_v0, %v1178_v1  ;;  %1130 = vst [vmem:[%s1505_s3 + $0x50] sm:$0xff] %v983_v3   ;;  %v988_v13 = vpack.c.bf16 %v307_v4, %v306_v62  ;;  %v864_v16 = vunpack.c.l.bf16 %v1104_v2 }
  0x20   :  { %v245_v14 = vadd.f32 %v1192_v7, %v174_v5  ;;  %v308_v15 = vmax.f32 %v244_v6, 0.0  ;;  %v177_v19 = vmul.f32 %v860_v10, %v1178_v1  ;;  %v178_v20 = vmul.f32 %v861_v11, %v1178_v1 }
  0x21   :  { %v246_v17 = vadd.f32 %v1192_v7, %v175_v8  ;;  %v247_v18 = vadd.f32 %v1192_v7, %v176_v9  ;;  %1131 = vst [vmem:[%s1505_s3 + $0x58] sm:$0xff] %v988_v13   ;;  %v865_v22 = vunpack.c.h.bf16 %v1104_v2  ;;  %v179_v23 = vmul.f32 %v864_v16, %v1178_v1  ;;  %v1110_v2 = vld [vmem:[%s1502_s0 + $0xa8] sm:$0xff]   ;;  %v1111_v16 = vld [vmem:[%s1502_s0 + $0xb0] sm:$0xff]  }
  0x22   :  { %v309_v21 = vmax.f32 %v245_v14, 0.0  ;;  %v868_v24 = vunpack.c.l.bf16 %v1105_v12  ;;  %v248_v27 = vadd.f32 %v1192_v7, %v177_v19  ;;  %v249_v28 = vadd.f32 %v1192_v7, %v178_v20 }
  0x23   :  { %v310_v25 = vmax.f32 %v246_v17, 0.0  ;;  %v311_v26 = vmax.f32 %v247_v18, 0.0  ;;  %v180_v31 = vmul.f32 %v865_v22, %v1178_v1  ;;  %v250_v32 = vadd.f32 %v1192_v7, %v179_v23 }
  0x24   :  { %v993_v30 = vpack.c.bf16 %v309_v21, %v308_v15  ;;  %v869_v33 = vunpack.c.h.bf16 %v1105_v12  ;;  %v312_v36 = vmax.f32 %v248_v27, 0.0  ;;  %v313_v37 = vmax.f32 %v249_v28, 0.0  ;;  %v1112_v21 = vld [vmem:[%s1502_s0 + $0xb8] sm:$0xff]  }
  0x25   :  { %v998_v35 = vpack.c.bf16 %v311_v26, %v310_v25  ;;  %v181_v38 = vmul.f32 %v868_v24, %v1178_v1  ;;  %v251_v39 = vadd.f32 %v1192_v7, %v180_v31  ;;  %v314_v40 = vmax.f32 %v250_v32, 0.0 }
  0x26   :  { %1132 = vst [vmem:[%s1505_s3 + $0x60] sm:$0xff] %v993_v30   ;;  %v182_v41 = vmul.f32 %v869_v33, %v1178_v1  ;;  %v872_v42 = vunpack.c.l.bf16 %v1106_v29  ;;  %v1003_v44 = vpack.c.bf16 %v313_v37, %v312_v36  ;;  %v873_v46 = vunpack.c.h.bf16 %v1106_v29 }
  0x27   :  { %1133 = vst [vmem:[%s1505_s3 + $0x68] sm:$0xff] %v998_v35   ;;  %v252_v45 = vadd.f32 %v1192_v7, %v181_v38  ;;  %v876_v47 = vunpack.c.l.bf16 %v1107_v34  ;;  %v315_v48 = vmax.f32 %v251_v39, 0.0  ;;  %v877_v51 = vunpack.c.h.bf16 %v1107_v34  ;;  %v1113_v34 = vld [vmem:[%s1502_s0 + $0xc0] sm:$0xff]  }
  0x28   :  { %v253_v49 = vadd.f32 %v1192_v7, %v182_v41  ;;  %v183_v50 = vmul.f32 %v872_v42, %v1178_v1  ;;  %1134 = vst [vmem:[%s1505_s3 + $0x70] sm:$0xff] %v1003_v44   ;;  %v184_v53 = vmul.f32 %v873_v46, %v1178_v1  ;;  %v880_v55 = vunpack.c.l.bf16 %v1108_v43 }
  0x29   :  { %v316_v52 = vmax.f32 %v252_v45, 0.0  ;;  %v185_v54 = vmul.f32 %v876_v47, %v1178_v1  ;;  %v1008_v57 = vpack.c.bf16 %v315_v48, %v314_v40  ;;  %v186_v60 = vmul.f32 %v877_v51, %v1178_v1  ;;  %v1114_v47 = vld [vmem:[%s1502_s0 + $0xc8] sm:$0xff]  }
  0x2a   :  { %v317_v58 = vmax.f32 %v253_v49, 0.0  ;;  %v254_v59 = vadd.f32 %v1192_v7, %v183_v50  ;;  %v255_v61 = vadd.f32 %v1192_v7, %v184_v53  ;;  %v881_v63 = vunpack.c.h.bf16 %v1108_v43 }
  0x2b   :  { %v256_v62 = vadd.f32 %v1192_v7, %v185_v54  ;;  %v187_v0 = vmul.f32 %v880_v55, %v1178_v1  ;;  %1135 = vst [vmem:[%s1505_s3 + $0x78] sm:$0xff] %v1008_v57   ;;  %v257_v5 = vadd.f32 %v1192_v7, %v186_v60  ;;  %v884_v6 = vunpack.c.l.bf16 %v1109_v56 }
  0x2c   :  { %v1013_v3 = vpack.c.bf16 %v317_v58, %v316_v52  ;;  %v318_v4 = vmax.f32 %v254_v59, 0.0  ;;  %v319_v8 = vmax.f32 %v255_v61, 0.0  ;;  %v188_v10 = vmul.f32 %v881_v63, %v1178_v1  ;;  %v1115_v52 = vld [vmem:[%s1502_s0 + $0xd0] sm:$0xff]   ;;  %v1116_v61 = vld [vmem:[%s1502_s0 + $0xd8] sm:$0xff]  }
  0x2d   :  { %v320_v9 = vmax.f32 %v256_v62, 0.0  ;;  %v258_v11 = vadd.f32 %v1192_v7, %v187_v0  ;;  %v321_v12 = vmax.f32 %v257_v5, 0.0  ;;  %v885_v13 = vunpack.c.h.bf16 %v1109_v56 }
  0x2e   :  { %1136 = vst [vmem:[%s1505_s3 + $0x80] sm:$0xff] %v1013_v3   ;;  %v189_v14 = vmul.f32 %v884_v6, %v1178_v1  ;;  %v888_v15 = vunpack.c.l.bf16 %v1110_v2  ;;  %v1018_v17 = vpack.c.bf16 %v319_v8, %v318_v4  ;;  %v259_v18 = vadd.f32 %v1192_v7, %v188_v10 }
  0x2f   :  { %v322_v19 = vmax.f32 %v258_v11, 0.0  ;;  %v889_v20 = vunpack.c.h.bf16 %v1110_v2  ;;  %v1023_v22 = vpack.c.bf16 %v321_v12, %v320_v9  ;;  %v190_v23 = vmul.f32 %v885_v13, %v1178_v1  ;;  %v1117_v12 = vld [vmem:[%s1502_s0 + $0xe0] sm:$0xff]  }
  0x30   :  { %v260_v24 = vadd.f32 %v1192_v7, %v189_v14  ;;  %v191_v25 = vmul.f32 %v888_v15, %v1178_v1  ;;  %1137 = vst [vmem:[%s1505_s3 + $0x88] sm:$0xff] %v1018_v17   ;;  %v323_v26 = vmax.f32 %v259_v18, 0.0  ;;  %v892_v28 = vunpack.c.l.bf16 %v1111_v16 }
  0x31   :  { %v192_v27 = vmul.f32 %v889_v20, %v1178_v1  ;;  %v893_v29 = vunpack.c.h.bf16 %v1111_v16  ;;  %1138 = vst [vmem:[%s1505_s3 + $0x90] sm:$0xff] %v1023_v22   ;;  %v261_v30 = vadd.f32 %v1192_v7, %v190_v23  ;;  %v896_v33 = vunpack.c.l.bf16 %v1112_v21 }
  0x32   :  { %v324_v31 = vmax.f32 %v260_v24, 0.0  ;;  %v262_v32 = vadd.f32 %v1192_v7, %v191_v25  ;;  %v1028_v35 = vpack.c.bf16 %v323_v26, %v322_v19  ;;  %v193_v37 = vmul.f32 %v892_v28, %v1178_v1 }
  0x33   :  { %v263_v36 = vadd.f32 %v1192_v7, %v192_v27  ;;  %v194_v38 = vmul.f32 %v893_v29, %v1178_v1  ;;  %v325_v39 = vmax.f32 %v261_v30, 0.0  ;;  %v897_v41 = vunpack.c.h.bf16 %v1112_v21  ;;  %v1118_v21 = vld [vmem:[%s1502_s0 + $0xe8] sm:$0xff]  }
  0x34   :  { %v326_v40 = vmax.f32 %v262_v32, 0.0  ;;  %v195_v42 = vmul.f32 %v896_v33, %v1178_v1  ;;  %1139 = vst [vmem:[%s1505_s3 + $0x98] sm:$0xff] %v1028_v35   ;;  %v264_v44 = vadd.f32 %v1192_v7, %v193_v37  ;;  %v900_v46 = vunpack.c.l.bf16 %v1113_v34 }
  0x35   :  { %v327_v43 = vmax.f32 %v263_v36, 0.0  ;;  %v265_v45 = vadd.f32 %v1192_v7, %v194_v38  ;;  %v1033_v48 = vpack.c.bf16 %v325_v39, %v324_v31  ;;  %v196_v49 = vmul.f32 %v897_v41, %v1178_v1  ;;  %v1120_v39 = vld [vmem:[%s1502_s0 + $0xf8] sm:$0xff]  }
  0x36   :  { %v266_v50 = vadd.f32 %v1192_v7, %v195_v42  ;;  %v901_v51 = vunpack.c.h.bf16 %v1113_v34  ;;  %v328_v54 = vmax.f32 %v264_v44, 0.0  ;;  %v197_v56 = vmul.f32 %v900_v46, %v1178_v1  ;;  %v1119_v34 = vld [vmem:[%s1502_s0 + $0xf0] sm:$0xff]  }
  0x37   :  { %v1038_v53 = vpack.c.bf16 %v327_v43, %v326_v40  ;;  %v329_v55 = vmax.f32 %v265_v45, 0.0  ;;  %1140 = vst [vmem:[%s1505_s3 + $0xa0] sm:$0xff] %v1033_v48   ;;  %v267_v57 = vadd.f32 %v1192_v7, %v196_v49  ;;  %v904_v60 = vunpack.c.l.bf16 %v1114_v47 }
  0x38   :  { %v330_v58 = vmax.f32 %v266_v50, 0.0  ;;  %v198_v59 = vmul.f32 %v901_v51, %v1178_v1  ;;  %v268_v63 = vadd.f32 %v1192_v7, %v197_v56  ;;  %v905_v0 = vunpack.c.h.bf16 %v1114_v47 }
  0x39   :  { %1141 = vst [vmem:[%s1505_s3 + $0xa8] sm:$0xff] %v1038_v53   ;;  %v1043_v62 = vpack.c.bf16 %v329_v55, %v328_v54  ;;  %v908_v2 = vunpack.c.l.bf16 %v1115_v52  ;;  %v331_v3 = vmax.f32 %v267_v57, 0.0  ;;  %v199_v5 = vmul.f32 %v904_v60, %v1178_v1 }
  0x3a   :  { %v269_v4 = vadd.f32 %v1192_v7, %v198_v59  ;;  %v909_v6 = vunpack.c.h.bf16 %v1115_v52  ;;  %v332_v8 = vmax.f32 %v268_v63, 0.0  ;;  %v200_v9 = vmul.f32 %v905_v0, %v1178_v1 }
  0x3b   :  { %1142 = vst [vmem:[%s1505_s3 + $0xb0] sm:$0xff] %v1043_v62   ;;  %v201_v10 = vmul.f32 %v908_v2, %v1178_v1  ;;  %v912_v11 = vunpack.c.l.bf16 %v1116_v61  ;;  %v1048_v13 = vpack.c.bf16 %v331_v3, %v330_v58  ;;  %v270_v15 = vadd.f32 %v1192_v7, %v199_v5 }
  0x3c   :  { %v333_v14 = vmax.f32 %v269_v4, 0.0  ;;  %v202_v16 = vmul.f32 %v909_v6, %v1178_v1  ;;  %v271_v17 = vadd.f32 %v1192_v7, %v200_v9  ;;  %v913_v19 = vunpack.c.h.bf16 %v1116_v61 }
  0x3d   :  { %v272_v18 = vadd.f32 %v1192_v7, %v201_v10  ;;  %v203_v20 = vmul.f32 %v912_v11, %v1178_v1  ;;  %1143 = vst [vmem:[%s1505_s3 + $0xb8] sm:$0xff] %v1048_v13   ;;  %v334_v23 = vmax.f32 %v270_v15, 0.0  ;;  %v916_v25 = vunpack.c.l.bf16 %v1117_v12 }
  0x3e   :  { %v1053_v22 = vpack.c.bf16 %v333_v14, %v332_v8  ;;  %v273_v24 = vadd.f32 %v1192_v7, %v202_v16  ;;  %v335_v26 = vmax.f32 %v271_v17, 0.0  ;;  %v204_v28 = vmul.f32 %v913_v19, %v1178_v1 }
  0x3f   :  { %v336_v27 = vmax.f32 %v272_v18, 0.0  ;;  %v274_v29 = vadd.f32 %v1192_v7, %v203_v20  ;;  %v917_v31 = vunpack.c.h.bf16 %v1117_v12  ;;  %v205_v32 = vmul.f32 %v916_v25, %v1178_v1 }
  0x40   :  { %1144 = vst [vmem:[%s1505_s3 + $0xc0] sm:$0xff] %v1053_v22   ;;  %v337_v30 = vmax.f32 %v273_v24, 0.0  ;;  %v920_v33 = vunpack.c.l.bf16 %v1118_v21  ;;  %v1058_v35 = vpack.c.bf16 %v335_v26, %v334_v23  ;;  %v275_v36 = vadd.f32 %v1192_v7, %v204_v28 }
  0x41   :  { %v338_v37 = vmax.f32 %v274_v29, 0.0  ;;  %v921_v38 = vunpack.c.h.bf16 %v1118_v21  ;;  %v206_v41 = vmul.f32 %v917_v31, %v1178_v1  ;;  %v276_v42 = vadd.f32 %v1192_v7, %v205_v32 }
  0x42   :  { %v1063_v40 = vpack.c.bf16 %v337_v30, %v336_v27  ;;  %v207_v43 = vmul.f32 %v920_v33, %v1178_v1  ;;  %1145 = vst [vmem:[%s1505_s3 + $0xc8] sm:$0xff] %v1058_v35   ;;  %v339_v44 = vmax.f32 %v275_v36, 0.0  ;;  %v924_v46 = vunpack.c.l.bf16 %v1119_v34 }
  0x43   :  { %v208_v45 = vmul.f32 %v921_v38, %v1178_v1  ;;  %v925_v47 = vunpack.c.h.bf16 %v1119_v34  ;;  %v277_v48 = vadd.f32 %v1192_v7, %v206_v41  ;;  %v340_v49 = vmax.f32 %v276_v42, 0.0 }
  0x44   :  { %1146 = vst [vmem:[%s1505_s3 + $0xd0] sm:$0xff] %v1063_v40   ;;  %v278_v50 = vadd.f32 %v1192_v7, %v207_v43  ;;  %v928_v51 = vunpack.c.l.bf16 %v1120_v39  ;;  %v1068_v52 = vpack.c.bf16 %v339_v44, %v338_v37  ;;  %v209_v54 = vmul.f32 %v924_v46, %v1178_v1 }
  0x45   :  { %v279_v53 = vadd.f32 %v1192_v7, %v208_v45  ;;  %v210_v55 = vmul.f32 %v925_v47, %v1178_v1  ;;  %v341_v56 = vmax.f32 %v277_v48, 0.0  ;;  %v929_v58 = vunpack.c.h.bf16 %v1120_v39 }
  0x46   :  { %v342_v57 = vmax.f32 %v278_v50, 0.0  ;;  %v211_v59 = vmul.f32 %v928_v51, %v1178_v1  ;;  %1147 = vst [vmem:[%s1505_s3 + $0xd8] sm:$0xff] %v1068_v52   ;;  %v280_v61 = vadd.f32 %v1192_v7, %v209_v54 }
  0x47   :  { %v343_v60 = vmax.f32 %v279_v53, 0.0  ;;  %v281_v62 = vadd.f32 %v1192_v7, %v210_v55  ;;  %v1073_v63 = vpack.c.bf16 %v341_v56, %v340_v49  ;;  %v212_v0 = vmul.f32 %v929_v58, %v1178_v1 }
  0x48   :  { %v282_v2 = vadd.f32 %v1192_v7, %v211_v59  ;;  %v344_v4 = vmax.f32 %v280_v61, 0.0 }
  0x49   :  { %v1078_v3 = vpack.c.bf16 %v343_v60, %v342_v57  ;;  %v345_v5 = vmax.f32 %v281_v62, 0.0  ;;  %1148 = vst [vmem:[%s1505_s3 + $0xe0] sm:$0xff] %v1073_v63   ;;  %v283_v6 = vadd.f32 %v1192_v7, %v212_v0 }
  0x4a   :  { %v346_v8 = vmax.f32 %v282_v2, 0.0 }
  0x4b   :  { %1149 = vst [vmem:[%s1505_s3 + $0xe8] sm:$0xff] %v1078_v3   ;;  %v1083_v9 = vpack.c.bf16 %v345_v5, %v344_v4  ;;  %v347_v10 = vmax.f32 %v283_v6, 0.0 }
  0x4d   :  { %1150 = vst [vmem:[%s1505_s3 + $0xf0] sm:$0xff] %v1083_v9   ;;  %v1088_v1 = vpack.c.bf16 %v347_v10, %v346_v8 }
  0x4f   :  { %1151 = vst [vmem:[%s1505_s3 + $0xf8] sm:$0xff] %v1088_v1  }

// kernel: decoder_block_forward.6
= control target key start
LH: loop header
LB: loop body
LE: loop exit
PB: predicated region body
PF: predicated region fallthrough
CT: control target
= control target key end

     0   :  { %s2134_s1 = inlined_call_operand.vmem [shape: bf16[128,128], index: 1, kind: input, shape index: {}]   ;;  %s2135_s0 = inlined_call_operand.vmem [shape: bf16[512,128], index: 0, kind: input, shape index: {}]   ;;  %s2136_s2 = inlined_call_operand.vmem [shape: bf16[512,128], index: 2, kind: output, shape index: {0}]   ;;  %s2137_s3 = inlined_call_operand.vmem [shape: f32[8,128], index: 3, kind: output, shape index: {1}]   ;;  %s2138_s4 = inlined_call_operand.vmem [shape: f32[8,128], index: 4, kind: output, shape index: {2}]  }
   0x1   :  { %v1655_v0 = vld [vmem:[%s2134_s1] sm:$0xff]   ;;  %v1656_v1 = vld [vmem:[%s2134_s1 + $0x8] sm:$0xff]   ;;  %v1657_v2 = vld [vmem:[%s2134_s1 + $0x10] sm:$0xff]  }
   0x2   :  { %1559 = vmatprep.subr.bf16.mxu0 %v1655_v0  ;;  %1639 = vmatprep.subr.bf16.mxu1 %v1655_v0  ;;  %v1658_v3 = vld [vmem:[%s2134_s1 + $0x18] sm:$0xff]   ;;  %v1663_v4 = vld [vmem:[%s2135_s0] sm:$0xff]   ;;  %v1660_v6 = vld [vmem:[%s2134_s1 + $0x28] sm:$0xff]  }
   0x3   :  { %1560 = vmatpush3.bf16.msra.mxu0 %v1655_v0  ;;  %1647 = vmatpush3.bf16.msra.mxu1 %v1655_v0  ;;  %v1659_v5 = vld [vmem:[%s2134_s1 + $0x20] sm:$0xff]   ;;  %v1661_v7 = vld [vmem:[%s2134_s1 + $0x30] sm:$0xff]   ;;  %v1662_v8 = vld [vmem:[%s2134_s1 + $0x38] sm:$0xff]  }
   0x4   :  { %1561 = vmatprep.subr.bf16.mxu0 %v1656_v1  ;;  %1640 = vmatprep.subr.bf16.mxu1 %v1656_v1  ;;  %v1679_v9 = vld [vmem:[%s2135_s0 + $0x80] sm:$0xff]   ;;  %v1664_v10 = vld [vmem:[%s2135_s0 + $0x8] sm:$0xff]   ;;  %v1665_v11 = vld [vmem:[%s2135_s0 + $0x10] sm:$0xff]  }
   0x5   :  { %1575 = vmatprep.mubr.bf16.mxu0 %v1663_v4  ;;  %1607 = vmatprep.mubr.bf16.mxu1 %v1679_v9  ;;  %v1680_v12 = vld [vmem:[%s2135_s0 + $0x88] sm:$0xff]   ;;  %v1681_v13 = vld [vmem:[%s2135_s0 + $0x90] sm:$0xff]   ;;  %v1666_v14 = vld [vmem:[%s2135_s0 + $0x18] sm:$0xff]  }
   0x6   :  { %v1667_v15 = vld [vmem:[%s2135_s0 + $0x20] sm:$0xff]   ;;  %v1682_v16 = vld [vmem:[%s2135_s0 + $0x98] sm:$0xff]   ;;  %v1668_v18 = vld [vmem:[%s2135_s0 + $0x28] sm:$0xff]  }
   0x7   :  { %1562 = vmatpush3.bf16.msra.mxu0 %v1656_v1  ;;  %1648 = vmatpush3.bf16.msra.mxu1 %v1656_v1  ;;  %v1683_v17 = vld [vmem:[%s2135_s0 + $0xa0] sm:$0xff]   ;;  %v1684_v19 = vld [vmem:[%s2135_s0 + $0xa8] sm:$0xff]   ;;  %v1669_v20 = vld [vmem:[%s2135_s0 + $0x30] sm:$0xff]  }
   0x8   :  { %1563 = vmatprep.subr.bf16.mxu0 %v1657_v2  ;;  %1641 = vmatprep.subr.bf16.mxu1 %v1657_v2  ;;  %v1685_v21 = vld [vmem:[%s2135_s0 + $0xb0] sm:$0xff]   ;;  %v1670_v22 = vld [vmem:[%s2135_s0 + $0x38] sm:$0xff]   ;;  %v1671_v24 = vld [vmem:[%s2135_s0 + $0x40] sm:$0xff]  }
   0x9   :  { %v1686_v23 = vld [vmem:[%s2135_s0 + $0xb8] sm:$0xff]   ;;  %v1687_v25 = vld [vmem:[%s2135_s0 + $0xc0] sm:$0xff]   ;;  %v1672_v26 = vld [vmem:[%s2135_s0 + $0x48] sm:$0xff]  }
   0xa   :  { %v1688_v27 = vld [vmem:[%s2135_s0 + $0xc8] sm:$0xff]   ;;  %v1673_v28 = vld [vmem:[%s2135_s0 + $0x50] sm:$0xff]   ;;  %v1674_v30 = vld [vmem:[%s2135_s0 + $0x58] sm:$0xff]  }
   0xb   :  { %1564 = vmatpush3.bf16.msra.mxu0 %v1657_v2  ;;  %1649 = vmatpush3.bf16.msra.mxu1 %v1657_v2  ;;  %v1689_v29 = vld [vmem:[%s2135_s0 + $0xd0] sm:$0xff]   ;;  %v1690_v31 = vld [vmem:[%s2135_s0 + $0xd8] sm:$0xff]   ;;  %v1675_v32 = vld [vmem:[%s2135_s0 + $0x60] sm:$0xff]  }
   0xc   :  { %1565 = vmatprep.subr.bf16.mxu0 %v1658_v3  ;;  %1642 = vmatprep.subr.bf16.mxu1 %v1658_v3  ;;  %v1691_v33 = vld [vmem:[%s2135_s0 + $0xe0] sm:$0xff]   ;;  %v1676_v34 = vld [vmem:[%s2135_s0 + $0x68] sm:$0xff]   ;;  %v1677_v36 = vld [vmem:[%s2135_s0 + $0x70] sm:$0xff]  }
   0xd   :  { %v1692_v35 = vld [vmem:[%s2135_s0 + $0xe8] sm:$0xff]   ;;  %v1693_v37 = vld [vmem:[%s2135_s0 + $0xf0] sm:$0xff]   ;;  %v1678_v38 = vld [vmem:[%s2135_s0 + $0x78] sm:$0xff]  }
   0xe   :  { %v1694_v39 = vld [vmem:[%s2135_s0 + $0xf8] sm:$0xff]  }
   0xf   :  { %1566 = vmatpush3.bf16.msra.mxu0 %v1658_v3  ;;  %1650 = vmatpush3.bf16.msra.mxu1 %v1658_v3 }
  0x10   :  { %1567 = vmatprep.subr.bf16.mxu0 %v1659_v5  ;;  %1643 = vmatprep.subr.bf16.mxu1 %v1659_v5 }
  0x13   :  { %1568 = vmatpush3.bf16.msra.mxu0 %v1659_v5  ;;  %1651 = vmatpush3.bf16.msra.mxu1 %v1659_v5 }
  0x14   :  { %1569 = vmatprep.subr.bf16.mxu0 %v1660_v6  ;;  %1644 = vmatprep.subr.bf16.mxu1 %v1660_v6 }
  0x17   :  { %1570 = vmatpush3.bf16.msra.mxu0 %v1660_v6  ;;  %1652 = vmatpush3.bf16.msra.mxu1 %v1660_v6 }
  0x18   :  { %1571 = vmatprep.subr.bf16.mxu0 %v1661_v7  ;;  %1645 = vmatprep.subr.bf16.mxu1 %v1661_v7 }
  0x1b   :  { %1572 = vmatpush3.bf16.msra.mxu0 %v1661_v7  ;;  %1653 = vmatpush3.bf16.msra.mxu1 %v1661_v7 }
  0x1c   :  { %1573 = vmatprep.subr.bf16.mxu0 %v1662_v8  ;;  %1646 = vmatprep.subr.bf16.mxu1 %v1662_v8 }
  0x1f   :  { %1574 = vmatpush3.bf16.msra.mxu0 %v1662_v8  ;;  %1654 = vmatpush3.bf16.msra.mxu1 %v1662_v8 }
  0x22   :  { %1576 = vmatmul.mubr.bf16.vlgmr.msra.gmra.mrb[0].mxu0 %v1664_v10  ;;  %1608 = vmatmul.mubr.bf16.vlgmr.msra.gmra.mrb[0].mxu1 %v1680_v12 }
  0x23   :  { %1579 = vmatprep.mubr.bf16.mxu0 %v1665_v11  ;;  %1611 = vmatprep.mubr.bf16.mxu1 %v1681_v13 }
  0x2a   :  { %1580 = vmatmul.mubr.bf16.gmra.mrb[4].mxu0 %v1666_v14  ;;  %1612 = vmatmul.mubr.bf16.gmra.mrb[4].mxu1 %v1682_v16 }
  0x2b   :  { %1583 = vmatprep.mubr.bf16.mxu0 %v1667_v15  ;;  %1615 = vmatprep.mubr.bf16.mxu1 %v1683_v17 }
  0x32   :  { %1584 = vmatmul.mubr.bf16.gmra.mrb[8].mxu0 %v1668_v18  ;;  %1616 = vmatmul.mubr.bf16.gmra.mrb[8].mxu1 %v1684_v19 }
  0x33   :  { %1587 = vmatprep.mubr.bf16.mxu0 %v1669_v20  ;;  %1619 = vmatprep.mubr.bf16.mxu1 %v1685_v21 }
  0x3a   :  { %1588 = vmatmul.mubr.bf16.gmra.mrb[12].mxu0 %v1670_v22  ;;  %1620 = vmatmul.mubr.bf16.gmra.mrb[12].mxu1 %v1686_v23 }
  0x3b   :  { %1591 = vmatprep.mubr.bf16.mxu0 %v1671_v24  ;;  %1623 = vmatprep.mubr.bf16.mxu1 %v1687_v25 }
  0x42   :  { %1592 = vmatmul.mubr.bf16.gmra.mrb[16].mxu0 %v1672_v26  ;;  %1624 = vmatmul.mubr.bf16.gmra.mrb[16].mxu1 %v1688_v27 }
  0x43   :  { %1595 = vmatprep.mubr.bf16.mxu0 %v1673_v28  ;;  %1627 = vmatprep.mubr.bf16.mxu1 %v1689_v29 }
  0x4a   :  { %1596 = vmatmul.mubr.bf16.gmra.mrb[20].mxu0 %v1674_v30  ;;  %1628 = vmatmul.mubr.bf16.gmra.mrb[20].mxu1 %v1690_v31 }
  0x4b   :  { %1599 = vmatprep.mubr.bf16.mxu0 %v1675_v32  ;;  %1631 = vmatprep.mubr.bf16.mxu1 %v1691_v33 }
  0x52   :  { %1600 = vmatmul.mubr.bf16.gmra.mrb[24].mxu0 %v1676_v34  ;;  %1632 = vmatmul.mubr.bf16.gmra.mrb[24].mxu1 %v1692_v35 }
  0x53   :  { %1603 = vmatprep.mubr.bf16.mxu0 %v1677_v36  ;;  %1635 = vmatprep.mubr.bf16.mxu1 %v1693_v37 }
  0x5a   :  { %1604 = vmatmul.mubr.bf16.gmra.mrb[28].mxu0 %v1678_v38  ;;  %1636 = vmatmul.mubr.bf16.gmra.mrb[28].mxu1 %v1694_v39 }
  0xf5   :  { %v1577_v40 = vpop.f32.mrb[0].mxu0  ;;  %v1840_v41 = vpop.f32.mrb[0].mxu1 }
  0xf6   :  { %v369_v42 = vpop.f32.mrb[1].mxu0  ;;  %v1842_v43 = vpop.f32.mrb[1].mxu1  ;;  %v1015_v55 = vmul.f32 %v1577_v40, %v1577_v40 }
  0xf7   :  { %v1578_v44 = vpop.f32.mrb[2].mxu0  ;;  %v1844_v45 = vpop.f32.mrb[2].mxu1  ;;  %v1013_v46 = vmul.f32 %v369_v42, %v369_v42 }
  0xf8   :  { %v1336_v47 = vpack.c.bf16 %v1578_v44, %v1577_v40  ;;  %v372_v48 = vpop.f32.mrb[3].mxu0  ;;  %v1416_v49 = vpack.c.bf16 %v1844_v45, %v1840_v41  ;;  %v1848_v50 = vpop.f32.mrb[3].mxu1  ;;  %v1016_v58 = vmul.f32 %v1578_v44, %v1578_v44 }
  0xf9   :  { %v1331_v51 = vpack.c.bf16 %v372_v48, %v369_v42  ;;  %v944_v52 = vadd.f32 %v372_v48, %v369_v42  ;;  %v1014_v53 = vmul.f32 %v372_v48, %v372_v48  ;;  %v1411_v54 = vpack.c.bf16 %v1848_v50, %v1842_v43 }
  0xfa   :  { %1488 = vst [vmem:[%s2136_s2 + $0x8] sm:$0xff] %v1336_v47   ;;  %1504 = vst [vmem:[%s2136_s2 + $0x88] sm:$0xff] %v1416_v49  }
  0xfb   :  { %1332 = vst [vmem:[%s2136_s2] sm:$0xff] %v1331_v51   ;;  %v945_v56 = vadd.f32 %v1577_v40, %v944_v52  ;;  %v1077_v57 = vadd.f32 %v1014_v53, %v1013_v46  ;;  %1503 = vst [vmem:[%s2136_s2 + $0x80] sm:$0xff] %v1411_v54  }
  0xfd   :  { %v1078_v59 = vadd.f32 %v1077_v57, %v1015_v55  ;;  %v1581_v60 = vpop.f32.mrb[4].mxu0  ;;  %v946_v61 = vadd.f32 %v1578_v44, %v945_v56  ;;  %v1864_v62 = vpop.f32.mrb[4].mxu1 }
  0xfe   :  { %v385_v63 = vpop.f32.mrb[5].mxu0  ;;  %v1866_v0 = vpop.f32.mrb[5].mxu1  ;;  %v1019_v15 = vmul.f32 %v1581_v60, %v1581_v60 }
  0xff   :  { %v947_v1 = vadd.f32 %v946_v61, %v385_v63  ;;  %v1017_v2 = vmul.f32 %v385_v63, %v385_v63  ;;  %v1079_v3 = vadd.f32 %v1078_v59, %v1016_v58  ;;  %v1582_v4 = vpop.f32.mrb[6].mxu0  ;;  %v1868_v5 = vpop.f32.mrb[6].mxu1 }
 0x100   :  { %v1346_v6 = vpack.c.bf16 %v1582_v4, %v1581_v60  ;;  %v388_v7 = vpop.f32.mrb[7].mxu0  ;;  %v1426_v8 = vpack.c.bf16 %v1868_v5, %v1864_v62  ;;  %v1872_v9 = vpop.f32.mrb[7].mxu1  ;;  %v1020_v18 = vmul.f32 %v1582_v4, %v1582_v4 }
 0x101   :  { %v1080_v10 = vadd.f32 %v1079_v3, %v1017_v2  ;;  %v1341_v11 = vpack.c.bf16 %v388_v7, %v385_v63  ;;  %v948_v12 = vadd.f32 %v947_v1, %v388_v7  ;;  %v1018_v13 = vmul.f32 %v388_v7, %v388_v7 }
 0x102   :  { %1490 = vst [vmem:[%s2136_s2 + $0x18] sm:$0xff] %v1346_v6   ;;  %1506 = vst [vmem:[%s2136_s2 + $0x98] sm:$0xff] %v1426_v8   ;;  %v1421_v14 = vpack.c.bf16 %v1872_v9, %v1866_v0 }
 0x103   :  { %1489 = vst [vmem:[%s2136_s2 + $0x10] sm:$0xff] %v1341_v11   ;;  %v949_v16 = vadd.f32 %v1581_v60, %v948_v12  ;;  %v1081_v17 = vadd.f32 %v1080_v10, %v1018_v13 }
 0x104   :  { %1505 = vst [vmem:[%s2136_s2 + $0x90] sm:$0xff] %v1421_v14  }
 0x105   :  { %v1082_v19 = vadd.f32 %v1081_v17, %v1019_v15  ;;  %v1585_v20 = vpop.f32.mrb[8].mxu0  ;;  %v950_v21 = vadd.f32 %v1582_v4, %v949_v16  ;;  %v1888_v22 = vpop.f32.mrb[8].mxu1 }
 0x106   :  { %v401_v23 = vpop.f32.mrb[9].mxu0  ;;  %v1890_v24 = vpop.f32.mrb[9].mxu1  ;;  %v1023_v39 = vmul.f32 %v1585_v20, %v1585_v20 }
 0x107   :  { %v951_v25 = vadd.f32 %v950_v21, %v401_v23  ;;  %v1021_v26 = vmul.f32 %v401_v23, %v401_v23  ;;  %v1083_v27 = vadd.f32 %v1082_v19, %v1020_v18  ;;  %v1586_v28 = vpop.f32.mrb[10].mxu0  ;;  %v1892_v29 = vpop.f32.mrb[10].mxu1 }
 0x108   :  { %v1356_v30 = vpack.c.bf16 %v1586_v28, %v1585_v20  ;;  %v404_v31 = vpop.f32.mrb[11].mxu0  ;;  %v1436_v32 = vpack.c.bf16 %v1892_v29, %v1888_v22  ;;  %v1896_v33 = vpop.f32.mrb[11].mxu1  ;;  %v1024_v44 = vmul.f32 %v1586_v28, %v1586_v28 }
 0x109   :  { %v1084_v34 = vadd.f32 %v1083_v27, %v1021_v26  ;;  %v1351_v35 = vpack.c.bf16 %v404_v31, %v401_v23  ;;  %v952_v36 = vadd.f32 %v951_v25, %v404_v31  ;;  %v1022_v37 = vmul.f32 %v404_v31, %v404_v31 }
 0x10a   :  { %1492 = vst [vmem:[%s2136_s2 + $0x28] sm:$0xff] %v1356_v30   ;;  %1508 = vst [vmem:[%s2136_s2 + $0xa8] sm:$0xff] %v1436_v32   ;;  %v1431_v38 = vpack.c.bf16 %v1896_v33, %v1890_v24 }
 0x10b   :  { %1491 = vst [vmem:[%s2136_s2 + $0x20] sm:$0xff] %v1351_v35   ;;  %v953_v40 = vadd.f32 %v1585_v20, %v952_v36  ;;  %v1085_v42 = vadd.f32 %v1084_v34, %v1022_v37 }
 0x10c   :  { %1507 = vst [vmem:[%s2136_s2 + $0xa0] sm:$0xff] %v1431_v38  }
 0x10d   :  { %v1086_v46 = vadd.f32 %v1085_v42, %v1023_v39  ;;  %v1589_v47 = vpop.f32.mrb[12].mxu0  ;;  %v954_v48 = vadd.f32 %v1586_v28, %v953_v40  ;;  %v1912_v49 = vpop.f32.mrb[12].mxu1 }
 0x10e   :  { %v417_v51 = vpop.f32.mrb[13].mxu0  ;;  %v1914_v52 = vpop.f32.mrb[13].mxu1  ;;  %v1027_v6 = vmul.f32 %v1589_v47, %v1589_v47 }
 0x10f   :  { %v955_v53 = vadd.f32 %v954_v48, %v417_v51  ;;  %v1025_v54 = vmul.f32 %v417_v51, %v417_v51  ;;  %v1087_v55 = vadd.f32 %v1086_v46, %v1024_v44  ;;  %v1590_v56 = vpop.f32.mrb[14].mxu0  ;;  %v1916_v57 = vpop.f32.mrb[14].mxu1 }
 0x110   :  { %v1366_v58 = vpack.c.bf16 %v1590_v56, %v1589_v47  ;;  %v420_v59 = vpop.f32.mrb[15].mxu0  ;;  %v1446_v60 = vpack.c.bf16 %v1916_v57, %v1912_v49  ;;  %v1920_v61 = vpop.f32.mrb[15].mxu1  ;;  %v1028_v10 = vmul.f32 %v1590_v56, %v1590_v56 }
 0x111   :  { %v1088_v63 = vadd.f32 %v1087_v55, %v1025_v54  ;;  %v1361_v1 = vpack.c.bf16 %v420_v59, %v417_v51  ;;  %v956_v2 = vadd.f32 %v955_v53, %v420_v59  ;;  %v1026_v3 = vmul.f32 %v420_v59, %v420_v59 }
 0x112   :  { %1494 = vst [vmem:[%s2136_s2 + $0x38] sm:$0xff] %v1366_v58   ;;  %1510 = vst [vmem:[%s2136_s2 + $0xb8] sm:$0xff] %v1446_v60   ;;  %v1441_v4 = vpack.c.bf16 %v1920_v61, %v1914_v52 }
 0x113   :  { %1493 = vst [vmem:[%s2136_s2 + $0x30] sm:$0xff] %v1361_v1   ;;  %v957_v7 = vadd.f32 %v1589_v47, %v956_v2  ;;  %v1089_v8 = vadd.f32 %v1088_v63, %v1026_v3 }
 0x114   :  { %1509 = vst [vmem:[%s2136_s2 + $0xb0] sm:$0xff] %v1441_v4  }
 0x115   :  { %v1090_v11 = vadd.f32 %v1089_v8, %v1027_v6  ;;  %v1593_v12 = vpop.f32.mrb[16].mxu0  ;;  %v958_v13 = vadd.f32 %v1590_v56, %v957_v7  ;;  %v1936_v14 = vpop.f32.mrb[16].mxu1 }
 0x116   :  { %v433_v15 = vpop.f32.mrb[17].mxu0  ;;  %v1938_v16 = vpop.f32.mrb[17].mxu1  ;;  %v1031_v35 = vmul.f32 %v1593_v12, %v1593_v12 }
 0x117   :  { %v959_v17 = vadd.f32 %v958_v13, %v433_v15  ;;  %v1029_v18 = vmul.f32 %v433_v15, %v433_v15  ;;  %v1091_v19 = vadd.f32 %v1090_v11, %v1028_v10  ;;  %v1594_v20 = vpop.f32.mrb[18].mxu0  ;;  %v1940_v21 = vpop.f32.mrb[18].mxu1 }
 0x118   :  { %v1376_v23 = vpack.c.bf16 %v1594_v20, %v1593_v12  ;;  %v436_v25 = vpop.f32.mrb[19].mxu0  ;;  %v1456_v26 = vpack.c.bf16 %v1940_v21, %v1936_v14  ;;  %v1944_v27 = vpop.f32.mrb[19].mxu1  ;;  %v1032_v38 = vmul.f32 %v1594_v20, %v1594_v20 }
 0x119   :  { %v1092_v28 = vadd.f32 %v1091_v19, %v1029_v18  ;;  %v1371_v30 = vpack.c.bf16 %v436_v25, %v433_v15  ;;  %v960_v31 = vadd.f32 %v959_v17, %v436_v25  ;;  %v1030_v32 = vmul.f32 %v436_v25, %v436_v25 }
 0x11a   :  { %1496 = vst [vmem:[%s2136_s2 + $0x48] sm:$0xff] %v1376_v23   ;;  %1512 = vst [vmem:[%s2136_s2 + $0xc8] sm:$0xff] %v1456_v26   ;;  %v1451_v34 = vpack.c.bf16 %v1944_v27, %v1938_v16 }
 0x11b   :  { %1495 = vst [vmem:[%s2136_s2 + $0x40] sm:$0xff] %v1371_v30   ;;  %v961_v36 = vadd.f32 %v1593_v12, %v960_v31  ;;  %v1093_v37 = vadd.f32 %v1092_v28, %v1030_v32 }
 0x11c   :  { %1511 = vst [vmem:[%s2136_s2 + $0xc0] sm:$0xff] %v1451_v34  }
 0x11d   :  { %v1094_v39 = vadd.f32 %v1093_v37, %v1031_v35  ;;  %v1597_v40 = vpop.f32.mrb[20].mxu0  ;;  %v962_v42 = vadd.f32 %v1594_v20, %v961_v36  ;;  %v1960_v44 = vpop.f32.mrb[20].mxu1 }
 0x11e   :  { %v449_v46 = vpop.f32.mrb[21].mxu0  ;;  %v1962_v47 = vpop.f32.mrb[21].mxu1  ;;  %v1035_v6 = vmul.f32 %v1597_v40, %v1597_v40 }
 0x11f   :  { %v963_v48 = vadd.f32 %v962_v42, %v449_v46  ;;  %v1033_v51 = vmul.f32 %v449_v46, %v449_v46  ;;  %v1095_v53 = vadd.f32 %v1094_v39, %v1032_v38  ;;  %v1598_v54 = vpop.f32.mrb[22].mxu0  ;;  %v1964_v55 = vpop.f32.mrb[22].mxu1 }
 0x120   :  { %v1386_v56 = vpack.c.bf16 %v1598_v54, %v1597_v40  ;;  %v452_v58 = vpop.f32.mrb[23].mxu0  ;;  %v1466_v59 = vpack.c.bf16 %v1964_v55, %v1960_v44  ;;  %v1968_v60 = vpop.f32.mrb[23].mxu1  ;;  %v1036_v10 = vmul.f32 %v1598_v54, %v1598_v54 }
 0x121   :  { %v1096_v63 = vadd.f32 %v1095_v53, %v1033_v51  ;;  %v1381_v1 = vpack.c.bf16 %v452_v58, %v449_v46  ;;  %v964_v2 = vadd.f32 %v963_v48, %v452_v58  ;;  %v1034_v3 = vmul.f32 %v452_v58, %v452_v58 }
 0x122   :  { %1498 = vst [vmem:[%s2136_s2 + $0x58] sm:$0xff] %v1386_v56   ;;  %1514 = vst [vmem:[%s2136_s2 + $0xd8] sm:$0xff] %v1466_v59   ;;  %v1461_v4 = vpack.c.bf16 %v1968_v60, %v1962_v47 }
 0x123   :  { %1497 = vst [vmem:[%s2136_s2 + $0x50] sm:$0xff] %v1381_v1   ;;  %v965_v7 = vadd.f32 %v1597_v40, %v964_v2  ;;  %v1097_v8 = vadd.f32 %v1096_v63, %v1034_v3 }
 0x124   :  { %1513 = vst [vmem:[%s2136_s2 + $0xd0] sm:$0xff] %v1461_v4  }
 0x125   :  { %v1098_v11 = vadd.f32 %v1097_v8, %v1035_v6  ;;  %v1601_v12 = vpop.f32.mrb[24].mxu0  ;;  %v966_v13 = vadd.f32 %v1598_v54, %v965_v7  ;;  %v1984_v15 = vpop.f32.mrb[24].mxu1 }
 0x126   :  { %v465_v17 = vpop.f32.mrb[25].mxu0  ;;  %v1986_v18 = vpop.f32.mrb[25].mxu1  ;;  %v1039_v39 = vmul.f32 %v1601_v12, %v1601_v12 }
 0x127   :  { %v967_v19 = vadd.f32 %v966_v13, %v465_v17  ;;  %v1037_v20 = vmul.f32 %v465_v17, %v465_v17  ;;  %v1099_v23 = vadd.f32 %v1098_v11, %v1036_v10  ;;  %v1602_v25 = vpop.f32.mrb[26].mxu0  ;;  %v1988_v26 = vpop.f32.mrb[26].mxu1 }
 0x128   :  { %v1396_v28 = vpack.c.bf16 %v1602_v25, %v1601_v12  ;;  %v468_v30 = vpop.f32.mrb[27].mxu0  ;;  %v1476_v31 = vpack.c.bf16 %v1988_v26, %v1984_v15  ;;  %v1992_v32 = vpop.f32.mrb[27].mxu1  ;;  %v1040_v46 = vmul.f32 %v1602_v25, %v1602_v25 }
 0x129   :  { %v1100_v34 = vadd.f32 %v1099_v23, %v1037_v20  ;;  %v1391_v35 = vpack.c.bf16 %v468_v30, %v465_v17  ;;  %v968_v36 = vadd.f32 %v967_v19, %v468_v30  ;;  %v1038_v37 = vmul.f32 %v468_v30, %v468_v30 }
 0x12a   :  { %1500 = vst [vmem:[%s2136_s2 + $0x68] sm:$0xff] %v1396_v28   ;;  %1516 = vst [vmem:[%s2136_s2 + $0xe8] sm:$0xff] %v1476_v31   ;;  %v1471_v38 = vpack.c.bf16 %v1992_v32, %v1986_v18  ;;  %v1045_v31 = vmul.f32 %v1842_v43, %v1842_v43 }
 0x12b   :  { %1499 = vst [vmem:[%s2136_s2 + $0x60] sm:$0xff] %v1391_v35   ;;  %v969_v40 = vadd.f32 %v1601_v12, %v968_v36  ;;  %v1101_v42 = vadd.f32 %v1100_v34, %v1038_v37 }
 0x12c   :  { %1515 = vst [vmem:[%s2136_s2 + $0xe0] sm:$0xff] %v1471_v38   ;;  %v1046_v38 = vmul.f32 %v1848_v50, %v1848_v50 }
 0x12d   :  { %v1102_v48 = vadd.f32 %v1101_v42, %v1039_v39  ;;  %v1605_v51 = vpop.f32.mrb[28].mxu0  ;;  %v970_v53 = vadd.f32 %v1602_v25, %v969_v40  ;;  %v2008_v54 = vpop.f32.mrb[28].mxu1  ;;  %v1047_v39 = vmul.f32 %v1840_v41, %v1840_v41 }
 0x12e   :  { %v481_v56 = vpop.f32.mrb[29].mxu0  ;;  %v2010_v58 = vpop.f32.mrb[29].mxu1  ;;  %v1043_v19 = vmul.f32 %v1605_v51, %v1605_v51 }
 0x12f   :  { %v971_v59 = vadd.f32 %v970_v53, %v481_v56  ;;  %v1041_v63 = vmul.f32 %v481_v56, %v481_v56  ;;  %v1103_v1 = vadd.f32 %v1102_v48, %v1040_v46  ;;  %v1606_v2 = vpop.f32.mrb[30].mxu0  ;;  %v2012_v3 = vpop.f32.mrb[30].mxu1  ;;  %v1048_v46 = vmul.f32 %v1844_v45, %v1844_v45 }
 0x130   :  { %v1406_v4 = vpack.c.bf16 %v1606_v2, %v1605_v51  ;;  %v484_v6 = vpop.f32.mrb[31].mxu0  ;;  %v1486_v7 = vpack.c.bf16 %v2012_v3, %v2008_v54  ;;  %v2016_v8 = vpop.f32.mrb[31].mxu1  ;;  %v1044_v25 = vmul.f32 %v1606_v2, %v1606_v2 }
 0x131   :  { %v1104_v10 = vadd.f32 %v1103_v1, %v1041_v63  ;;  %v1401_v11 = vpack.c.bf16 %v484_v6, %v481_v56  ;;  %v972_v12 = vadd.f32 %v971_v59, %v484_v6  ;;  %v1042_v13 = vmul.f32 %v484_v6, %v484_v6 }
 0x132   :  { %1502 = vst [vmem:[%s2136_s2 + $0x78] sm:$0xff] %v1406_v4   ;;  %1518 = vst [vmem:[%s2136_s2 + $0xf8] sm:$0xff] %v1486_v7   ;;  %v1481_v17 = vpack.c.bf16 %v2016_v8, %v2010_v58  ;;  %v1050_v63 = vmul.f32 %v1872_v9, %v1872_v9 }
 0x133   :  { %1501 = vst [vmem:[%s2136_s2 + $0x70] sm:$0xff] %v1401_v11   ;;  %v973_v20 = vadd.f32 %v1605_v51, %v972_v12  ;;  %v1105_v23 = vadd.f32 %v1104_v10, %v1042_v13  ;;  %v1054_v12 = vmul.f32 %v1896_v33, %v1896_v33 }
 0x134   :  { %1517 = vst [vmem:[%s2136_s2 + $0xf0] sm:$0xff] %v1481_v17  }
 0x135   :  { %v1106_v28 = vadd.f32 %v1105_v23, %v1043_v19  ;;  %v974_v30 = vadd.f32 %v1606_v2, %v973_v20 }
 0x137   :  { %v975_v34 = vadd.f32 %v974_v30, %v1842_v43  ;;  %v1107_v35 = vadd.f32 %v1106_v28, %v1044_v25  ;;  %v1049_v43 = vmul.f32 %v1866_v0, %v1866_v0  ;;  %v1058_v30 = vmul.f32 %v1920_v61, %v1920_v61 }
 0x139   :  { %v1108_v36 = vadd.f32 %v1107_v35, %v1045_v31  ;;  %v976_v37 = vadd.f32 %v975_v34, %v1848_v50 }
 0x13b   :  { %v977_v40 = vadd.f32 %v1840_v41, %v976_v37  ;;  %v1109_v42 = vadd.f32 %v1108_v36, %v1046_v38  ;;  %v1051_v41 = vmul.f32 %v1864_v62, %v1864_v62 }
 0x13d   :  { %v1110_v48 = vadd.f32 %v1109_v42, %v1047_v39  ;;  %v978_v51 = vadd.f32 %v1844_v45, %v977_v40  ;;  %v1052_v45 = vmul.f32 %v1868_v5, %v1868_v5  ;;  %v1062_v40 = vmul.f32 %v1944_v27, %v1944_v27 }
 0x13f   :  { %v979_v53 = vadd.f32 %v978_v51, %v1866_v0  ;;  %v1111_v56 = vadd.f32 %v1110_v48, %v1048_v46  ;;  %v1053_v0 = vmul.f32 %v1890_v24, %v1890_v24 }
 0x141   :  { %v1112_v59 = vadd.f32 %v1111_v56, %v1049_v43  ;;  %v980_v50 = vadd.f32 %v979_v53, %v1872_v9 }
 0x143   :  { %v981_v1 = vadd.f32 %v1864_v62, %v980_v50  ;;  %v1113_v2 = vadd.f32 %v1112_v59, %v1050_v63  ;;  %v1055_v62 = vmul.f32 %v1888_v22, %v1888_v22  ;;  %v1066_v59 = vmul.f32 %v1968_v60, %v1968_v60 }
 0x145   :  { %v1114_v4 = vadd.f32 %v1113_v2, %v1051_v41  ;;  %v982_v6 = vadd.f32 %v1868_v5, %v981_v1  ;;  %v1056_v5 = vmul.f32 %v1892_v29, %v1892_v29 }
 0x147   :  { %v983_v7 = vadd.f32 %v982_v6, %v1890_v24  ;;  %v1115_v10 = vadd.f32 %v1114_v4, %v1052_v45  ;;  %v1057_v24 = vmul.f32 %v1914_v52, %v1914_v52  ;;  %v1070_v6 = vmul.f32 %v1992_v32, %v1992_v32 }
 0x149   :  { %v1116_v11 = vadd.f32 %v1115_v10, %v1053_v0  ;;  %v984_v9 = vadd.f32 %v983_v7, %v1896_v33 }
 0x14b   :  { %v985_v13 = vadd.f32 %v1888_v22, %v984_v9  ;;  %v1117_v17 = vadd.f32 %v1116_v11, %v1054_v12  ;;  %v1059_v22 = vmul.f32 %v1912_v49, %v1912_v49 }
 0x14d   :  { %v1118_v19 = vadd.f32 %v1117_v17, %v1055_v62  ;;  %v986_v20 = vadd.f32 %v1892_v29, %v985_v13  ;;  %v1060_v29 = vmul.f32 %v1916_v57, %v1916_v57  ;;  %v1074_v13 = vmul.f32 %v2016_v8, %v2016_v8 }
 0x14f   :  { %v987_v23 = vadd.f32 %v986_v20, %v1914_v52  ;;  %v1119_v25 = vadd.f32 %v1118_v19, %v1056_v5  ;;  %v1061_v52 = vmul.f32 %v1938_v16, %v1938_v16 }
 0x151   :  { %v1120_v28 = vadd.f32 %v1119_v25, %v1057_v24  ;;  %v988_v33 = vadd.f32 %v987_v23, %v1920_v61 }
 0x153   :  { %v989_v31 = vadd.f32 %v1912_v49, %v988_v33  ;;  %v1121_v34 = vadd.f32 %v1120_v28, %v1058_v30  ;;  %v1063_v49 = vmul.f32 %v1936_v14, %v1936_v14 }
 0x155   :  { %v1122_v35 = vadd.f32 %v1121_v34, %v1059_v22  ;;  %v990_v36 = vadd.f32 %v1916_v57, %v989_v31  ;;  %v1064_v57 = vmul.f32 %v1940_v21, %v1940_v21 }
 0x157   :  { %v991_v37 = vadd.f32 %v990_v36, %v1938_v16  ;;  %v1123_v38 = vadd.f32 %v1122_v35, %v1060_v29  ;;  %v1065_v16 = vmul.f32 %v1962_v47, %v1962_v47 }
 0x159   :  { %v1124_v39 = vadd.f32 %v1123_v38, %v1061_v52  ;;  %v992_v61 = vadd.f32 %v991_v37, %v1944_v27 }
 0x15b   :  { %v993_v42 = vadd.f32 %v1936_v14, %v992_v61  ;;  %v1125_v46 = vadd.f32 %v1124_v39, %v1062_v40  ;;  %v1067_v14 = vmul.f32 %v1960_v44, %v1960_v44 }
 0x15d   :  { %v1126_v48 = vadd.f32 %v1125_v46, %v1063_v49  ;;  %v994_v51 = vadd.f32 %v1940_v21, %v993_v42  ;;  %v1068_v21 = vmul.f32 %v1964_v55, %v1964_v55 }
 0x15f   :  { %v995_v43 = vadd.f32 %v994_v51, %v1962_v47  ;;  %v1127_v53 = vadd.f32 %v1126_v48, %v1064_v57  ;;  %v1069_v47 = vmul.f32 %v1986_v18, %v1986_v18 }
 0x161   :  { %v1128_v56 = vadd.f32 %v1127_v53, %v1065_v16  ;;  %v996_v27 = vadd.f32 %v995_v43, %v1968_v60 }
 0x163   :  { %v997_v50 = vadd.f32 %v1960_v44, %v996_v27  ;;  %v1129_v63 = vadd.f32 %v1128_v56, %v1066_v59  ;;  %v1071_v44 = vmul.f32 %v1984_v15, %v1984_v15 }
 0x165   :  { %v1130_v41 = vadd.f32 %v1129_v63, %v1067_v14  ;;  %v998_v1 = vadd.f32 %v1964_v55, %v997_v50  ;;  %v1072_v55 = vmul.f32 %v1988_v26, %v1988_v26 }
 0x167   :  { %v999_v2 = vadd.f32 %v998_v1, %v1986_v18  ;;  %v1131_v45 = vadd.f32 %v1130_v41, %v1068_v21  ;;  %v1073_v18 = vmul.f32 %v2010_v58, %v2010_v58 }
 0x169   :  { %v1132_v4 = vadd.f32 %v1131_v45, %v1069_v47  ;;  %v1000_v60 = vadd.f32 %v999_v2, %v1992_v32 }
 0x16b   :  { %v1001_v0 = vadd.f32 %v1984_v15, %v1000_v60  ;;  %v1133_v7 = vadd.f32 %v1132_v4, %v1070_v6  ;;  %v1075_v15 = vmul.f32 %v2008_v54, %v2008_v54 }
 0x16d   :  { %v1134_v10 = vadd.f32 %v1133_v7, %v1071_v44  ;;  %v1002_v11 = vadd.f32 %v1988_v26, %v1001_v0  ;;  %v1076_v26 = vmul.f32 %v2012_v3, %v2012_v3 }
 0x16f   :  { %v1003_v9 = vadd.f32 %v1002_v11, %v2010_v58  ;;  %v1135_v12 = vadd.f32 %v1134_v10, %v1072_v55 }
 0x171   :  { %v1136_v62 = vadd.f32 %v1135_v12, %v1073_v18  ;;  %v1004_v32 = vadd.f32 %v1003_v9, %v2016_v8 }
 0x173   :  { %v1005_v17 = vadd.f32 %v2008_v54, %v1004_v32  ;;  %v1137_v5 = vadd.f32 %v1136_v62, %v1074_v13 }
 0x175   :  { %v1006_v19 = vadd.f32 %v2012_v3, %v1005_v17  ;;  %v1138_v20 = vadd.f32 %v1137_v5, %v1075_v15 }
 0x177   :  { %v1007_v58 = vrot.slane %v1006_v19, 4  ;;  %v1139_v24 = vadd.f32 %v1138_v20, %v1076_v26 }
 0x179   :  { %v1008_v23 = vadd.f32 %v1007_v58, %v1006_v19  ;;  %v1140_v25 = vrot.slane %v1139_v24, 4 }
 0x17b   :  { %v1009_v28 = vrot.slane %v1008_v23, 2  ;;  %v1141_v33 = vadd.f32 %v1140_v25, %v1139_v24 }
 0x17d   :  { %v1010_v30 = vadd.f32 %v1009_v28, %v1008_v23  ;;  %v1142_v8 = vrot.slane %v1141_v33, 2 }
 0x17f   :  { %v1011_v22 = vrot.slane %v1010_v30, 1  ;;  %v1143_v31 = vadd.f32 %v1142_v8, %v1141_v33 }
 0x181   :  { %v1012_v34 = vadd.f32 %v1011_v22, %v1010_v30  ;;  %v1144_v29 = vrot.slane %v1143_v31, 1 }
 0x183   :  { %v1145_v54 = vadd.f32 %v1144_v29, %v1143_v31  ;;  %1146 = vst [vmem:[%s2137_s3] sm:$0xff] %v1012_v34 }
 0x185   :  { %1147 = vst [vmem:[%s2138_s4] sm:$0xff] %v1145_v54 }

// kernel: decoder_block_forward.9
= control target key start
LH: loop header
LB: loop body
LE: loop exit
PB: predicated region body
PF: predicated region fallthrough
CT: control target
= control target key end

     0   :  { %s1411_s12 = smov 0   ;;  %s1641_s0 = inlined_call_operand.vmem [shape: bf16[2048,128], index: 0, kind: input, shape index: {}]   ;;  %s1642_s1 = inlined_call_operand.vmem [shape: f32[1,128], index: 1, kind: input, shape index: {}]   ;;  %s1643_s2 = inlined_call_operand.vmem [shape: f32[1,128], index: 2, kind: input, shape index: {}]   ;;  %s1644_s3 = inlined_call_operand.vmem [shape: bf16[2048,128], index: 3, kind: output, shape index: {}]  }
   0x1 LB: > { %s884_s13 = sadd.s32 4294967295, %s1389_s12   ;;  %p888_p0 = scmp.ge.s32.totalorder %s1389_s12, 1  ;;  %s1389_s12 = sphi %s1411_s12, %s13_s12  }
   0x2   : > { %p138_p1 = scmp.lt.s32.totalorder %s1389_s12, 5 }
   0x4   : > { %p139_p2 = pnand %p888_p0, %p138_p1 }
   0x5   : > { %s889_s14 = sshll.u32 (!%p139_p2), %s884_s13, 6  ;;  %v1432_v0 = vld [vmem:[%s1642_s1] ss:$0 sm:$0xff] (!%p139_p2) }
   0x6   : > { %142 = sbr.rel (%p139_p2) target bundleno = 95 (0x5f), region = 32  ;;  %p163_p3 = scmp.lt.s32.totalorder (!%p139_p2), %s889_s14, 255  ;;  %v1441_v9 = vld [vmem:[%s1643_s2] ss:$0 sm:$0xff] (!%p139_p2) }
   0xd   : > { %s1646_s14 = smov (!%p163_p3, %s889_s14), 255 }
   0xe   : > { %s890_s15 = sshll.u32 %s1646_s14, 2 }
   0xf   : > { %s1427_s18 = scalar_lea.vmem %s1641_s0, %s890_s15  ;;  %s1466_s25 = scalar_lea.vmem %s1644_s3, %s890_s15 }
  0x10   : > { %v1026_v1 = vld [vmem:[%s1427_s18] sm:$0xff]   ;;  %v1313_v2 = vld [vmem:[%s1427_s18 + $0x8] sm:$0xff]   ;;  %v1314_v3 = vld [vmem:[%s1427_s18 + $0x10] sm:$0xff]  }
  0x11   : > { %v1027_v4 = vunpack.c.l.bf16 %v1026_v1  ;;  %v1028_v5 = vunpack.c.h.bf16 %v1026_v1  ;;  %v1031_v6 = vunpack.c.l.bf16 %v1313_v2  ;;  %v1032_v7 = vunpack.c.h.bf16 %v1313_v2  ;;  %v1315_v8 = vld [vmem:[%s1427_s18 + $0x18] sm:$0xff]   ;;  %v1316_v30 = vld [vmem:[%s1427_s18 + $0x20] sm:$0xff]   ;;  %v1317_v35 = vld [vmem:[%s1427_s18 + $0x28] sm:$0xff]  }
  0x12   : > { %v1035_v10 = vunpack.c.l.bf16 %v1314_v3  ;;  %v1036_v11 = vunpack.c.h.bf16 %v1314_v3  ;;  %v1039_v12 = vunpack.c.l.bf16 %v1315_v8  ;;  %v1040_v13 = vunpack.c.h.bf16 %v1315_v8  ;;  %v1318_v40 = vld [vmem:[%s1427_s18 + $0x30] sm:$0xff]   ;;  %v1319_v45 = vld [vmem:[%s1427_s18 + $0x38] sm:$0xff]   ;;  %v1320_v3 = vld [vmem:[%s1427_s18 + $0x40] sm:$0xff]  }
  0x13   : > { %v309_v14 = vmul.f32 %v1027_v4, %v1432_v0  ;;  %v310_v15 = vmul.f32 %v1028_v5, %v1432_v0  ;;  %v311_v16 = vmul.f32 %v1031_v6, %v1432_v0  ;;  %v312_v17 = vmul.f32 %v1032_v7, %v1432_v0 }
  0x14   : > { %v313_v18 = vmul.f32 %v1035_v10, %v1432_v0  ;;  %v314_v19 = vmul.f32 %v1036_v11, %v1432_v0  ;;  %v315_v20 = vmul.f32 %v1039_v12, %v1432_v0  ;;  %v316_v21 = vmul.f32 %v1040_v13, %v1432_v0  ;;  %v1321_v13 = vld [vmem:[%s1427_s18 + $0x48] sm:$0xff]  }
  0x15   : > { %v380_v22 = vadd.f32 %v1441_v9, %v309_v14  ;;  %v381_v23 = vadd.f32 %v1441_v9, %v310_v15  ;;  %v382_v24 = vadd.f32 %v1441_v9, %v311_v16  ;;  %v383_v25 = vadd.f32 %v1441_v9, %v312_v17 }
  0x16   : > { %v384_v26 = vadd.f32 %v1441_v9, %v313_v18  ;;  %v385_v27 = vadd.f32 %v1441_v9, %v314_v19  ;;  %v386_v28 = vadd.f32 %v1441_v9, %v315_v20  ;;  %v387_v29 = vadd.f32 %v1441_v9, %v316_v21  ;;  %v1322_v18 = vld [vmem:[%s1427_s18 + $0x50] sm:$0xff]  }
  0x17   : > { %v444_v31 = vmax.f32 %v380_v22, 0.0  ;;  %v445_v32 = vmax.f32 %v381_v23, 0.0  ;;  %v446_v33 = vmax.f32 %v382_v24, 0.0  ;;  %v447_v34 = vmax.f32 %v383_v25, 0.0  ;;  %v1323_v23 = vld [vmem:[%s1427_s18 + $0x58] sm:$0xff]  }
  0x18   : > { %v448_v36 = vmax.f32 %v384_v26, 0.0  ;;  %v449_v37 = vmax.f32 %v385_v27, 0.0  ;;  %v450_v38 = vmax.f32 %v386_v28, 0.0  ;;  %v451_v39 = vmax.f32 %v387_v29, 0.0 }
  0x19   : > { %v1156_v41 = vpack.c.bf16 %v445_v32, %v444_v31  ;;  %v1161_v42 = vpack.c.bf16 %v447_v34, %v446_v33  ;;  %v1043_v43 = vunpack.c.l.bf16 %v1316_v30  ;;  %v1044_v44 = vunpack.c.h.bf16 %v1316_v30 }
  0x1a   : > { %v1166_v46 = vpack.c.bf16 %v449_v37, %v448_v36  ;;  %v1171_v47 = vpack.c.bf16 %v451_v39, %v450_v38  ;;  %v1047_v48 = vunpack.c.l.bf16 %v1317_v35  ;;  %v1048_v49 = vunpack.c.h.bf16 %v1317_v35 }
  0x1b   : > { %1157 = vst [vmem:[%s1466_s25] sm:$0xff] %v1156_v41   ;;  %1344 = vst [vmem:[%s1466_s25 + $0x8] sm:$0xff] %v1161_v42   ;;  %v317_v50 = vmul.f32 %v1043_v43, %v1432_v0  ;;  %v318_v51 = vmul.f32 %v1044_v44, %v1432_v0  ;;  %v1051_v52 = vunpack.c.l.bf16 %v1318_v40  ;;  %v1052_v53 = vunpack.c.h.bf16 %v1318_v40  ;;  %v1324_v40 = vld [vmem:[%s1427_s18 + $0x60] sm:$0xff]  }
  0x1c   : > { %1345 = vst [vmem:[%s1466_s25 + $0x10] sm:$0xff] %v1166_v46   ;;  %1346 = vst [vmem:[%s1466_s25 + $0x18] sm:$0xff] %v1171_v47   ;;  %v319_v54 = vmul.f32 %v1047_v48, %v1432_v0  ;;  %v320_v55 = vmul.f32 %v1048_v49, %v1432_v0  ;;  %v1055_v56 = vunpack.c.l.bf16 %v1319_v45  ;;  %v1056_v57 = vunpack.c.h.bf16 %v1319_v45 }
  0x1d   : > { %v388_v58 = vadd.f32 %v1441_v9, %v317_v50  ;;  %v389_v59 = vadd.f32 %v1441_v9, %v318_v51  ;;  %v321_v60 = vmul.f32 %v1051_v52, %v1432_v0  ;;  %v322_v61 = vmul.f32 %v1052_v53, %v1432_v0  ;;  %v1325_v53 = vld [vmem:[%s1427_s18 + $0x68] sm:$0xff]  }
  0x1e   : > { %v390_v62 = vadd.f32 %v1441_v9, %v319_v54  ;;  %v391_v63 = vadd.f32 %v1441_v9, %v320_v55  ;;  %v323_v1 = vmul.f32 %v1055_v56, %v1432_v0  ;;  %v324_v2 = vmul.f32 %v1056_v57, %v1432_v0 }
  0x1f   : > { %v452_v4 = vmax.f32 %v388_v58, 0.0  ;;  %v453_v5 = vmax.f32 %v389_v59, 0.0  ;;  %v392_v6 = vadd.f32 %v1441_v9, %v321_v60  ;;  %v393_v7 = vadd.f32 %v1441_v9, %v322_v61  ;;  %v1326_v58 = vld [vmem:[%s1427_s18 + $0x70] sm:$0xff]  }
  0x20   : > { %v454_v8 = vmax.f32 %v390_v62, 0.0  ;;  %v455_v10 = vmax.f32 %v391_v63, 0.0  ;;  %v394_v11 = vadd.f32 %v1441_v9, %v323_v1  ;;  %v395_v12 = vadd.f32 %v1441_v9, %v324_v2  ;;  %v1327_v63 = vld [vmem:[%s1427_s18 + $0x78] sm:$0xff]  }
  0x21   : > { %v1176_v14 = vpack.c.bf16 %v453_v5, %v452_v4  ;;  %v456_v15 = vmax.f32 %v392_v6, 0.0  ;;  %v457_v16 = vmax.f32 %v393_v7, 0.0  ;;  %v1059_v17 = vunpack.c.l.bf16 %v1320_v3 }
  0x22   : > { %v1181_v19 = vpack.c.bf16 %v455_v10, %v454_v8  ;;  %v458_v20 = vmax.f32 %v394_v11, 0.0  ;;  %v459_v21 = vmax.f32 %v395_v12, 0.0  ;;  %v1060_v22 = vunpack.c.h.bf16 %v1320_v3 }
  0x23   : > { %1347 = vst [vmem:[%s1466_s25 + $0x20] sm:$0xff] %v1176_v14   ;;  %v1186_v24 = vpack.c.bf16 %v457_v16, %v456_v15  ;;  %v325_v25 = vmul.f32 %v1059_v17, %v1432_v0  ;;  %v1063_v26 = vunpack.c.l.bf16 %v1321_v13  ;;  %v1064_v27 = vunpack.c.h.bf16 %v1321_v13  ;;  %v1328_v14 = vld [vmem:[%s1427_s18 + $0x80] sm:$0xff]  }
  0x24   : > { %1348 = vst [vmem:[%s1466_s25 + $0x28] sm:$0xff] %v1181_v19   ;;  %v1191_v28 = vpack.c.bf16 %v459_v21, %v458_v20  ;;  %v326_v29 = vmul.f32 %v1060_v22, %v1432_v0  ;;  %v1067_v30 = vunpack.c.l.bf16 %v1322_v18  ;;  %v1068_v31 = vunpack.c.h.bf16 %v1322_v18 }
  0x25   : > { %1349 = vst [vmem:[%s1466_s25 + $0x30] sm:$0xff] %v1186_v24   ;;  %v396_v32 = vadd.f32 %v1441_v9, %v325_v25  ;;  %v327_v33 = vmul.f32 %v1063_v26, %v1432_v0  ;;  %v328_v34 = vmul.f32 %v1064_v27, %v1432_v0  ;;  %v1071_v35 = vunpack.c.l.bf16 %v1323_v23 }
  0x26   : > { %1350 = vst [vmem:[%s1466_s25 + $0x38] sm:$0xff] %v1191_v28   ;;  %v397_v36 = vadd.f32 %v1441_v9, %v326_v29  ;;  %v329_v37 = vmul.f32 %v1067_v30, %v1432_v0  ;;  %v330_v38 = vmul.f32 %v1068_v31, %v1432_v0  ;;  %v1072_v39 = vunpack.c.h.bf16 %v1323_v23  ;;  %v1329_v31 = vld [vmem:[%s1427_s18 + $0x88] sm:$0xff]  }
  0x27   : > { %v460_v41 = vmax.f32 %v396_v32, 0.0  ;;  %v398_v42 = vadd.f32 %v1441_v9, %v327_v33  ;;  %v399_v43 = vadd.f32 %v1441_v9, %v328_v34  ;;  %v331_v44 = vmul.f32 %v1071_v35, %v1432_v0 }
  0x28   : > { %v461_v45 = vmax.f32 %v397_v36, 0.0  ;;  %v400_v46 = vadd.f32 %v1441_v9, %v329_v37  ;;  %v401_v47 = vadd.f32 %v1441_v9, %v330_v38  ;;  %v332_v48 = vmul.f32 %v1072_v39, %v1432_v0  ;;  %v1330_v36 = vld [vmem:[%s1427_s18 + $0x90] sm:$0xff]  }
  0x29   : > { %v462_v49 = vmax.f32 %v398_v42, 0.0  ;;  %v463_v50 = vmax.f32 %v399_v43, 0.0  ;;  %v402_v51 = vadd.f32 %v1441_v9, %v331_v44  ;;  %v1075_v52 = vunpack.c.l.bf16 %v1324_v40 }
  0x2a   : > { %v1196_v54 = vpack.c.bf16 %v461_v45, %v460_v41  ;;  %v464_v55 = vmax.f32 %v400_v46, 0.0  ;;  %v465_v56 = vmax.f32 %v401_v47, 0.0  ;;  %v403_v57 = vadd.f32 %v1441_v9, %v332_v48  ;;  %v1331_v41 = vld [vmem:[%s1427_s18 + $0x98] sm:$0xff]  }
  0x2b   : > { %v1201_v59 = vpack.c.bf16 %v463_v50, %v462_v49  ;;  %v466_v60 = vmax.f32 %v402_v51, 0.0  ;;  %v1076_v61 = vunpack.c.h.bf16 %v1324_v40  ;;  %v333_v62 = vmul.f32 %v1075_v52, %v1432_v0 }
  0x2c   : > { %1351 = vst [vmem:[%s1466_s25 + $0x40] sm:$0xff] %v1196_v54   ;;  %v1206_v1 = vpack.c.bf16 %v465_v56, %v464_v55  ;;  %v467_v2 = vmax.f32 %v403_v57, 0.0  ;;  %v1079_v3 = vunpack.c.l.bf16 %v1325_v53  ;;  %v1080_v4 = vunpack.c.h.bf16 %v1325_v53  ;;  %v1332_v54 = vld [vmem:[%s1427_s18 + $0xa0] sm:$0xff]  }
  0x2d   : > { %1352 = vst [vmem:[%s1466_s25 + $0x48] sm:$0xff] %v1201_v59   ;;  %v334_v5 = vmul.f32 %v1076_v61, %v1432_v0  ;;  %v404_v6 = vadd.f32 %v1441_v9, %v333_v62  ;;  %v1083_v7 = vunpack.c.l.bf16 %v1326_v58  ;;  %v1084_v8 = vunpack.c.h.bf16 %v1326_v58 }
  0x2e   : > { %1353 = vst [vmem:[%s1466_s25 + $0x50] sm:$0xff] %v1206_v1   ;;  %v1211_v10 = vpack.c.bf16 %v467_v2, %v466_v60  ;;  %v335_v11 = vmul.f32 %v1079_v3, %v1432_v0  ;;  %v336_v12 = vmul.f32 %v1080_v4, %v1432_v0  ;;  %v1087_v13 = vunpack.c.l.bf16 %v1327_v63  ;;  %v1333_v4 = vld [vmem:[%s1427_s18 + $0xa8] sm:$0xff]  }
  0x2f   : > { %v405_v15 = vadd.f32 %v1441_v9, %v334_v5  ;;  %v468_v16 = vmax.f32 %v404_v6, 0.0  ;;  %v337_v17 = vmul.f32 %v1083_v7, %v1432_v0  ;;  %v338_v18 = vmul.f32 %v1084_v8, %v1432_v0 }
  0x30   : > { %1354 = vst [vmem:[%s1466_s25 + $0x58] sm:$0xff] %v1211_v10   ;;  %v406_v19 = vadd.f32 %v1441_v9, %v335_v11  ;;  %v407_v20 = vadd.f32 %v1441_v9, %v336_v12  ;;  %v1088_v21 = vunpack.c.h.bf16 %v1327_v63  ;;  %v339_v22 = vmul.f32 %v1087_v13, %v1432_v0 }
  0x31   : > { %v469_v23 = vmax.f32 %v405_v15, 0.0  ;;  %v408_v24 = vadd.f32 %v1441_v9, %v337_v17  ;;  %v409_v25 = vadd.f32 %v1441_v9, %v338_v18  ;;  %v1091_v26 = vunpack.c.l.bf16 %v1328_v14 }
  0x32   : > { %v470_v27 = vmax.f32 %v406_v19, 0.0  ;;  %v471_v28 = vmax.f32 %v407_v20, 0.0  ;;  %v340_v29 = vmul.f32 %v1088_v21, %v1432_v0  ;;  %v410_v30 = vadd.f32 %v1441_v9, %v339_v22  ;;  %v1335_v19 = vld [vmem:[%s1427_s18 + $0xb8] sm:$0xff]  }
  0x33   : > { %v1216_v32 = vpack.c.bf16 %v469_v23, %v468_v16  ;;  %v472_v33 = vmax.f32 %v408_v24, 0.0  ;;  %v473_v34 = vmax.f32 %v409_v25, 0.0  ;;  %v1092_v35 = vunpack.c.h.bf16 %v1328_v14  ;;  %v1334_v14 = vld [vmem:[%s1427_s18 + $0xb0] sm:$0xff]  }
  0x34   : > { %v1221_v37 = vpack.c.bf16 %v471_v28, %v470_v27  ;;  %v411_v38 = vadd.f32 %v1441_v9, %v340_v29  ;;  %v474_v39 = vmax.f32 %v410_v30, 0.0  ;;  %v341_v40 = vmul.f32 %v1091_v26, %v1432_v0 }
  0x35   : > { %1355 = vst [vmem:[%s1466_s25 + $0x60] sm:$0xff] %v1216_v32   ;;  %v1226_v42 = vpack.c.bf16 %v473_v34, %v472_v33  ;;  %v342_v43 = vmul.f32 %v1092_v35, %v1432_v0  ;;  %v1095_v44 = vunpack.c.l.bf16 %v1329_v31  ;;  %v1096_v45 = vunpack.c.h.bf16 %v1329_v31  ;;  %v1336_v32 = vld [vmem:[%s1427_s18 + $0xc0] sm:$0xff]  }
  0x36   : > { %1356 = vst [vmem:[%s1466_s25 + $0x68] sm:$0xff] %v1221_v37   ;;  %v475_v46 = vmax.f32 %v411_v38, 0.0  ;;  %v412_v47 = vadd.f32 %v1441_v9, %v341_v40  ;;  %v1099_v48 = vunpack.c.l.bf16 %v1330_v36  ;;  %v1100_v49 = vunpack.c.h.bf16 %v1330_v36 }
  0x37   : > { %1357 = vst [vmem:[%s1466_s25 + $0x70] sm:$0xff] %v1226_v42   ;;  %v413_v50 = vadd.f32 %v1441_v9, %v342_v43  ;;  %v343_v51 = vmul.f32 %v1095_v44, %v1432_v0  ;;  %v344_v52 = vmul.f32 %v1096_v45, %v1432_v0  ;;  %v1103_v53 = vunpack.c.l.bf16 %v1331_v41  ;;  %v1337_v45 = vld [vmem:[%s1427_s18 + $0xc8] sm:$0xff]  }
  0x38   : > { %v1231_v55 = vpack.c.bf16 %v475_v46, %v474_v39  ;;  %v476_v56 = vmax.f32 %v412_v47, 0.0  ;;  %v345_v57 = vmul.f32 %v1099_v48, %v1432_v0  ;;  %v346_v58 = vmul.f32 %v1100_v49, %v1432_v0 }
  0x39   : > { %v477_v59 = vmax.f32 %v413_v50, 0.0  ;;  %v414_v60 = vadd.f32 %v1441_v9, %v343_v51  ;;  %v415_v61 = vadd.f32 %v1441_v9, %v344_v52  ;;  %v1104_v62 = vunpack.c.h.bf16 %v1331_v41 }
  0x3a   : > { %1358 = vst [vmem:[%s1466_s25 + $0x78] sm:$0xff] %v1231_v55   ;;  %v416_v63 = vadd.f32 %v1441_v9, %v345_v57  ;;  %v417_v1 = vadd.f32 %v1441_v9, %v346_v58  ;;  %v347_v2 = vmul.f32 %v1103_v53, %v1432_v0  ;;  %v1107_v3 = vunpack.c.l.bf16 %v1332_v54 }
  0x3b   : > { %v1236_v5 = vpack.c.bf16 %v477_v59, %v476_v56  ;;  %v478_v6 = vmax.f32 %v414_v60, 0.0  ;;  %v479_v7 = vmax.f32 %v415_v61, 0.0  ;;  %v348_v8 = vmul.f32 %v1104_v62, %v1432_v0 }
  0x3c   : > { %v480_v10 = vmax.f32 %v416_v63, 0.0  ;;  %v481_v11 = vmax.f32 %v417_v1, 0.0  ;;  %v418_v12 = vadd.f32 %v1441_v9, %v347_v2  ;;  %v1108_v13 = vunpack.c.h.bf16 %v1332_v54  ;;  %v1338_v54 = vld [vmem:[%s1427_s18 + $0xd0] sm:$0xff]   ;;  %v1339_v63 = vld [vmem:[%s1427_s18 + $0xd8] sm:$0xff]  }
  0x3d   : > { %1359 = vst [vmem:[%s1466_s25 + $0x80] sm:$0xff] %v1236_v5   ;;  %v1241_v15 = vpack.c.bf16 %v479_v7, %v478_v6  ;;  %v419_v16 = vadd.f32 %v1441_v9, %v348_v8  ;;  %v349_v17 = vmul.f32 %v1107_v3, %v1432_v0  ;;  %v1111_v18 = vunpack.c.l.bf16 %v1333_v4 }
  0x3e   : > { %v1246_v20 = vpack.c.bf16 %v481_v11, %v480_v10  ;;  %v482_v21 = vmax.f32 %v418_v12, 0.0  ;;  %v350_v22 = vmul.f32 %v1108_v13, %v1432_v0  ;;  %v1112_v23 = vunpack.c.h.bf16 %v1333_v4  ;;  %v1340_v10 = vld [vmem:[%s1427_s18 + $0xe0] sm:$0xff]  }
  0x3f   : > { %1360 = vst [vmem:[%s1466_s25 + $0x88] sm:$0xff] %v1241_v15   ;;  %v483_v24 = vmax.f32 %v419_v16, 0.0  ;;  %v420_v25 = vadd.f32 %v1441_v9, %v349_v17  ;;  %v351_v26 = vmul.f32 %v1111_v18, %v1432_v0  ;;  %v1115_v27 = vunpack.c.l.bf16 %v1334_v14 }
  0x40   : > { %1361 = vst [vmem:[%s1466_s25 + $0x90] sm:$0xff] %v1246_v20   ;;  %v421_v28 = vadd.f32 %v1441_v9, %v350_v22  ;;  %v352_v29 = vmul.f32 %v1112_v23, %v1432_v0  ;;  %v1116_v30 = vunpack.c.h.bf16 %v1334_v14  ;;  %v1119_v31 = vunpack.c.l.bf16 %v1335_v19  ;;  %v1341_v23 = vld [vmem:[%s1427_s18 + $0xe8] sm:$0xff]  }
  0x41   : > { %v1251_v33 = vpack.c.bf16 %v483_v24, %v482_v21  ;;  %v484_v34 = vmax.f32 %v420_v25, 0.0  ;;  %v422_v35 = vadd.f32 %v1441_v9, %v351_v26  ;;  %v353_v36 = vmul.f32 %v1115_v27, %v1432_v0 }
  0x42   : > { %v485_v37 = vmax.f32 %v421_v28, 0.0  ;;  %v423_v38 = vadd.f32 %v1441_v9, %v352_v29  ;;  %v354_v39 = vmul.f32 %v1116_v30, %v1432_v0  ;;  %v1120_v40 = vunpack.c.h.bf16 %v1335_v19 }
  0x43   : > { %1362 = vst [vmem:[%s1466_s25 + $0x98] sm:$0xff] %v1251_v33   ;;  %v486_v41 = vmax.f32 %v422_v35, 0.0  ;;  %v424_v42 = vadd.f32 %v1441_v9, %v353_v36  ;;  %v355_v43 = vmul.f32 %v1119_v31, %v1432_v0  ;;  %v1123_v44 = vunpack.c.l.bf16 %v1336_v32 }
  0x44   : > { %v1256_v46 = vpack.c.bf16 %v485_v37, %v484_v34  ;;  %v487_v47 = vmax.f32 %v423_v38, 0.0  ;;  %v425_v48 = vadd.f32 %v1441_v9, %v354_v39  ;;  %v356_v49 = vmul.f32 %v1120_v40, %v1432_v0 }
  0x45   : > { %v488_v50 = vmax.f32 %v424_v42, 0.0  ;;  %v426_v51 = vadd.f32 %v1441_v9, %v355_v43  ;;  %v1124_v52 = vunpack.c.h.bf16 %v1336_v32  ;;  %v357_v53 = vmul.f32 %v1123_v44, %v1432_v0  ;;  %v1342_v32 = vld [vmem:[%s1427_s18 + $0xf0] sm:$0xff]  }
  0x46   : > { %1363 = vst [vmem:[%s1466_s25 + $0xa0] sm:$0xff] %v1256_v46   ;;  %v1261_v55 = vpack.c.bf16 %v487_v47, %v486_v41  ;;  %v489_v56 = vmax.f32 %v425_v48, 0.0  ;;  %v427_v57 = vadd.f32 %v1441_v9, %v356_v49  ;;  %v1127_v58 = vunpack.c.l.bf16 %v1337_v45  ;;  %v1343_v41 = vld [vmem:[%s1427_s18 + $0xf8] sm:$0xff]  }
  0x47   : > { %v490_v59 = vmax.f32 %v426_v51, 0.0  ;;  %v358_v60 = vmul.f32 %v1124_v52, %v1432_v0  ;;  %v428_v61 = vadd.f32 %v1441_v9, %v357_v53  ;;  %v1128_v62 = vunpack.c.h.bf16 %v1337_v45 }
  0x48   : > { %1364 = vst [vmem:[%s1466_s25 + $0xa8] sm:$0xff] %v1261_v55   ;;  %v1266_v1 = vpack.c.bf16 %v489_v56, %v488_v50  ;;  %v491_v2 = vmax.f32 %v427_v57, 0.0  ;;  %v359_v3 = vmul.f32 %v1127_v58, %v1432_v0  ;;  %v1131_v4 = vunpack.c.l.bf16 %v1338_v54 }
  0x49   : > { %v429_v5 = vadd.f32 %v1441_v9, %v358_v60  ;;  %v492_v6 = vmax.f32 %v428_v61, 0.0  ;;  %v360_v7 = vmul.f32 %v1128_v62, %v1432_v0  ;;  %v1132_v8 = vunpack.c.h.bf16 %v1338_v54 }
  0x4a   : > { %1365 = vst [vmem:[%s1466_s25 + $0xb0] sm:$0xff] %v1266_v1   ;;  %v1271_v11 = vpack.c.bf16 %v491_v2, %v490_v59  ;;  %v430_v12 = vadd.f32 %v1441_v9, %v359_v3  ;;  %v361_v13 = vmul.f32 %v1131_v4, %v1432_v0  ;;  %v1135_v14 = vunpack.c.l.bf16 %v1339_v63 }
  0x4b   : > { %v493_v15 = vmax.f32 %v429_v5, 0.0  ;;  %v431_v16 = vadd.f32 %v1441_v9, %v360_v7  ;;  %v362_v17 = vmul.f32 %v1132_v8, %v1432_v0  ;;  %v1136_v18 = vunpack.c.h.bf16 %v1339_v63 }
  0x4c   : > { %1366 = vst [vmem:[%s1466_s25 + $0xb8] sm:$0xff] %v1271_v11   ;;  %v494_v19 = vmax.f32 %v430_v12, 0.0  ;;  %v432_v20 = vadd.f32 %v1441_v9, %v361_v13  ;;  %v363_v21 = vmul.f32 %v1135_v14, %v1432_v0  ;;  %v1139_v22 = vunpack.c.l.bf16 %v1340_v10 }
  0x4d   : > { %v1276_v24 = vpack.c.bf16 %v493_v15, %v492_v6  ;;  %v495_v25 = vmax.f32 %v431_v16, 0.0  ;;  %v433_v26 = vadd.f32 %v1441_v9, %v362_v17  ;;  %v364_v27 = vmul.f32 %v1136_v18, %v1432_v0 }
  0x4e   : > { %v496_v28 = vmax.f32 %v432_v20, 0.0  ;;  %v434_v29 = vadd.f32 %v1441_v9, %v363_v21  ;;  %v1140_v30 = vunpack.c.h.bf16 %v1340_v10  ;;  %v365_v31 = vmul.f32 %v1139_v22, %v1432_v0 }
  0x4f   : > { %1367 = vst [vmem:[%s1466_s25 + $0xc0] sm:$0xff] %v1276_v24   ;;  %v1281_v33 = vpack.c.bf16 %v495_v25, %v494_v19  ;;  %v497_v34 = vmax.f32 %v433_v26, 0.0  ;;  %v435_v35 = vadd.f32 %v1441_v9, %v364_v27  ;;  %v1143_v36 = vunpack.c.l.bf16 %v1341_v23 }
  0x50   : > { %v498_v37 = vmax.f32 %v434_v29, 0.0  ;;  %v366_v38 = vmul.f32 %v1140_v30, %v1432_v0  ;;  %v436_v39 = vadd.f32 %v1441_v9, %v365_v31  ;;  %v1144_v40 = vunpack.c.h.bf16 %v1341_v23 }
  0x51   : > { %1368 = vst [vmem:[%s1466_s25 + $0xc8] sm:$0xff] %v1281_v33   ;;  %v1286_v42 = vpack.c.bf16 %v497_v34, %v496_v28  ;;  %v499_v43 = vmax.f32 %v435_v35, 0.0  ;;  %v367_v44 = vmul.f32 %v1143_v36, %v1432_v0  ;;  %v1147_v45 = vunpack.c.l.bf16 %v1342_v32 }
  0x52   : > { %v437_v46 = vadd.f32 %v1441_v9, %v366_v38  ;;  %v500_v47 = vmax.f32 %v436_v39, 0.0  ;;  %v368_v48 = vmul.f32 %v1144_v40, %v1432_v0  ;;  %v1148_v49 = vunpack.c.h.bf16 %v1342_v32 }
  0x53   : > { %1369 = vst [vmem:[%s1466_s25 + $0xd0] sm:$0xff] %v1286_v42   ;;  %v1291_v50 = vpack.c.bf16 %v499_v43, %v498_v37  ;;  %v438_v51 = vadd.f32 %v1441_v9, %v367_v44  ;;  %v369_v52 = vmul.f32 %v1147_v45, %v1432_v0  ;;  %v1151_v53 = vunpack.c.l.bf16 %v1343_v41 }
  0x54   : > { %v501_v54 = vmax.f32 %v437_v46, 0.0  ;;  %v439_v55 = vadd.f32 %v1441_v9, %v368_v48  ;;  %v370_v56 = vmul.f32 %v1148_v49, %v1432_v0  ;;  %v1152_v57 = vunpack.c.h.bf16 %v1343_v41 }
  0x55   : > { %1370 = vst [vmem:[%s1466_s25 + $0xd8] sm:$0xff] %v1291_v50   ;;  %v502_v58 = vmax.f32 %v438_v51, 0.0  ;;  %v440_v59 = vadd.f32 %v1441_v9, %v369_v52  ;;  %v371_v60 = vmul.f32 %v1151_v53, %v1432_v0 }
  0x56   : > { %v1296_v61 = vpack.c.bf16 %v501_v54, %v500_v47  ;;  %v503_v62 = vmax.f32 %v439_v55, 0.0  ;;  %v441_v63 = vadd.f32 %v1441_v9, %v370_v56  ;;  %v372_v1 = vmul.f32 %v1152_v57, %v1432_v0 }
  0x57   : > { %v504_v2 = vmax.f32 %v440_v59, 0.0  ;;  %v442_v3 = vadd.f32 %v1441_v9, %v371_v60 }
  0x58   : > { %1371 = vst [vmem:[%s1466_s25 + $0xe0] sm:$0xff] %v1296_v61   ;;  %v1301_v4 = vpack.c.bf16 %v503_v62, %v502_v58  ;;  %v505_v5 = vmax.f32 %v441_v63, 0.0  ;;  %v443_v6 = vadd.f32 %v1441_v9, %v372_v1 }
  0x59   : > { %v506_v7 = vmax.f32 %v442_v3, 0.0 }
  0x5a   : > { %1372 = vst [vmem:[%s1466_s25 + $0xe8] sm:$0xff] %v1301_v4   ;;  %v1306_v8 = vpack.c.bf16 %v505_v5, %v504_v2  ;;  %v507_v10 = vmax.f32 %v443_v6, 0.0 }
  0x5c   : > { %1373 = vst [vmem:[%s1466_s25 + $0xf0] sm:$0xff] %v1306_v8   ;;  %v1311_v11 = vpack.c.bf16 %v507_v10, %v506_v7 }
  0x5e   : > { %1374 = vst [vmem:[%s1466_s25 + $0xf8] sm:$0xff] %v1311_v11  }
  0x5f PF: > { %s13_s12 = sadd.s32 1, %s1389_s12  }
  0x60   : > { %p10_p4 = scmp.ge.s32.totalorder %s13_s12, 6  }
  0x62   :  { %12 = sbr.rel (!%p10_p4) target bundleno = 1 (0x1), region = 62 }

// kernel: decoder_block_forward.10
= control target key start
LH: loop header
LB: loop body
LE: loop exit
PB: predicated region body
PF: predicated region fallthrough
CT: control target
= control target key end

     0   :  { %s2063_s15 = smov 0   ;;  %s2382_s0 = inlined_call_operand.vmem [shape: bf16[2048,128], index: 0, kind: input, shape index: {}]   ;;  %s2383_s1 = inlined_call_operand.vmem [shape: bf16[128,128], index: 1, kind: input, shape index: {}]   ;;  %s2384_s2 = inlined_call_operand.vmem [shape: bf16[2048,128], index: 2, kind: output, shape index: {0}]   ;;  %s2385_s3 = inlined_call_operand.vmem [shape: f32[32,128], index: 3, kind: output, shape index: {1}]   ;;  %s2386_s4 = inlined_call_operand.vmem [shape: f32[32,128], index: 4, kind: output, shape index: {2}]  }
   0x1 LB: > { %s2069_s16 = sadd.s32 4294967295, %s2036_s15   ;;  %p1478_p0 = scmp.ge.s32.totalorder %s2036_s15, 1  ;;  %s2036_s15 = sphi %s2063_s15, %s15_s15  }
   0x2   : > { %p168_p1 = scmp.lt.s32.totalorder %s2036_s15, 5 }
   0x4   : > { %p169_p2 = pnand %p1478_p0, %p168_p1 }
   0x5   : > { %v1990_v0 = vld [vmem:[%s2383_s1] sm:$0xff] (!%p169_p2)   ;;  %s1479_s19 = sshll.u32 (!%p169_p2), %s2069_s16, 6  ;;  %v1991_v1 = vld [vmem:[%s2383_s1 + $0x8] sm:$0xff] (!%p169_p2)   ;;  %v1992_v2 = vld [vmem:[%s2383_s1 + $0x10] sm:$0xff] (!%p169_p2)   ;;  %p214_p4 = scmp.lt.s32.totalorder (!%p169_p2), %s2069_s16, 3 }
   0x6   : > { %172 = sbr.rel (%p169_p2) target bundleno = 394 (0x18a), region = 28  ;;  %p203_p3 = scmp.lt.s32.totalorder (!%p169_p2), %s1479_s19, 255  ;;  %1886 = vmatprep.subr.bf16.mxu0 (!%p169_p2), %v1990_v0  ;;  %1966 = vmatprep.subr.bf16.mxu1 (!%p169_p2), %v1990_v0  ;;  %v1993_v3 = vld [vmem:[%s2383_s1 + $0x18] sm:$0xff] (!%p169_p2)   ;;  %v1994_v5 = vld [vmem:[%s2383_s1 + $0x20] sm:$0xff] (!%p169_p2)   ;;  %v1995_v6 = vld [vmem:[%s2383_s1 + $0x28] sm:$0xff] (!%p169_p2)  }
   0x7   : > { %1887 = vmatpush3.bf16.msra.mxu0 (!%p169_p2), %v1990_v0  ;;  %1974 = vmatpush3.bf16.msra.mxu1 (!%p169_p2), %v1990_v0  ;;  %v1996_v7 = vld [vmem:[%s2383_s1 + $0x30] sm:$0xff] (!%p169_p2)   ;;  %v1997_v8 = vld [vmem:[%s2383_s1 + $0x38] sm:$0xff] (!%p169_p2)  }
   0x8   : > { %1888 = vmatprep.subr.bf16.mxu0 (!%p169_p2), %v1991_v1  ;;  %1967 = vmatprep.subr.bf16.mxu1 (!%p169_p2), %v1991_v1 }
   0xb   : > { %1889 = vmatpush3.bf16.msra.mxu0 (!%p169_p2), %v1991_v1  ;;  %1975 = vmatpush3.bf16.msra.mxu1 (!%p169_p2), %v1991_v1 }
   0xc   : > { %1890 = vmatprep.subr.bf16.mxu0 (!%p169_p2), %v1992_v2  ;;  %1968 = vmatprep.subr.bf16.mxu1 (!%p169_p2), %v1992_v2 }
   0xd   : > { %s2388_s19 = smov (!%p203_p3, %s1479_s19), 255  ;;  %s2390_s16 = smov (!%p214_p4, %s2069_s16), 3 }
   0xe   : > { %s1480_s24 = sshll.u32 %s2388_s19, 2  ;;  %s1483_s17 = sshll.u32 %s2390_s16, 3 }
   0xf   : > { %s2091_s27 = scalar_lea.vmem %s2382_s0, %s1480_s24  ;;  %1891 = vmatpush3.bf16.msra.mxu0 %v1992_v2  ;;  %1976 = vmatpush3.bf16.msra.mxu1 %v1992_v2  ;;  %s2149_s14 = scalar_lea.vmem %s2384_s2, %s1480_s24 }
  0x10   : > { %v1998_v4 = vld [vmem:[%s2091_s27] sm:$0xff]   ;;  %1892 = vmatprep.subr.bf16.mxu0 %v1993_v3  ;;  %1969 = vmatprep.subr.bf16.mxu1 %v1993_v3  ;;  %v1999_v10 = vld [vmem:[%s2091_s27 + $0x8] sm:$0xff]   ;;  %v2000_v11 = vld [vmem:[%s2091_s27 + $0x10] sm:$0xff]   ;;  %s217_s20 = scalar_lea.vmem %s2385_s3, %s1483_s17  ;;  %s221_s23 = scalar_lea.vmem %s2386_s4, %s1483_s17 }
  0x11   : > { %1902 = vmatprep.mubr.bf16.mxu0 %v1998_v4  ;;  %v2014_v9 = vld [vmem:[%s2091_s27 + $0x80] sm:$0xff]   ;;  %v2015_v12 = vld [vmem:[%s2091_s27 + $0x88] sm:$0xff]   ;;  %v2016_v13 = vld [vmem:[%s2091_s27 + $0x90] sm:$0xff]  }
  0x12   : > { %1934 = vmatprep.mubr.bf16.mxu1 %v2014_v9  ;;  %v2001_v14 = vld [vmem:[%s2091_s27 + $0x18] sm:$0xff]   ;;  %v2002_v15 = vld [vmem:[%s2091_s27 + $0x20] sm:$0xff]   ;;  %v2003_v18 = vld [vmem:[%s2091_s27 + $0x28] sm:$0xff]  }
  0x13   : > { %1893 = vmatpush3.bf16.msra.mxu0 %v1993_v3  ;;  %1977 = vmatpush3.bf16.msra.mxu1 %v1993_v3  ;;  %v2017_v16 = vld [vmem:[%s2091_s27 + $0x98] sm:$0xff]   ;;  %v2018_v17 = vld [vmem:[%s2091_s27 + $0xa0] sm:$0xff]   ;;  %v2019_v19 = vld [vmem:[%s2091_s27 + $0xa8] sm:$0xff]  }
  0x14   : > { %1894 = vmatprep.subr.bf16.mxu0 %v1994_v5  ;;  %1970 = vmatprep.subr.bf16.mxu1 %v1994_v5  ;;  %v2004_v20 = vld [vmem:[%s2091_s27 + $0x30] sm:$0xff]   ;;  %v2005_v22 = vld [vmem:[%s2091_s27 + $0x38] sm:$0xff]   ;;  %v2006_v24 = vld [vmem:[%s2091_s27 + $0x40] sm:$0xff]  }
  0x15   : > { %v2020_v21 = vld [vmem:[%s2091_s27 + $0xb0] sm:$0xff]   ;;  %v2021_v23 = vld [vmem:[%s2091_s27 + $0xb8] sm:$0xff]   ;;  %v2022_v25 = vld [vmem:[%s2091_s27 + $0xc0] sm:$0xff]  }
  0x16   : > { %v2007_v26 = vld [vmem:[%s2091_s27 + $0x48] sm:$0xff]   ;;  %v2008_v28 = vld [vmem:[%s2091_s27 + $0x50] sm:$0xff]   ;;  %v2009_v30 = vld [vmem:[%s2091_s27 + $0x58] sm:$0xff]  }
  0x17   : > { %1895 = vmatpush3.bf16.msra.mxu0 %v1994_v5  ;;  %1978 = vmatpush3.bf16.msra.mxu1 %v1994_v5  ;;  %v2023_v27 = vld [vmem:[%s2091_s27 + $0xc8] sm:$0xff]   ;;  %v2024_v29 = vld [vmem:[%s2091_s27 + $0xd0] sm:$0xff]   ;;  %v2025_v31 = vld [vmem:[%s2091_s27 + $0xd8] sm:$0xff]  }
  0x18   : > { %1896 = vmatprep.subr.bf16.mxu0 %v1995_v6  ;;  %1971 = vmatprep.subr.bf16.mxu1 %v1995_v6  ;;  %v2010_v32 = vld [vmem:[%s2091_s27 + $0x60] sm:$0xff]   ;;  %v2011_v34 = vld [vmem:[%s2091_s27 + $0x68] sm:$0xff]   ;;  %v2012_v36 = vld [vmem:[%s2091_s27 + $0x70] sm:$0xff]  }
  0x19   : > { %v2026_v33 = vld [vmem:[%s2091_s27 + $0xe0] sm:$0xff]   ;;  %v2027_v35 = vld [vmem:[%s2091_s27 + $0xe8] sm:$0xff]   ;;  %v2028_v37 = vld [vmem:[%s2091_s27 + $0xf0] sm:$0xff]  }
  0x1a   : > { %v2013_v38 = vld [vmem:[%s2091_s27 + $0x78] sm:$0xff]  }
  0x1b   : > { %1897 = vmatpush3.bf16.msra.mxu0 %v1995_v6  ;;  %1979 = vmatpush3.bf16.msra.mxu1 %v1995_v6  ;;  %v2029_v39 = vld [vmem:[%s2091_s27 + $0xf8] sm:$0xff]  }
  0x1c   : > { %1898 = vmatprep.subr.bf16.mxu0 %v1996_v7  ;;  %1972 = vmatprep.subr.bf16.mxu1 %v1996_v7 }
  0x1f   : > { %1899 = vmatpush3.bf16.msra.mxu0 %v1996_v7  ;;  %1980 = vmatpush3.bf16.msra.mxu1 %v1996_v7 }
  0x20   : > { %1900 = vmatprep.subr.bf16.mxu0 %v1997_v8  ;;  %1973 = vmatprep.subr.bf16.mxu1 %v1997_v8 }
  0x23   : > { %1901 = vmatpush3.bf16.msra.mxu0 %v1997_v8  ;;  %1981 = vmatpush3.bf16.msra.mxu1 %v1997_v8 }
  0x26   : > { %1903 = vmatmul.mubr.bf16.vlgmr.msra.gmra.mrb[0].mxu0 %v1999_v10  ;;  %1935 = vmatmul.mubr.bf16.vlgmr.msra.gmra.mrb[0].mxu1 %v2015_v12 }
  0x27   : > { %1906 = vmatprep.mubr.bf16.mxu0 %v2000_v11  ;;  %1938 = vmatprep.mubr.bf16.mxu1 %v2016_v13 }
  0x2e   : > { %1907 = vmatmul.mubr.bf16.gmra.mrb[4].mxu0 %v2001_v14  ;;  %1939 = vmatmul.mubr.bf16.gmra.mrb[4].mxu1 %v2017_v16 }
  0x2f   : > { %1910 = vmatprep.mubr.bf16.mxu0 %v2002_v15  ;;  %1942 = vmatprep.mubr.bf16.mxu1 %v2018_v17 }
  0x36   : > { %1911 = vmatmul.mubr.bf16.gmra.mrb[8].mxu0 %v2003_v18  ;;  %1943 = vmatmul.mubr.bf16.gmra.mrb[8].mxu1 %v2019_v19 }
  0x37   : > { %1914 = vmatprep.mubr.bf16.mxu0 %v2004_v20  ;;  %1946 = vmatprep.mubr.bf16.mxu1 %v2020_v21 }
  0x3e   : > { %1915 = vmatmul.mubr.bf16.gmra.mrb[12].mxu0 %v2005_v22  ;;  %1947 = vmatmul.mubr.bf16.gmra.mrb[12].mxu1 %v2021_v23 }
  0x3f   : > { %1918 = vmatprep.mubr.bf16.mxu0 %v2006_v24  ;;  %1950 = vmatprep.mubr.bf16.mxu1 %v2022_v25 }
  0x46   : > { %1919 = vmatmul.mubr.bf16.gmra.mrb[16].mxu0 %v2007_v26  ;;  %1951 = vmatmul.mubr.bf16.gmra.mrb[16].mxu1 %v2023_v27 }
  0x47   : > { %1922 = vmatprep.mubr.bf16.mxu0 %v2008_v28  ;;  %1954 = vmatprep.mubr.bf16.mxu1 %v2024_v29 }
  0x4e   : > { %1923 = vmatmul.mubr.bf16.gmra.mrb[20].mxu0 %v2009_v30  ;;  %1955 = vmatmul.mubr.bf16.gmra.mrb[20].mxu1 %v2025_v31 }
  0x4f   : > { %1926 = vmatprep.mubr.bf16.mxu0 %v2010_v32  ;;  %1958 = vmatprep.mubr.bf16.mxu1 %v2026_v33 }
  0x56   : > { %1927 = vmatmul.mubr.bf16.gmra.mrb[24].mxu0 %v2011_v34  ;;  %1959 = vmatmul.mubr.bf16.gmra.mrb[24].mxu1 %v2027_v35 }
  0x57   : > { %1930 = vmatprep.mubr.bf16.mxu0 %v2012_v36  ;;  %1962 = vmatprep.mubr.bf16.mxu1 %v2028_v37 }
  0x5e   : > { %1931 = vmatmul.mubr.bf16.gmra.mrb[28].mxu0 %v2013_v38  ;;  %1963 = vmatmul.mubr.bf16.gmra.mrb[28].mxu1 %v2029_v39 }
  0xf9   : > { %v1904_v40 = vpop.f32.mrb[0].mxu0  ;;  %v2140_v41 = vpop.f32.mrb[0].mxu1 }
  0xfa   : > { %v577_v42 = vpop.f32.mrb[1].mxu0  ;;  %v2142_v43 = vpop.f32.mrb[1].mxu1  ;;  %v1223_v55 = vmul.f32 %v1904_v40, %v1904_v40 }
  0xfb   : > { %v1905_v44 = vpop.f32.mrb[2].mxu0  ;;  %v2151_v45 = vpop.f32.mrb[2].mxu1  ;;  %v1221_v46 = vmul.f32 %v577_v42, %v577_v42 }
  0xfc   : > { %v1663_v47 = vpack.c.bf16 %v1905_v44, %v1904_v40  ;;  %v580_v48 = vpop.f32.mrb[3].mxu0  ;;  %v1743_v49 = vpack.c.bf16 %v2151_v45, %v2140_v41  ;;  %v2155_v50 = vpop.f32.mrb[3].mxu1  ;;  %v1224_v58 = vmul.f32 %v1905_v44, %v1905_v44 }
  0xfd   : > { %v1658_v51 = vpack.c.bf16 %v580_v48, %v577_v42  ;;  %v1152_v52 = vadd.f32 %v580_v48, %v577_v42  ;;  %v1222_v53 = vmul.f32 %v580_v48, %v580_v48  ;;  %v1738_v54 = vpack.c.bf16 %v2155_v50, %v2142_v43 }
  0xfe   : > { %1815 = vst [vmem:[%s2149_s14 + $0x8] sm:$0xff] %v1663_v47   ;;  %1831 = vst [vmem:[%s2149_s14 + $0x88] sm:$0xff] %v1743_v49  }
  0xff   : > { %1659 = vst [vmem:[%s2149_s14] sm:$0xff] %v1658_v51   ;;  %v1153_v56 = vadd.f32 %v1904_v40, %v1152_v52  ;;  %v1285_v57 = vadd.f32 %v1222_v53, %v1221_v46  ;;  %1830 = vst [vmem:[%s2149_s14 + $0x80] sm:$0xff] %v1738_v54  }
 0x101   : > { %v1286_v59 = vadd.f32 %v1285_v57, %v1223_v55  ;;  %v1908_v60 = vpop.f32.mrb[4].mxu0  ;;  %v1154_v61 = vadd.f32 %v1905_v44, %v1153_v56  ;;  %v2163_v62 = vpop.f32.mrb[4].mxu1 }
 0x102   : > { %v593_v63 = vpop.f32.mrb[5].mxu0  ;;  %v2165_v0 = vpop.f32.mrb[5].mxu1  ;;  %v1227_v15 = vmul.f32 %v1908_v60, %v1908_v60 }
 0x103   : > { %v1155_v1 = vadd.f32 %v1154_v61, %v593_v63  ;;  %v1225_v2 = vmul.f32 %v593_v63, %v593_v63  ;;  %v1287_v3 = vadd.f32 %v1286_v59, %v1224_v58  ;;  %v1909_v4 = vpop.f32.mrb[6].mxu0  ;;  %v2167_v5 = vpop.f32.mrb[6].mxu1 }
 0x104   : > { %v1673_v6 = vpack.c.bf16 %v1909_v4, %v1908_v60  ;;  %v596_v7 = vpop.f32.mrb[7].mxu0  ;;  %v1753_v8 = vpack.c.bf16 %v2167_v5, %v2163_v62  ;;  %v2171_v9 = vpop.f32.mrb[7].mxu1  ;;  %v1228_v18 = vmul.f32 %v1909_v4, %v1909_v4 }
 0x105   : > { %v1288_v10 = vadd.f32 %v1287_v3, %v1225_v2  ;;  %v1668_v11 = vpack.c.bf16 %v596_v7, %v593_v63  ;;  %v1156_v12 = vadd.f32 %v1155_v1, %v596_v7  ;;  %v1226_v13 = vmul.f32 %v596_v7, %v596_v7 }
 0x106   : > { %1817 = vst [vmem:[%s2149_s14 + $0x18] sm:$0xff] %v1673_v6   ;;  %1833 = vst [vmem:[%s2149_s14 + $0x98] sm:$0xff] %v1753_v8   ;;  %v1748_v14 = vpack.c.bf16 %v2171_v9, %v2165_v0 }
 0x107   : > { %1816 = vst [vmem:[%s2149_s14 + $0x10] sm:$0xff] %v1668_v11   ;;  %v1157_v16 = vadd.f32 %v1908_v60, %v1156_v12  ;;  %v1289_v17 = vadd.f32 %v1288_v10, %v1226_v13 }
 0x108   : > { %1832 = vst [vmem:[%s2149_s14 + $0x90] sm:$0xff] %v1748_v14  }
 0x109   : > { %v1290_v19 = vadd.f32 %v1289_v17, %v1227_v15  ;;  %v1912_v20 = vpop.f32.mrb[8].mxu0  ;;  %v1158_v21 = vadd.f32 %v1909_v4, %v1157_v16  ;;  %v2179_v22 = vpop.f32.mrb[8].mxu1 }
 0x10a   : > { %v609_v23 = vpop.f32.mrb[9].mxu0  ;;  %v2181_v24 = vpop.f32.mrb[9].mxu1  ;;  %v1231_v39 = vmul.f32 %v1912_v20, %v1912_v20 }
 0x10b   : > { %v1159_v25 = vadd.f32 %v1158_v21, %v609_v23  ;;  %v1229_v26 = vmul.f32 %v609_v23, %v609_v23  ;;  %v1291_v27 = vadd.f32 %v1290_v19, %v1228_v18  ;;  %v1913_v28 = vpop.f32.mrb[10].mxu0  ;;  %v2183_v29 = vpop.f32.mrb[10].mxu1 }
 0x10c   : > { %v1683_v30 = vpack.c.bf16 %v1913_v28, %v1912_v20  ;;  %v612_v31 = vpop.f32.mrb[11].mxu0  ;;  %v1763_v32 = vpack.c.bf16 %v2183_v29, %v2179_v22  ;;  %v2187_v33 = vpop.f32.mrb[11].mxu1  ;;  %v1232_v44 = vmul.f32 %v1913_v28, %v1913_v28 }
 0x10d   : > { %v1292_v34 = vadd.f32 %v1291_v27, %v1229_v26  ;;  %v1678_v35 = vpack.c.bf16 %v612_v31, %v609_v23  ;;  %v1160_v36 = vadd.f32 %v1159_v25, %v612_v31  ;;  %v1230_v37 = vmul.f32 %v612_v31, %v612_v31 }
 0x10e   : > { %1819 = vst [vmem:[%s2149_s14 + $0x28] sm:$0xff] %v1683_v30   ;;  %1835 = vst [vmem:[%s2149_s14 + $0xa8] sm:$0xff] %v1763_v32   ;;  %v1758_v38 = vpack.c.bf16 %v2187_v33, %v2181_v24 }
 0x10f   : > { %1818 = vst [vmem:[%s2149_s14 + $0x20] sm:$0xff] %v1678_v35   ;;  %v1161_v40 = vadd.f32 %v1912_v20, %v1160_v36  ;;  %v1293_v42 = vadd.f32 %v1292_v34, %v1230_v37 }
 0x110   : > { %1834 = vst [vmem:[%s2149_s14 + $0xa0] sm:$0xff] %v1758_v38  }
 0x111   : > { %v1294_v46 = vadd.f32 %v1293_v42, %v1231_v39  ;;  %v1916_v47 = vpop.f32.mrb[12].mxu0  ;;  %v1162_v48 = vadd.f32 %v1913_v28, %v1161_v40  ;;  %v2195_v49 = vpop.f32.mrb[12].mxu1 }
 0x112   : > { %v625_v51 = vpop.f32.mrb[13].mxu0  ;;  %v2197_v52 = vpop.f32.mrb[13].mxu1  ;;  %v1235_v6 = vmul.f32 %v1916_v47, %v1916_v47 }
 0x113   : > { %v1163_v53 = vadd.f32 %v1162_v48, %v625_v51  ;;  %v1233_v54 = vmul.f32 %v625_v51, %v625_v51  ;;  %v1295_v55 = vadd.f32 %v1294_v46, %v1232_v44  ;;  %v1917_v56 = vpop.f32.mrb[14].mxu0  ;;  %v2199_v57 = vpop.f32.mrb[14].mxu1 }
 0x114   : > { %v1693_v58 = vpack.c.bf16 %v1917_v56, %v1916_v47  ;;  %v628_v59 = vpop.f32.mrb[15].mxu0  ;;  %v1773_v60 = vpack.c.bf16 %v2199_v57, %v2195_v49  ;;  %v2203_v61 = vpop.f32.mrb[15].mxu1  ;;  %v1236_v10 = vmul.f32 %v1917_v56, %v1917_v56 }
 0x115   : > { %v1296_v63 = vadd.f32 %v1295_v55, %v1233_v54  ;;  %v1688_v1 = vpack.c.bf16 %v628_v59, %v625_v51  ;;  %v1164_v2 = vadd.f32 %v1163_v53, %v628_v59  ;;  %v1234_v3 = vmul.f32 %v628_v59, %v628_v59 }
 0x116   : > { %1821 = vst [vmem:[%s2149_s14 + $0x38] sm:$0xff] %v1693_v58   ;;  %1837 = vst [vmem:[%s2149_s14 + $0xb8] sm:$0xff] %v1773_v60   ;;  %v1768_v4 = vpack.c.bf16 %v2203_v61, %v2197_v52 }
 0x117   : > { %1820 = vst [vmem:[%s2149_s14 + $0x30] sm:$0xff] %v1688_v1   ;;  %v1165_v7 = vadd.f32 %v1916_v47, %v1164_v2  ;;  %v1297_v8 = vadd.f32 %v1296_v63, %v1234_v3 }
 0x118   : > { %1836 = vst [vmem:[%s2149_s14 + $0xb0] sm:$0xff] %v1768_v4  }
 0x119   : > { %v1298_v11 = vadd.f32 %v1297_v8, %v1235_v6  ;;  %v1920_v12 = vpop.f32.mrb[16].mxu0  ;;  %v1166_v13 = vadd.f32 %v1917_v56, %v1165_v7  ;;  %v2211_v14 = vpop.f32.mrb[16].mxu1 }
 0x11a   : > { %v641_v15 = vpop.f32.mrb[17].mxu0  ;;  %v2213_v16 = vpop.f32.mrb[17].mxu1  ;;  %v1239_v35 = vmul.f32 %v1920_v12, %v1920_v12 }
 0x11b   : > { %v1167_v17 = vadd.f32 %v1166_v13, %v641_v15  ;;  %v1237_v18 = vmul.f32 %v641_v15, %v641_v15  ;;  %v1299_v19 = vadd.f32 %v1298_v11, %v1236_v10  ;;  %v1921_v20 = vpop.f32.mrb[18].mxu0  ;;  %v2215_v21 = vpop.f32.mrb[18].mxu1 }
 0x11c   : > { %v1703_v23 = vpack.c.bf16 %v1921_v20, %v1920_v12  ;;  %v644_v25 = vpop.f32.mrb[19].mxu0  ;;  %v1783_v26 = vpack.c.bf16 %v2215_v21, %v2211_v14  ;;  %v2219_v27 = vpop.f32.mrb[19].mxu1  ;;  %v1240_v38 = vmul.f32 %v1921_v20, %v1921_v20 }
 0x11d   : > { %v1300_v28 = vadd.f32 %v1299_v19, %v1237_v18  ;;  %v1698_v30 = vpack.c.bf16 %v644_v25, %v641_v15  ;;  %v1168_v31 = vadd.f32 %v1167_v17, %v644_v25  ;;  %v1238_v32 = vmul.f32 %v644_v25, %v644_v25 }
 0x11e   : > { %1823 = vst [vmem:[%s2149_s14 + $0x48] sm:$0xff] %v1703_v23   ;;  %1839 = vst [vmem:[%s2149_s14 + $0xc8] sm:$0xff] %v1783_v26   ;;  %v1778_v34 = vpack.c.bf16 %v2219_v27, %v2213_v16 }
 0x11f   : > { %1822 = vst [vmem:[%s2149_s14 + $0x40] sm:$0xff] %v1698_v30   ;;  %v1169_v36 = vadd.f32 %v1920_v12, %v1168_v31  ;;  %v1301_v37 = vadd.f32 %v1300_v28, %v1238_v32 }
 0x120   : > { %1838 = vst [vmem:[%s2149_s14 + $0xc0] sm:$0xff] %v1778_v34  }
 0x121   : > { %v1302_v39 = vadd.f32 %v1301_v37, %v1239_v35  ;;  %v1924_v40 = vpop.f32.mrb[20].mxu0  ;;  %v1170_v42 = vadd.f32 %v1921_v20, %v1169_v36  ;;  %v2227_v44 = vpop.f32.mrb[20].mxu1 }
 0x122   : > { %v657_v46 = vpop.f32.mrb[21].mxu0  ;;  %v2229_v47 = vpop.f32.mrb[21].mxu1  ;;  %v1243_v6 = vmul.f32 %v1924_v40, %v1924_v40 }
 0x123   : > { %v1171_v48 = vadd.f32 %v1170_v42, %v657_v46  ;;  %v1241_v51 = vmul.f32 %v657_v46, %v657_v46  ;;  %v1303_v53 = vadd.f32 %v1302_v39, %v1240_v38  ;;  %v1925_v54 = vpop.f32.mrb[22].mxu0  ;;  %v2231_v55 = vpop.f32.mrb[22].mxu1 }
 0x124   : > { %v1713_v56 = vpack.c.bf16 %v1925_v54, %v1924_v40  ;;  %v660_v58 = vpop.f32.mrb[23].mxu0  ;;  %v1793_v59 = vpack.c.bf16 %v2231_v55, %v2227_v44  ;;  %v2235_v60 = vpop.f32.mrb[23].mxu1  ;;  %v1244_v10 = vmul.f32 %v1925_v54, %v1925_v54 }
 0x125   : > { %v1304_v63 = vadd.f32 %v1303_v53, %v1241_v51  ;;  %v1708_v1 = vpack.c.bf16 %v660_v58, %v657_v46  ;;  %v1172_v2 = vadd.f32 %v1171_v48, %v660_v58  ;;  %v1242_v3 = vmul.f32 %v660_v58, %v660_v58 }
 0x126   : > { %1825 = vst [vmem:[%s2149_s14 + $0x58] sm:$0xff] %v1713_v56   ;;  %1841 = vst [vmem:[%s2149_s14 + $0xd8] sm:$0xff] %v1793_v59   ;;  %v1788_v4 = vpack.c.bf16 %v2235_v60, %v2229_v47 }
 0x127   : > { %1824 = vst [vmem:[%s2149_s14 + $0x50] sm:$0xff] %v1708_v1   ;;  %v1173_v7 = vadd.f32 %v1924_v40, %v1172_v2  ;;  %v1305_v8 = vadd.f32 %v1304_v63, %v1242_v3 }
 0x128   : > { %1840 = vst [vmem:[%s2149_s14 + $0xd0] sm:$0xff] %v1788_v4  }
 0x129   : > { %v1306_v11 = vadd.f32 %v1305_v8, %v1243_v6  ;;  %v1928_v12 = vpop.f32.mrb[24].mxu0  ;;  %v1174_v13 = vadd.f32 %v1925_v54, %v1173_v7  ;;  %v2243_v15 = vpop.f32.mrb[24].mxu1 }
 0x12a   : > { %v673_v17 = vpop.f32.mrb[25].mxu0  ;;  %v2245_v18 = vpop.f32.mrb[25].mxu1  ;;  %v1247_v39 = vmul.f32 %v1928_v12, %v1928_v12 }
 0x12b   : > { %v1175_v19 = vadd.f32 %v1174_v13, %v673_v17  ;;  %v1245_v20 = vmul.f32 %v673_v17, %v673_v17  ;;  %v1307_v23 = vadd.f32 %v1306_v11, %v1244_v10  ;;  %v1929_v25 = vpop.f32.mrb[26].mxu0  ;;  %v2247_v26 = vpop.f32.mrb[26].mxu1 }
 0x12c   : > { %v1723_v28 = vpack.c.bf16 %v1929_v25, %v1928_v12  ;;  %v676_v30 = vpop.f32.mrb[27].mxu0  ;;  %v1803_v31 = vpack.c.bf16 %v2247_v26, %v2243_v15  ;;  %v2251_v32 = vpop.f32.mrb[27].mxu1  ;;  %v1248_v46 = vmul.f32 %v1929_v25, %v1929_v25 }
 0x12d   : > { %v1308_v34 = vadd.f32 %v1307_v23, %v1245_v20  ;;  %v1718_v35 = vpack.c.bf16 %v676_v30, %v673_v17  ;;  %v1176_v36 = vadd.f32 %v1175_v19, %v676_v30  ;;  %v1246_v37 = vmul.f32 %v676_v30, %v676_v30 }
 0x12e   : > { %1827 = vst [vmem:[%s2149_s14 + $0x68] sm:$0xff] %v1723_v28   ;;  %1843 = vst [vmem:[%s2149_s14 + $0xe8] sm:$0xff] %v1803_v31   ;;  %v1798_v38 = vpack.c.bf16 %v2251_v32, %v2245_v18  ;;  %v1253_v31 = vmul.f32 %v2142_v43, %v2142_v43 }
 0x12f   : > { %1826 = vst [vmem:[%s2149_s14 + $0x60] sm:$0xff] %v1718_v35   ;;  %v1177_v40 = vadd.f32 %v1928_v12, %v1176_v36  ;;  %v1309_v42 = vadd.f32 %v1308_v34, %v1246_v37 }
 0x130   : > { %1842 = vst [vmem:[%s2149_s14 + $0xe0] sm:$0xff] %v1798_v38   ;;  %v1254_v38 = vmul.f32 %v2155_v50, %v2155_v50 }
 0x131   : > { %v1310_v48 = vadd.f32 %v1309_v42, %v1247_v39  ;;  %v1932_v51 = vpop.f32.mrb[28].mxu0  ;;  %v1178_v53 = vadd.f32 %v1929_v25, %v1177_v40  ;;  %v2259_v54 = vpop.f32.mrb[28].mxu1  ;;  %v1255_v39 = vmul.f32 %v2140_v41, %v2140_v41 }
 0x132   : > { %v689_v56 = vpop.f32.mrb[29].mxu0  ;;  %v2261_v58 = vpop.f32.mrb[29].mxu1  ;;  %v1251_v19 = vmul.f32 %v1932_v51, %v1932_v51 }
 0x133   : > { %v1179_v59 = vadd.f32 %v1178_v53, %v689_v56  ;;  %v1249_v63 = vmul.f32 %v689_v56, %v689_v56  ;;  %v1311_v1 = vadd.f32 %v1310_v48, %v1248_v46  ;;  %v1933_v2 = vpop.f32.mrb[30].mxu0  ;;  %v2263_v3 = vpop.f32.mrb[30].mxu1  ;;  %v1256_v46 = vmul.f32 %v2151_v45, %v2151_v45 }
 0x134   : > { %v1733_v4 = vpack.c.bf16 %v1933_v2, %v1932_v51  ;;  %v692_v6 = vpop.f32.mrb[31].mxu0  ;;  %v1813_v7 = vpack.c.bf16 %v2263_v3, %v2259_v54  ;;  %v2267_v8 = vpop.f32.mrb[31].mxu1  ;;  %v1252_v25 = vmul.f32 %v1933_v2, %v1933_v2 }
 0x135   : > { %v1312_v10 = vadd.f32 %v1311_v1, %v1249_v63  ;;  %v1728_v11 = vpack.c.bf16 %v692_v6, %v689_v56  ;;  %v1180_v12 = vadd.f32 %v1179_v59, %v692_v6  ;;  %v1250_v13 = vmul.f32 %v692_v6, %v692_v6 }
 0x136   : > { %1829 = vst [vmem:[%s2149_s14 + $0x78] sm:$0xff] %v1733_v4   ;;  %1845 = vst [vmem:[%s2149_s14 + $0xf8] sm:$0xff] %v1813_v7   ;;  %v1808_v17 = vpack.c.bf16 %v2267_v8, %v2261_v58  ;;  %v1258_v63 = vmul.f32 %v2171_v9, %v2171_v9 }
 0x137   : > { %1828 = vst [vmem:[%s2149_s14 + $0x70] sm:$0xff] %v1728_v11   ;;  %v1181_v20 = vadd.f32 %v1932_v51, %v1180_v12  ;;  %v1313_v23 = vadd.f32 %v1312_v10, %v1250_v13  ;;  %v1262_v12 = vmul.f32 %v2187_v33, %v2187_v33 }
 0x138   : > { %1844 = vst [vmem:[%s2149_s14 + $0xf0] sm:$0xff] %v1808_v17  }
 0x139   : > { %v1314_v28 = vadd.f32 %v1313_v23, %v1251_v19  ;;  %v1182_v30 = vadd.f32 %v1933_v2, %v1181_v20 }
 0x13b   : > { %v1183_v34 = vadd.f32 %v1182_v30, %v2142_v43  ;;  %v1315_v35 = vadd.f32 %v1314_v28, %v1252_v25  ;;  %v1257_v43 = vmul.f32 %v2165_v0, %v2165_v0  ;;  %v1266_v30 = vmul.f32 %v2203_v61, %v2203_v61 }
 0x13d   : > { %v1316_v36 = vadd.f32 %v1315_v35, %v1253_v31  ;;  %v1184_v37 = vadd.f32 %v1183_v34, %v2155_v50 }
 0x13f   : > { %v1185_v40 = vadd.f32 %v2140_v41, %v1184_v37  ;;  %v1317_v42 = vadd.f32 %v1316_v36, %v1254_v38  ;;  %v1259_v41 = vmul.f32 %v2163_v62, %v2163_v62 }
 0x141   : > { %v1318_v48 = vadd.f32 %v1317_v42, %v1255_v39  ;;  %v1186_v51 = vadd.f32 %v2151_v45, %v1185_v40  ;;  %v1260_v45 = vmul.f32 %v2167_v5, %v2167_v5  ;;  %v1270_v40 = vmul.f32 %v2219_v27, %v2219_v27 }
 0x143   : > { %v1187_v53 = vadd.f32 %v1186_v51, %v2165_v0  ;;  %v1319_v56 = vadd.f32 %v1318_v48, %v1256_v46  ;;  %v1261_v0 = vmul.f32 %v2181_v24, %v2181_v24 }
 0x145   : > { %v1320_v59 = vadd.f32 %v1319_v56, %v1257_v43  ;;  %v1188_v50 = vadd.f32 %v1187_v53, %v2171_v9 }
 0x147   : > { %v1189_v1 = vadd.f32 %v2163_v62, %v1188_v50  ;;  %v1321_v2 = vadd.f32 %v1320_v59, %v1258_v63  ;;  %v1263_v62 = vmul.f32 %v2179_v22, %v2179_v22  ;;  %v1274_v59 = vmul.f32 %v2235_v60, %v2235_v60 }
 0x149   : > { %v1322_v4 = vadd.f32 %v1321_v2, %v1259_v41  ;;  %v1190_v6 = vadd.f32 %v2167_v5, %v1189_v1  ;;  %v1264_v5 = vmul.f32 %v2183_v29, %v2183_v29 }
 0x14b   : > { %v1191_v7 = vadd.f32 %v1190_v6, %v2181_v24  ;;  %v1323_v10 = vadd.f32 %v1322_v4, %v1260_v45  ;;  %v1265_v24 = vmul.f32 %v2197_v52, %v2197_v52  ;;  %v1278_v6 = vmul.f32 %v2251_v32, %v2251_v32 }
 0x14d   : > { %v1324_v11 = vadd.f32 %v1323_v10, %v1261_v0  ;;  %v1192_v9 = vadd.f32 %v1191_v7, %v2187_v33 }
 0x14f   : > { %v1193_v13 = vadd.f32 %v2179_v22, %v1192_v9  ;;  %v1325_v17 = vadd.f32 %v1324_v11, %v1262_v12  ;;  %v1267_v22 = vmul.f32 %v2195_v49, %v2195_v49  ;;  %v1281_v11 = vmul.f32 %v2261_v58, %v2261_v58 }
 0x151   : > { %v1326_v19 = vadd.f32 %v1325_v17, %v1263_v62  ;;  %v1194_v20 = vadd.f32 %v2183_v29, %v1193_v13  ;;  %v1268_v29 = vmul.f32 %v2199_v57, %v2199_v57  ;;  %v1283_v13 = vmul.f32 %v2259_v54, %v2259_v54 }
 0x153   : > { %v1195_v23 = vadd.f32 %v1194_v20, %v2197_v52  ;;  %v1327_v25 = vadd.f32 %v1326_v19, %v1264_v5  ;;  %v1269_v52 = vmul.f32 %v2213_v16, %v2213_v16 }
 0x155   : > { %v1328_v28 = vadd.f32 %v1327_v25, %v1265_v24  ;;  %v1196_v33 = vadd.f32 %v1195_v23, %v2203_v61 }
 0x157   : > { %v1197_v31 = vadd.f32 %v2195_v49, %v1196_v33  ;;  %v1329_v34 = vadd.f32 %v1328_v28, %v1266_v30  ;;  %v1271_v49 = vmul.f32 %v2211_v14, %v2211_v14 }
 0x159   : > { %v1330_v35 = vadd.f32 %v1329_v34, %v1267_v22  ;;  %v1198_v36 = vadd.f32 %v2199_v57, %v1197_v31  ;;  %v1272_v57 = vmul.f32 %v2215_v21, %v2215_v21 }
 0x15b   : > { %v1199_v37 = vadd.f32 %v1198_v36, %v2213_v16  ;;  %v1331_v38 = vadd.f32 %v1330_v35, %v1268_v29  ;;  %v1273_v16 = vmul.f32 %v2229_v47, %v2229_v47 }
 0x15d   : > { %v1332_v39 = vadd.f32 %v1331_v38, %v1269_v52  ;;  %v1200_v61 = vadd.f32 %v1199_v37, %v2219_v27 }
 0x15f   : > { %v1201_v42 = vadd.f32 %v2211_v14, %v1200_v61  ;;  %v1333_v46 = vadd.f32 %v1332_v39, %v1270_v40  ;;  %v1275_v14 = vmul.f32 %v2227_v44, %v2227_v44 }
 0x161   : > { %v1334_v48 = vadd.f32 %v1333_v46, %v1271_v49  ;;  %v1202_v51 = vadd.f32 %v2215_v21, %v1201_v42  ;;  %v1276_v21 = vmul.f32 %v2231_v55, %v2231_v55 }
 0x163   : > { %v1203_v43 = vadd.f32 %v1202_v51, %v2229_v47  ;;  %v1335_v53 = vadd.f32 %v1334_v48, %v1272_v57  ;;  %v1277_v47 = vmul.f32 %v2245_v18, %v2245_v18 }
 0x165   : > { %v1336_v56 = vadd.f32 %v1335_v53, %v1273_v16  ;;  %v1204_v27 = vadd.f32 %v1203_v43, %v2235_v60 }
 0x167   : > { %v1205_v50 = vadd.f32 %v2227_v44, %v1204_v27  ;;  %v1337_v63 = vadd.f32 %v1336_v56, %v1274_v59  ;;  %v1279_v44 = vmul.f32 %v2243_v15, %v2243_v15 }
 0x169   : > { %v1338_v41 = vadd.f32 %v1337_v63, %v1275_v14  ;;  %v1206_v1 = vadd.f32 %v2231_v55, %v1205_v50  ;;  %v1280_v55 = vmul.f32 %v2247_v26, %v2247_v26 }
 0x16b   : > { %v1207_v2 = vadd.f32 %v1206_v1, %v2245_v18  ;;  %v1339_v45 = vadd.f32 %v1338_v41, %v1276_v21 }
 0x16d   : > { %v1340_v4 = vadd.f32 %v1339_v45, %v1277_v47  ;;  %v1208_v60 = vadd.f32 %v1207_v2, %v2251_v32 }
 0x16f   : > { %v1209_v0 = vadd.f32 %v2243_v15, %v1208_v60  ;;  %v1341_v7 = vadd.f32 %v1340_v4, %v1278_v6  ;;  %v1282_v15 = vmul.f32 %v2267_v8, %v2267_v8 }
 0x171   : > { %v1342_v10 = vadd.f32 %v1341_v7, %v1279_v44  ;;  %v1210_v18 = vadd.f32 %v2247_v26, %v1209_v0  ;;  %v1284_v26 = vmul.f32 %v2263_v3, %v2263_v3 }
 0x173   : > { %v1211_v9 = vadd.f32 %v1210_v18, %v2261_v58  ;;  %v1343_v32 = vadd.f32 %v1342_v10, %v1280_v55 }
 0x175   : > { %v1344_v12 = vadd.f32 %v1343_v32, %v1281_v11  ;;  %v1212_v62 = vadd.f32 %v1211_v9, %v2267_v8 }
 0x177   : > { %v1213_v17 = vadd.f32 %v2259_v54, %v1212_v62  ;;  %v1345_v5 = vadd.f32 %v1344_v12, %v1282_v15 }
 0x179   : > { %v1214_v19 = vadd.f32 %v2263_v3, %v1213_v17  ;;  %v1346_v58 = vadd.f32 %v1345_v5, %v1283_v13 }
 0x17b   : > { %v1215_v20 = vrot.slane %v1214_v19, 4  ;;  %v1347_v24 = vadd.f32 %v1346_v58, %v1284_v26 }
 0x17d   : > { %v1216_v23 = vadd.f32 %v1215_v20, %v1214_v19  ;;  %v1348_v25 = vrot.slane %v1347_v24, 4 }
 0x17f   : > { %v1217_v28 = vrot.slane %v1216_v23, 2  ;;  %v1349_v8 = vadd.f32 %v1348_v25, %v1347_v24 }
 0x181   : > { %v1218_v33 = vadd.f32 %v1217_v28, %v1216_v23  ;;  %v1350_v30 = vrot.slane %v1349_v8, 2 }
 0x183   : > { %v1219_v22 = vrot.slane %v1218_v33, 1  ;;  %v1351_v54 = vadd.f32 %v1350_v30, %v1349_v8 }
 0x185   : > { %v1220_v31 = vadd.f32 %v1219_v22, %v1218_v33  ;;  %v1352_v34 = vrot.slane %v1351_v54, 1 }
 0x187   : > { %v1353_v3 = vadd.f32 %v1352_v34, %v1351_v54  ;;  %1354 = vst [vmem:[%s217_s20] sm:$0xff] %v1220_v31 }
 0x189   : > { %1355 = vst [vmem:[%s221_s23] sm:$0xff] %v1353_v3 }
 0x18a PF: > { %s15_s15 = sadd.s32 1, %s2036_s15  }
 0x18b   : > { %p12_p5 = scmp.ge.s32.totalorder %s15_s15, 6  }
 0x18d   :  { %14 = sbr.rel (!%p12_p5) target bundleno = 1 (0x1), region = 82 }

// kernel: decoder_block_forward.11
= control target key start
LH: loop header
LB: loop body
LE: loop exit
PB: predicated region body
PF: predicated region fallthrough
CT: control target
= control target key end

     0   :  { %s836_s12 = smov 0   ;;  %s1095_s0 = inlined_call_operand.vmem [shape: bf16[2048,128], index: 0, kind: input, shape index: {}]   ;;  %s1096_s1 = inlined_call_operand.vmem [shape: f32[1,128], index: 1, kind: input, shape index: {}]   ;;  %s1097_s2 = inlined_call_operand.vmem [shape: f32[1,128], index: 2, kind: input, shape index: {}]   ;;  %s1098_s3 = inlined_call_operand.vmem [shape: f32[2048,128], index: 3, kind: output, shape index: {}]  }
   0x1 LB: > { %s628_s13 = sadd.s32 4294967295, %s814_s12   ;;  %p632_p0 = scmp.ge.s32.totalorder %s814_s12, 1  ;;  %s814_s12 = sphi %s836_s12, %s13_s12  }
   0x2   : > { %p138_p1 = scmp.lt.s32.totalorder %s814_s12, 5 }
   0x4   : > { %p139_p2 = pnand %p632_p0, %p138_p1 }
   0x5   : > { %s633_s14 = sshll.u32 (!%p139_p2), %s628_s13, 6  ;;  %v855_v0 = vld [vmem:[%s1096_s1] ss:$0 sm:$0xff] (!%p139_p2) }
   0x6   : > { %142 = sbr.rel (%p139_p2) target bundleno = 85 (0x55), region = 32  ;;  %p163_p3 = scmp.lt.s32.totalorder (!%p139_p2), %s633_s14, 255  ;;  %v864_v9 = vld [vmem:[%s1097_s2] ss:$0 sm:$0xff] (!%p139_p2) }
   0xd   : > { %s1100_s14 = smov (!%p163_p3, %s633_s14), 255 }
   0xe   : > { %s634_s15 = sshll.u32 %s1100_s14, 2  ;;  %s636_s23 = sshll.u32 %s1100_s14, 3 }
   0xf   : > { %s850_s18 = scalar_lea.vmem %s1095_s0, %s634_s15  ;;  %s882_s26 = scalar_lea.vmem %s1098_s3, %s636_s23 }
  0x10   : > { %v642_v1 = vld [vmem:[%s850_s18] sm:$0xff]   ;;  %v769_v2 = vld [vmem:[%s850_s18 + $0x8] sm:$0xff]   ;;  %v770_v3 = vld [vmem:[%s850_s18 + $0x10] sm:$0xff]  }
  0x11   : > { %v643_v4 = vunpack.c.l.bf16 %v642_v1  ;;  %v644_v5 = vunpack.c.h.bf16 %v642_v1  ;;  %v647_v6 = vunpack.c.l.bf16 %v769_v2  ;;  %v648_v7 = vunpack.c.h.bf16 %v769_v2  ;;  %v771_v8 = vld [vmem:[%s850_s18 + $0x18] sm:$0xff]   ;;  %v772_v30 = vld [vmem:[%s850_s18 + $0x20] sm:$0xff]   ;;  %v773_v31 = vld [vmem:[%s850_s18 + $0x28] sm:$0xff]  }
  0x12   : > { %v651_v10 = vunpack.c.l.bf16 %v770_v3  ;;  %v652_v11 = vunpack.c.h.bf16 %v770_v3  ;;  %v655_v12 = vunpack.c.l.bf16 %v771_v8  ;;  %v656_v13 = vunpack.c.h.bf16 %v771_v8  ;;  %v774_v36 = vld [vmem:[%s850_s18 + $0x30] sm:$0xff]   ;;  %v775_v37 = vld [vmem:[%s850_s18 + $0x38] sm:$0xff]   ;;  %v776_v3 = vld [vmem:[%s850_s18 + $0x40] sm:$0xff]  }
  0x13   : > { %v309_v14 = vmul.f32 %v643_v4, %v855_v0  ;;  %v310_v15 = vmul.f32 %v644_v5, %v855_v0  ;;  %v311_v16 = vmul.f32 %v647_v6, %v855_v0  ;;  %v312_v17 = vmul.f32 %v648_v7, %v855_v0  ;;  %v777_v4 = vld [vmem:[%s850_s18 + $0x48] sm:$0xff]  }
  0x14   : > { %v313_v18 = vmul.f32 %v651_v10, %v855_v0  ;;  %v314_v19 = vmul.f32 %v652_v11, %v855_v0  ;;  %v315_v20 = vmul.f32 %v655_v12, %v855_v0  ;;  %v316_v21 = vmul.f32 %v656_v13, %v855_v0  ;;  %v778_v10 = vld [vmem:[%s850_s18 + $0x50] sm:$0xff]   ;;  %v779_v11 = vld [vmem:[%s850_s18 + $0x58] sm:$0xff]  }
  0x15   : > { %v380_v22 = vadd.f32 %v864_v9, %v309_v14  ;;  %v381_v23 = vadd.f32 %v864_v9, %v310_v15  ;;  %v382_v24 = vadd.f32 %v864_v9, %v311_v16  ;;  %v383_v25 = vadd.f32 %v864_v9, %v312_v17 }
  0x16   : > { %v384_v26 = vadd.f32 %v864_v9, %v313_v18  ;;  %v385_v27 = vadd.f32 %v864_v9, %v314_v19  ;;  %v386_v28 = vadd.f32 %v864_v9, %v315_v20  ;;  %v387_v29 = vadd.f32 %v864_v9, %v316_v21 }
  0x17   : > { %v444_v32 = vmax.f32 %v380_v22, 0.0  ;;  %v445_v33 = vmax.f32 %v381_v23, 0.0  ;;  %v446_v34 = vmax.f32 %v382_v24, 0.0  ;;  %v447_v35 = vmax.f32 %v383_v25, 0.0 }
  0x18   : > { %v448_v38 = vmax.f32 %v384_v26, 0.0  ;;  %v449_v39 = vmax.f32 %v385_v27, 0.0  ;;  %v450_v40 = vmax.f32 %v386_v28, 0.0  ;;  %v451_v41 = vmax.f32 %v387_v29, 0.0 }
  0x19   : > { %508 = vst [vmem:[%s882_s26] sm:$0xff] %v444_v32  ;;  %509 = vst [vmem:[%s882_s26 + $0x8] sm:$0xff] %v445_v33  ;;  %v659_v42 = vunpack.c.l.bf16 %v772_v30  ;;  %v660_v43 = vunpack.c.h.bf16 %v772_v30  ;;  %v663_v44 = vunpack.c.l.bf16 %v773_v31  ;;  %v664_v45 = vunpack.c.h.bf16 %v773_v31 }
  0x1a   : > { %510 = vst [vmem:[%s882_s26 + $0x10] sm:$0xff] %v446_v34  ;;  %511 = vst [vmem:[%s882_s26 + $0x18] sm:$0xff] %v447_v35  ;;  %v667_v46 = vunpack.c.l.bf16 %v774_v36  ;;  %v668_v47 = vunpack.c.h.bf16 %v774_v36  ;;  %v671_v48 = vunpack.c.l.bf16 %v775_v37  ;;  %v672_v49 = vunpack.c.h.bf16 %v775_v37 }
  0x1b   : > { %512 = vst [vmem:[%s882_s26 + $0x20] sm:$0xff] %v448_v38  ;;  %513 = vst [vmem:[%s882_s26 + $0x28] sm:$0xff] %v449_v39  ;;  %v317_v50 = vmul.f32 %v659_v42, %v855_v0  ;;  %v318_v51 = vmul.f32 %v660_v43, %v855_v0  ;;  %v319_v52 = vmul.f32 %v663_v44, %v855_v0  ;;  %v675_v16 = vunpack.c.l.bf16 %v776_v3 }
  0x1c   : > { %514 = vst [vmem:[%s882_s26 + $0x30] sm:$0xff] %v450_v40  ;;  %515 = vst [vmem:[%s882_s26 + $0x38] sm:$0xff] %v451_v41  ;;  %v320_v53 = vmul.f32 %v664_v45, %v855_v0  ;;  %v321_v54 = vmul.f32 %v667_v46, %v855_v0  ;;  %v322_v55 = vmul.f32 %v668_v47, %v855_v0  ;;  %v676_v17 = vunpack.c.h.bf16 %v776_v3  ;;  %v780_v40 = vld [vmem:[%s850_s18 + $0x60] sm:$0xff]   ;;  %v781_v41 = vld [vmem:[%s850_s18 + $0x68] sm:$0xff]  }
  0x1d   : > { %v323_v56 = vmul.f32 %v671_v48, %v855_v0  ;;  %v324_v57 = vmul.f32 %v672_v49, %v855_v0  ;;  %v388_v58 = vadd.f32 %v864_v9, %v317_v50  ;;  %v389_v59 = vadd.f32 %v864_v9, %v318_v51  ;;  %v782_v46 = vld [vmem:[%s850_s18 + $0x70] sm:$0xff]   ;;  %v783_v47 = vld [vmem:[%s850_s18 + $0x78] sm:$0xff]  }
  0x1e   : > { %v390_v60 = vadd.f32 %v864_v9, %v319_v52  ;;  %v391_v61 = vadd.f32 %v864_v9, %v320_v53  ;;  %v392_v62 = vadd.f32 %v864_v9, %v321_v54  ;;  %v393_v63 = vadd.f32 %v864_v9, %v322_v55 }
  0x1f   : > { %v394_v1 = vadd.f32 %v864_v9, %v323_v56  ;;  %v395_v2 = vadd.f32 %v864_v9, %v324_v57  ;;  %v452_v5 = vmax.f32 %v388_v58, 0.0  ;;  %v453_v6 = vmax.f32 %v389_v59, 0.0 }
  0x20   : > { %v454_v7 = vmax.f32 %v390_v60, 0.0  ;;  %v455_v8 = vmax.f32 %v391_v61, 0.0  ;;  %v456_v12 = vmax.f32 %v392_v62, 0.0  ;;  %v457_v13 = vmax.f32 %v393_v63, 0.0 }
  0x21   : > { %v458_v14 = vmax.f32 %v394_v1, 0.0  ;;  %v459_v15 = vmax.f32 %v395_v2, 0.0  ;;  %516 = vst [vmem:[%s882_s26 + $0x40] sm:$0xff] %v452_v5  ;;  %517 = vst [vmem:[%s882_s26 + $0x48] sm:$0xff] %v453_v6  ;;  %v679_v18 = vunpack.c.l.bf16 %v777_v4  ;;  %v680_v19 = vunpack.c.h.bf16 %v777_v4 }
  0x22   : > { %518 = vst [vmem:[%s882_s26 + $0x50] sm:$0xff] %v454_v7  ;;  %519 = vst [vmem:[%s882_s26 + $0x58] sm:$0xff] %v455_v8  ;;  %v683_v20 = vunpack.c.l.bf16 %v778_v10  ;;  %v684_v21 = vunpack.c.h.bf16 %v778_v10  ;;  %v687_v22 = vunpack.c.l.bf16 %v779_v11  ;;  %v688_v23 = vunpack.c.h.bf16 %v779_v11 }
  0x23   : > { %520 = vst [vmem:[%s882_s26 + $0x60] sm:$0xff] %v456_v12  ;;  %521 = vst [vmem:[%s882_s26 + $0x68] sm:$0xff] %v457_v13  ;;  %v325_v24 = vmul.f32 %v675_v16, %v855_v0  ;;  %v326_v25 = vmul.f32 %v676_v17, %v855_v0  ;;  %v327_v26 = vmul.f32 %v679_v18, %v855_v0  ;;  %v691_v52 = vunpack.c.l.bf16 %v780_v40 }
  0x24   : > { %522 = vst [vmem:[%s882_s26 + $0x70] sm:$0xff] %v458_v14  ;;  %523 = vst [vmem:[%s882_s26 + $0x78] sm:$0xff] %v459_v15  ;;  %v328_v27 = vmul.f32 %v680_v19, %v855_v0  ;;  %v329_v28 = vmul.f32 %v683_v20, %v855_v0  ;;  %v330_v29 = vmul.f32 %v684_v21, %v855_v0  ;;  %v692_v53 = vunpack.c.h.bf16 %v780_v40  ;;  %v784_v14 = vld [vmem:[%s850_s18 + $0x80] sm:$0xff]   ;;  %v785_v15 = vld [vmem:[%s850_s18 + $0x88] sm:$0xff]  }
  0x25   : > { %v331_v30 = vmul.f32 %v687_v22, %v855_v0  ;;  %v332_v31 = vmul.f32 %v688_v23, %v855_v0  ;;  %v396_v32 = vadd.f32 %v864_v9, %v325_v24  ;;  %v397_v33 = vadd.f32 %v864_v9, %v326_v25  ;;  %v786_v20 = vld [vmem:[%s850_s18 + $0x90] sm:$0xff]   ;;  %v787_v21 = vld [vmem:[%s850_s18 + $0x98] sm:$0xff]  }
  0x26   : > { %v398_v34 = vadd.f32 %v864_v9, %v327_v26  ;;  %v399_v35 = vadd.f32 %v864_v9, %v328_v27  ;;  %v400_v36 = vadd.f32 %v864_v9, %v329_v28  ;;  %v401_v37 = vadd.f32 %v864_v9, %v330_v29 }
  0x27   : > { %v402_v38 = vadd.f32 %v864_v9, %v331_v30  ;;  %v403_v39 = vadd.f32 %v864_v9, %v332_v31  ;;  %v460_v42 = vmax.f32 %v396_v32, 0.0  ;;  %v461_v43 = vmax.f32 %v397_v33, 0.0 }
  0x28   : > { %v462_v44 = vmax.f32 %v398_v34, 0.0  ;;  %v463_v45 = vmax.f32 %v399_v35, 0.0  ;;  %v464_v48 = vmax.f32 %v400_v36, 0.0  ;;  %v465_v49 = vmax.f32 %v401_v37, 0.0 }
  0x29   : > { %v466_v50 = vmax.f32 %v402_v38, 0.0  ;;  %v467_v51 = vmax.f32 %v403_v39, 0.0  ;;  %524 = vst [vmem:[%s882_s26 + $0x80] sm:$0xff] %v460_v42  ;;  %525 = vst [vmem:[%s882_s26 + $0x88] sm:$0xff] %v461_v43  ;;  %v695_v54 = vunpack.c.l.bf16 %v781_v41  ;;  %v696_v55 = vunpack.c.h.bf16 %v781_v41 }
  0x2a   : > { %526 = vst [vmem:[%s882_s26 + $0x90] sm:$0xff] %v462_v44  ;;  %527 = vst [vmem:[%s882_s26 + $0x98] sm:$0xff] %v463_v45  ;;  %v699_v56 = vunpack.c.l.bf16 %v782_v46  ;;  %v700_v57 = vunpack.c.h.bf16 %v782_v46  ;;  %v703_v58 = vunpack.c.l.bf16 %v783_v47  ;;  %v704_v59 = vunpack.c.h.bf16 %v783_v47 }
  0x2b   : > { %528 = vst [vmem:[%s882_s26 + $0xa0] sm:$0xff] %v464_v48  ;;  %529 = vst [vmem:[%s882_s26 + $0xa8] sm:$0xff] %v465_v49  ;;  %v333_v60 = vmul.f32 %v691_v52, %v855_v0  ;;  %v334_v61 = vmul.f32 %v692_v53, %v855_v0  ;;  %v335_v62 = vmul.f32 %v695_v54, %v855_v0  ;;  %v707_v26 = vunpack.c.l.bf16 %v784_v14 }
  0x2c   : > { %530 = vst [vmem:[%s882_s26 + $0xb0] sm:$0xff] %v466_v50  ;;  %531 = vst [vmem:[%s882_s26 + $0xb8] sm:$0xff] %v467_v51  ;;  %v336_v63 = vmul.f32 %v696_v55, %v855_v0  ;;  %v337_v1 = vmul.f32 %v699_v56, %v855_v0  ;;  %v338_v2 = vmul.f32 %v700_v57, %v855_v0  ;;  %v708_v27 = vunpack.c.h.bf16 %v784_v14  ;;  %v788_v50 = vld [vmem:[%s850_s18 + $0xa0] sm:$0xff]   ;;  %v789_v51 = vld [vmem:[%s850_s18 + $0xa8] sm:$0xff]  }
  0x2d   : > { %v339_v3 = vmul.f32 %v703_v58, %v855_v0  ;;  %v340_v4 = vmul.f32 %v704_v59, %v855_v0  ;;  %v404_v5 = vadd.f32 %v864_v9, %v333_v60  ;;  %v405_v6 = vadd.f32 %v864_v9, %v334_v61  ;;  %v790_v56 = vld [vmem:[%s850_s18 + $0xb0] sm:$0xff]   ;;  %v791_v57 = vld [vmem:[%s850_s18 + $0xb8] sm:$0xff]  }
  0x2e   : > { %v406_v7 = vadd.f32 %v864_v9, %v335_v62  ;;  %v407_v8 = vadd.f32 %v864_v9, %v336_v63  ;;  %v408_v10 = vadd.f32 %v864_v9, %v337_v1  ;;  %v409_v11 = vadd.f32 %v864_v9, %v338_v2 }
  0x2f   : > { %v410_v12 = vadd.f32 %v864_v9, %v339_v3  ;;  %v411_v13 = vadd.f32 %v864_v9, %v340_v4  ;;  %v468_v16 = vmax.f32 %v404_v5, 0.0  ;;  %v469_v17 = vmax.f32 %v405_v6, 0.0 }
  0x30   : > { %v470_v18 = vmax.f32 %v406_v7, 0.0  ;;  %v471_v19 = vmax.f32 %v407_v8, 0.0  ;;  %v472_v22 = vmax.f32 %v408_v10, 0.0  ;;  %v473_v23 = vmax.f32 %v409_v11, 0.0 }
  0x31   : > { %v474_v24 = vmax.f32 %v410_v12, 0.0  ;;  %v475_v25 = vmax.f32 %v411_v13, 0.0  ;;  %532 = vst [vmem:[%s882_s26 + $0xc0] sm:$0xff] %v468_v16  ;;  %533 = vst [vmem:[%s882_s26 + $0xc8] sm:$0xff] %v469_v17  ;;  %v711_v28 = vunpack.c.l.bf16 %v785_v15  ;;  %v712_v29 = vunpack.c.h.bf16 %v785_v15 }
  0x32   : > { %534 = vst [vmem:[%s882_s26 + $0xd0] sm:$0xff] %v470_v18  ;;  %535 = vst [vmem:[%s882_s26 + $0xd8] sm:$0xff] %v471_v19  ;;  %v715_v30 = vunpack.c.l.bf16 %v786_v20  ;;  %v716_v31 = vunpack.c.h.bf16 %v786_v20  ;;  %v719_v32 = vunpack.c.l.bf16 %v787_v21  ;;  %v720_v33 = vunpack.c.h.bf16 %v787_v21 }
  0x33   : > { %536 = vst [vmem:[%s882_s26 + $0xe0] sm:$0xff] %v472_v22  ;;  %537 = vst [vmem:[%s882_s26 + $0xe8] sm:$0xff] %v473_v23  ;;  %v341_v34 = vmul.f32 %v707_v26, %v855_v0  ;;  %v342_v35 = vmul.f32 %v708_v27, %v855_v0  ;;  %v343_v36 = vmul.f32 %v711_v28, %v855_v0  ;;  %v723_v62 = vunpack.c.l.bf16 %v788_v50 }
  0x34   : > { %538 = vst [vmem:[%s882_s26 + $0xf0] sm:$0xff] %v474_v24  ;;  %539 = vst [vmem:[%s882_s26 + $0xf8] sm:$0xff] %v475_v25  ;;  %v344_v37 = vmul.f32 %v712_v29, %v855_v0  ;;  %v345_v38 = vmul.f32 %v715_v30, %v855_v0  ;;  %v346_v39 = vmul.f32 %v716_v31, %v855_v0  ;;  %v724_v63 = vunpack.c.h.bf16 %v788_v50  ;;  %v792_v24 = vld [vmem:[%s850_s18 + $0xc0] sm:$0xff]   ;;  %v793_v25 = vld [vmem:[%s850_s18 + $0xc8] sm:$0xff]  }
  0x35   : > { %v347_v40 = vmul.f32 %v719_v32, %v855_v0  ;;  %v348_v41 = vmul.f32 %v720_v33, %v855_v0  ;;  %v412_v42 = vadd.f32 %v864_v9, %v341_v34  ;;  %v413_v43 = vadd.f32 %v864_v9, %v342_v35  ;;  %v794_v30 = vld [vmem:[%s850_s18 + $0xd0] sm:$0xff]   ;;  %v795_v31 = vld [vmem:[%s850_s18 + $0xd8] sm:$0xff]  }
  0x36   : > { %v414_v44 = vadd.f32 %v864_v9, %v343_v36  ;;  %v415_v45 = vadd.f32 %v864_v9, %v344_v37  ;;  %v416_v46 = vadd.f32 %v864_v9, %v345_v38  ;;  %v417_v47 = vadd.f32 %v864_v9, %v346_v39 }
  0x37   : > { %v418_v48 = vadd.f32 %v864_v9, %v347_v40  ;;  %v419_v49 = vadd.f32 %v864_v9, %v348_v41  ;;  %v476_v52 = vmax.f32 %v412_v42, 0.0  ;;  %v477_v53 = vmax.f32 %v413_v43, 0.0 }
  0x38   : > { %v478_v54 = vmax.f32 %v414_v44, 0.0  ;;  %v479_v55 = vmax.f32 %v415_v45, 0.0  ;;  %v480_v58 = vmax.f32 %v416_v46, 0.0  ;;  %v481_v59 = vmax.f32 %v417_v47, 0.0 }
  0x39   : > { %v482_v60 = vmax.f32 %v418_v48, 0.0  ;;  %v483_v61 = vmax.f32 %v419_v49, 0.0  ;;  %540 = vst [vmem:[%s882_s26 + $0x100] sm:$0xff] %v476_v52  ;;  %541 = vst [vmem:[%s882_s26 + $0x108] sm:$0xff] %v477_v53  ;;  %v727_v1 = vunpack.c.l.bf16 %v789_v51  ;;  %v728_v2 = vunpack.c.h.bf16 %v789_v51 }
  0x3a   : > { %542 = vst [vmem:[%s882_s26 + $0x110] sm:$0xff] %v478_v54  ;;  %543 = vst [vmem:[%s882_s26 + $0x118] sm:$0xff] %v479_v55  ;;  %v731_v3 = vunpack.c.l.bf16 %v790_v56  ;;  %v732_v4 = vunpack.c.h.bf16 %v790_v56  ;;  %v735_v5 = vunpack.c.l.bf16 %v791_v57  ;;  %v736_v6 = vunpack.c.h.bf16 %v791_v57 }
  0x3b   : > { %544 = vst [vmem:[%s882_s26 + $0x120] sm:$0xff] %v480_v58  ;;  %545 = vst [vmem:[%s882_s26 + $0x128] sm:$0xff] %v481_v59  ;;  %v349_v7 = vmul.f32 %v723_v62, %v855_v0  ;;  %v350_v8 = vmul.f32 %v724_v63, %v855_v0  ;;  %v351_v10 = vmul.f32 %v727_v1, %v855_v0  ;;  %v739_v36 = vunpack.c.l.bf16 %v792_v24 }
  0x3c   : > { %546 = vst [vmem:[%s882_s26 + $0x130] sm:$0xff] %v482_v60  ;;  %547 = vst [vmem:[%s882_s26 + $0x138] sm:$0xff] %v483_v61  ;;  %v352_v11 = vmul.f32 %v728_v2, %v855_v0  ;;  %v353_v12 = vmul.f32 %v731_v3, %v855_v0  ;;  %v354_v13 = vmul.f32 %v732_v4, %v855_v0  ;;  %v740_v37 = vunpack.c.h.bf16 %v792_v24  ;;  %v796_v60 = vld [vmem:[%s850_s18 + $0xe0] sm:$0xff]   ;;  %v797_v61 = vld [vmem:[%s850_s18 + $0xe8] sm:$0xff]  }
  0x3d   : > { %v355_v14 = vmul.f32 %v735_v5, %v855_v0  ;;  %v356_v15 = vmul.f32 %v736_v6, %v855_v0  ;;  %v420_v16 = vadd.f32 %v864_v9, %v349_v7  ;;  %v421_v17 = vadd.f32 %v864_v9, %v350_v8  ;;  %v798_v3 = vld [vmem:[%s850_s18 + $0xf0] sm:$0xff]   ;;  %v799_v4 = vld [vmem:[%s850_s18 + $0xf8] sm:$0xff]  }
  0x3e   : > { %v422_v18 = vadd.f32 %v864_v9, %v351_v10  ;;  %v423_v19 = vadd.f32 %v864_v9, %v352_v11  ;;  %v424_v20 = vadd.f32 %v864_v9, %v353_v12  ;;  %v425_v21 = vadd.f32 %v864_v9, %v354_v13 }
  0x3f   : > { %v426_v22 = vadd.f32 %v864_v9, %v355_v14  ;;  %v427_v23 = vadd.f32 %v864_v9, %v356_v15  ;;  %v484_v26 = vmax.f32 %v420_v16, 0.0  ;;  %v485_v27 = vmax.f32 %v421_v17, 0.0 }
  0x40   : > { %v486_v28 = vmax.f32 %v422_v18, 0.0  ;;  %v487_v29 = vmax.f32 %v423_v19, 0.0  ;;  %v488_v32 = vmax.f32 %v424_v20, 0.0  ;;  %v489_v33 = vmax.f32 %v425_v21, 0.0 }
  0x41   : > { %v490_v34 = vmax.f32 %v426_v22, 0.0  ;;  %v491_v35 = vmax.f32 %v427_v23, 0.0  ;;  %548 = vst [vmem:[%s882_s26 + $0x140] sm:$0xff] %v484_v26  ;;  %549 = vst [vmem:[%s882_s26 + $0x148] sm:$0xff] %v485_v27  ;;  %v743_v38 = vunpack.c.l.bf16 %v793_v25  ;;  %v744_v39 = vunpack.c.h.bf16 %v793_v25 }
  0x42   : > { %550 = vst [vmem:[%s882_s26 + $0x150] sm:$0xff] %v486_v28  ;;  %551 = vst [vmem:[%s882_s26 + $0x158] sm:$0xff] %v487_v29  ;;  %v747_v40 = vunpack.c.l.bf16 %v794_v30  ;;  %v748_v41 = vunpack.c.h.bf16 %v794_v30  ;;  %v751_v42 = vunpack.c.l.bf16 %v795_v31  ;;  %v752_v43 = vunpack.c.h.bf16 %v795_v31 }
  0x43   : > { %552 = vst [vmem:[%s882_s26 + $0x160] sm:$0xff] %v488_v32  ;;  %553 = vst [vmem:[%s882_s26 + $0x168] sm:$0xff] %v489_v33  ;;  %v357_v44 = vmul.f32 %v739_v36, %v855_v0  ;;  %v358_v45 = vmul.f32 %v740_v37, %v855_v0  ;;  %v359_v46 = vmul.f32 %v743_v38, %v855_v0  ;;  %v755_v10 = vunpack.c.l.bf16 %v796_v60 }
  0x44   : > { %554 = vst [vmem:[%s882_s26 + $0x170] sm:$0xff] %v490_v34  ;;  %555 = vst [vmem:[%s882_s26 + $0x178] sm:$0xff] %v491_v35  ;;  %v360_v47 = vmul.f32 %v744_v39, %v855_v0  ;;  %v361_v48 = vmul.f32 %v747_v40, %v855_v0  ;;  %v362_v49 = vmul.f32 %v748_v41, %v855_v0  ;;  %v756_v11 = vunpack.c.h.bf16 %v796_v60 }
  0x45   : > { %v363_v50 = vmul.f32 %v751_v42, %v855_v0  ;;  %v364_v51 = vmul.f32 %v752_v43, %v855_v0  ;;  %v428_v52 = vadd.f32 %v864_v9, %v357_v44  ;;  %v429_v53 = vadd.f32 %v864_v9, %v358_v45 }
  0x46   : > { %v430_v54 = vadd.f32 %v864_v9, %v359_v46  ;;  %v431_v55 = vadd.f32 %v864_v9, %v360_v47  ;;  %v432_v56 = vadd.f32 %v864_v9, %v361_v48  ;;  %v433_v57 = vadd.f32 %v864_v9, %v362_v49 }
  0x47   : > { %v434_v58 = vadd.f32 %v864_v9, %v363_v50  ;;  %v435_v59 = vadd.f32 %v864_v9, %v364_v51  ;;  %v492_v62 = vmax.f32 %v428_v52, 0.0  ;;  %v493_v63 = vmax.f32 %v429_v53, 0.0 }
  0x48   : > { %v494_v1 = vmax.f32 %v430_v54, 0.0  ;;  %v495_v2 = vmax.f32 %v431_v55, 0.0  ;;  %v496_v5 = vmax.f32 %v432_v56, 0.0  ;;  %v497_v6 = vmax.f32 %v433_v57, 0.0 }
  0x49   : > { %v498_v7 = vmax.f32 %v434_v58, 0.0  ;;  %v499_v8 = vmax.f32 %v435_v59, 0.0  ;;  %556 = vst [vmem:[%s882_s26 + $0x180] sm:$0xff] %v492_v62  ;;  %557 = vst [vmem:[%s882_s26 + $0x188] sm:$0xff] %v493_v63  ;;  %v759_v12 = vunpack.c.l.bf16 %v797_v61  ;;  %v760_v13 = vunpack.c.h.bf16 %v797_v61 }
  0x4a   : > { %558 = vst [vmem:[%s882_s26 + $0x190] sm:$0xff] %v494_v1  ;;  %559 = vst [vmem:[%s882_s26 + $0x198] sm:$0xff] %v495_v2  ;;  %v763_v14 = vunpack.c.l.bf16 %v798_v3  ;;  %v764_v15 = vunpack.c.h.bf16 %v798_v3  ;;  %v767_v16 = vunpack.c.l.bf16 %v799_v4  ;;  %v768_v17 = vunpack.c.h.bf16 %v799_v4 }
  0x4b   : > { %560 = vst [vmem:[%s882_s26 + $0x1a0] sm:$0xff] %v496_v5  ;;  %561 = vst [vmem:[%s882_s26 + $0x1a8] sm:$0xff] %v497_v6  ;;  %v365_v18 = vmul.f32 %v755_v10, %v855_v0  ;;  %v366_v19 = vmul.f32 %v756_v11, %v855_v0  ;;  %v367_v20 = vmul.f32 %v759_v12, %v855_v0 }
  0x4c   : > { %562 = vst [vmem:[%s882_s26 + $0x1b0] sm:$0xff] %v498_v7  ;;  %563 = vst [vmem:[%s882_s26 + $0x1b8] sm:$0xff] %v499_v8  ;;  %v368_v21 = vmul.f32 %v760_v13, %v855_v0  ;;  %v369_v22 = vmul.f32 %v763_v14, %v855_v0  ;;  %v370_v23 = vmul.f32 %v764_v15, %v855_v0 }
  0x4d   : > { %v371_v24 = vmul.f32 %v767_v16, %v855_v0  ;;  %v372_v25 = vmul.f32 %v768_v17, %v855_v0  ;;  %v436_v26 = vadd.f32 %v864_v9, %v365_v18  ;;  %v437_v27 = vadd.f32 %v864_v9, %v366_v19 }
  0x4e   : > { %v438_v28 = vadd.f32 %v864_v9, %v367_v20  ;;  %v439_v29 = vadd.f32 %v864_v9, %v368_v21  ;;  %v440_v30 = vadd.f32 %v864_v9, %v369_v22  ;;  %v441_v31 = vadd.f32 %v864_v9, %v370_v23 }
  0x4f   : > { %v442_v0 = vadd.f32 %v864_v9, %v371_v24  ;;  %v443_v32 = vadd.f32 %v864_v9, %v372_v25  ;;  %v500_v33 = vmax.f32 %v436_v26, 0.0  ;;  %v501_v34 = vmax.f32 %v437_v27, 0.0 }
  0x50   : > { %v502_v35 = vmax.f32 %v438_v28, 0.0  ;;  %v503_v36 = vmax.f32 %v439_v29, 0.0  ;;  %v504_v37 = vmax.f32 %v440_v30, 0.0  ;;  %v505_v38 = vmax.f32 %v441_v31, 0.0 }
  0x51   : > { %v506_v39 = vmax.f32 %v442_v0, 0.0  ;;  %v507_v40 = vmax.f32 %v443_v32, 0.0  ;;  %564 = vst [vmem:[%s882_s26 + $0x1c0] sm:$0xff] %v500_v33  ;;  %565 = vst [vmem:[%s882_s26 + $0x1c8] sm:$0xff] %v501_v34 }
  0x52   : > { %566 = vst [vmem:[%s882_s26 + $0x1d0] sm:$0xff] %v502_v35  ;;  %567 = vst [vmem:[%s882_s26 + $0x1d8] sm:$0xff] %v503_v36 }
  0x53   : > { %568 = vst [vmem:[%s882_s26 + $0x1e0] sm:$0xff] %v504_v37  ;;  %569 = vst [vmem:[%s882_s26 + $0x1e8] sm:$0xff] %v505_v38 }
  0x54   : > { %570 = vst [vmem:[%s882_s26 + $0x1f0] sm:$0xff] %v506_v39  ;;  %571 = vst [vmem:[%s882_s26 + $0x1f8] sm:$0xff] %v507_v40 }
  0x55 PF: > { %s13_s12 = sadd.s32 1, %s814_s12  }
  0x56   : > { %p10_p4 = scmp.ge.s32.totalorder %s13_s12, 6  }
  0x58   :  { %12 = sbr.rel (!%p10_p4) target bundleno = 1 (0x1), region = 62 }

// kernel: decoder_block_forward.8
= control target key start
LH: loop header
LB: loop body
LE: loop exit
PB: predicated region body
PF: predicated region fallthrough
CT: control target
= control target key end

     0   :  { %s7399_s15 = smov 0   ;;  %s7401_s16 = smov 0   ;;  %s9102_s0 = inlined_call_operand.vmem [shape: bf16[2,18,18,128], index: 0, kind: input, shape index: {}]   ;;  %s9103_s1 = inlined_call_operand.vmem [shape: bf16[4,512,128], index: 1, kind: input, shape index: {}]   ;;  %s9104_s2 = inlined_call_operand.vmem [shape: bf16[4,2,256,128], index: 2, kind: output, shape index: {0}]   ;;  %s9105_s3 = inlined_call_operand.vmem [shape: f32[16,128], index: 3, kind: output, shape index: {1}]   ;;  %s9106_s4 = inlined_call_operand.vmem [shape: f32[16,128], index: 4, kind: output, shape index: {2}]  }
   0x1   :  { %s7403_s17 = smov 0  }
   0x2 LB: > { %s7412_s18 = sadd.s32 4294967295, %s7372_s17   ;;  %s7414_s19 = sadd.s32 1, %s7372_s17   ;;  %s7372_s17 = sphi %s7403_s17, %s9347_s17   ;;  %s7368_s16 = sphi %s7401_s16, %s9346_s16   ;;  %s7364_s15 = sphi %s7399_s15, %s9345_s15  }
   0x3   : > { %s66_s20 = ssub.s32 %s7372_s17, %s7414_s19  ;;  %s69_s21 = sadd.s32 1, %s7368_s16 }
   0x4   : > { %p67_p0 = scmp.eq.s32.totalorder %s66_s20, 0  ;;  %p79_p1 = scmp.ne.s32.totalorder %s7368_s16, %s7364_s15 }
   0x5   : > { %p80_p2 = scmp.eq.s32.totalorder %s7412_s18, 1  ;;  %p5146_p3 = scmp.ge.s32.totalorder %s7372_s17, 1 }
   0x6   : > { %s7422_s22 = scalar_select %p67_p0, %s7368_s16, %s69_s21  }
   0x7   : > { %p7424_p4 = por %p80_p2, %p79_p1  ;;  %p167_p5 = scmp.lt.s32.totalorder %s7372_s17, 3 }
   0x9   : > { %p168_p6 = pnand %p5146_p3, %p167_p5 }
   0xb   : > { %171 = sbr.rel (%p168_p6) target bundleno = 797 (0x31d), region = 28 }
  0x12   : > { %v7169_v0 = vld [vmem:[%s9103_s1 + $0x40] sm:$0xff]   ;;  %v7173_v4 = vld [vmem:[%s9103_s1 + $0x48] sm:$0xff]   ;;  %v7177_v8 = vld [vmem:[%s9103_s1 + $0x50] sm:$0xff]   ;;  %p200_p7 = scmp.lt.s32.totalorder %s7412_s18, 1  ;;  %vm523_vm0 = vsmask.f32 7424 }
  0x13   : > { %v7170_v1 = vld [vmem:[%s9103_s1 + $0xc0] sm:$0xff]   ;;  %6248 = vmatprep.subr.bf16.mxu0 %v7169_v0  ;;  %v7174_v5 = vld [vmem:[%s9103_s1 + $0xc8] sm:$0xff]   ;;  %v7178_v9 = vld [vmem:[%s9103_s1 + $0xd0] sm:$0xff]   ;;  %vm1727_vm1 = vsmask.f32 256  ;;  %vm1745_vm2 = vcmask 1046528  }
  0x14   : > { %v7171_v2 = vld [vmem:[%s9103_s1] sm:$0xff]   ;;  %6360 = vmatprep.subr.bf16.mxu1 %v7170_v1  ;;  %v7175_v6 = vld [vmem:[%s9103_s1 + $0x8] sm:$0xff]   ;;  %v7179_v10 = vld [vmem:[%s9103_s1 + $0x10] sm:$0xff]   ;;  %s7496_s28 = scalar_select %p200_p7, %s7412_s18, 1 }
  0x15   : > { %v7172_v3 = vld [vmem:[%s9103_s1 + $0x80] sm:$0xff]   ;;  %6249 = vmatpush3.bf16.msra.mxu0 %v7171_v2  ;;  %v7176_v7 = vld [vmem:[%s9103_s1 + $0x88] sm:$0xff]   ;;  %v7180_v11 = vld [vmem:[%s9103_s1 + $0x90] sm:$0xff]   ;;  %s185_s14 = sand.u32 1, %s7364_s15  }
  0x16   : > { %6361 = vmatpush3.bf16.msra.mxu1 %v7172_v3  ;;  %6250 = vmatprep.subr.bf16.mxu0 %v7173_v4  ;;  %v7181_v12 = vld [vmem:[%s9103_s1 + $0x58] sm:$0xff]   ;;  %v7185_v16 = vld [vmem:[%s9103_s1 + $0x60] sm:$0xff]   ;;  %v7189_v20 = vld [vmem:[%s9103_s1 + $0x68] sm:$0xff]   ;;  %s7144_s11 = smul.u32 216, %s7496_s28  ;;  %s5147_s17 = sshll.u32 %s185_s14, 9 }
  0x17   : > { %6362 = vmatprep.subr.bf16.mxu1 %v7174_v5  ;;  %v7182_v13 = vld [vmem:[%s9103_s1 + $0xd8] sm:$0xff]   ;;  %v7186_v17 = vld [vmem:[%s9103_s1 + $0xe0] sm:$0xff]   ;;  %v7190_v21 = vld [vmem:[%s9103_s1 + $0xe8] sm:$0xff]   ;;  %s8597_s15 = scalar_lea.vmem [#allocation2], %s5147_s17 }
  0x18   : > { %v7183_v14 = vld [vmem:[%s9103_s1 + $0x18] sm:$0xff]   ;;  %v7187_v18 = vld [vmem:[%s9103_s1 + $0x20] sm:$0xff]   ;;  %v7191_v22 = vld [vmem:[%s9103_s1 + $0x28] sm:$0xff]   ;;  %s7526_s29 = scalar_lea.vmem %s9102_s0, %s7144_s11 }
  0x19   : > { %6251 = vmatpush3.bf16.msra.mxu0 %v7175_v6  ;;  %v7184_v15 = vld [vmem:[%s9103_s1 + $0x98] sm:$0xff]   ;;  %v7188_v19 = vld [vmem:[%s9103_s1 + $0xa0] sm:$0xff]   ;;  %v7192_v23 = vld [vmem:[%s9103_s1 + $0xa8] sm:$0xff]  }
  0x1a   : > { %6363 = vmatpush3.bf16.msra.mxu1 %v7176_v7  ;;  %6252 = vmatprep.subr.bf16.mxu0 %v7177_v8  ;;  %v7193_v24 = vld [vmem:[%s9103_s1 + $0x70] sm:$0xff]   ;;  %v7197_v28 = vld [vmem:[%s9103_s1 + $0x78] sm:$0xff]   ;;  %v7202_v35 = vld [vmem:[%s7526_s29] sm:$0xff]  }
  0x1b   : > { %6364 = vmatprep.subr.bf16.mxu1 %v7178_v9  ;;  %v7194_v25 = vld [vmem:[%s9103_s1 + $0xf0] sm:$0xff]   ;;  %v7198_v29 = vld [vmem:[%s9103_s1 + $0xf8] sm:$0xff]   ;;  %v7205_v36 = vld [vmem:[%s9103_s1 + $0x140] sm:$0xff]   ;;  %v517_v40 = vshrl.u32 %v7202_v35, 16  ;;  %v520_v41 = vshll.u32 %v7202_v35, 16 }
  0x1c   : > { %v7195_v26 = vld [vmem:[%s9103_s1 + $0x30] sm:$0xff]   ;;  %v7199_v30 = vld [vmem:[%s9103_s1 + $0x38] sm:$0xff]   ;;  %v7206_v38 = vld [vmem:[%s9103_s1 + $0x1c0] sm:$0xff]  }
  0x1d   : > { %6253 = vmatpush3.bf16.msra.mxu0 %v7179_v10  ;;  %v7196_v27 = vld [vmem:[%s9103_s1 + $0xb0] sm:$0xff]   ;;  %v7200_v31 = vld [vmem:[%s9103_s1 + $0xb8] sm:$0xff]   ;;  %v7549_v44 = vld [vmem:[%s7526_s29 + $0x8] ss:$0 sps:$4 sm:$0x11]   ;;  %v7555_v47 = vrot.slane %v517_v40, 7 }
  0x1e   : > { %6365 = vmatpush3.bf16.msra.mxu1 %v7180_v11  ;;  %6254 = vmatprep.subr.bf16.mxu0 %v7181_v12  ;;  %v7201_v32 = vld [vmem:[%s7526_s29 + $0xc] sm:$0xff]   ;;  %v7540_v37 = vld [vmem:[%s7526_s29 + $0x14] ss:$0 sps:$4 sm:$0x11]   ;;  %v543_v49 = vrot.slane %v520_v41, 1  ;;  %v9111_v50 = vshll.u32 %v7549_v44, 16 }
  0x1f   : > { %6366 = vmatprep.subr.bf16.mxu1 %v7182_v13  ;;  %v397_v33 = vshrl.u32 %v7201_v32, 16  ;;  %v400_v34 = vshll.u32 %v7201_v32, 16  ;;  %v9113_v43 = vshll.u32 %v7540_v37, 16  ;;  %v7563_v54 = vor.u32 %v520_v41, %v7555_v47  ;;  %v7209_v61 = vld [vmem:[%s7526_s29 + $0x18] sm:$0xff]   ;;  %v7207_v0 = vld [vmem:[%s9103_s1 + $0x100] sm:$0xff]  }
  0x20   : > { %v558_v55 = vshll.u32 %v7555_v47, 16  ;;  %v548_v57 = vrot.slane %v9111_v50, 1  ;;  %v544_v63 = vor.u32 %v543_v49, %v517_v40  ;;  %v7575_v1 = vld [vmem:[%s7526_s29 + $0x24] sm:$0xff]   ;;  %v404_v4 = vshrl.u32 %v7209_v61, 16  ;;  %v7638_v49 = vld [vmem:[%s7526_s29 + $0x3c] sm:$0xff]  }
  0x21   : > { %6255 = vmatpush3.bf16.msra.mxu0 %v7183_v14  ;;  %v7545_v39 = vrot.slane %v397_v33, 7  ;;  %v524_v42 = vrot.slane %v400_v34, 1  ;;  %v529_v48 = vrot.slane %v9113_v43, 1  ;;  %v551_v59 = vshrl.u32 %v7563_v54, 16  ;;  %v7208_v12 = vld [vmem:[%s9103_s1 + $0x180] sm:$0xff]  }
  0x22   : > { %6367 = vmatpush3.bf16.msra.mxu1 %v7184_v15  ;;  %6256 = vmatprep.subr.bf16.mxu0 %v7185_v16  ;;  %v553_v60 = vshll.u32 %v7563_v54, 16  ;;  %v560_v62 = vrot.slane %v558_v55, 1  ;;  %v407_v5 = vshll.u32 %v7209_v61, 16  ;;  %v7578_v6 = vld [vmem:[%s7526_s29 + $0x20] ss:$0 sps:$4 sm:$0x11]   ;;  %v549_v14 = vsel %vm523_vm0, %v544_v63, %v548_v57 }
  0x23   : > { %6368 = vmatprep.subr.bf16.mxu1 %v7186_v17  ;;  %v7552_v45 = vor.u32 %v400_v34, %v7545_v39  ;;  %v539_v46 = vshll.u32 %v7545_v39, 16  ;;  %v525_v56 = vor.u32 %v524_v42, %v397_v33  ;;  %9199 = vst [vmem:[#allocation4_spill] sm:$0xff] %v7578_v6  ;;  %v411_v8 = vshrl.u32 %v7575_v1, 16  ;;  %v7217_v42 = vld [vmem:[%s7526_s29 + $0x30] sm:$0xff]  }
  0x24   : > { %v555_v3 = vrot.slane %v553_v60, 1  ;;  %v414_v9 = vshll.u32 %v7575_v1, 16  ;;  %v7591_v13 = vrot.slane %v404_v4, 7  ;;  %v562_v15 = vrot.slane %v407_v5, 1  ;;  %v7224_v1 = vld [vmem:[%s9103_s1 + $0x190] sm:$0xff]  }
  0x25   : > { %6257 = vmatpush3.bf16.msra.mxu0 %v7187_v18  ;;  %9198 = vst [vmem:[#allocation3_spill] sm:$0xff] %v7552_v45  ;;  %v532_v51 = vshrl.u32 %v7552_v45, 16  ;;  %v534_v52 = vshll.u32 %v7552_v45, 16  ;;  %v541_v53 = vrot.slane %v539_v46, 1  ;;  %v7581_v7 = vsel %vm523_vm0, %v525_v56, %v529_v48 }
  0x26   : > { %6369 = vmatpush3.bf16.msra.mxu1 %v7188_v19  ;;  %6258 = vmatprep.subr.bf16.mxu0 %v7189_v20  ;;  %9200 = vst [vmem:[#allocation5_spill] sm:$0xff] %v7581_v7  ;;  %v556_v11 = vor.u32 %v555_v3, %v551_v59  ;;  %9202 = vst [vmem:[#allocation7_spill] sm:$0xff] %v7591_v13  ;;  %v9110_v16 = vshll.u32 %v7578_v6, 16  ;;  %v7598_v17 = vrot.slane %v411_v8, 7  ;;  %v421_v55 = vshll.u32 %v7217_v42, 16  ;;  %v7221_v59 = vld [vmem:[%s9103_s1 + $0x150] sm:$0xff]  }
  0x27   : > { %6370 = vmatprep.subr.bf16.mxu1 %v7190_v21  ;;  %v536_v58 = vrot.slane %v534_v52, 1  ;;  %v7601_v18 = vld [vmem:[%s7526_s29 + $0x2c] ss:$0 sps:$4 sm:$0x11]   ;;  %v7606_v20 = vor.u32 %v407_v5, %v7591_v13  ;;  %v577_v21 = vshll.u32 %v7591_v13, 16  ;;  %v563_v32 = vor.u32 %v562_v15, %v404_v4 }
  0x28   : > { %9203 = vst [vmem:[#allocation8_spill] sm:$0xff] %v7598_v17  ;;  %9204 = vst [vmem:[#allocation9_spill] sm:$0xff] %v7601_v18  ;;  %v561_v19 = vsel %vm523_vm0, %v556_v11, %v560_v62  ;;  %v9109_v35 = vshll.u32 %v7601_v18, 16  ;;  %v7635_v48 = vld [vmem:[%s7526_s29 + $0x38] ss:$0 sps:$4 sm:$0x11]  }
  0x29   : > { %6259 = vmatpush3.bf16.msra.mxu0 %v7191_v22  ;;  %v537_v2 = vor.u32 %v536_v58, %v532_v51  ;;  %9205 = vst [vmem:[#allocation10_spill] sm:$0xff] %v7606_v20  ;;  %v7213_v22 = vld [vmem:[%s9103_s1 + $0x148] sm:$0xff]   ;;  %1330 = vmatprep.mubr.bf16.mxu1 %v561_v19  ;;  %9207 = vst [vmem:[#allocation12_spill] sm:$0xff] %v7635_v48  ;;  %v425_v57 = vshrl.u32 %v7638_v49, 16  ;;  %v428_v58 = vshll.u32 %v7638_v49, 16  ;;  %v7222_v62 = vld [vmem:[%s9103_s1 + $0x1d0] sm:$0xff]  }
  0x2a   : > { %6371 = vmatpush3.bf16.msra.mxu1 %v7192_v23  ;;  %6260 = vmatprep.subr.bf16.mxu0 %v7193_v24  ;;  %v7613_v23 = vor.u32 %v414_v9, %v7598_v17  ;;  %v596_v24 = vshll.u32 %v7598_v17, 16  ;;  %v586_v3 = vrot.slane %v9109_v35, 1  ;;  %v7689_v15 = vld [vmem:[%s7526_s29 + $0x48] sm:$0xff]   ;;  %v7238_v49 = vld [vmem:[%s9103_s1 + $0x1e0] sm:$0xff]  }
  0x2b   : > { %6372 = vmatprep.subr.bf16.mxu1 %v7194_v25  ;;  %v7586_v10 = vsel %vm523_vm0, %v537_v2, %v541_v53  ;;  %v581_v25 = vrot.slane %v414_v9, 1  ;;  %v418_v53 = vshrl.u32 %v7217_v42, 16  ;;  %v7664_v63 = vrot.slane %v425_v57, 7  ;;  %v7229_v42 = vld [vmem:[%s9103_s1 + $0x158] sm:$0xff]  }
  0x2c   : > { %9201 = vst [vmem:[#allocation6_spill] sm:$0xff] %v7586_v10  ;;  %1169 = vmatprep.mubr.bf16.mxu0 %v7586_v10  ;;  %9206 = vst [vmem:[#allocation11_spill] sm:$0xff] %v7613_v23  ;;  %v589_v33 = vshrl.u32 %v7613_v23, 16  ;;  %v591_v34 = vshll.u32 %v7613_v23, 16  ;;  %v598_v40 = vrot.slane %v596_v24, 1  ;;  %v9108_v9 = vshll.u32 %v7635_v48, 16 }
  0x2d   : > { %6261 = vmatpush3.bf16.msra.mxu0 %v7195_v26  ;;  %v7214_v26 = vld [vmem:[%s9103_s1 + $0x1c8] sm:$0xff]   ;;  %v7655_v61 = vrot.slane %v418_v53, 7  ;;  %9212 = vst [vmem:[#allocation17_spill] sm:$0xff] %v7664_v63  ;;  %v582_v2 = vor.u32 %v581_v25, %v411_v8  ;;  %v7681_v11 = vor.u32 %v428_v58, %v7664_v63  ;;  %v634_v24 = vshll.u32 %v7664_v63, 16  ;;  %v7263_v63 = vld [vmem:[%s9103_s1 + $0x138] sm:$0xff]  }
  0x2e   : > { %6373 = vmatpush3.bf16.msra.mxu1 %v7196_v27  ;;  %6262 = vmatprep.subr.bf16.mxu0 %v7197_v28  ;;  %v7215_v27 = vld [vmem:[%s9103_s1 + $0x108] sm:$0xff]   ;;  %v570_v28 = vshrl.u32 %v7606_v20, 16  ;;  %v593_v41 = vrot.slane %v591_v34, 1  ;;  %v7711_v34 = vld [vmem:[%s7526_s29 + $0x54] sm:$0xff]  }
  0x2f   : > { %6374 = vmatprep.subr.bf16.mxu1 %v7198_v29  ;;  %v572_v29 = vshll.u32 %v7606_v20, 16  ;;  %9211 = vst [vmem:[#allocation16_spill] sm:$0xff] %v7655_v61  ;;  %v7676_v4 = vor.u32 %v421_v55, %v7655_v61  ;;  %v615_v5 = vshll.u32 %v7655_v61, 16  ;;  %9214 = vst [vmem:[#allocation19_spill] sm:$0xff] %v7681_v11  ;;  %v7695_v25 = vsel %vm523_vm0, %v582_v2, %v586_v3  ;;  %v7230_v2 = vld [vmem:[%s9103_s1 + $0x1d8] sm:$0xff]   ;;  %v7268_v20 = vld [vmem:[%s9103_s1 + $0x2c0] sm:$0xff]  }
  0x30   : > { %v594_v52 = vor.u32 %v593_v41, %v589_v33  ;;  %9215 = vst [vmem:[#allocation20_spill] sm:$0xff] %v7695_v25  ;;  %v605_v33 = vrot.slane %v9108_v9, 1  ;;  %v7264_v61 = vld [vmem:[%s9103_s1 + $0x1b8] sm:$0xff]  }
  0x31   : > { %6263 = vmatpush3.bf16.msra.mxu0 %v7199_v30  ;;  %v579_v30 = vrot.slane %v577_v21, 1  ;;  %9213 = vst [vmem:[#allocation18_spill] sm:$0xff] %v7676_v4  ;;  %v608_v8 = vshrl.u32 %v7676_v4, 16  ;;  %v617_v19 = vrot.slane %v615_v5, 1  ;;  %v627_v21 = vshrl.u32 %v7681_v11, 16 }
  0x32   : > { %6375 = vmatpush3.bf16.msra.mxu1 %v7200_v31  ;;  %6472 = vmatprep.subr.bf16.mxu0 %v7205_v36  ;;  %v567_v31 = vrot.slane %v9110_v16, 1  ;;  %v7216_v36 = vld [vmem:[%s9103_s1 + $0x188] sm:$0xff]   ;;  %v7653_v60 = vsel %vm523_vm0, %v594_v52, %v598_v40  ;;  %v636_v40 = vrot.slane %v634_v24, 1  ;;  %v439_v52 = vshrl.u32 %v7711_v34, 16 }
  0x33   : > { %6584 = vmatprep.subr.bf16.mxu1 %v7206_v38  ;;  %v574_v38 = vrot.slane %v572_v29, 1  ;;  %9210 = vst [vmem:[#allocation15_spill] sm:$0xff] %v7653_v60  ;;  %v435_v29 = vshll.u32 %v7689_v15, 16  ;;  %v8051_v13 = vld [vmem:[%s7526_s29 + $0xbc] ss:$0 sps:$4 sm:$0x11]  }
  0x34   : > { %1170 = vmatmul.mubr.bf16.vlgmr.msra.gmra.mrb[0].mxu0 %v7581_v7  ;;  %v7641_v51 = vsel %vm523_vm0, %v563_v32, %v567_v31  ;;  %v7700_v31 = vld [vmem:[%s7526_s29 + $0x44] ss:$0 sps:$4 sm:$0x11]  }
  0x35   : > { %6473 = vmatpush3.bf16.msra.mxu0 %v7207_v0  ;;  %1331 = vmatmul.mubr.bf16.vlgmr.msra.gmra.mrb[0].mxu1 %v549_v14  ;;  %v575_v46 = vor.u32 %v574_v38, %v570_v28  ;;  %9208 = vst [vmem:[#allocation13_spill] sm:$0xff] %v7641_v51  ;;  %v7223_v0 = vld [vmem:[%s9103_s1 + $0x110] sm:$0xff]   ;;  %v600_v14 = vrot.slane %v421_v55, 1  ;;  %9216 = vst [vmem:[#allocation21_spill] sm:$0xff] %v7700_v31  ;;  %v442_v55 = vshll.u32 %v7711_v34, 16  ;;  %v7248_v34 = vld [vmem:[%s9103_s1 + $0x1a8] sm:$0xff]  }
  0x36   : > { %6474 = vmatprep.subr.bf16.mxu0 %v7213_v22  ;;  %6585 = vmatpush3.bf16.msra.mxu1 %v7208_v12  ;;  %v610_v12 = vshll.u32 %v7676_v4, 16  ;;  %v629_v22 = vshll.u32 %v7681_v11, 16  ;;  %v7997_v4 = vld [vmem:[%s7526_s29 + $0xa4] ss:$0 sps:$4 sm:$0x11]  }
  0x37   : > { %1338 = vmatprep.mubr.bf16.mxu1 %v7586_v10  ;;  %6586 = vmatprep.subr.bf16.mxu1 %v7214_v26  ;;  %v7644_v56 = vsel %vm523_vm0, %v575_v46, %v579_v30  ;;  %v601_v38 = vor.u32 %v600_v14, %v418_v53  ;;  %v9107_v53 = vshll.u32 %v7700_v31, 16 }
  0x38   : > { %9209 = vst [vmem:[#allocation14_spill] sm:$0xff] %v7644_v56  ;;  %1177 = vmatprep.mubr.bf16.mxu0 %v7644_v56  ;;  %v612_v26 = vrot.slane %v610_v12, 1  ;;  %v631_v28 = vrot.slane %v629_v22, 1  ;;  %v7760_v22 = vld [vmem:[%s7526_s29 + $0x60] sm:$0xff]  }
  0x39   : > { %6475 = vmatpush3.bf16.msra.mxu0 %v7215_v27  ;;  %v432_v27 = vshrl.u32 %v7689_v15, 16  ;;  %v7736_v3 = vsel %vm523_vm0, %v601_v38, %v605_v33 }
  0x3a   : > { %6587 = vmatpush3.bf16.msra.mxu1 %v7216_v36  ;;  %6476 = vmatprep.subr.bf16.mxu0 %v7221_v59  ;;  %v613_v30 = vor.u32 %v612_v26, %v608_v8  ;;  %v632_v46 = vor.u32 %v631_v28, %v627_v21  ;;  %9218 = vst [vmem:[#allocation23_spill] sm:$0xff] %v7736_v3  ;;  %v7757_v21 = vld [vmem:[%s7526_s29 + $0x50] ss:$0 sps:$4 sm:$0x11]   ;;  %v624_v26 = vrot.slane %v9107_v53, 1 }
  0x3b   : > { %6588 = vmatprep.subr.bf16.mxu1 %v7222_v62  ;;  %v7704_v32 = vrot.slane %v432_v27, 7  ;;  %v619_v62 = vrot.slane %v428_v58, 1  ;;  %v7231_v58 = vld [vmem:[%s9103_s1 + $0x118] sm:$0xff]  }
  0x3c   : > { %1178 = vmatmul.mubr.bf16.gmra.mrb[4].mxu0 %v7641_v51  ;;  %v7714_v36 = vsel %vm523_vm0, %v613_v30, %v617_v19  ;;  %v7232_v19 = vld [vmem:[%s9103_s1 + $0x198] sm:$0xff]   ;;  %v7769_v30 = vld [vmem:[%s7526_s29 + $0x6c] sm:$0xff]  }
  0x3d   : > { %1339 = vmatmul.mubr.bf16.gmra.mrb[4].mxu1 %v7581_v7  ;;  %1185 = vmatprep.mubr.bf16.mxu0 %v7653_v60  ;;  %9217 = vst [vmem:[#allocation22_spill] sm:$0xff] %v7714_v36  ;;  %v7718_v41 = vor.u32 %v435_v29, %v7704_v32  ;;  %v653_v5 = vshll.u32 %v7704_v32, 16  ;;  %v620_v24 = vor.u32 %v619_v62, %v425_v57  ;;  %v638_v57 = vrot.slane %v435_v29, 1  ;;  %v7239_v62 = vld [vmem:[%s9103_s1 + $0x120] sm:$0xff]  }
  0x3e   : > { %1346 = vmatprep.mubr.bf16.mxu1 %v7644_v56  ;;  %6477 = vmatpush3.bf16.msra.mxu0 %v7223_v0  ;;  %v7730_v0 = vrot.slane %v439_v52, 7  ;;  %v7240_v29 = vld [vmem:[%s9103_s1 + $0x1a0] sm:$0xff]  }
  0x3f   : > { %6589 = vmatpush3.bf16.msra.mxu1 %v7224_v1  ;;  %v648_v59 = vshll.u32 %v7718_v41, 16  ;;  %6478 = vmatprep.subr.bf16.mxu0 %v7229_v42  ;;  %v7743_v1 = vsel %vm523_vm0, %v632_v46, %v636_v40  ;;  %v646_v8 = vshrl.u32 %v7718_v41, 16  ;;  %v655_v28 = vrot.slane %v653_v5, 1  ;;  %v7237_v46 = vld [vmem:[%s9103_s1 + $0x160] sm:$0xff]  }
  0x40   : > { %9219 = vst [vmem:[#allocation24_spill] sm:$0xff] %v7743_v1  ;;  %v7749_v14 = vor.u32 %v442_v55, %v7730_v0  ;;  %6590 = vmatprep.subr.bf16.mxu1 %v7230_v2  ;;  %v9115_v40 = vshrl.u32 %v7760_v22, 16  ;;  %v9117_v42 = vshll.u32 %v7760_v22, 16  ;;  %v7788_v2 = vsel %vm523_vm0, %v620_v24, %v624_v26 }
  0x41   : > { %v650_v12 = vrot.slane %v648_v59, 1  ;;  %9220 = vst [vmem:[#allocation25_spill] sm:$0xff] %v7788_v2  ;;  %v9112_v5 = vshll.u32 %v7757_v21, 16  ;;  %v639_v26 = vor.u32 %v638_v57, %v432_v27  ;;  %v7823_v27 = vld [vmem:[%s7526_s29 + $0x78] sm:$0xff]  }
  0x42   : > { %6479 = vmatpush3.bf16.msra.mxu0 %v7231_v58  ;;  %v667_v38 = vshll.u32 %v7749_v14, 16  ;;  %v7782_v59 = vrot.slane %v9115_v40, 7  ;;  %v672_v58 = vshll.u32 %v7730_v0, 16  ;;  %9222 = vst [vmem:[#allocation27_spill] sm:$0xff] %v7823_v27 }
  0x43   : > { %v651_v33 = vor.u32 %v650_v12, %v646_v8  ;;  %6591 = vmatpush3.bf16.msra.mxu1 %v7232_v19  ;;  %6480 = vmatprep.subr.bf16.mxu0 %v7237_v46  ;;  %v9114_v8 = vshrl.u32 %v7769_v30, 16  ;;  %v665_v19 = vshrl.u32 %v7749_v14, 16 }
  0x44   : > { %1186 = vmatmul.mubr.bf16.gmra.mrb[8].mxu0 %v7695_v25  ;;  %6592 = vmatprep.subr.bf16.mxu1 %v7238_v49  ;;  %v669_v46 = vrot.slane %v667_v38, 1  ;;  %v7803_v24 = vor.u32 %v9117_v42, %v7782_v59  ;;  %v674_v38 = vrot.slane %v672_v58, 1  ;;  %v691_v53 = vshll.u32 %v7782_v59, 16 }
  0x45   : > { %1347 = vmatmul.mubr.bf16.gmra.mrb[8].mxu1 %v7641_v51  ;;  %1193 = vmatprep.mubr.bf16.mxu0 %v7714_v36  ;;  %v7797_v12 = vsel %vm523_vm0, %v651_v33, %v655_v28  ;;  %v7810_v28 = vld [vmem:[%s7526_s29 + $0x5c] ss:$0 sps:$4 sm:$0x11]   ;;  %v643_v33 = vrot.slane %v9112_v5, 1  ;;  %v7818_v49 = vrot.slane %v9114_v8, 7  ;;  %v657_v58 = vrot.slane %v442_v55, 1 }
  0x46   : > { %1354 = vmatprep.mubr.bf16.mxu1 %v7653_v60  ;;  %9221 = vst [vmem:[#allocation26_spill] sm:$0xff] %v7797_v12  ;;  %6481 = vmatpush3.bf16.msra.mxu0 %v7239_v62  ;;  %v456_v62 = vshll.u32 %v7769_v30, 16  ;;  %v686_v15 = vshll.u32 %v7803_v24, 16  ;;  %v9116_v57 = vshll.u32 %v7810_v28, 16  ;;  %v684_v35 = vshrl.u32 %v7803_v24, 16  ;;  %v7246_v55 = vld [vmem:[%s9103_s1 + $0x1e8] sm:$0xff]  }
  0x47   : > { %6593 = vmatpush3.bf16.msra.mxu1 %v7240_v29  ;;  %v670_v29 = vor.u32 %v669_v46, %v665_v19  ;;  %v7828_v9 = vsel %vm523_vm0, %v639_v26, %v643_v33  ;;  %v7245_v19 = vld [vmem:[%s9103_s1 + $0x168] sm:$0xff]   ;;  %v9118_v5 = vshrl.u32 %v7823_v27, 16  ;;  %v693_v43 = vrot.slane %v691_v53, 1 }
  0x48   : > { %9223 = vst [vmem:[#allocation28_spill] sm:$0xff] %v7828_v9  ;;  %v7834_v16 = vor.u32 %v456_v62, %v7818_v49  ;;  %v688_v50 = vrot.slane %v686_v15, 1  ;;  %v7844_v26 = vld [vmem:[%s7526_s29 + $0x68] ss:$0 sps:$4 sm:$0x11]   ;;  %6482 = vmatprep.subr.bf16.mxu0 %v7245_v19  ;;  %v662_v33 = vrot.slane %v9116_v57, 1  ;;  %6594 = vmatprep.subr.bf16.mxu1 %v7246_v55 }
  0x49   : > { %v7840_v46 = vsel %vm523_vm0, %v670_v29, %v674_v38  ;;  %v7854_v38 = vld [vmem:[%s7526_s29 + $0x84] sm:$0xff]   ;;  %v658_v29 = vor.u32 %v657_v58, %v439_v52  ;;  %v463_v19 = vshll.u32 %v7823_v27, 16  ;;  %v7864_v40 = vrot.slane %v9118_v5, 7  ;;  %v7880_v58 = vld [vmem:[%s7526_s29 + $0x74] ss:$0 sps:$4 sm:$0x11]  }
  0x4a   : > { %9224 = vst [vmem:[#allocation29_spill] sm:$0xff] %v7840_v46  ;;  %9225 = vst [vmem:[#allocation30_spill] sm:$0xff] %v7854_v38  ;;  %v705_v15 = vshll.u32 %v7834_v16, 16  ;;  %v689_v8 = vor.u32 %v688_v50, %v684_v35  ;;  %v7247_v53 = vld [vmem:[%s9103_s1 + $0x128] sm:$0xff]   ;;  %v710_v42 = vshll.u32 %v7818_v49, 16  ;;  %v9227_v35 = vshll.u32 %v7760_v22, 16 }
  0x4b   : > { %6483 = vmatpush3.bf16.msra.mxu0 %v7247_v53  ;;  %v7875_v50 = vsel %vm523_vm0, %v658_v29, %v662_v33  ;;  %v9129_v55 = vshrl.u32 %v7854_v38, 16  ;;  %v703_v53 = vshrl.u32 %v7834_v16, 16  ;;  %6595 = vmatpush3.bf16.msra.mxu1 %v7248_v34  ;;  %v9229_v33 = vshll.u32 %v7844_v26, 16 }
  0x4c   : > { %1194 = vmatmul.mubr.bf16.gmra.mrb[12].mxu0 %v7736_v3  ;;  %9226 = vst [vmem:[#allocation31_spill] sm:$0xff] %v7875_v50  ;;  %v676_v52 = vrot.slane %v9227_v35, 1  ;;  %v7884_v5 = vsel %vm523_vm0, %v689_v8, %v693_v43  ;;  %v707_v57 = vrot.slane %v705_v15, 1  ;;  %v712_v35 = vrot.slane %v710_v42, 1 }
  0x4d   : > { %1355 = vmatmul.mubr.bf16.gmra.mrb[12].mxu1 %v7695_v25  ;;  %1201 = vmatprep.mubr.bf16.mxu0 %v7743_v1  ;;  %9228 = vst [vmem:[#allocation32_spill] sm:$0xff] %v7884_v5  ;;  %v681_v29 = vrot.slane %v9229_v33, 1  ;;  %v470_v43 = vshll.u32 %v7854_v38, 16  ;;  %v9230_v8 = vshrl.u32 %v7760_v22, 16  ;;  %v7901_v34 = vrot.slane %v9129_v55, 7  ;;  %v7256_v25 = vld [vmem:[%s9103_s1 + $0x1b0] sm:$0xff]  }
  0x4e   : > { %1362 = vmatprep.mubr.bf16.mxu1 %v7714_v36  ;;  %v7908_v42 = vld [vmem:[%s7526_s29 + $0x80] ss:$0 sps:$4 sm:$0x11]   ;;  %v7922_v55 = vld [vmem:[%s7526_s29 + $0x8c] ss:$0 sps:$4 sm:$0x11]  }
  0x4f   : > { %v677_v15 = vor.u32 %v676_v52, %v9230_v8  ;;  %v7255_v8 = vld [vmem:[%s9103_s1 + $0x130] sm:$0xff]   ;;  %v7928_v36 = vor.u32 %v470_v43, %v7901_v34  ;;  %v7948_v51 = vrot.slane %v470_v43, 1 }
  0x51   : > { %9232 = vst [vmem:[#allocation34_spill] sm:$0xff] %v7928_v36  ;;  %v741_v56 = vshrl.u32 %v7928_v36, 16 }
  0x54   : > { %1202 = vmatmul.mubr.bf16.gmra.mrb[16].mxu0 %v7788_v2 }
  0x55   : > { %1363 = vmatmul.mubr.bf16.gmra.mrb[16].mxu1 %v7736_v3  ;;  %1209 = vmatprep.mubr.bf16.mxu0 %v7797_v12  ;;  %v7925_v3 = vsel %vm523_vm0, %v677_v15, %v681_v29  ;;  %v7940_v29 = vld [vmem:[%s7526_s29 + $0x9c] sm:$0xff]   ;;  %v9234_v15 = vshll.u32 %v7880_v58, 16 }
  0x56   : > { %1370 = vmatprep.mubr.bf16.mxu1 %v7743_v1  ;;  %v7253_v1 = vld [vmem:[%s9103_s1 + $0x170] sm:$0xff]   ;;  %9231 = vst [vmem:[#allocation33_spill] sm:$0xff] %v7925_v3  ;;  %v484_v10 = vshll.u32 %v7940_v29, 16 }
  0x57   : > { %6484 = vmatprep.subr.bf16.mxu0 %v7253_v1  ;;  %v700_v7 = vrot.slane %v9234_v15, 1  ;;  %v748_v15 = vshll.u32 %v7901_v34, 16 }
  0x58   : > { %6485 = vmatpush3.bf16.msra.mxu0 %v7255_v8  ;;  %v9235_v8 = vshrl.u32 %v7769_v30, 16 }
  0x5c   : > { %1210 = vmatmul.mubr.bf16.gmra.mrb[20].mxu0 %v7828_v9 }
  0x5d   : > { %1371 = vmatmul.mubr.bf16.gmra.mrb[20].mxu1 %v7788_v2  ;;  %1217 = vmatprep.mubr.bf16.mxu0 %v7840_v46  ;;  %v7904_v2 = vld [vmem:[%s7526_s29 + $0x90] sm:$0xff]  }
  0x5e   : > { %1378 = vmatprep.mubr.bf16.mxu1 %v7797_v12  ;;  %v7888_v12 = vor.u32 %v463_v19, %v7864_v40  ;;  %v477_v43 = vshll.u32 %v7904_v2, 16 }
  0x60   : > { %v724_v33 = vshll.u32 %v7888_v12, 16  ;;  %v722_v60 = vshrl.u32 %v7888_v12, 16  ;;  %v752_v48 = vrot.slane %v477_v43, 1 }
  0x62   : > { %v726_v1 = vrot.slane %v724_v33, 1  ;;  %v7261_v33 = vld [vmem:[%s9103_s1 + $0x178] sm:$0xff]  }
  0x63   : > { %6486 = vmatprep.subr.bf16.mxu0 %v7261_v33 }
  0x64   : > { %1218 = vmatmul.mubr.bf16.gmra.mrb[24].mxu0 %v7875_v50 }
  0x65   : > { %1379 = vmatmul.mubr.bf16.gmra.mrb[24].mxu1 %v7828_v9  ;;  %1225 = vmatprep.mubr.bf16.mxu0 %v7884_v5  ;;  %v708_v9 = vor.u32 %v707_v57, %v703_v53  ;;  %v695_v57 = vrot.slane %v456_v62, 1  ;;  %v729_v53 = vshll.u32 %v7864_v40, 16 }
  0x66   : > { %1386 = vmatprep.mubr.bf16.mxu1 %v7840_v46  ;;  %v7254_v46 = vld [vmem:[%s9103_s1 + $0x1f0] sm:$0xff]   ;;  %6487 = vmatpush3.bf16.msra.mxu0 %v7263_v63  ;;  %v9244_v63 = vshrl.u32 %v7823_v27, 16 }
  0x67   : > { %6596 = vmatprep.subr.bf16.mxu1 %v7254_v46  ;;  %v7935_v62 = vsel %vm523_vm0, %v708_v9, %v712_v35  ;;  %v9149_v46 = vshll.u32 %v7908_v42, 16  ;;  %v696_v52 = vor.u32 %v695_v57, %v9235_v8  ;;  %v731_v9 = vrot.slane %v729_v53, 1 }
  0x68   : > { %9233 = vst [vmem:[#allocation35_spill] sm:$0xff] %v7935_v62  ;;  %6597 = vmatpush3.bf16.msra.mxu1 %v7256_v25  ;;  %v714_v35 = vrot.slane %v463_v19, 1  ;;  %v743_v25 = vshll.u32 %v7928_v36, 16  ;;  %v9236_v57 = vshrl.u32 %v7904_v2, 16  ;;  %v727_v53 = vor.u32 %v726_v1, %v722_v60  ;;  %v7980_v1 = vld [vmem:[%s7526_s29 + $0xb4] sm:$0xff]  }
  0x69   : > { %v719_v8 = vrot.slane %v9149_v46, 1  ;;  %v7974_v11 = vsel %vm523_vm0, %v696_v52, %v700_v7  ;;  %v7977_v60 = vld [vmem:[%s7526_s29 + $0x98] ss:$0 sps:$4 sm:$0x11]   ;;  %9239 = vst [vmem:[#allocation38_spill] sm:$0xff] %v7980_v1  ;;  %v9242_v7 = vshrl.u32 %v7940_v29, 16 }
  0x6a   : > { %v7959_v19 = vrot.slane %v9236_v57, 7  ;;  %v7971_v57 = vld [vmem:[%s7526_s29 + $0xa8] sm:$0xff]   ;;  %9238 = vst [vmem:[#allocation37_spill] sm:$0xff] %v7974_v11  ;;  %v745_v46 = vrot.slane %v743_v25, 1  ;;  %v7990_v31 = vsel %vm523_vm0, %v727_v53, %v731_v9 }
  0x6b   : > { %9237 = vst [vmem:[#allocation36_spill] sm:$0xff] %v7971_v57  ;;  %9241 = vst [vmem:[#allocation40_spill] sm:$0xff] %v7990_v31  ;;  %v7994_v52 = vrot.slane %v9242_v7, 7  ;;  %v9245_v7 = vshrl.u32 %v7971_v57, 16 }
  0x6c   : > { %1226 = vmatmul.mubr.bf16.gmra.mrb[28].mxu0 %v7925_v3  ;;  %v7983_v33 = vor.u32 %v477_v43, %v7959_v19  ;;  %v746_v9 = vor.u32 %v745_v46, %v741_v56  ;;  %v767_v23 = vshll.u32 %v7959_v19, 16  ;;  %v7267_v56 = vld [vmem:[%s9103_s1 + $0x240] sm:$0xff]   ;;  %v9246_v46 = vshrl.u32 %v7980_v1, 16 }
  0x6d   : > { %1387 = vmatmul.mubr.bf16.gmra.mrb[28].mxu1 %v7875_v50  ;;  %1233 = vmatprep.mubr.bf16.mxu0 %v7935_v62  ;;  %v750_v50 = vrot.slane %v748_v15, 1  ;;  %v8019_v17 = vor.u32 %v484_v10, %v7994_v52  ;;  %v786_v18 = vshll.u32 %v7994_v52, 16 }
  0x6e   : > { %1394 = vmatprep.mubr.bf16.mxu1 %v7884_v5  ;;  %v7262_v5 = vld [vmem:[%s9103_s1 + $0x1f8] sm:$0xff]   ;;  %9240 = vst [vmem:[#allocation39_spill] sm:$0xff] %v7983_v33  ;;  %v762_v15 = vshll.u32 %v7983_v33, 16  ;;  %v8035_v43 = vrot.slane %v9246_v46, 7  ;;  %6696 = vmatprep.subr.bf16.mxu0 %v7267_v56  ;;  %v771_v56 = vrot.slane %v484_v10, 1 }
  0x6f   : > { %6598 = vmatprep.subr.bf16.mxu1 %v7262_v5  ;;  %v9243_v5 = vshll.u32 %v7922_v55, 16  ;;  %v8047_v45 = vsel %vm523_vm0, %v746_v9, %v750_v50  ;;  %v781_v46 = vshll.u32 %v8019_v17, 16  ;;  %v9249_v50 = vshrl.u32 %v7854_v38, 16 }
  0x70   : > { %6599 = vmatpush3.bf16.msra.mxu1 %v7264_v61  ;;  %9247 = vst [vmem:[#allocation41_spill] sm:$0xff] %v8035_v43  ;;  %v764_v53 = vrot.slane %v762_v15, 1  ;;  %v769_v15 = vrot.slane %v767_v23, 1  ;;  %v788_v38 = vrot.slane %v786_v18, 1 }
  0x71   : > { %v8001_v25 = vrot.slane %v9243_v5, 1  ;;  %v715_v5 = vor.u32 %v714_v35, %v9244_v63  ;;  %v8028_v35 = vld [vmem:[%s7526_s29 + $0xb0] ss:$0 sps:$4 sm:$0x11]   ;;  %v498_v63 = vshll.u32 %v7980_v1, 16  ;;  %6808 = vmatprep.subr.bf16.mxu1 %v7268_v20  ;;  %v734_v9 = vor.u32 %v7948_v51, %v9249_v50 }
  0x72   : > { %v9250_v1 = vshll.u32 %v7997_v4, 16  ;;  %v9252_v36 = vshll.u32 %v8028_v35, 16 }
  0x73   : > { %v8039_v61 = vsel %vm523_vm0, %v715_v5, %v719_v8  ;;  %v9248_v8 = vshll.u32 %v7977_v60, 16 }
  0x74   : > { %1234 = vmatmul.mubr.bf16.gmra.mrb[32].mxu0 %v7974_v11  ;;  %v8081_v27 = vrot.slane %v9252_v36, 1 }
  0x75   : > { %1395 = vmatmul.mubr.bf16.gmra.mrb[32].mxu1 %v7925_v3  ;;  %1241 = vmatprep.mubr.bf16.mxu0 %v7990_v31  ;;  %v8024_v3 = vrot.slane %v9245_v7, 7  ;;  %v760_v7 = vshrl.u32 %v7983_v33, 16  ;;  %v757_v5 = vrot.slane %v9248_v8, 1  ;;  %v8066_v33 = vrot.slane %v9250_v1, 1 }
  0x76   : > { %1402 = vmatprep.mubr.bf16.mxu1 %v7935_v62  ;;  %v491_v62 = vshll.u32 %v7971_v57, 16  ;;  %v8069_v8 = vor.u32 %v498_v63, %v8035_v43  ;;  %v783_v57 = vrot.slane %v781_v46, 1  ;;  %v824_v1 = vshll.u32 %v8035_v43, 16 }
  0x77   : > { %9251 = vst [vmem:[#allocation42_spill] sm:$0xff] %v8066_v33  ;;  %v765_v20 = vor.u32 %v764_v53, %v760_v7  ;;  %v805_v10 = vshll.u32 %v8024_v3, 16  ;;  %v8083_v33 = vrot.slane %v498_v63, 1  ;;  %v9254_v53 = vshrl.u32 %v7904_v2, 16 }
  0x78   : > { %v8056_v6 = vor.u32 %v491_v62, %v8024_v3  ;;  %v8075_v51 = vrot.slane %v491_v62, 1  ;;  %v819_v7 = vshll.u32 %v8069_v8, 16  ;;  %v8090_v62 = vld [vmem:[%s7526_s29 + $0xc0] sm:$0xff]   ;;  %v8094_v46 = vsel %vm523_vm0, %v734_v9, %v8001_v25  ;;  %v8116_v9 = vld [vmem:[%s7526_s29 + $0xc8] ss:$0 sps:$4 sm:$0x11]  }
  0x79   : > { %9253 = vst [vmem:[#allocation43_spill] sm:$0xff] %v8083_v33  ;;  %v753_v18 = vor.u32 %v752_v48, %v9254_v53  ;;  %v8097_v36 = vsel %vm523_vm0, %v765_v20, %v769_v15  ;;  %v8100_v23 = vrot.slane %v805_v10, 1  ;;  %v8103_v53 = vrot.slane %v824_v1, 1 }
  0x7a   : > { %v800_v50 = vshll.u32 %v8056_v6, 16  ;;  %v798_v63 = vshrl.u32 %v8056_v6, 16  ;;  %v9255_v43 = vshll.u32 %v8051_v13, 16  ;;  %v9256_v20 = vshll.u32 %v7540_v37, 16 }
  0x7b   : > { %v8112_v25 = vsel %vm523_vm0, %v753_v18, %v757_v5  ;;  %v505_v1 = vshll.u32 %v8090_v62, 16  ;;  %v9257_v5 = vshll.u32 %v7757_v21, 16  ;;  %v9258_v18 = vshll.u32 %v7810_v28, 16 }
  0x7c   : > { %1242 = vmatmul.mubr.bf16.gmra.mrb[36].mxu0 %v8039_v61  ;;  %v8107_v33 = vrot.slane %v9255_v43, 1  ;;  %v8122_v10 = vsel %vm1727_vm1, %v7545_v39, %v9256_v20  ;;  %v8126_v43 = vrot.slane %v819_v7, 1  ;;  %v9259_v20 = vshll.u32 %v7844_v26, 16 }
  0x7d   : > { %1403 = vmatmul.mubr.bf16.gmra.mrb[36].mxu1 %v7974_v11  ;;  %1249 = vmatprep.mubr.bf16.mxu0 %v8047_v45  ;;  %v779_v11 = vshrl.u32 %v8019_v17, 16  ;;  %v1734_v37 = vsel %vm1727_vm1, %v7730_v0, %v9258_v18  ;;  %v9260_v7 = vshll.u32 %v7880_v58, 16  ;;  %v9261_v21 = vshll.u32 %v7908_v42, 16 }
  0x7e   : > { %1410 = vmatprep.mubr.bf16.mxu1 %v7990_v31  ;;  %v802_v31 = vrot.slane %v800_v50, 1  ;;  %v1733_v50 = vsel %vm1727_vm1, %v7704_v32, %v9257_v5  ;;  %v1735_v48 = vsel %vm1727_vm1, %v7782_v59, %v9259_v20  ;;  %v9262_v0 = vshll.u32 %v7549_v44, 16 }
  0x7f   : > { %v784_v39 = vor.u32 %v783_v57, %v779_v11  ;;  %v1736_v15 = vsel %vm1727_vm1, %v7818_v49, %v9260_v7  ;;  %v1737_v32 = vsel %vm1727_vm1, %v7864_v40, %v9261_v21  ;;  %v1785_v59 = vrot.slane %v7718_v41, 1 }
  0x80   : > { %v8154_v11 = vsel %vm1727_vm1, %v7555_v47, %v9262_v0  ;;  %v1786_v57 = vrot.slane %v1733_v50, 1  ;;  %v9263_v5 = vshrl.u32 %v8090_v62, 16  ;;  %v1791_v20 = vrot.slane %v7749_v14, 1 }
  0x81   : > { %v1792_v40 = vrot.slane %v1734_v37, 1  ;;  %v8163_v7 = vrot.slane %v505_v1, 1  ;;  %v9264_v47 = vshll.u32 %v7922_v55, 16  ;;  %v9265_v50 = vshll.u32 %v7977_v60, 16 }
  0x82   : > { %v8159_v18 = vrot.slane %v9263_v5, 7  ;;  %v8166_v44 = vsel %vm1745_vm2, %v1785_v59, %v1786_v57  ;;  %v8179_v0 = vsel %vm523_vm0, %v784_v39, %v788_v38  ;;  %v831_v14 = vshll.u32 %v8116_v9, 16 }
  0x83   : > { %v1738_v41 = vsel %vm1727_vm1, %v7901_v34, %v9264_v47  ;;  %v8176_v21 = vsel %vm1727_vm1, %v7959_v19, %v9265_v50  ;;  %v8183_v37 = vsel %vm1745_vm2, %v1791_v20, %v1792_v40  ;;  %v1797_v59 = vrot.slane %v7803_v24, 1  ;;  %v8202_v50 = vld [vmem:[%s7526_s29 + $0xc] sm:$0xff]  }
  0x84   : > { %1250 = vmatmul.mubr.bf16.gmra.mrb[40].mxu0 %v8094_v46  ;;  %v9266_v57 = vshrl.u32 %v7940_v29, 16  ;;  %v1798_v47 = vrot.slane %v1735_v48, 1  ;;  %v1794_v38 = vrot.slane %v7760_v22, 1  ;;  %v1795_v19 = vrot.slane %v7844_v26, 1 }
  0x85   : > { %1411 = vmatmul.mubr.bf16.gmra.mrb[40].mxu1 %v8039_v61  ;;  %1257 = vmatprep.mubr.bf16.mxu0 %v8097_v36  ;;  %v1803_v39 = vrot.slane %v7834_v16, 1  ;;  %v1804_v20 = vrot.slane %v1736_v15, 1  ;;  %v803_v24 = vor.u32 %v802_v31, %v798_v63  ;;  %v1800_v48 = vrot.slane %v7769_v30, 1  ;;  %v8213_v31 = vld [vmem:[%s7526_s29 + $0x14] ss:$0 sps:$4 sm:$0x11]  }
  0x86   : > { %1418 = vmatprep.mubr.bf16.mxu1 %v8047_v45  ;;  %v772_v34 = vor.u32 %v771_v56, %v9266_v57  ;;  %v8197_v56 = vsel %vm1745_vm2, %v1797_v59, %v1798_v47  ;;  %v1801_v40 = vrot.slane %v7880_v58, 1  ;;  %v8206_v26 = vsel %vm1745_vm2, %v1794_v38, %v1795_v19  ;;  %v9268_v47 = vld [vmem:[#allocation42_spill] sm:$0xff] }
  0x87   : > { %v8209_v16 = vsel %vm1745_vm2, %v1803_v39, %v1804_v20  ;;  %v1809_v15 = vrot.slane %v7888_v12, 1  ;;  %v1810_v58 = vrot.slane %v1737_v32, 1  ;;  %v9267_v59 = vshll.u32 %v7997_v4, 16  ;;  %v9269_v39 = vld [vmem:[#allocation27_spill] sm:$0xff]  ;;  %v9273_v63 = vld [vmem:[#allocation30_spill] sm:$0xff] }
  0x88   : > { %v8217_v30 = vsel %vm1745_vm2, %v1800_v48, %v1801_v40  ;;  %v8225_v38 = vsel %vm523_vm0, %v772_v34, %v9268_v47  ;;  %v8228_v12 = vor.u32 %v505_v1, %v8159_v18  ;;  %v843_v19 = vshll.u32 %v8159_v18, 16  ;;  %v9270_v40 = vld [vmem:[#allocation34_spill] sm:$0xff] }
  0x89   : > { %v1740_v57 = vsel %vm1727_vm1, %v7994_v52, %v9267_v59  ;;  %v1806_v20 = vrot.slane %v9269_v39, 1  ;;  %v8233_v48 = vsel %vm1745_vm2, %v1809_v15, %v1810_v58  ;;  %v1807_v32 = vrot.slane %v7908_v42, 1  ;;  %v9271_v59 = vld [vmem:[#allocation36_spill] sm:$0xff]  ;;  %v8249_v42 = vld [vmem:[%s7526_s29] sm:$0xff]  }
  0x8a   : > { %v1815_v22 = vrot.slane %v9270_v40, 1  ;;  %v1816_v52 = vrot.slane %v1738_v41, 1  ;;  %v8239_v34 = vsel %vm523_vm0, %v803_v24, %v8100_v23  ;;  %v9272_v1 = vshrl.u32 %v9271_v59, 16 }
  0x8b   : > { %v1812_v49 = vrot.slane %v9273_v63, 1  ;;  %v1813_v39 = vrot.slane %v7922_v55, 1  ;;  %v833_v15 = vrot.slane %v831_v14, 1  ;;  %v8253_v41 = vsel %vm1745_vm2, %v1806_v20, %v1807_v32  ;;  %v8265_v63 = vld [vmem:[%s7526_s29 + $0x8] ss:$0 sps:$4 sm:$0x11]  }
  0x8c   : > { %1258 = vmatmul.mubr.bf16.gmra.mrb[44].mxu0 %v8112_v25  ;;  %v791_v47 = vor.u32 %v8075_v51, %v9272_v1  ;;  %v8256_v23 = vsel %vm1745_vm2, %v1815_v22, %v1816_v52  ;;  %v9275_v51 = vshrl.u32 %v8069_v8, 16  ;;  %v836_v24 = vshrl.u32 %v8228_v12, 16  ;;  %v9277_v52 = vld [vmem:[#allocation39_spill] sm:$0xff] }
  0x8d   : > { %1419 = vmatmul.mubr.bf16.gmra.mrb[44].mxu1 %v8094_v46  ;;  %1265 = vmatprep.mubr.bf16.mxu0 %v8179_v0  ;;  %9274 = vst [vmem:[#allocation42_spill] sm:$0xff] %v8256_v23  ;;  %v8269_v20 = vsel %vm1745_vm2, %v1812_v49, %v1813_v39  ;;  %v838_v22 = vshll.u32 %v8228_v12, 16  ;;  %v845_v32 = vrot.slane %v843_v19, 1  ;;  %v1821_v1 = vrot.slane %v9277_v52, 1 }
  0x8e   : > { %1426 = vmatprep.mubr.bf16.mxu1 %v8097_v36  ;;  %v822_v55 = vor.u32 %v8126_v43, %v9275_v51  ;;  %9276 = vst [vmem:[#allocation27_spill] sm:$0xff] %v8269_v20  ;;  %v1822_v43 = vrot.slane %v8176_v21, 1  ;;  %v1818_v51 = vrot.slane %v7904_v2, 1  ;;  %v1819_v58 = vrot.slane %v7977_v60, 1 }
  0x8f   : > { %v1827_v40 = vrot.slane %v8019_v17, 1  ;;  %v1828_v5 = vrot.slane %v1740_v57, 1  ;;  %v1824_v39 = vrot.slane %v7940_v29, 1  ;;  %v1825_v28 = vrot.slane %v7997_v4, 1 }
  0x90   : > { %v8280_v49 = vsel %vm1745_vm2, %v1821_v1, %v1822_v43  ;;  %v9279_v19 = vshll.u32 %v8028_v35, 16  ;;  %v8290_v2 = vsel %vm523_vm0, %v791_v47, %v8081_v27  ;;  %v8293_v60 = vsel %vm1745_vm2, %v1818_v51, %v1819_v58 }
  0x91   : > { %9278 = vst [vmem:[#allocation34_spill] sm:$0xff] %v8280_v49  ;;  %9280 = vst [vmem:[#allocation36_spill] sm:$0xff] %v8293_v60  ;;  %v8296_v17 = vsel %vm1745_vm2, %v1827_v40, %v1828_v5  ;;  %v8299_v21 = vsel %vm1745_vm2, %v1824_v39, %v1825_v28  ;;  %v1833_v4 = vrot.slane %v8056_v6, 1  ;;  %v1830_v57 = vrot.slane %v9271_v59, 1  ;;  %v9282_v6 = vld [vmem:[#allocation38_spill] sm:$0xff]  ;;  %v9284_v5 = vld [vmem:[#allocation43_spill] sm:$0xff] }
  0x92   : > { %v1741_v52 = vsel %vm1727_vm1, %v8024_v3, %v9279_v19  ;;  %v8305_v3 = vsel %vm523_vm0, %v822_v55, %v8103_v53  ;;  %v840_v27 = vrot.slane %v838_v22, 1  ;;  %v1831_v47 = vrot.slane %v8028_v35, 1  ;;  %v9286_v40 = vld [vmem:[#allocation41_spill] sm:$0xff] }
  0x93   : > { %v1834_v29 = vrot.slane %v1741_v52, 1  ;;  %v9283_v53 = vshrl.u32 %v9282_v6, 16  ;;  %v9285_v35 = vshll.u32 %v8051_v13, 16  ;;  %v1839_v1 = vrot.slane %v8069_v8, 1 }
  0x94   : > { %1266 = vmatmul.mubr.bf16.gmra.mrb[48].mxu0 %v8225_v38  ;;  %v8314_v28 = vsel %vm1745_vm2, %v1830_v57, %v1831_v47  ;;  %v841_v55 = vor.u32 %v840_v27, %v836_v24  ;;  %v1836_v39 = vrot.slane %v9282_v6, 1  ;;  %v1837_v19 = vrot.slane %v8051_v13, 1  ;;  %v9290_v13 = vld [vmem:[#allocation4_spill] sm:$0xff]  ;;  %v9294_v6 = vld [vmem:[#allocation3_spill] sm:$0xff] }
  0x95   : > { %1427 = vmatmul.mubr.bf16.gmra.mrb[48].mxu1 %v8112_v25  ;;  %1273 = vmatprep.mubr.bf16.mxu0 %v8239_v34  ;;  %v8309_v58 = vsel %vm1745_vm2, %v1833_v4, %v1834_v29  ;;  %9281 = vst [vmem:[#allocation30_spill] sm:$0xff] %v8314_v28  ;;  %v810_v59 = vor.u32 %v9284_v5, %v9283_v53  ;;  %v9292_v29 = vld [vmem:[#allocation7_spill] sm:$0xff]  ;;  %v9295_v53 = vrot.slane %v9294_v6, 1 }
  0x96   : > { %1434 = vmatprep.mubr.bf16.mxu1 %v8179_v0  ;;  %v1742_v22 = vsel %vm1727_vm1, %v9286_v40, %v9285_v35  ;;  %v8333_v52 = vsel %vm523_vm0, %v841_v55, %v845_v32  ;;  %v8339_v4 = vsel %vm1745_vm2, %v1836_v39, %v1837_v19  ;;  %v9291_v32 = vshll.u32 %v9290_v13, 16  ;;  %v9296_v35 = vld [vmem:[#allocation10_spill] sm:$0xff]  ;;  %v7338_v19 = vld [vmem:[%s7526_s29 + $0x20] ss:$0 sps:$4 sm:$0x11]  }
  0x97   : > { %v1840_v43 = vrot.slane %v1742_v22, 1  ;;  %v8328_v51 = vsel %vm523_vm0, %v810_v59, %v8107_v33  ;;  %9288 = vst [vmem:[#allocation38_spill] sm:$0xff] %v8339_v4  ;;  %v9289_v33 = vshrl.u32 %v8090_v62, 16  ;;  %v1743_v27 = vsel %vm1727_vm1, %v8159_v18, %v831_v14  ;;  %v7337_v22 = vld [vmem:[%s7526_s29 + $0x18] sm:$0xff]  }
  0x98   : > { %v1729_v57 = vsel %vm1727_vm1, %v9292_v29, %v9291_v32  ;;  %v1845_v59 = vrot.slane %v8228_v12, 1  ;;  %v1846_v55 = vrot.slane %v1743_v27, 1  ;;  %v1761_v40 = vrot.slane %v9296_v35, 1  ;;  %v7271_v27 = vld [vmem:[%s9103_s1 + $0x248] sm:$0xff]  }
  0x99   : > { %v8336_v24 = vsel %vm1745_vm2, %v1839_v1, %v1840_v43  ;;  %v829_v8 = vor.u32 %v8163_v7, %v9289_v33  ;;  %v9293_v7 = vrot.slane %v8122_v10, 1  ;;  %v1758_v1 = vrot.slane %v7337_v22, 1  ;;  %v7275_v22 = vld [vmem:[%s9103_s1 + $0x250] sm:$0xff]  }
  0x9a   : > { %9287 = vst [vmem:[#allocation39_spill] sm:$0xff] %v8336_v24  ;;  %v1842_v43 = vrot.slane %v8090_v62, 1  ;;  %v1843_v18 = vrot.slane %v8116_v9, 1  ;;  %v9297_v14 = vrot.slane %v8154_v11, 1  ;;  %v9298_v10 = vrot.slane %v7563_v54, 1  ;;  %v7269_v54 = vld [vmem:[%s9103_s1 + $0x200] sm:$0xff]  }
  0x9b   : > { %v8357_v47 = vsel %vm523_vm0, %v829_v8, %v833_v15  ;;  %v8364_v5 = vsel %vm1745_vm2, %v9295_v53, %v9293_v7  ;;  %v1762_v39 = vrot.slane %v1729_v57, 1  ;;  %v1759_v33 = vrot.slane %v7338_v19, 1  ;;  %v7270_v62 = vld [vmem:[%s9103_s1 + $0x280] sm:$0xff]   ;;  %v7272_v7 = vld [vmem:[%s9103_s1 + $0x2c8] sm:$0xff]  }
  0x9c   : > { %1274 = vmatmul.mubr.bf16.gmra.mrb[52].mxu0 %v8290_v2  ;;  %v1757_v15 = vsel %vm1745_vm2, %v9298_v10, %v9297_v14  ;;  %v8378_v12 = vsel %vm1745_vm2, %v1845_v59, %v1846_v55  ;;  %v8381_v8 = vsel %vm1745_vm2, %v1842_v43, %v1843_v18  ;;  %v9301_v9 = vrot.slane %v8213_v31, 1  ;;  %v9307_v53 = vld [vmem:[#allocation8_spill] sm:$0xff]  ;;  %v9308_v55 = vld [vmem:[#allocation11_spill] sm:$0xff]  ;;  %v7276_v43 = vld [vmem:[%s9103_s1 + $0x2d0] sm:$0xff]  }
  0x9d   : > { %1435 = vmatmul.mubr.bf16.gmra.mrb[52].mxu1 %v8225_v38  ;;  %1281 = vmatprep.mubr.bf16.mxu0 %v8305_v3  ;;  %9299 = vst [vmem:[#allocation43_spill] sm:$0xff] %v8378_v12  ;;  %9300 = vst [vmem:[#allocation41_spill] sm:$0xff] %v8381_v8  ;;  %v9302_v11 = vrot.slane %v8202_v50, 1  ;;  %v9303_v32 = vrot.slane %v8265_v63, 1  ;;  %v9304_v29 = vrot.slane %v8249_v42, 1  ;;  %v8411_v31 = vsel %vm1745_vm2, %v1761_v40, %v1762_v39  ;;  %v9305_v50 = vld [vmem:[#allocation9_spill] sm:$0xff] }
  0x9e   : > { %1442 = vmatprep.mubr.bf16.mxu1 %v8239_v34  ;;  %v9306_v6 = vshll.u32 %v9305_v50, 16  ;;  %v7273_v42 = vld [vmem:[%s9103_s1 + $0x208] sm:$0xff]   ;;  %v1767_v35 = vrot.slane %v9308_v55, 1  ;;  %v8434_v18 = vsel %vm1745_vm2, %v1758_v1, %v1759_v33  ;;  %v7277_v10 = vld [vmem:[%s9103_s1 + $0x210] sm:$0xff]   ;;  %v7281_v50 = vld [vmem:[%s9103_s1 + $0x218] sm:$0xff]  }
  0x9f   : > { %v8397_v13 = vsel %vm1745_vm2, %v9302_v11, %v9301_v9  ;;  %v1754_v57 = vsel %vm1745_vm2, %v9304_v29, %v9303_v32  ;;  %v7274_v59 = vld [vmem:[%s9103_s1 + $0x288] sm:$0xff]   ;;  %v7285_v55 = vld [vmem:[%s9103_s1 + $0x220] sm:$0xff]  }
  0xa0   : > { %v1730_v63 = vsel %vm1727_vm1, %v9307_v53, %v9306_v6  ;;  %v9309_v39 = vld [vmem:[#allocation12_spill] sm:$0xff]  ;;  %v7282_v6 = vld [vmem:[%s9103_s1 + $0x298] sm:$0xff]   ;;  %v7283_v53 = vld [vmem:[%s9103_s1 + $0x260] sm:$0xff]  }
  0xa1   : > { %v1768_v40 = vrot.slane %v1730_v63, 1  ;;  %v9310_v19 = vshll.u32 %v9309_v39, 16  ;;  %v9311_v1 = vld [vmem:[#allocation16_spill] sm:$0xff]  ;;  %v7284_v63 = vld [vmem:[%s9103_s1 + $0x2e0] sm:$0xff]  }
  0xa2   : > { %v7339_v9 = vld [vmem:[%s7526_s29 + $0x24] sm:$0xff]   ;;  %v7340_v32 = vld [vmem:[%s7526_s29 + $0x2c] ss:$0 sps:$4 sm:$0x11]  }
  0xa3   : > { %v8437_v14 = vsel %vm1745_vm2, %v1767_v35, %v1768_v40  ;;  %v1731_v33 = vsel %vm1727_vm1, %v9311_v1, %v9310_v19  ;;  %v1764_v11 = vrot.slane %v7339_v9, 1  ;;  %v1765_v29 = vrot.slane %v7340_v32, 1  ;;  %v7286_v35 = vld [vmem:[%s9103_s1 + $0x2a0] sm:$0xff]   ;;  %v9313_v40 = vld [vmem:[#allocation21_spill] sm:$0xff]  ;;  %v7288_v39 = vld [vmem:[%s9103_s1 + $0x2e8] sm:$0xff]  }
  0xa4   : > { %1282 = vmatmul.mubr.bf16.gmra.mrb[56].mxu0 %v8328_v51  ;;  %v7341_v19 = vld [vmem:[%s7526_s29 + $0x30] sm:$0xff]   ;;  %v7289_v32 = vld [vmem:[%s9103_s1 + $0x228] sm:$0xff]  }
  0xa5   : > { %1443 = vmatmul.mubr.bf16.gmra.mrb[56].mxu1 %v8290_v2  ;;  %1289 = vmatprep.mubr.bf16.mxu0 %v8333_v52  ;;  %v1770_v1 = vrot.slane %v7341_v19, 1  ;;  %v7300_v19 = vld [vmem:[%s9103_s1 + $0x3c0] sm:$0xff]  }
  0xa6   : > { %1450 = vmatprep.mubr.bf16.mxu1 %v8305_v3 }
  0xac   : > { %1290 = vmatmul.mubr.bf16.gmra.mrb[60].mxu0 %v8357_v47 }
  0xad   : > { %1451 = vmatmul.mubr.bf16.gmra.mrb[60].mxu1 %v8328_v51  ;;  %2171 = vmatprep.mubr.bf16.mxu0 %v8364_v5 }
  0xae   : > { %2332 = vmatprep.mubr.bf16.mxu1 %v1757_v15  ;;  %v7278_v15 = vld [vmem:[%s9103_s1 + $0x290] sm:$0xff]  }
  0xb4   : > { %2172 = vmatmul.mubr.bf16.vlgmr.msra.gmra.mrb[64].mxu0 %v8397_v13 }
  0xb5   : > { %2333 = vmatmul.mubr.bf16.vlgmr.msra.gmra.mrb[64].mxu1 %v1754_v57  ;;  %6697 = vmatpush3.bf16.msra.mxu0 %v7269_v54  ;;  %v7279_v54 = vld [vmem:[%s9103_s1 + $0x258] sm:$0xff]  }
  0xb6   : > { %6809 = vmatpush3.bf16.msra.mxu1 %v7270_v62  ;;  %2179 = vmatprep.mubr.bf16.mxu0 %v8411_v31  ;;  %v7280_v62 = vld [vmem:[%s9103_s1 + $0x2d8] sm:$0xff]  }
  0xb7   : > { %2340 = vmatprep.mubr.bf16.mxu1 %v8364_v5  ;;  %6698 = vmatprep.subr.bf16.mxu0 %v7271_v27  ;;  %v9312_v57 = vld [vmem:[#allocation18_spill] sm:$0xff] }
  0xb8   : > { %6810 = vmatprep.subr.bf16.mxu1 %v7272_v7  ;;  %v1773_v27 = vrot.slane %v9312_v57, 1  ;;  %v1774_v7 = vrot.slane %v1731_v33, 1  ;;  %v7342_v33 = vld [vmem:[%s7526_s29 + $0x38] ss:$0 sps:$4 sm:$0x11]   ;;  %v7291_v57 = vld [vmem:[%s9103_s1 + $0x270] sm:$0xff]  }
  0xb9   : > { %6699 = vmatpush3.bf16.msra.mxu0 %v7273_v42  ;;  %v8475_v42 = vsel %vm1745_vm2, %v1764_v11, %v1765_v29  ;;  %v7290_v29 = vld [vmem:[%s9103_s1 + $0x2a8] sm:$0xff]  }
  0xba   : > { %6811 = vmatpush3.bf16.msra.mxu1 %v7274_v59  ;;  %6700 = vmatprep.subr.bf16.mxu0 %v7275_v22  ;;  %v8478_v59 = vsel %vm1745_vm2, %v1773_v27, %v1774_v7  ;;  %v9314_v22 = vshll.u32 %v9313_v40, 16  ;;  %v7292_v27 = vld [vmem:[%s9103_s1 + $0x2f0] sm:$0xff]  }
  0xbb   : > { %6812 = vmatprep.subr.bf16.mxu1 %v7276_v43  ;;  %v9315_v43 = vld [vmem:[#allocation17_spill] sm:$0xff] }
  0xbc   : > { %2180 = vmatmul.mubr.bf16.gmra.mrb[68].mxu0 %v8434_v18 }
  0xbd   : > { %2341 = vmatmul.mubr.bf16.gmra.mrb[68].mxu1 %v8397_v13  ;;  %2187 = vmatprep.mubr.bf16.mxu0 %v8437_v14 }
  0xbe   : > { %2348 = vmatprep.mubr.bf16.mxu1 %v8411_v31  ;;  %6701 = vmatpush3.bf16.msra.mxu0 %v7277_v10  ;;  %v1732_v10 = vsel %vm1727_vm1, %v9315_v43, %v9314_v22  ;;  %v7344_v22 = vld [vmem:[%s7526_s29 + $0x44] ss:$0 sps:$4 sm:$0x11]  }
  0xbf   : > { %6813 = vmatpush3.bf16.msra.mxu1 %v7278_v15  ;;  %6702 = vmatprep.subr.bf16.mxu0 %v7279_v54  ;;  %v7287_v15 = vld [vmem:[%s9103_s1 + $0x268] sm:$0xff]   ;;  %v1771_v54 = vrot.slane %v7342_v33, 1  ;;  %v1780_v11 = vrot.slane %v1732_v10, 1  ;;  %v1777_v43 = vrot.slane %v7344_v22, 1  ;;  %v7297_v10 = vld [vmem:[%s9103_s1 + $0x238] sm:$0xff]  }
  0xc0   : > { %6814 = vmatprep.subr.bf16.mxu1 %v7280_v62  ;;  %v9316_v62 = vld [vmem:[#allocation19_spill] sm:$0xff]  ;;  %v7345_v33 = vld [vmem:[%s7526_s29 + $0x48] sm:$0xff]  }
  0xc1   : > { %v1779_v9 = vrot.slane %v9316_v62, 1  ;;  %v8516_v7 = vsel %vm1745_vm2, %v1770_v1, %v1771_v54  ;;  %v1782_v54 = vrot.slane %v7345_v33, 1  ;;  %v7346_v62 = vld [vmem:[%s7526_s29 + $0x50] ss:$0 sps:$4 sm:$0x11]  }
  0xc2   : > { %6703 = vmatpush3.bf16.msra.mxu0 %v7281_v50 }
  0xc3   : > { %6815 = vmatpush3.bf16.msra.mxu1 %v7282_v6  ;;  %6704 = vmatprep.subr.bf16.mxu0 %v7283_v53  ;;  %v8519_v50 = vsel %vm1745_vm2, %v1779_v9, %v1780_v11  ;;  %v7293_v6 = vld [vmem:[%s9103_s1 + $0x230] sm:$0xff]   ;;  %v1783_v9 = vrot.slane %v7346_v62, 1 }
  0xc4   : > { %6816 = vmatprep.subr.bf16.mxu1 %v7284_v63  ;;  %2188 = vmatmul.mubr.bf16.gmra.mrb[72].mxu0 %v8475_v42  ;;  %v7294_v53 = vld [vmem:[%s9103_s1 + $0x2b0] sm:$0xff]   ;;  %v7295_v63 = vld [vmem:[%s9103_s1 + $0x278] sm:$0xff]  }
  0xc5   : > { %2349 = vmatmul.mubr.bf16.gmra.mrb[72].mxu1 %v8434_v18  ;;  %2195 = vmatprep.mubr.bf16.mxu0 %v8478_v59  ;;  %v8561_v11 = vsel %vm1745_vm2, %v1782_v54, %v1783_v9 }
  0xc6   : > { %2356 = vmatprep.mubr.bf16.mxu1 %v8437_v14  ;;  %6705 = vmatpush3.bf16.msra.mxu0 %v7285_v55  ;;  %v7296_v55 = vld [vmem:[%s9103_s1 + $0x2f8] sm:$0xff]  }
  0xc7   : > { %6817 = vmatpush3.bf16.msra.mxu1 %v7286_v35  ;;  %6706 = vmatprep.subr.bf16.mxu0 %v7287_v15  ;;  %v7343_v35 = vld [vmem:[%s7526_s29 + $0x3c] sm:$0xff]  }
  0xc8   : > { %6818 = vmatprep.subr.bf16.mxu1 %v7288_v39  ;;  %v1776_v40 = vrot.slane %v7343_v35, 1  ;;  %v7298_v15 = vld [vmem:[%s9103_s1 + $0x2b8] sm:$0xff]   ;;  %v7299_v39 = vld [vmem:[%s9103_s1 + $0x340] sm:$0xff]  }
  0xca   : > { %6707 = vmatpush3.bf16.msra.mxu0 %v7289_v32  ;;  %v8552_v1 = vsel %vm1745_vm2, %v1776_v40, %v1777_v43  ;;  %v7347_v32 = vld [vmem:[%s7526_s29 + $0x54] sm:$0xff]  }
  0xcb   : > { %6819 = vmatpush3.bf16.msra.mxu1 %v7290_v29  ;;  %6708 = vmatprep.subr.bf16.mxu0 %v7291_v57  ;;  %v1788_v29 = vrot.slane %v7347_v32, 1  ;;  %v7348_v57 = vld [vmem:[%s7526_s29 + $0x5c] ss:$0 sps:$4 sm:$0x11]  }
  0xcc   : > { %6820 = vmatprep.subr.bf16.mxu1 %v7292_v27  ;;  %2196 = vmatmul.mubr.bf16.gmra.mrb[76].mxu0 %v8516_v7  ;;  %v1789_v27 = vrot.slane %v7348_v57, 1 }
  0xcd   : > { %2357 = vmatmul.mubr.bf16.gmra.mrb[76].mxu1 %v8475_v42  ;;  %2203 = vmatprep.mubr.bf16.mxu0 %v8519_v50 }
  0xce   : > { %2364 = vmatprep.mubr.bf16.mxu1 %v8478_v59  ;;  %6709 = vmatpush3.bf16.msra.mxu0 %v7293_v6  ;;  %v8570_v6 = vsel %vm1745_vm2, %v1788_v29, %v1789_v27 }
  0xcf   : > { %6821 = vmatpush3.bf16.msra.mxu1 %v7294_v53  ;;  %6710 = vmatprep.subr.bf16.mxu0 %v7295_v63 }
  0xd0   : > { %6822 = vmatprep.subr.bf16.mxu1 %v7296_v55 }
  0xd2   : > { %6711 = vmatpush3.bf16.msra.mxu0 %v7297_v10 }
  0xd3   : > { %6823 = vmatpush3.bf16.msra.mxu1 %v7298_v15  ;;  %6920 = vmatprep.subr.bf16.mxu0 %v7299_v39 }
  0xd4   : > { %7032 = vmatprep.subr.bf16.mxu1 %v7300_v19  ;;  %2204 = vmatmul.mubr.bf16.gmra.mrb[80].mxu0 %v8552_v1 }
  0xd5   : > { %2365 = vmatmul.mubr.bf16.gmra.mrb[80].mxu1 %v8516_v7  ;;  %2211 = vmatprep.mubr.bf16.mxu0 %v8166_v44 }
  0xd6   : > { %2372 = vmatprep.mubr.bf16.mxu1 %v8519_v50 }
  0xdc   : > { %2212 = vmatmul.mubr.bf16.gmra.mrb[84].mxu0 %v8561_v11 }
  0xdd   : > { %2373 = vmatmul.mubr.bf16.gmra.mrb[84].mxu1 %v8552_v1  ;;  %2219 = vmatprep.mubr.bf16.mxu0 %v8183_v37 }
  0xde   : > { %2380 = vmatprep.mubr.bf16.mxu1 %v8166_v44 }
  0xe4   : > { %2220 = vmatmul.mubr.bf16.gmra.mrb[88].mxu0 %v8570_v6 }
  0xe5   : > { %2381 = vmatmul.mubr.bf16.gmra.mrb[88].mxu1 %v8561_v11  ;;  %2227 = vmatprep.mubr.bf16.mxu0 %v8197_v56 }
  0xe6   : > { %2388 = vmatprep.mubr.bf16.mxu1 %v8183_v37 }
  0xec   : > { %2228 = vmatmul.mubr.bf16.gmra.mrb[92].mxu0 %v8206_v26 }
  0xed   : > { %2389 = vmatmul.mubr.bf16.gmra.mrb[92].mxu1 %v8570_v6  ;;  %2235 = vmatprep.mubr.bf16.mxu0 %v8209_v16 }
  0xee   : > { %2396 = vmatprep.mubr.bf16.mxu1 %v8197_v56 }
  0xf4   : > { %2236 = vmatmul.mubr.bf16.gmra.mrb[96].mxu0 %v8217_v30 }
  0xf5   : > { %2397 = vmatmul.mubr.bf16.gmra.mrb[96].mxu1 %v8206_v26  ;;  %2243 = vmatprep.mubr.bf16.mxu0 %v8233_v48 }
  0xf6   : > { %2404 = vmatprep.mubr.bf16.mxu1 %v8209_v16 }
  0xfc   : > { %2244 = vmatmul.mubr.bf16.gmra.mrb[100].mxu0 %v8253_v41 }
  0xfd   : > { %2405 = vmatmul.mubr.bf16.gmra.mrb[100].mxu1 %v8217_v30  ;;  %2251 = vmatprep.mubr.bf16.mxu0 %v8256_v23 }
  0xfe   : > { %2412 = vmatprep.mubr.bf16.mxu1 %v8233_v48 }
 0x104   : > { %2252 = vmatmul.mubr.bf16.gmra.mrb[104].mxu0 %v8269_v20 }
 0x105   : > { %2413 = vmatmul.mubr.bf16.gmra.mrb[104].mxu1 %v8253_v41  ;;  %2259 = vmatprep.mubr.bf16.mxu0 %v8280_v49 }
 0x106   : > { %2420 = vmatprep.mubr.bf16.mxu1 %v8256_v23 }
 0x107   : > { %v6264_v53 = vpop.f32.mrb[0].mxu0 }
 0x108   : > { %v6265_v63 = vpop.f32.mrb[1].mxu0  ;;  %v6376_v55 = vpop.f32.mrb[0].mxu1 }
 0x109   : > { %v6266_v35 = vadd.f32 %v6265_v63, %v6264_v53  ;;  %v6267_v40 = vpop.f32.mrb[2].mxu0  ;;  %v6377_v22 = vpop.f32.mrb[1].mxu1 }
 0x10a   : > { %v6268_v43 = vpop.f32.mrb[3].mxu0  ;;  %v6378_v10 = vadd.f32 %v6377_v22, %v6376_v55  ;;  %v6379_v15 = vpop.f32.mrb[2].mxu1 }
 0x10b   : > { %v6269_v39 = vadd.f32 %v6268_v43, %v6267_v40  ;;  %v6380_v19 = vpop.f32.mrb[3].mxu1 }
 0x10c   : > { %v1333_v33 = vadd.f32 %v6378_v10, %v6266_v35  ;;  %v6381_v54 = vadd.f32 %v6380_v19, %v6379_v15  ;;  %2260 = vmatmul.mubr.bf16.gmra.mrb[108].mxu0 %v8293_v60 }
 0x10d   : > { %2421 = vmatmul.mubr.bf16.gmra.mrb[108].mxu1 %v8269_v20  ;;  %2267 = vmatprep.mubr.bf16.mxu0 %v8296_v17 }
 0x10e   : > { %v1336_v62 = vadd.f32 %v6381_v54, %v6269_v39  ;;  %2428 = vmatprep.mubr.bf16.mxu1 %v8280_v49  ;;  %v1657_v9 = vmul.f32 %v1333_v33, %v1333_v33 }
 0x10f   : > { %v6270_v27 = vpop.f32.mrb[4].mxu0 }
 0x110   : > { %v5868_v32 = vpack.c.bf16 %v1336_v62, %v1333_v33  ;;  %v1619_v29 = vadd.f32 %v1336_v62, %v1333_v33  ;;  %v1658_v57 = vmul.f32 %v1336_v62, %v1336_v62  ;;  %v6382_v53 = vpop.f32.mrb[4].mxu1  ;;  %v6271_v63 = vpop.f32.mrb[5].mxu0 }
 0x111   : > { %v6383_v55 = vpop.f32.mrb[5].mxu1  ;;  %v6272_v40 = vadd.f32 %v6271_v63, %v6270_v27  ;;  %v6273_v43 = vpop.f32.mrb[6].mxu0 }
 0x112   : > { %5869 = vst [vmem:[%s8597_s15] sm:$0xff] %v5868_v32   ;;  %v1689_v35 = vadd.f32 %v1658_v57, %v1657_v9  ;;  %v6384_v22 = vadd.f32 %v6383_v55, %v6382_v53  ;;  %v6385_v10 = vpop.f32.mrb[6].mxu1  ;;  %v6274_v15 = vpop.f32.mrb[7].mxu0 }
 0x113   : > { %v6386_v39 = vpop.f32.mrb[7].mxu1  ;;  %v6275_v54 = vadd.f32 %v6274_v15, %v6273_v43 }
 0x114   : > { %v1341_v19 = vadd.f32 %v6384_v22, %v6272_v40  ;;  %v6387_v49 = vadd.f32 %v6386_v39, %v6385_v10  ;;  %2268 = vmatmul.mubr.bf16.gmra.mrb[112].mxu0 %v8299_v21 }
 0x115   : > { %2429 = vmatmul.mubr.bf16.gmra.mrb[112].mxu1 %v8293_v60  ;;  %2275 = vmatprep.mubr.bf16.mxu0 %v8309_v58 }
 0x116   : > { %v1620_v33 = vadd.f32 %v1619_v29, %v1341_v19  ;;  %v1659_v62 = vmul.f32 %v1341_v19, %v1341_v19  ;;  %v1344_v20 = vadd.f32 %v6387_v49, %v6275_v54  ;;  %2436 = vmatprep.mubr.bf16.mxu1 %v8296_v17 }
 0x117   : > { %v6276_v53 = vpop.f32.mrb[8].mxu0 }
 0x118   : > { %v1690_v9 = vadd.f32 %v1689_v35, %v1659_v62  ;;  %v5873_v32 = vpack.c.bf16 %v1344_v20, %v1341_v19  ;;  %v1621_v57 = vadd.f32 %v1620_v33, %v1344_v20  ;;  %v1660_v27 = vmul.f32 %v1344_v20, %v1344_v20  ;;  %v6388_v63 = vpop.f32.mrb[8].mxu1  ;;  %v6277_v55 = vpop.f32.mrb[9].mxu0 }
 0x119   : > { %v6389_v40 = vpop.f32.mrb[9].mxu1  ;;  %v6278_v43 = vadd.f32 %v6277_v55, %v6276_v53  ;;  %v6279_v15 = vpop.f32.mrb[10].mxu0 }
 0x11a   : > { %6185 = vst [vmem:[%s8597_s15 + $0x8] sm:$0xff] %v5873_v32   ;;  %v1691_v22 = vadd.f32 %v1690_v9, %v1660_v27  ;;  %v6390_v10 = vadd.f32 %v6389_v40, %v6388_v63  ;;  %v6391_v29 = vpop.f32.mrb[10].mxu1  ;;  %v6280_v39 = vpop.f32.mrb[11].mxu0 }
 0x11b   : > { %v6392_v49 = vpop.f32.mrb[11].mxu1  ;;  %v6281_v60 = vadd.f32 %v6280_v39, %v6279_v15 }
 0x11c   : > { %v1349_v54 = vadd.f32 %v6390_v10, %v6278_v43  ;;  %v6393_v23 = vadd.f32 %v6392_v49, %v6391_v29  ;;  %2276 = vmatmul.mubr.bf16.gmra.mrb[116].mxu0 %v8314_v28 }
 0x11d   : > { %2437 = vmatmul.mubr.bf16.gmra.mrb[116].mxu1 %v8299_v21  ;;  %2283 = vmatprep.mubr.bf16.mxu0 %v8336_v24 }
 0x11e   : > { %v1622_v20 = vadd.f32 %v1621_v57, %v1349_v54  ;;  %v1661_v35 = vmul.f32 %v1349_v54, %v1349_v54  ;;  %v1352_v19 = vadd.f32 %v6393_v23, %v6281_v60  ;;  %2444 = vmatprep.mubr.bf16.mxu1 %v8309_v58 }
 0x11f   : > { %v6282_v27 = vpop.f32.mrb[12].mxu0 }
 0x120   : > { %v1692_v33 = vadd.f32 %v1691_v22, %v1661_v35  ;;  %v5878_v62 = vpack.c.bf16 %v1352_v19, %v1349_v54  ;;  %v1623_v9 = vadd.f32 %v1622_v20, %v1352_v19  ;;  %v1662_v32 = vmul.f32 %v1352_v19, %v1352_v19  ;;  %v6394_v53 = vpop.f32.mrb[12].mxu1  ;;  %v6283_v63 = vpop.f32.mrb[13].mxu0 }
 0x121   : > { %v6395_v55 = vpop.f32.mrb[13].mxu1  ;;  %v6284_v43 = vadd.f32 %v6283_v63, %v6282_v27  ;;  %v6285_v15 = vpop.f32.mrb[14].mxu0 }
 0x122   : > { %6186 = vst [vmem:[%s8597_s15 + $0x10] sm:$0xff] %v5878_v62   ;;  %v1693_v40 = vadd.f32 %v1692_v33, %v1662_v32  ;;  %v6396_v10 = vadd.f32 %v6395_v55, %v6394_v53  ;;  %v6397_v57 = vpop.f32.mrb[14].mxu1  ;;  %v6286_v29 = vpop.f32.mrb[15].mxu0 }
 0x123   : > { %v6398_v23 = vpop.f32.mrb[15].mxu1  ;;  %v6287_v39 = vadd.f32 %v6286_v29, %v6285_v15 }
 0x124   : > { %v1357_v60 = vadd.f32 %v6396_v10, %v6284_v43  ;;  %v6399_v49 = vadd.f32 %v6398_v23, %v6397_v57  ;;  %2284 = vmatmul.mubr.bf16.gmra.mrb[120].mxu0 %v8339_v4 }
 0x125   : > { %2445 = vmatmul.mubr.bf16.gmra.mrb[120].mxu1 %v8314_v28  ;;  %2291 = vmatprep.mubr.bf16.mxu0 %v8378_v12 }
 0x126   : > { %v1624_v22 = vadd.f32 %v1623_v9, %v1357_v60  ;;  %v1663_v54 = vmul.f32 %v1357_v60, %v1357_v60  ;;  %v1360_v20 = vadd.f32 %v6399_v49, %v6287_v39  ;;  %2452 = vmatprep.mubr.bf16.mxu1 %v8336_v24 }
 0x127   : > { %v6288_v32 = vpop.f32.mrb[16].mxu0 }
 0x128   : > { %v1694_v35 = vadd.f32 %v1693_v40, %v1663_v54  ;;  %v5883_v19 = vpack.c.bf16 %v1360_v20, %v1357_v60  ;;  %v1625_v33 = vadd.f32 %v1624_v22, %v1360_v20  ;;  %v1664_v62 = vmul.f32 %v1360_v20, %v1360_v20  ;;  %v6400_v27 = vpop.f32.mrb[16].mxu1  ;;  %v6289_v53 = vpop.f32.mrb[17].mxu0  ;;  %v9317_v54 = vld [vmem:[#allocation14_spill] sm:$0xff] }
 0x129   : > { %v6401_v63 = vpop.f32.mrb[17].mxu1  ;;  %v6290_v43 = vadd.f32 %v6289_v53, %v6288_v32  ;;  %v6291_v15 = vpop.f32.mrb[18].mxu0  ;;  %v9318_v20 = vld [vmem:[#allocation6_spill] sm:$0xff] }
 0x12a   : > { %6187 = vst [vmem:[%s8597_s15 + $0x18] sm:$0xff] %v5883_v19   ;;  %v1695_v55 = vadd.f32 %v1694_v35, %v1664_v62  ;;  %v6402_v10 = vadd.f32 %v6401_v63, %v6400_v27  ;;  %v6403_v9 = vpop.f32.mrb[18].mxu1  ;;  %v6292_v57 = vpop.f32.mrb[19].mxu0 }
 0x12b   : > { %v6404_v29 = vpop.f32.mrb[19].mxu1  ;;  %v6293_v39 = vadd.f32 %v6292_v57, %v6291_v15 }
 0x12c   : > { %v1365_v23 = vadd.f32 %v6402_v10, %v6290_v43  ;;  %v6405_v49 = vadd.f32 %v6404_v29, %v6403_v9  ;;  %2292 = vmatmul.mubr.bf16.gmra.mrb[124].mxu0 %v8381_v8  ;;  %v7301_v29 = vld [vmem:[%s9103_s1 + $0x300] sm:$0xff]  }
 0x12d   : > { %2453 = vmatmul.mubr.bf16.gmra.mrb[124].mxu1 %v8339_v4  ;;  %3055 = vmatprep.mubr.bf16.mxu0 %v9317_v54 }
 0x12e   : > { %v1626_v40 = vadd.f32 %v1625_v33, %v1365_v23  ;;  %v1665_v60 = vmul.f32 %v1365_v23, %v1365_v23  ;;  %v1368_v22 = vadd.f32 %v6405_v49, %v6293_v39  ;;  %3216 = vmatprep.mubr.bf16.mxu1 %v9318_v20  ;;  %v9319_v20 = vld [vmem:[#allocation13_spill] sm:$0xff] }
 0x12f   : > { %v6294_v27 = vpop.f32.mrb[20].mxu0 }
 0x130   : > { %v1696_v35 = vadd.f32 %v1695_v55, %v1665_v60  ;;  %v5888_v19 = vpack.c.bf16 %v1368_v22, %v1365_v23  ;;  %v1627_v62 = vadd.f32 %v1626_v40, %v1368_v22  ;;  %v1666_v32 = vmul.f32 %v1368_v22, %v1368_v22  ;;  %v6406_v53 = vpop.f32.mrb[20].mxu1  ;;  %v6295_v63 = vpop.f32.mrb[21].mxu0  ;;  %v7302_v55 = vld [vmem:[%s9103_s1 + $0x380] sm:$0xff]   ;;  %v7303_v22 = vld [vmem:[%s9103_s1 + $0x348] sm:$0xff]  }
 0x131   : > { %v6407_v43 = vpop.f32.mrb[21].mxu1  ;;  %v6296_v15 = vadd.f32 %v6295_v63, %v6294_v27  ;;  %v6297_v57 = vpop.f32.mrb[22].mxu0  ;;  %v7305_v63 = vld [vmem:[%s9103_s1 + $0x308] sm:$0xff]  }
 0x132   : > { %6188 = vst [vmem:[%s8597_s15 + $0x20] sm:$0xff] %v5888_v19   ;;  %v1697_v10 = vadd.f32 %v1696_v35, %v1666_v32  ;;  %v6408_v9 = vadd.f32 %v6407_v43, %v6406_v53  ;;  %v6409_v33 = vpop.f32.mrb[22].mxu1  ;;  %v6298_v23 = vpop.f32.mrb[23].mxu0  ;;  %v9320_v35 = vld [vmem:[#allocation5_spill] sm:$0xff]  ;;  %v7304_v19 = vld [vmem:[%s9103_s1 + $0x3c8] sm:$0xff]  }
 0x133   : > { %v6410_v39 = vpop.f32.mrb[23].mxu1  ;;  %v6299_v40 = vadd.f32 %v6298_v23, %v6297_v57  ;;  %v7306_v43 = vld [vmem:[%s9103_s1 + $0x388] sm:$0xff]  }
 0x134   : > { %v1373_v49 = vadd.f32 %v6408_v9, %v6296_v15  ;;  %v6411_v60 = vadd.f32 %v6410_v39, %v6409_v33  ;;  %3056 = vmatmul.mubr.bf16.vlgmr.msra.gmra.mrb[128].mxu0 %v9319_v20  ;;  %v9321_v15 = vld [vmem:[#allocation15_spill] sm:$0xff]  ;;  %v7308_v9 = vld [vmem:[%s9103_s1 + $0x3d0] sm:$0xff]  }
 0x135   : > { %3217 = vmatmul.mubr.bf16.vlgmr.msra.gmra.mrb[128].mxu1 %v9320_v35  ;;  %6921 = vmatpush3.bf16.msra.mxu0 %v7301_v29 }
 0x136   : > { %v1628_v32 = vadd.f32 %v1627_v62, %v1373_v49  ;;  %v1667_v27 = vmul.f32 %v1373_v49, %v1373_v49  ;;  %v1376_v53 = vadd.f32 %v6411_v60, %v6299_v40  ;;  %7033 = vmatpush3.bf16.msra.mxu1 %v7302_v55  ;;  %3063 = vmatprep.mubr.bf16.mxu0 %v9321_v15  ;;  %v7307_v62 = vld [vmem:[%s9103_s1 + $0x350] sm:$0xff]  }
 0x137   : > { %3224 = vmatprep.mubr.bf16.mxu1 %v9317_v54  ;;  %v6300_v23 = vpop.f32.mrb[24].mxu0  ;;  %6922 = vmatprep.subr.bf16.mxu0 %v7303_v22 }
 0x138   : > { %v1698_v57 = vadd.f32 %v1697_v10, %v1667_v27  ;;  %v5893_v33 = vpack.c.bf16 %v1376_v53, %v1373_v49  ;;  %v1629_v29 = vadd.f32 %v1628_v32, %v1376_v53  ;;  %v1668_v55 = vmul.f32 %v1376_v53, %v1376_v53  ;;  %v6412_v39 = vpop.f32.mrb[24].mxu1  ;;  %v6301_v40 = vpop.f32.mrb[25].mxu0  ;;  %7034 = vmatprep.subr.bf16.mxu1 %v7304_v19  ;;  %v7309_v10 = vld [vmem:[%s9103_s1 + $0x310] sm:$0xff]   ;;  %v7311_v27 = vld [vmem:[%s9103_s1 + $0x358] sm:$0xff]   ;;  %v9322_v53 = vld [vmem:[#allocation20_spill] sm:$0xff] }
 0x139   : > { %v6413_v60 = vpop.f32.mrb[25].mxu1  ;;  %v6302_v35 = vadd.f32 %v6301_v40, %v6300_v23  ;;  %v6303_v12 = vpop.f32.mrb[26].mxu0  ;;  %6923 = vmatpush3.bf16.msra.mxu0 %v7305_v63  ;;  %v7310_v49 = vld [vmem:[%s9103_s1 + $0x390] sm:$0xff]   ;;  %v7312_v63 = vld [vmem:[%s9103_s1 + $0x3d8] sm:$0xff]  }
 0x13a   : > { %6189 = vst [vmem:[%s8597_s15 + $0x28] sm:$0xff] %v5893_v33   ;;  %v1699_v54 = vadd.f32 %v1698_v57, %v1668_v55  ;;  %v6414_v8 = vadd.f32 %v6413_v60, %v6412_v39  ;;  %v6415_v4 = vpop.f32.mrb[26].mxu1  ;;  %7035 = vmatpush3.bf16.msra.mxu1 %v7306_v43  ;;  %v6304_v24 = vpop.f32.mrb[27].mxu0  ;;  %6924 = vmatprep.subr.bf16.mxu0 %v7307_v62  ;;  %v9323_v57 = vld [vmem:[#allocation22_spill] sm:$0xff]  ;;  %v7316_v55 = vld [vmem:[%s9103_s1 + $0x3e0] sm:$0xff]  }
 0x13b   : > { %v6416_v28 = vpop.f32.mrb[27].mxu1  ;;  %7036 = vmatprep.subr.bf16.mxu1 %v7308_v9  ;;  %v6305_v19 = vadd.f32 %v6304_v24, %v6303_v12  ;;  %v7314_v24 = vld [vmem:[%s9103_s1 + $0x398] sm:$0xff]  }
 0x13c   : > { %v1381_v22 = vadd.f32 %v6414_v8, %v6302_v35  ;;  %v6417_v32 = vadd.f32 %v6416_v28, %v6415_v4  ;;  %3064 = vmatmul.mubr.bf16.gmra.mrb[132].mxu0 %v9322_v53  ;;  %v7313_v28 = vld [vmem:[%s9103_s1 + $0x318] sm:$0xff]  }
 0x13d   : > { %3225 = vmatmul.mubr.bf16.gmra.mrb[132].mxu1 %v9319_v20  ;;  %3071 = vmatprep.mubr.bf16.mxu0 %v9323_v57 }
 0x13e   : > { %v1630_v43 = vadd.f32 %v1629_v29, %v1381_v22  ;;  %v1669_v62 = vmul.f32 %v1381_v22, %v1381_v22  ;;  %v1384_v9 = vadd.f32 %v6417_v32, %v6305_v19  ;;  %3232 = vmatprep.mubr.bf16.mxu1 %v9321_v15  ;;  %6925 = vmatpush3.bf16.msra.mxu0 %v7309_v10  ;;  %v7315_v15 = vld [vmem:[%s9103_s1 + $0x360] sm:$0xff]  }
 0x13f   : > { %7037 = vmatpush3.bf16.msra.mxu1 %v7310_v49  ;;  %v6306_v33 = vpop.f32.mrb[28].mxu0  ;;  %6926 = vmatprep.subr.bf16.mxu0 %v7311_v27  ;;  %v7317_v19 = vld [vmem:[%s9103_s1 + $0x320] sm:$0xff]  }
 0x140   : > { %v1700_v4 = vadd.f32 %v1699_v54, %v1669_v62  ;;  %v5898_v12 = vpack.c.bf16 %v1384_v9, %v1381_v22  ;;  %v1631_v8 = vadd.f32 %v1630_v43, %v1384_v9  ;;  %v1670_v20 = vmul.f32 %v1384_v9, %v1384_v9  ;;  %v6418_v29 = vpop.f32.mrb[28].mxu1  ;;  %v6307_v23 = vpop.f32.mrb[29].mxu0  ;;  %7038 = vmatprep.subr.bf16.mxu1 %v7312_v63  ;;  %v7318_v32 = vld [vmem:[%s9103_s1 + $0x3a0] sm:$0xff]   ;;  %v7319_v62 = vld [vmem:[%s9103_s1 + $0x368] sm:$0xff]  }
 0x141   : > { %v6419_v39 = vpop.f32.mrb[29].mxu1  ;;  %v6308_v60 = vadd.f32 %v6307_v23, %v6306_v33  ;;  %v6309_v35 = vpop.f32.mrb[30].mxu0  ;;  %v9324_v9 = vld [vmem:[#allocation23_spill] sm:$0xff]  ;;  %v7321_v33 = vld [vmem:[%s9103_s1 + $0x328] sm:$0xff]  }
 0x142   : > { %6190 = vst [vmem:[%s8597_s15 + $0x30] sm:$0xff] %v5898_v12   ;;  %v1701_v40 = vadd.f32 %v1700_v4, %v1670_v20  ;;  %v6420_v54 = vadd.f32 %v6419_v39, %v6418_v29  ;;  %v6421_v10 = vpop.f32.mrb[30].mxu1  ;;  %v6310_v49 = vpop.f32.mrb[31].mxu0  ;;  %6927 = vmatpush3.bf16.msra.mxu0 %v7313_v28  ;;  %v7320_v28 = vld [vmem:[%s9103_s1 + $0x3e8] sm:$0xff]  }
 0x143   : > { %v6422_v22 = vpop.f32.mrb[31].mxu1  ;;  %7039 = vmatpush3.bf16.msra.mxu1 %v7314_v24  ;;  %v6311_v63 = vadd.f32 %v6310_v49, %v6309_v35  ;;  %6928 = vmatprep.subr.bf16.mxu0 %v7315_v15  ;;  %v9325_v20 = vld [vmem:[#allocation24_spill] sm:$0xff] }
 0x144   : > { %v1389_v27 = vadd.f32 %v6420_v54, %v6308_v60  ;;  %v6423_v43 = vadd.f32 %v6422_v22, %v6421_v10  ;;  %7040 = vmatprep.subr.bf16.mxu1 %v7316_v55  ;;  %3072 = vmatmul.mubr.bf16.gmra.mrb[136].mxu0 %v9324_v9  ;;  %v7324_v60 = vld [vmem:[%s9103_s1 + $0x3f0] sm:$0xff]  }
 0x145   : > { %3233 = vmatmul.mubr.bf16.gmra.mrb[136].mxu1 %v9322_v53  ;;  %3079 = vmatprep.mubr.bf16.mxu0 %v9325_v20  ;;  %v7322_v53 = vld [vmem:[%s9103_s1 + $0x3a8] sm:$0xff]  }
 0x146   : > { %v1632_v24 = vadd.f32 %v1631_v8, %v1389_v27  ;;  %v1671_v4 = vmul.f32 %v1389_v27, %v1389_v27  ;;  %v1392_v12 = vadd.f32 %v6423_v43, %v6311_v63  ;;  %3240 = vmatprep.mubr.bf16.mxu1 %v9323_v57  ;;  %6929 = vmatpush3.bf16.msra.mxu0 %v7317_v19  ;;  %v7323_v57 = vld [vmem:[%s9103_s1 + $0x370] sm:$0xff]  }
 0x147   : > { %7041 = vmatpush3.bf16.msra.mxu1 %v7318_v32  ;;  %v6312_v23 = vpop.f32.mrb[32].mxu0  ;;  %6930 = vmatprep.subr.bf16.mxu0 %v7319_v62  ;;  %v7325_v63 = vld [vmem:[%s9103_s1 + $0x330] sm:$0xff]  }
 0x148   : > { %v1702_v29 = vadd.f32 %v1701_v40, %v1671_v4  ;;  %v5903_v15 = vpack.c.bf16 %v1392_v12, %v1389_v27  ;;  %v1633_v8 = vadd.f32 %v1632_v24, %v1392_v12  ;;  %v1672_v55 = vmul.f32 %v1392_v12, %v1392_v12  ;;  %v6424_v39 = vpop.f32.mrb[32].mxu1  ;;  %v6313_v54 = vpop.f32.mrb[33].mxu0  ;;  %7042 = vmatprep.subr.bf16.mxu1 %v7320_v28  ;;  %v7326_v43 = vld [vmem:[%s9103_s1 + $0x3b0] sm:$0xff]   ;;  %v7327_v4 = vld [vmem:[%s9103_s1 + $0x378] sm:$0xff]  }
 0x149   : > { %v6425_v35 = vpop.f32.mrb[33].mxu1  ;;  %v6314_v40 = vadd.f32 %v6313_v54, %v6312_v23  ;;  %v6315_v22 = vpop.f32.mrb[34].mxu0  ;;  %v9326_v12 = vld [vmem:[#allocation25_spill] sm:$0xff]  ;;  %v7329_v23 = vld [vmem:[%s9103_s1 + $0x338] sm:$0xff]  }
 0x14a   : > { %6191 = vst [vmem:[%s8597_s15 + $0x38] sm:$0xff] %v5903_v15   ;;  %v1703_v10 = vadd.f32 %v1702_v29, %v1672_v55  ;;  %v6426_v49 = vadd.f32 %v6425_v35, %v6424_v39  ;;  %v6427_v19 = vpop.f32.mrb[34].mxu1  ;;  %v6316_v32 = vpop.f32.mrb[35].mxu0  ;;  %6931 = vmatpush3.bf16.msra.mxu0 %v7321_v33  ;;  %v7328_v33 = vld [vmem:[%s9103_s1 + $0x3f8] sm:$0xff]  }
 0x14b   : > { %v6428_v27 = vpop.f32.mrb[35].mxu1  ;;  %7043 = vmatpush3.bf16.msra.mxu1 %v7322_v53  ;;  %v6317_v28 = vadd.f32 %v6316_v32, %v6315_v22  ;;  %6932 = vmatprep.subr.bf16.mxu0 %v7323_v57  ;;  %v9327_v55 = vld [vmem:[#allocation26_spill] sm:$0xff] }
 0x14c   : > { %v1397_v62 = vadd.f32 %v6426_v49, %v6314_v40  ;;  %v6429_v24 = vadd.f32 %v6428_v27, %v6427_v19  ;;  %7044 = vmatprep.subr.bf16.mxu1 %v7324_v60  ;;  %3080 = vmatmul.mubr.bf16.gmra.mrb[140].mxu0 %v9326_v12 }
 0x14d   : > { %3241 = vmatmul.mubr.bf16.gmra.mrb[140].mxu1 %v9324_v9  ;;  %3087 = vmatprep.mubr.bf16.mxu0 %v9327_v55  ;;  %v7330_v9 = vld [vmem:[%s9103_s1 + $0x3b8] sm:$0xff]  }
 0x14e   : > { %v1634_v53 = vadd.f32 %v1633_v8, %v1397_v62  ;;  %v1673_v29 = vmul.f32 %v1397_v62, %v1397_v62  ;;  %v1400_v15 = vadd.f32 %v6429_v24, %v6317_v28  ;;  %3248 = vmatprep.mubr.bf16.mxu1 %v9325_v20  ;;  %6933 = vmatpush3.bf16.msra.mxu0 %v7325_v63  ;;  %v9328_v24 = vld [vmem:[#allocation28_spill] sm:$0xff] }
 0x14f   : > { %7045 = vmatpush3.bf16.msra.mxu1 %v7326_v43  ;;  %v6318_v54 = vpop.f32.mrb[36].mxu0  ;;  %6934 = vmatprep.subr.bf16.mxu0 %v7327_v4 }
 0x150   : > { %v1704_v39 = vadd.f32 %v1703_v10, %v1673_v29  ;;  %v5908_v57 = vpack.c.bf16 %v1400_v15, %v1397_v62  ;;  %v1635_v8 = vadd.f32 %v1634_v53, %v1400_v15  ;;  %v1674_v60 = vmul.f32 %v1400_v15, %v1400_v15  ;;  %v6430_v35 = vpop.f32.mrb[36].mxu1  ;;  %v6319_v40 = vpop.f32.mrb[37].mxu0  ;;  %7046 = vmatprep.subr.bf16.mxu1 %v7328_v33  ;;  %v9329_v29 = vld [vmem:[#allocation29_spill] sm:$0xff] }
 0x151   : > { %v6431_v49 = vpop.f32.mrb[37].mxu1  ;;  %v6320_v22 = vadd.f32 %v6319_v40, %v6318_v54  ;;  %v6321_v32 = vpop.f32.mrb[38].mxu0 }
 0x152   : > { %6192 = vst [vmem:[%s8597_s15 + $0x40] sm:$0xff] %v5908_v57   ;;  %v1705_v20 = vadd.f32 %v1704_v39, %v1674_v60  ;;  %v6432_v19 = vadd.f32 %v6431_v49, %v6430_v35  ;;  %v6433_v27 = vpop.f32.mrb[38].mxu1  ;;  %v6322_v63 = vpop.f32.mrb[39].mxu0  ;;  %6935 = vmatpush3.bf16.msra.mxu0 %v7329_v23 }
 0x153   : > { %v6434_v43 = vpop.f32.mrb[39].mxu1  ;;  %7047 = vmatpush3.bf16.msra.mxu1 %v7330_v9  ;;  %v6323_v62 = vadd.f32 %v6322_v63, %v6321_v32 }
 0x154   : > { %v1405_v10 = vadd.f32 %v6432_v19, %v6320_v22  ;;  %v6435_v28 = vadd.f32 %v6434_v43, %v6433_v27  ;;  %3088 = vmatmul.mubr.bf16.gmra.mrb[144].mxu0 %v9328_v24 }
 0x155   : > { %3249 = vmatmul.mubr.bf16.gmra.mrb[144].mxu1 %v9326_v12  ;;  %3095 = vmatprep.mubr.bf16.mxu0 %v9329_v29 }
 0x156   : > { %v1636_v4 = vadd.f32 %v1635_v8, %v1405_v10  ;;  %v1675_v33 = vmul.f32 %v1405_v10, %v1405_v10  ;;  %v1408_v53 = vadd.f32 %v6435_v28, %v6323_v62  ;;  %3256 = vmatprep.mubr.bf16.mxu1 %v9327_v55  ;;  %v9330_v55 = vld [vmem:[#allocation31_spill] sm:$0xff]  ;;  %v9331_v28 = vld [vmem:[#allocation32_spill] sm:$0xff] }
 0x157   : > { %v6324_v9 = vpop.f32.mrb[40].mxu0 }
 0x158   : > { %v1706_v15 = vadd.f32 %v1705_v20, %v1675_v33  ;;  %v5913_v39 = vpack.c.bf16 %v1408_v53, %v1405_v10  ;;  %v1637_v57 = vadd.f32 %v1636_v4, %v1408_v53  ;;  %v1676_v23 = vmul.f32 %v1408_v53, %v1408_v53  ;;  %v6436_v60 = vpop.f32.mrb[40].mxu1  ;;  %v6325_v54 = vpop.f32.mrb[41].mxu0 }
 0x159   : > { %v6437_v35 = vpop.f32.mrb[41].mxu1  ;;  %v6326_v49 = vadd.f32 %v6325_v54, %v6324_v9  ;;  %v6327_v12 = vpop.f32.mrb[42].mxu0 }
 0x15a   : > { %6193 = vst [vmem:[%s8597_s15 + $0x48] sm:$0xff] %v5913_v39   ;;  %v1707_v40 = vadd.f32 %v1706_v15, %v1676_v23  ;;  %v6438_v22 = vadd.f32 %v6437_v35, %v6436_v60  ;;  %v6439_v8 = vpop.f32.mrb[42].mxu1  ;;  %v6328_v19 = vpop.f32.mrb[43].mxu0 }
 0x15b   : > { %v6440_v32 = vpop.f32.mrb[43].mxu1  ;;  %v6329_v63 = vadd.f32 %v6328_v19, %v6327_v12 }
 0x15c   : > { %v1413_v27 = vadd.f32 %v6438_v22, %v6326_v49  ;;  %v6441_v43 = vadd.f32 %v6440_v32, %v6439_v8  ;;  %3096 = vmatmul.mubr.bf16.gmra.mrb[148].mxu0 %v9330_v55 }
 0x15d   : > { %3257 = vmatmul.mubr.bf16.gmra.mrb[148].mxu1 %v9328_v24  ;;  %3103 = vmatprep.mubr.bf16.mxu0 %v9331_v28 }
 0x15e   : > { %v1638_v20 = vadd.f32 %v1637_v57, %v1413_v27  ;;  %v1677_v10 = vmul.f32 %v1413_v27, %v1413_v27  ;;  %v1416_v62 = vadd.f32 %v6441_v43, %v6329_v63  ;;  %3264 = vmatprep.mubr.bf16.mxu1 %v9329_v29  ;;  %v9332_v29 = vld [vmem:[#allocation33_spill] sm:$0xff]  ;;  %v9333_v43 = vld [vmem:[#allocation35_spill] sm:$0xff] }
 0x15f   : > { %v6330_v39 = vpop.f32.mrb[44].mxu0 }
 0x160   : > { %v1708_v4 = vadd.f32 %v1707_v40, %v1677_v10  ;;  %v5918_v33 = vpack.c.bf16 %v1416_v62, %v1413_v27  ;;  %v1639_v53 = vadd.f32 %v1638_v20, %v1416_v62  ;;  %v1678_v15 = vmul.f32 %v1416_v62, %v1416_v62  ;;  %v6442_v23 = vpop.f32.mrb[44].mxu1  ;;  %v6331_v9 = vpop.f32.mrb[45].mxu0 }
 0x161   : > { %v6443_v60 = vpop.f32.mrb[45].mxu1  ;;  %v6332_v35 = vadd.f32 %v6331_v9, %v6330_v39  ;;  %v6333_v24 = vpop.f32.mrb[46].mxu0 }
 0x162   : > { %6194 = vst [vmem:[%s8597_s15 + $0x50] sm:$0xff] %v5918_v33   ;;  %v1709_v54 = vadd.f32 %v1708_v4, %v1678_v15  ;;  %v6444_v49 = vadd.f32 %v6443_v60, %v6442_v23  ;;  %v6445_v57 = vpop.f32.mrb[46].mxu1  ;;  %v6334_v22 = vpop.f32.mrb[47].mxu0 }
 0x163   : > { %v6446_v12 = vpop.f32.mrb[47].mxu1  ;;  %v6335_v19 = vadd.f32 %v6334_v22, %v6333_v24 }
 0x164   : > { %v1421_v8 = vadd.f32 %v6444_v49, %v6332_v35  ;;  %v6447_v32 = vadd.f32 %v6446_v12, %v6445_v57  ;;  %3104 = vmatmul.mubr.bf16.gmra.mrb[152].mxu0 %v9332_v29 }
 0x165   : > { %3265 = vmatmul.mubr.bf16.gmra.mrb[152].mxu1 %v9330_v55  ;;  %3111 = vmatprep.mubr.bf16.mxu0 %v9333_v43 }
 0x166   : > { %v1640_v40 = vadd.f32 %v1639_v53, %v1421_v8  ;;  %v1679_v27 = vmul.f32 %v1421_v8, %v1421_v8  ;;  %v1424_v63 = vadd.f32 %v6447_v32, %v6335_v19  ;;  %3272 = vmatprep.mubr.bf16.mxu1 %v9331_v28  ;;  %v9334_v28 = vld [vmem:[#allocation37_spill] sm:$0xff]  ;;  %v9335_v32 = vld [vmem:[#allocation40_spill] sm:$0xff] }
 0x167   : > { %v6336_v33 = vpop.f32.mrb[48].mxu0 }
 0x168   : > { %v1710_v20 = vadd.f32 %v1709_v54, %v1679_v27  ;;  %v5923_v10 = vpack.c.bf16 %v1424_v63, %v1421_v8  ;;  %v1641_v62 = vadd.f32 %v1640_v40, %v1424_v63  ;;  %v1680_v4 = vmul.f32 %v1424_v63, %v1424_v63  ;;  %v6448_v15 = vpop.f32.mrb[48].mxu1  ;;  %v6337_v39 = vpop.f32.mrb[49].mxu0 }
 0x169   : > { %v6449_v23 = vpop.f32.mrb[49].mxu1  ;;  %v6338_v60 = vadd.f32 %v6337_v39, %v6336_v33  ;;  %v6339_v55 = vpop.f32.mrb[50].mxu0 }
 0x16a   : > { %6195 = vst [vmem:[%s8597_s15 + $0x58] sm:$0xff] %v5923_v10   ;;  %v1711_v9 = vadd.f32 %v1710_v20, %v1680_v4  ;;  %v6450_v35 = vadd.f32 %v6449_v23, %v6448_v15  ;;  %v6451_v53 = vpop.f32.mrb[50].mxu1  ;;  %v6340_v49 = vpop.f32.mrb[51].mxu0 }
 0x16b   : > { %v6452_v24 = vpop.f32.mrb[51].mxu1  ;;  %v6341_v22 = vadd.f32 %v6340_v49, %v6339_v55 }
 0x16c   : > { %v1429_v57 = vadd.f32 %v6450_v35, %v6338_v60  ;;  %v6453_v12 = vadd.f32 %v6452_v24, %v6451_v53  ;;  %3112 = vmatmul.mubr.bf16.gmra.mrb[156].mxu0 %v9334_v28 }
 0x16d   : > { %3273 = vmatmul.mubr.bf16.gmra.mrb[156].mxu1 %v9332_v29  ;;  %3119 = vmatprep.mubr.bf16.mxu0 %v9335_v32 }
 0x16e   : > { %v1642_v54 = vadd.f32 %v1641_v62, %v1429_v57  ;;  %v1681_v8 = vmul.f32 %v1429_v57, %v1429_v57  ;;  %v1432_v19 = vadd.f32 %v6453_v12, %v6341_v22  ;;  %3280 = vmatprep.mubr.bf16.mxu1 %v9333_v43 }
 0x16f   : > { %v6342_v10 = vpop.f32.mrb[52].mxu0 }
 0x170   : > { %v1712_v40 = vadd.f32 %v1711_v9, %v1681_v8  ;;  %v5928_v27 = vpack.c.bf16 %v1432_v19, %v1429_v57  ;;  %v1643_v63 = vadd.f32 %v1642_v54, %v1432_v19  ;;  %v1682_v20 = vmul.f32 %v1432_v19, %v1432_v19  ;;  %v6454_v4 = vpop.f32.mrb[52].mxu1  ;;  %v6343_v33 = vpop.f32.mrb[53].mxu0 }
 0x171   : > { %v6455_v15 = vpop.f32.mrb[53].mxu1  ;;  %v6344_v23 = vadd.f32 %v6343_v33, %v6342_v10  ;;  %v6345_v29 = vpop.f32.mrb[54].mxu0 }
 0x172   : > { %6196 = vst [vmem:[%s8597_s15 + $0x60] sm:$0xff] %v5928_v27   ;;  %v1713_v39 = vadd.f32 %v1712_v40, %v1682_v20  ;;  %v6456_v60 = vadd.f32 %v6455_v15, %v6454_v4  ;;  %v6457_v62 = vpop.f32.mrb[54].mxu1  ;;  %v6346_v35 = vpop.f32.mrb[55].mxu0 }
 0x173   : > { %v6458_v55 = vpop.f32.mrb[55].mxu1  ;;  %v6347_v49 = vadd.f32 %v6346_v35, %v6345_v29 }
 0x174   : > { %v1437_v53 = vadd.f32 %v6456_v60, %v6344_v23  ;;  %v6459_v24 = vadd.f32 %v6458_v55, %v6457_v62  ;;  %3120 = vmatmul.mubr.bf16.gmra.mrb[160].mxu0 %v8039_v61 }
 0x175   : > { %3281 = vmatmul.mubr.bf16.gmra.mrb[160].mxu1 %v9334_v28  ;;  %3127 = vmatprep.mubr.bf16.mxu0 %v8047_v45 }
 0x176   : > { %v1644_v43 = vadd.f32 %v1643_v63, %v1437_v53  ;;  %v1683_v9 = vmul.f32 %v1437_v53, %v1437_v53  ;;  %v1440_v57 = vadd.f32 %v6459_v24, %v6347_v49  ;;  %3288 = vmatprep.mubr.bf16.mxu1 %v9335_v32 }
 0x177   : > { %v6348_v19 = vpop.f32.mrb[56].mxu0 }
 0x178   : > { %v1714_v22 = vadd.f32 %v1713_v39, %v1683_v9  ;;  %v5933_v12 = vpack.c.bf16 %v1440_v57, %v1437_v53  ;;  %v1645_v54 = vadd.f32 %v1644_v43, %v1440_v57  ;;  %v1684_v8 = vmul.f32 %v1440_v57, %v1440_v57  ;;  %v6460_v40 = vpop.f32.mrb[56].mxu1  ;;  %v6349_v27 = vpop.f32.mrb[57].mxu0 }
 0x179   : > { %v6461_v20 = vpop.f32.mrb[57].mxu1  ;;  %v6350_v4 = vadd.f32 %v6349_v27, %v6348_v19  ;;  %v6351_v28 = vpop.f32.mrb[58].mxu0 }
 0x17a   : > { %6197 = vst [vmem:[%s8597_s15 + $0x68] sm:$0xff] %v5933_v12   ;;  %v1715_v10 = vadd.f32 %v1714_v22, %v1684_v8  ;;  %v6462_v33 = vadd.f32 %v6461_v20, %v6460_v40  ;;  %v6463_v63 = vpop.f32.mrb[58].mxu1  ;;  %v6352_v15 = vpop.f32.mrb[59].mxu0 }
 0x17b   : > { %v6464_v23 = vpop.f32.mrb[59].mxu1  ;;  %v6353_v29 = vadd.f32 %v6352_v15, %v6351_v28 }
 0x17c   : > { %v1445_v60 = vadd.f32 %v6462_v33, %v6350_v4  ;;  %v6465_v62 = vadd.f32 %v6464_v23, %v6463_v63  ;;  %3128 = vmatmul.mubr.bf16.gmra.mrb[164].mxu0 %v8094_v46  ;;  %v8765_v63 = vld [vmem:[%s7526_s29 + $0xcc] sm:$0xff]  }
 0x17d   : > { %3289 = vmatmul.mubr.bf16.gmra.mrb[164].mxu1 %v8039_v61  ;;  %3135 = vmatprep.mubr.bf16.mxu0 %v8097_v36 }
 0x17e   : > { %v1646_v32 = vadd.f32 %v1645_v54, %v1445_v60  ;;  %v1685_v39 = vmul.f32 %v1445_v60, %v1445_v60  ;;  %v1448_v35 = vadd.f32 %v6465_v62, %v6353_v29  ;;  %3296 = vmatprep.mubr.bf16.mxu1 %v8047_v45 }
 0x17f   : > { %v6354_v43 = vpop.f32.mrb[60].mxu0 }
 0x180   : > { %v1716_v55 = vadd.f32 %v1715_v10, %v1685_v39  ;;  %v5938_v53 = vpack.c.bf16 %v1448_v35, %v1445_v60  ;;  %v1647_v49 = vadd.f32 %v1646_v32, %v1448_v35  ;;  %v1686_v24 = vmul.f32 %v1448_v35, %v1448_v35  ;;  %v6466_v9 = vpop.f32.mrb[60].mxu1  ;;  %v6355_v57 = vpop.f32.mrb[61].mxu0 }
 0x181   : > { %v6467_v22 = vpop.f32.mrb[61].mxu1  ;;  %v6356_v8 = vadd.f32 %v6355_v57, %v6354_v43  ;;  %v6357_v54 = vpop.f32.mrb[62].mxu0 }
 0x182   : > { %6198 = vst [vmem:[%s8597_s15 + $0x70] sm:$0xff] %v5938_v53   ;;  %v1717_v12 = vadd.f32 %v1716_v55, %v1686_v24  ;;  %v6468_v61 = vadd.f32 %v6467_v22, %v6466_v9  ;;  %v6469_v19 = vpop.f32.mrb[62].mxu1  ;;  %v6358_v40 = vpop.f32.mrb[63].mxu0  ;;  %v2739_v9 = vshrl.u32 %v8765_v63, 16 }
 0x183   : > { %v6470_v27 = vpop.f32.mrb[63].mxu1  ;;  %v6359_v4 = vadd.f32 %v6358_v40, %v6357_v54  ;;  %v2742_v54 = vshll.u32 %v8765_v63, 16 }
 0x184   : > { %v1453_v20 = vadd.f32 %v6468_v61, %v6356_v8  ;;  %v6471_v45 = vadd.f32 %v6470_v27, %v6469_v19  ;;  %3136 = vmatmul.mubr.bf16.gmra.mrb[168].mxu0 %v8112_v25  ;;  %v8779_v61 = vrot.slane %v2739_v9, 7 }
 0x185   : > { %3297 = vmatmul.mubr.bf16.gmra.mrb[168].mxu1 %v8094_v46  ;;  %3143 = vmatprep.mubr.bf16.mxu0 %v8179_v0 }
 0x186   : > { %v1648_v10 = vadd.f32 %v1647_v49, %v1453_v20  ;;  %v1687_v33 = vmul.f32 %v1453_v20, %v1453_v20  ;;  %v1456_v28 = vadd.f32 %v6471_v45, %v6359_v4  ;;  %3304 = vmatprep.mubr.bf16.mxu1 %v8097_v36 }
 0x187   : > { %v6488_v62 = vpop.f32.mrb[64].mxu0 }
 0x188   : > { %v1718_v15 = vadd.f32 %v1717_v12, %v1687_v33  ;;  %v5943_v23 = vpack.c.bf16 %v1456_v28, %v1453_v20  ;;  %v8767_v60 = vadd.f32 %v1648_v10, %v1456_v28  ;;  %v1688_v29 = vmul.f32 %v1456_v28, %v1456_v28  ;;  %v6600_v32 = vpop.f32.mrb[64].mxu1  ;;  %v6489_v39 = vpop.f32.mrb[65].mxu0 }
 0x189   : > { %v6601_v35 = vpop.f32.mrb[65].mxu1  ;;  %v6490_v55 = vadd.f32 %v6489_v39, %v6488_v62  ;;  %v6491_v49 = vpop.f32.mrb[66].mxu0 }
 0x18a   : > { %6199 = vst [vmem:[%s8597_s15 + $0x78] sm:$0xff] %v5943_v23   ;;  %v8770_v46 = vadd.f32 %v1718_v15, %v1688_v29  ;;  %v6602_v53 = vadd.f32 %v6601_v35, %v6600_v32  ;;  %v6603_v24 = vpop.f32.mrb[66].mxu1  ;;  %v6492_v43 = vpop.f32.mrb[67].mxu0  ;;  %v8786_v32 = vor.u32 %v2742_v54, %v8779_v61 }
 0x18b   : > { %v6604_v36 = vpop.f32.mrb[67].mxu1  ;;  %v6493_v22 = vadd.f32 %v6492_v43, %v6491_v49 }
 0x18c   : > { %v2335_v57 = vadd.f32 %v6602_v53, %v6490_v55  ;;  %v6605_v12 = vadd.f32 %v6604_v36, %v6603_v24  ;;  %3144 = vmatmul.mubr.bf16.gmra.mrb[172].mxu0 %v8225_v38  ;;  %v2755_v43 = vshll.u32 %v8786_v32, 16 }
 0x18d   : > { %3305 = vmatmul.mubr.bf16.gmra.mrb[172].mxu1 %v8112_v25  ;;  %3151 = vmatprep.mubr.bf16.mxu0 %v8239_v34 }
 0x18e   : > { %3312 = vmatprep.mubr.bf16.mxu1 %v8179_v0  ;;  %v2338_v8 = vadd.f32 %v6605_v12, %v6493_v22  ;;  %v2660_v27 = vmul.f32 %v2335_v57, %v2335_v57 }
 0x18f   : > { %v6494_v19 = vpop.f32.mrb[68].mxu0 }
 0x190   : > { %v6606_v40 = vpop.f32.mrb[68].mxu1  ;;  %v5948_v20 = vpack.c.bf16 %v2338_v8, %v2335_v57  ;;  %v2622_v4 = vadd.f32 %v2338_v8, %v2335_v57  ;;  %v2661_v45 = vmul.f32 %v2338_v8, %v2338_v8  ;;  %v6495_v10 = vpop.f32.mrb[69].mxu0 }
 0x191   : > { %v6607_v25 = vpop.f32.mrb[69].mxu1  ;;  %v6496_v33 = vadd.f32 %v6495_v10, %v6494_v19  ;;  %v6497_v15 = vpop.f32.mrb[70].mxu0 }
 0x192   : > { %v6608_v28 = vadd.f32 %v6607_v25, %v6606_v40  ;;  %v6609_v0 = vpop.f32.mrb[70].mxu1  ;;  %6200 = vst [vmem:[%s8597_s15 + $0x80] sm:$0xff] %v5948_v20   ;;  %v2692_v23 = vadd.f32 %v2661_v45, %v2660_v27  ;;  %v6498_v29 = vpop.f32.mrb[71].mxu0 }
 0x193   : > { %v6610_v62 = vpop.f32.mrb[71].mxu1  ;;  %v6499_v35 = vadd.f32 %v6498_v29, %v6497_v15  ;;  %v2760_v15 = vshll.u32 %v8779_v61, 16 }
 0x194   : > { %v2343_v39 = vadd.f32 %v6608_v28, %v6496_v33  ;;  %v6611_v55 = vadd.f32 %v6610_v62, %v6609_v0  ;;  %3152 = vmatmul.mubr.bf16.gmra.mrb[176].mxu0 %v8290_v2  ;;  %v2753_v33 = vshrl.u32 %v8786_v32, 16  ;;  %v2757_v28 = vrot.slane %v2755_v43, 1 }
 0x195   : > { %3313 = vmatmul.mubr.bf16.gmra.mrb[176].mxu1 %v8225_v38  ;;  %3159 = vmatprep.mubr.bf16.mxu0 %v8305_v3 }
 0x196   : > { %v2623_v53 = vadd.f32 %v2622_v4, %v2343_v39  ;;  %v2662_v49 = vmul.f32 %v2343_v39, %v2343_v39  ;;  %3320 = vmatprep.mubr.bf16.mxu1 %v8239_v34  ;;  %v2346_v24 = vadd.f32 %v6611_v55, %v6499_v35  ;;  %v8801_v55 = vld [vmem:[%s7526_s29 + $0xd4] ss:$0 sps:$4 sm:$0x11]  }
 0x197   : > { %v6500_v57 = vpop.f32.mrb[72].mxu0 }
 0x198   : > { %v2693_v36 = vadd.f32 %v2692_v23, %v2662_v49  ;;  %v6612_v22 = vpop.f32.mrb[72].mxu1  ;;  %v5953_v12 = vpack.c.bf16 %v2346_v24, %v2343_v39  ;;  %v2624_v8 = vadd.f32 %v2623_v53, %v2346_v24  ;;  %v2663_v19 = vmul.f32 %v2346_v24, %v2346_v24  ;;  %v6501_v40 = vpop.f32.mrb[73].mxu0 }
 0x199   : > { %v6613_v27 = vpop.f32.mrb[73].mxu1  ;;  %v6502_v20 = vadd.f32 %v6501_v40, %v6500_v57  ;;  %v6503_v4 = vpop.f32.mrb[74].mxu0  ;;  %v2758_v53 = vor.u32 %v2757_v28, %v2753_v33  ;;  %v2762_v49 = vrot.slane %v2760_v15, 1 }
 0x19a   : > { %v6614_v38 = vadd.f32 %v6613_v27, %v6612_v22  ;;  %v6615_v45 = vpop.f32.mrb[74].mxu1  ;;  %6201 = vst [vmem:[%s8597_s15 + $0x88] sm:$0xff] %v5953_v12   ;;  %v2694_v10 = vadd.f32 %v2693_v36, %v2663_v19  ;;  %v6504_v25 = vpop.f32.mrb[75].mxu0 }
 0x19b   : > { %v6616_v34 = vpop.f32.mrb[75].mxu1  ;;  %v6505_v23 = vadd.f32 %v6504_v25, %v6503_v4  ;;  %v2748_v4 = vshll.u32 %v8801_v55, 16  ;;  %v2763_v25 = vsel %vm523_vm0, %v2758_v53, %v2762_v49 }
 0x19c   : > { %v2351_v0 = vadd.f32 %v6614_v38, %v6502_v20  ;;  %v6617_v29 = vadd.f32 %v6616_v34, %v6615_v45  ;;  %3160 = vmatmul.mubr.bf16.gmra.mrb[180].mxu0 %v8328_v51 }
 0x19d   : > { %3321 = vmatmul.mubr.bf16.gmra.mrb[180].mxu1 %v8290_v2  ;;  %3167 = vmatprep.mubr.bf16.mxu0 %v8333_v52 }
 0x19e   : > { %v2625_v62 = vadd.f32 %v2624_v8, %v2351_v0  ;;  %v2664_v39 = vmul.f32 %v2351_v0, %v2351_v0  ;;  %v2354_v35 = vadd.f32 %v6617_v29, %v6505_v23  ;;  %3328 = vmatprep.mubr.bf16.mxu1 %v8305_v3  ;;  %v2745_v8 = vrot.slane %v2742_v54, 1 }
 0x19f   : > { %v6506_v22 = vpop.f32.mrb[76].mxu0  ;;  %v2750_v29 = vrot.slane %v2748_v4, 1 }
 0x1a0   : > { %v2695_v24 = vadd.f32 %v2694_v10, %v2664_v39  ;;  %v5958_v43 = vpack.c.bf16 %v2354_v35, %v2351_v0  ;;  %v2626_v36 = vadd.f32 %v2625_v62, %v2354_v35  ;;  %v2665_v57 = vmul.f32 %v2354_v35, %v2354_v35  ;;  %v6618_v12 = vpop.f32.mrb[76].mxu1  ;;  %v6507_v19 = vpop.f32.mrb[77].mxu0 }
 0x1a1   : > { %v6619_v2 = vpop.f32.mrb[77].mxu1  ;;  %v6508_v27 = vadd.f32 %v6507_v19, %v6506_v22  ;;  %v6509_v3 = vpop.f32.mrb[78].mxu0  ;;  %v2746_v54 = vor.u32 %v2745_v8, %v2739_v9 }
 0x1a2   : > { %6202 = vst [vmem:[%s8597_s15 + $0x90] sm:$0xff] %v5958_v43   ;;  %v2696_v40 = vadd.f32 %v2695_v24, %v2665_v57  ;;  %v6620_v20 = vadd.f32 %v6619_v2, %v6618_v12  ;;  %v6621_v38 = vpop.f32.mrb[78].mxu1  ;;  %v6510_v45 = vpop.f32.mrb[79].mxu0 }
 0x1a3   : > { %v6622_v10 = vpop.f32.mrb[79].mxu1  ;;  %v6511_v33 = vadd.f32 %v6510_v45, %v6509_v3  ;;  %v2751_v12 = vsel %vm523_vm0, %v2746_v54, %v2750_v29 }
 0x1a4   : > { %v2359_v34 = vadd.f32 %v6620_v20, %v6508_v27  ;;  %v6623_v28 = vadd.f32 %v6622_v10, %v6621_v38  ;;  %3168 = vmatmul.mubr.bf16.gmra.mrb[184].mxu0 %v8357_v47 }
 0x1a5   : > { %3329 = vmatmul.mubr.bf16.gmra.mrb[184].mxu1 %v8328_v51  ;;  %3175 = vmatprep.mubr.bf16.mxu0 %v2763_v25 }
 0x1a6   : > { %v2627_v15 = vadd.f32 %v2626_v36, %v2359_v34  ;;  %v2666_v0 = vmul.f32 %v2359_v34, %v2359_v34  ;;  %v2362_v23 = vadd.f32 %v6623_v28, %v6511_v33  ;;  %3336 = vmatprep.mubr.bf16.mxu1 %v8333_v52 }
 0x1a7   : > { %v6512_v49 = vpop.f32.mrb[80].mxu0 }
 0x1a8   : > { %v2697_v62 = vadd.f32 %v2696_v40, %v2666_v0  ;;  %v5963_v39 = vpack.c.bf16 %v2362_v23, %v2359_v34  ;;  %v2628_v35 = vadd.f32 %v2627_v15, %v2362_v23  ;;  %v2667_v53 = vmul.f32 %v2362_v23, %v2362_v23  ;;  %v6624_v24 = vpop.f32.mrb[80].mxu1  ;;  %v6513_v51 = vpop.f32.mrb[81].mxu0 }
 0x1a9   : > { %v6625_v43 = vpop.f32.mrb[81].mxu1  ;;  %v6514_v9 = vadd.f32 %v6513_v51, %v6512_v49  ;;  %v6515_v57 = vpop.f32.mrb[82].mxu0 }
 0x1aa   : > { %6203 = vst [vmem:[%s8597_s15 + $0x98] sm:$0xff] %v5963_v39   ;;  %v2698_v63 = vadd.f32 %v2697_v62, %v2667_v53  ;;  %v6626_v36 = vadd.f32 %v6625_v43, %v6624_v24  ;;  %v6627_v22 = vpop.f32.mrb[82].mxu1  ;;  %v6516_v52 = vpop.f32.mrb[83].mxu0 }
 0x1ab   : > { %v6628_v19 = vpop.f32.mrb[83].mxu1  ;;  %v6517_v8 = vadd.f32 %v6516_v52, %v6515_v57 }
 0x1ac   : > { %v2367_v2 = vadd.f32 %v6626_v36, %v6514_v9  ;;  %v6629_v40 = vadd.f32 %v6628_v19, %v6627_v22  ;;  %3176 = vmatmul.mubr.bf16.gmra.mrb[188].mxu0 %v2751_v12 }
 0x1ad   : > { %3337 = vmatmul.mubr.bf16.gmra.mrb[188].mxu1 %v8357_v47  ;;  %3912 = vmatprep.mubr.bf16.mxu0 %v8411_v31 }
 0x1ae   : > { %v2629_v27 = vadd.f32 %v2628_v35, %v2367_v2  ;;  %v2668_v20 = vmul.f32 %v2367_v2, %v2367_v2  ;;  %v2370_v3 = vadd.f32 %v6629_v40, %v6517_v8  ;;  %4073 = vmatprep.mubr.bf16.mxu1 %v8364_v5 }
 0x1af   : > { %v6518_v34 = vpop.f32.mrb[84].mxu0 }
 0x1b0   : > { %v2699_v38 = vadd.f32 %v2698_v63, %v2668_v20  ;;  %v5968_v45 = vpack.c.bf16 %v2370_v3, %v2367_v2  ;;  %v2630_v10 = vadd.f32 %v2629_v27, %v2370_v3  ;;  %v2669_v25 = vmul.f32 %v2370_v3, %v2370_v3  ;;  %v6630_v33 = vpop.f32.mrb[84].mxu1  ;;  %v6519_v28 = vpop.f32.mrb[85].mxu0 }
 0x1b1   : > { %v6631_v54 = vpop.f32.mrb[85].mxu1  ;;  %v6520_v0 = vadd.f32 %v6519_v28, %v6518_v34  ;;  %v6521_v47 = vpop.f32.mrb[86].mxu0 }
 0x1b2   : > { %6204 = vst [vmem:[%s8597_s15 + $0xa0] sm:$0xff] %v5968_v45   ;;  %v2700_v15 = vadd.f32 %v2699_v38, %v2669_v25  ;;  %v6632_v23 = vadd.f32 %v6631_v54, %v6630_v33  ;;  %v6633_v29 = vpop.f32.mrb[86].mxu1  ;;  %v6522_v62 = vpop.f32.mrb[87].mxu0 }
 0x1b3   : > { %v6634_v39 = vpop.f32.mrb[87].mxu1  ;;  %v6523_v53 = vadd.f32 %v6522_v62, %v6521_v47 }
 0x1b4   : > { %v2375_v35 = vadd.f32 %v6632_v23, %v6520_v0  ;;  %v6635_v49 = vadd.f32 %v6634_v39, %v6633_v29  ;;  %3913 = vmatmul.mubr.bf16.vlgmr.msra.gmra.mrb[192].mxu0 %v8434_v18 }
 0x1b5   : > { %4074 = vmatmul.mubr.bf16.vlgmr.msra.gmra.mrb[192].mxu1 %v8397_v13  ;;  %3920 = vmatprep.mubr.bf16.mxu0 %v8437_v14 }
 0x1b6   : > { %v2631_v5 = vadd.f32 %v2630_v10, %v2375_v35  ;;  %v2670_v24 = vmul.f32 %v2375_v35, %v2375_v35  ;;  %v2378_v51 = vadd.f32 %v6635_v49, %v6523_v53  ;;  %4081 = vmatprep.mubr.bf16.mxu1 %v8411_v31 }
 0x1b7   : > { %v6524_v57 = vpop.f32.mrb[88].mxu0 }
 0x1b8   : > { %v2701_v43 = vadd.f32 %v2700_v15, %v2670_v24  ;;  %v5973_v63 = vpack.c.bf16 %v2378_v51, %v2375_v35  ;;  %v2632_v9 = vadd.f32 %v2631_v5, %v2378_v51  ;;  %v2671_v36 = vmul.f32 %v2378_v51, %v2378_v51  ;;  %v6636_v22 = vpop.f32.mrb[88].mxu1  ;;  %v6525_v12 = vpop.f32.mrb[89].mxu0 }
 0x1b9   : > { %v6637_v52 = vpop.f32.mrb[89].mxu1  ;;  %v6526_v2 = vadd.f32 %v6525_v12, %v6524_v57  ;;  %v6527_v13 = vpop.f32.mrb[90].mxu0 }
 0x1ba   : > { %6205 = vst [vmem:[%s8597_s15 + $0xa8] sm:$0xff] %v5973_v63   ;;  %v2702_v19 = vadd.f32 %v2701_v43, %v2671_v36  ;;  %v6638_v8 = vadd.f32 %v6637_v52, %v6636_v22  ;;  %v6639_v40 = vpop.f32.mrb[90].mxu1  ;;  %v6528_v27 = vpop.f32.mrb[91].mxu0 }
 0x1bb   : > { %v6640_v20 = vpop.f32.mrb[91].mxu1  ;;  %v6529_v38 = vadd.f32 %v6528_v27, %v6527_v13 }
 0x1bc   : > { %v2383_v3 = vadd.f32 %v6638_v8, %v6526_v2  ;;  %v6641_v45 = vadd.f32 %v6640_v20, %v6639_v40  ;;  %3921 = vmatmul.mubr.bf16.gmra.mrb[196].mxu0 %v8475_v42 }
 0x1bd   : > { %4082 = vmatmul.mubr.bf16.gmra.mrb[196].mxu1 %v8434_v18  ;;  %3928 = vmatprep.mubr.bf16.mxu0 %v8478_v59 }
 0x1be   : > { %v2633_v31 = vadd.f32 %v2632_v9, %v2383_v3  ;;  %v2672_v10 = vmul.f32 %v2383_v3, %v2383_v3  ;;  %v2386_v25 = vadd.f32 %v6641_v45, %v6529_v38  ;;  %4089 = vmatprep.mubr.bf16.mxu1 %v8437_v14 }
 0x1bf   : > { %v6530_v15 = vpop.f32.mrb[92].mxu0 }
 0x1c0   : > { %v2703_v34 = vadd.f32 %v2702_v19, %v2672_v10  ;;  %v5978_v33 = vpack.c.bf16 %v2386_v25, %v2383_v3  ;;  %v2634_v28 = vadd.f32 %v2633_v31, %v2386_v25  ;;  %v2673_v54 = vmul.f32 %v2386_v25, %v2386_v25  ;;  %v6642_v0 = vpop.f32.mrb[92].mxu1  ;;  %v6531_v23 = vpop.f32.mrb[93].mxu0 }
 0x1c1   : > { %v6643_v47 = vpop.f32.mrb[93].mxu1  ;;  %v6532_v62 = vadd.f32 %v6531_v23, %v6530_v15  ;;  %v6533_v18 = vpop.f32.mrb[94].mxu0 }
 0x1c2   : > { %6206 = vst [vmem:[%s8597_s15 + $0xb0] sm:$0xff] %v5978_v33   ;;  %v2704_v29 = vadd.f32 %v2703_v34, %v2673_v54  ;;  %v6644_v39 = vadd.f32 %v6643_v47, %v6642_v0  ;;  %v6645_v35 = vpop.f32.mrb[94].mxu1  ;;  %v6534_v53 = vpop.f32.mrb[95].mxu0 }
 0x1c3   : > { %v6646_v49 = vpop.f32.mrb[95].mxu1  ;;  %v6535_v24 = vadd.f32 %v6534_v53, %v6533_v18 }
 0x1c4   : > { %v2391_v5 = vadd.f32 %v6644_v39, %v6532_v62  ;;  %v6647_v51 = vadd.f32 %v6646_v49, %v6645_v35  ;;  %3929 = vmatmul.mubr.bf16.gmra.mrb[200].mxu0 %v8516_v7 }
 0x1c5   : > { %4090 = vmatmul.mubr.bf16.gmra.mrb[200].mxu1 %v8475_v42  ;;  %3936 = vmatprep.mubr.bf16.mxu0 %v8519_v50 }
 0x1c6   : > { %v2635_v14 = vadd.f32 %v2634_v28, %v2391_v5  ;;  %v2674_v43 = vmul.f32 %v2391_v5, %v2391_v5  ;;  %v2394_v63 = vadd.f32 %v6647_v51, %v6535_v24  ;;  %4097 = vmatprep.mubr.bf16.mxu1 %v8478_v59 }
 0x1c7   : > { %v6536_v12 = vpop.f32.mrb[96].mxu0 }
 0x1c8   : > { %v2705_v9 = vadd.f32 %v2704_v29, %v2674_v43  ;;  %v5983_v36 = vpack.c.bf16 %v2394_v63, %v2391_v5  ;;  %v2636_v57 = vadd.f32 %v2635_v14, %v2394_v63  ;;  %v2675_v22 = vmul.f32 %v2394_v63, %v2394_v63  ;;  %v6648_v52 = vpop.f32.mrb[96].mxu1  ;;  %v6537_v19 = vpop.f32.mrb[97].mxu0 }
 0x1c9   : > { %v6649_v2 = vpop.f32.mrb[97].mxu1  ;;  %v6538_v13 = vadd.f32 %v6537_v19, %v6536_v12  ;;  %v6539_v42 = vpop.f32.mrb[98].mxu0 }
 0x1ca   : > { %6207 = vst [vmem:[%s8597_s15 + $0xb8] sm:$0xff] %v5983_v36   ;;  %v2706_v8 = vadd.f32 %v2705_v9, %v2675_v22  ;;  %v6650_v40 = vadd.f32 %v6649_v2, %v6648_v52  ;;  %v6651_v27 = vpop.f32.mrb[98].mxu1  ;;  %v6540_v20 = vpop.f32.mrb[99].mxu0 }
 0x1cb   : > { %v6652_v3 = vpop.f32.mrb[99].mxu1  ;;  %v6541_v45 = vadd.f32 %v6540_v20, %v6539_v42 }
 0x1cc   : > { %v2399_v38 = vadd.f32 %v6650_v40, %v6538_v13  ;;  %v6653_v31 = vadd.f32 %v6652_v3, %v6651_v27  ;;  %3937 = vmatmul.mubr.bf16.gmra.mrb[204].mxu0 %v8552_v1 }
 0x1cd   : > { %4098 = vmatmul.mubr.bf16.gmra.mrb[204].mxu1 %v8516_v7  ;;  %3944 = vmatprep.mubr.bf16.mxu0 %v8166_v44 }
 0x1ce   : > { %v2637_v59 = vadd.f32 %v2636_v57, %v2399_v38  ;;  %v2676_v10 = vmul.f32 %v2399_v38, %v2399_v38  ;;  %v2402_v25 = vadd.f32 %v6653_v31, %v6541_v45  ;;  %4105 = vmatprep.mubr.bf16.mxu1 %v8519_v50 }
 0x1cf   : > { %v6542_v15 = vpop.f32.mrb[100].mxu0 }
 0x1d0   : > { %v2707_v34 = vadd.f32 %v2706_v8, %v2676_v10  ;;  %v5988_v33 = vpack.c.bf16 %v2402_v25, %v2399_v38  ;;  %v2638_v28 = vadd.f32 %v2637_v59, %v2402_v25  ;;  %v2677_v54 = vmul.f32 %v2402_v25, %v2402_v25  ;;  %v6654_v0 = vpop.f32.mrb[100].mxu1  ;;  %v6543_v23 = vpop.f32.mrb[101].mxu0 }
 0x1d1   : > { %v6655_v47 = vpop.f32.mrb[101].mxu1  ;;  %v6544_v62 = vadd.f32 %v6543_v23, %v6542_v15  ;;  %v6545_v7 = vpop.f32.mrb[102].mxu0 }
 0x1d2   : > { %6208 = vst [vmem:[%s8597_s15 + $0xc0] sm:$0xff] %v5988_v33   ;;  %v2708_v29 = vadd.f32 %v2707_v34, %v2677_v54  ;;  %v6656_v39 = vadd.f32 %v6655_v47, %v6654_v0  ;;  %v6657_v18 = vpop.f32.mrb[102].mxu1  ;;  %v6546_v35 = vpop.f32.mrb[103].mxu0 }
 0x1d3   : > { %v6658_v53 = vpop.f32.mrb[103].mxu1  ;;  %v6547_v5 = vadd.f32 %v6546_v35, %v6545_v7 }
 0x1d4   : > { %v2407_v49 = vadd.f32 %v6656_v39, %v6544_v62  ;;  %v6659_v24 = vadd.f32 %v6658_v53, %v6657_v18  ;;  %3945 = vmatmul.mubr.bf16.gmra.mrb[208].mxu0 %v8561_v11 }
 0x1d5   : > { %4106 = vmatmul.mubr.bf16.gmra.mrb[208].mxu1 %v8552_v1  ;;  %3952 = vmatprep.mubr.bf16.mxu0 %v8183_v37 }
 0x1d6   : > { %v2639_v50 = vadd.f32 %v2638_v28, %v2407_v49  ;;  %v2678_v51 = vmul.f32 %v2407_v49, %v2407_v49  ;;  %v2410_v14 = vadd.f32 %v6659_v24, %v6547_v5  ;;  %4113 = vmatprep.mubr.bf16.mxu1 %v8166_v44 }
 0x1d7   : > { %v6548_v57 = vpop.f32.mrb[104].mxu0 }
 0x1d8   : > { %v2709_v43 = vadd.f32 %v2708_v29, %v2678_v51  ;;  %v5993_v63 = vpack.c.bf16 %v2410_v14, %v2407_v49  ;;  %v2640_v9 = vadd.f32 %v2639_v50, %v2410_v14  ;;  %v2679_v36 = vmul.f32 %v2410_v14, %v2410_v14  ;;  %v6660_v22 = vpop.f32.mrb[104].mxu1  ;;  %v6549_v12 = vpop.f32.mrb[105].mxu0 }
 0x1d9   : > { %v6661_v52 = vpop.f32.mrb[105].mxu1  ;;  %v6550_v2 = vadd.f32 %v6549_v12, %v6548_v57  ;;  %v6551_v1 = vpop.f32.mrb[106].mxu0 }
 0x1da   : > { %6209 = vst [vmem:[%s8597_s15 + $0xc8] sm:$0xff] %v5993_v63   ;;  %v2710_v19 = vadd.f32 %v2709_v43, %v2679_v36  ;;  %v6662_v8 = vadd.f32 %v6661_v52, %v6660_v22  ;;  %v6663_v13 = vpop.f32.mrb[106].mxu1  ;;  %v6552_v40 = vpop.f32.mrb[107].mxu0 }
 0x1db   : > { %v6664_v42 = vpop.f32.mrb[107].mxu1  ;;  %v6553_v20 = vadd.f32 %v6552_v40, %v6551_v1 }
 0x1dc   : > { %v2415_v27 = vadd.f32 %v6662_v8, %v6550_v2  ;;  %v6665_v3 = vadd.f32 %v6664_v42, %v6663_v13  ;;  %3953 = vmatmul.mubr.bf16.gmra.mrb[212].mxu0 %v8570_v6 }
 0x1dd   : > { %4114 = vmatmul.mubr.bf16.gmra.mrb[212].mxu1 %v8561_v11  ;;  %3960 = vmatprep.mubr.bf16.mxu0 %v8197_v56 }
 0x1de   : > { %v2641_v44 = vadd.f32 %v2640_v9, %v2415_v27  ;;  %v2680_v38 = vmul.f32 %v2415_v27, %v2415_v27  ;;  %v2418_v45 = vadd.f32 %v6665_v3, %v6553_v20  ;;  %4121 = vmatprep.mubr.bf16.mxu1 %v8183_v37 }
 0x1df   : > { %v6554_v34 = vpop.f32.mrb[108].mxu0 }
 0x1e0   : > { %v2711_v31 = vadd.f32 %v2710_v19, %v2680_v38  ;;  %v5998_v59 = vpack.c.bf16 %v2418_v45, %v2415_v27  ;;  %v2642_v10 = vadd.f32 %v2641_v44, %v2418_v45  ;;  %v2681_v25 = vmul.f32 %v2418_v45, %v2418_v45  ;;  %v6666_v33 = vpop.f32.mrb[108].mxu1  ;;  %v6555_v28 = vpop.f32.mrb[109].mxu0 }
 0x1e1   : > { %v6667_v54 = vpop.f32.mrb[109].mxu1  ;;  %v6556_v0 = vadd.f32 %v6555_v28, %v6554_v34  ;;  %v6557_v11 = vpop.f32.mrb[110].mxu0 }
 0x1e2   : > { %6210 = vst [vmem:[%s8597_s15 + $0xd0] sm:$0xff] %v5998_v59   ;;  %v2712_v15 = vadd.f32 %v2711_v31, %v2681_v25  ;;  %v6668_v23 = vadd.f32 %v6667_v54, %v6666_v33  ;;  %v6669_v47 = vpop.f32.mrb[110].mxu1  ;;  %v6558_v29 = vpop.f32.mrb[111].mxu0 }
 0x1e3   : > { %v6670_v62 = vpop.f32.mrb[111].mxu1  ;;  %v6559_v7 = vadd.f32 %v6558_v29, %v6557_v11  ;;  %v9336_v11 = vld [vmem:[#allocation42_spill] sm:$0xff] }
 0x1e4   : > { %v2423_v39 = vadd.f32 %v6668_v23, %v6556_v0  ;;  %v6671_v18 = vadd.f32 %v6670_v62, %v6669_v47  ;;  %3961 = vmatmul.mubr.bf16.gmra.mrb[216].mxu0 %v8206_v26 }
 0x1e5   : > { %4122 = vmatmul.mubr.bf16.gmra.mrb[216].mxu1 %v8570_v6  ;;  %3968 = vmatprep.mubr.bf16.mxu0 %v8209_v16 }
 0x1e6   : > { %v2643_v37 = vadd.f32 %v2642_v10, %v2423_v39  ;;  %v2682_v35 = vmul.f32 %v2423_v39, %v2423_v39  ;;  %v2426_v53 = vadd.f32 %v6671_v18, %v6559_v7  ;;  %4129 = vmatprep.mubr.bf16.mxu1 %v8197_v56 }
 0x1e7   : > { %v6560_v51 = vpop.f32.mrb[112].mxu0 }
 0x1e8   : > { %v2713_v49 = vadd.f32 %v2712_v15, %v2682_v35  ;;  %v6003_v5 = vpack.c.bf16 %v2426_v53, %v2423_v39  ;;  %v2644_v24 = vadd.f32 %v2643_v37, %v2426_v53  ;;  %v2683_v50 = vmul.f32 %v2426_v53, %v2426_v53  ;;  %v6672_v14 = vpop.f32.mrb[112].mxu1  ;;  %v6561_v43 = vpop.f32.mrb[113].mxu0 }
 0x1e9   : > { %v6673_v63 = vpop.f32.mrb[113].mxu1  ;;  %v6562_v36 = vadd.f32 %v6561_v43, %v6560_v51  ;;  %v6563_v6 = vpop.f32.mrb[114].mxu0 }
 0x1ea   : > { %6211 = vst [vmem:[%s8597_s15 + $0xd8] sm:$0xff] %v6003_v5   ;;  %v2714_v9 = vadd.f32 %v2713_v49, %v2683_v50  ;;  %v6674_v57 = vadd.f32 %v6673_v63, %v6672_v14  ;;  %v6675_v22 = vpop.f32.mrb[114].mxu1  ;;  %v6564_v12 = vpop.f32.mrb[115].mxu0 }
 0x1eb   : > { %v6676_v52 = vpop.f32.mrb[115].mxu1  ;;  %v6565_v2 = vadd.f32 %v6564_v12, %v6563_v6  ;;  %v9338_v6 = vld [vmem:[#allocation34_spill] sm:$0xff]  ;;  %v1720_v12 = vrot.slane %v8770_v46, 4 }
 0x1ec   : > { %v2431_v19 = vadd.f32 %v6674_v57, %v6562_v36  ;;  %v6677_v8 = vadd.f32 %v6676_v52, %v6675_v22  ;;  %3969 = vmatmul.mubr.bf16.gmra.mrb[220].mxu0 %v8217_v30  ;;  %v1650_v22 = vrot.slane %v8767_v60, 4 }
 0x1ed   : > { %4130 = vmatmul.mubr.bf16.gmra.mrb[220].mxu1 %v8206_v26  ;;  %3976 = vmatprep.mubr.bf16.mxu0 %v8233_v48 }
 0x1ee   : > { %v2645_v56 = vadd.f32 %v2644_v24, %v2431_v19  ;;  %v2684_v1 = vmul.f32 %v2431_v19, %v2431_v19  ;;  %v2434_v13 = vadd.f32 %v6677_v8, %v6565_v2  ;;  %4137 = vmatprep.mubr.bf16.mxu1 %v8209_v16 }
 0x1ef   : > { %v6566_v3 = vpop.f32.mrb[116].mxu0 }
 0x1f0   : > { %v2715_v40 = vadd.f32 %v2714_v9, %v2684_v1  ;;  %v6008_v42 = vpack.c.bf16 %v2434_v13, %v2431_v19  ;;  %v2646_v27 = vadd.f32 %v2645_v56, %v2434_v13  ;;  %v2685_v20 = vmul.f32 %v2434_v13, %v2434_v13  ;;  %v6678_v44 = vpop.f32.mrb[116].mxu1  ;;  %v6567_v38 = vpop.f32.mrb[117].mxu0 }
 0x1f1   : > { %v6679_v45 = vpop.f32.mrb[117].mxu1  ;;  %v6568_v59 = vadd.f32 %v6567_v38, %v6566_v3  ;;  %v6569_v26 = vpop.f32.mrb[118].mxu0  ;;  %v1721_v38 = vadd.f32 %v1720_v12, %v8770_v46 }
 0x1f2   : > { %6212 = vst [vmem:[%s8597_s15 + $0xe0] sm:$0xff] %v6008_v42   ;;  %v2716_v31 = vadd.f32 %v2715_v40, %v2685_v20  ;;  %v6680_v10 = vadd.f32 %v6679_v45, %v6678_v44  ;;  %v6681_v25 = vpop.f32.mrb[118].mxu1  ;;  %v6570_v34 = vpop.f32.mrb[119].mxu0  ;;  %v1651_v44 = vadd.f32 %v1650_v22, %v8767_v60 }
 0x1f3   : > { %v6682_v33 = vpop.f32.mrb[119].mxu1  ;;  %v6571_v54 = vadd.f32 %v6570_v34, %v6569_v26 }
 0x1f4   : > { %v2439_v28 = vadd.f32 %v6680_v10, %v6568_v59  ;;  %v6683_v15 = vadd.f32 %v6682_v33, %v6681_v25  ;;  %3977 = vmatmul.mubr.bf16.gmra.mrb[224].mxu0 %v8253_v41  ;;  %v9339_v25 = vld [vmem:[#allocation36_spill] sm:$0xff]  ;;  %v1652_v60 = vrot.slane %v1651_v44, 2 }
 0x1f5   : > { %4138 = vmatmul.mubr.bf16.gmra.mrb[224].mxu1 %v8217_v30  ;;  %3984 = vmatprep.mubr.bf16.mxu0 %v9336_v11 }
 0x1f6   : > { %v2647_v16 = vadd.f32 %v2646_v27, %v2439_v28  ;;  %v2686_v0 = vmul.f32 %v2439_v28, %v2439_v28  ;;  %v2442_v23 = vadd.f32 %v6683_v15, %v6571_v54  ;;  %4145 = vmatprep.mubr.bf16.mxu1 %v8233_v48  ;;  %v9337_v48 = vld [vmem:[#allocation27_spill] sm:$0xff]  ;;  %v1722_v54 = vrot.slane %v1721_v38, 2 }
 0x1f7   : > { %v6572_v7 = vpop.f32.mrb[120].mxu0 }
 0x1f8   : > { %v2717_v47 = vadd.f32 %v2716_v31, %v2686_v0  ;;  %v6013_v29 = vpack.c.bf16 %v2442_v23, %v2439_v28  ;;  %v2648_v62 = vadd.f32 %v2647_v16, %v2442_v23  ;;  %v2687_v39 = vmul.f32 %v2442_v23, %v2442_v23  ;;  %v6684_v18 = vpop.f32.mrb[120].mxu1  ;;  %v6573_v37 = vpop.f32.mrb[121].mxu0 }
 0x1f9   : > { %v6685_v35 = vpop.f32.mrb[121].mxu1  ;;  %v6574_v49 = vadd.f32 %v6573_v37, %v6572_v7  ;;  %v6575_v30 = vpop.f32.mrb[122].mxu0 }
 0x1fa   : > { %6213 = vst [vmem:[%s8597_s15 + $0xe8] sm:$0xff] %v6013_v29   ;;  %v2718_v53 = vadd.f32 %v2717_v47, %v2687_v39  ;;  %v6686_v5 = vadd.f32 %v6685_v35, %v6684_v18  ;;  %v6687_v24 = vpop.f32.mrb[122].mxu1  ;;  %v6576_v50 = vpop.f32.mrb[123].mxu0 }
 0x1fb   : > { %v6688_v51 = vpop.f32.mrb[123].mxu1  ;;  %v6577_v43 = vadd.f32 %v6576_v50, %v6575_v30 }
 0x1fc   : > { %v2447_v14 = vadd.f32 %v6686_v5, %v6574_v49  ;;  %v6689_v63 = vadd.f32 %v6688_v51, %v6687_v24  ;;  %3985 = vmatmul.mubr.bf16.gmra.mrb[228].mxu0 %v9337_v48  ;;  %v1723_v49 = vadd.f32 %v1722_v54, %v1721_v38 }
 0x1fd   : > { %4146 = vmatmul.mubr.bf16.gmra.mrb[228].mxu1 %v8253_v41  ;;  %3992 = vmatprep.mubr.bf16.mxu0 %v9338_v6 }
 0x1fe   : > { %v2649_v9 = vadd.f32 %v2648_v62, %v2447_v14  ;;  %v2688_v36 = vmul.f32 %v2447_v14, %v2447_v14  ;;  %v2450_v57 = vadd.f32 %v6689_v63, %v6577_v43  ;;  %4153 = vmatprep.mubr.bf16.mxu1 %v9336_v11 }
 0x1ff   : > { %v6578_v56 = vpop.f32.mrb[124].mxu0 }
 0x200   : > { %v2719_v52 = vadd.f32 %v2718_v53, %v2688_v36  ;;  %v6018_v19 = vpack.c.bf16 %v2450_v57, %v2447_v14  ;;  %v2650_v2 = vadd.f32 %v2649_v9, %v2450_v57  ;;  %v2689_v8 = vmul.f32 %v2450_v57, %v2450_v57  ;;  %v6690_v1 = vpop.f32.mrb[124].mxu1  ;;  %v6579_v13 = vpop.f32.mrb[125].mxu0 }
 0x201   : > { %v6691_v41 = vpop.f32.mrb[125].mxu1  ;;  %v6580_v42 = vadd.f32 %v6579_v13, %v6578_v56  ;;  %v6581_v20 = vpop.f32.mrb[126].mxu0  ;;  %v1653_v53 = vadd.f32 %v1652_v60, %v1651_v44  ;;  %v1724_v57 = vrot.slane %v1723_v49, 1 }
 0x202   : > { %6214 = vst [vmem:[%s8597_s15 + $0xf0] sm:$0xff] %v6018_v19   ;;  %v2720_v40 = vadd.f32 %v2719_v52, %v2689_v8  ;;  %v6692_v27 = vadd.f32 %v6691_v41, %v6690_v1  ;;  %v6693_v3 = vpop.f32.mrb[126].mxu1  ;;  %v6582_v45 = vpop.f32.mrb[127].mxu0 }
 0x203   : > { %v6694_v31 = vpop.f32.mrb[127].mxu1  ;;  %v6583_v10 = vadd.f32 %v6582_v45, %v6581_v20  ;;  %v1654_v9 = vrot.slane %v1653_v53, 1 }
 0x204   : > { %v2455_v59 = vadd.f32 %v6692_v27, %v6580_v42  ;;  %v6695_v26 = vadd.f32 %v6694_v31, %v6693_v3  ;;  %3993 = vmatmul.mubr.bf16.gmra.mrb[232].mxu0 %v9339_v25 }
 0x205   : > { %4154 = vmatmul.mubr.bf16.gmra.mrb[232].mxu1 %v9337_v48  ;;  %4000 = vmatprep.mubr.bf16.mxu0 %v8296_v17  ;;  %v1655_v3 = vadd.f32 %v1654_v9, %v1653_v53  ;;  %v9343_v9 = vld [vmem:[#allocation43_spill] sm:$0xff] }
 0x206   : > { %v2651_v34 = vadd.f32 %v2650_v2, %v2455_v59  ;;  %v2690_v33 = vmul.f32 %v2455_v59, %v2455_v59  ;;  %v2458_v28 = vadd.f32 %v6695_v26, %v6583_v10  ;;  %4161 = vmatprep.mubr.bf16.mxu1 %v9338_v6 }
 0x207   : > { %v6712_v23 = vpop.f32.mrb[128].mxu0 }
 0x208   : > { %v2721_v46 = vadd.f32 %v2720_v40, %v2690_v33  ;;  %v6023_v15 = vpack.c.bf16 %v2458_v28, %v2455_v59  ;;  %v2652_v16 = vadd.f32 %v2651_v34, %v2458_v28  ;;  %v2691_v0 = vmul.f32 %v2458_v28, %v2458_v28  ;;  %v6824_v11 = vpop.f32.mrb[128].mxu1  ;;  %v6713_v47 = vpop.f32.mrb[129].mxu0  ;;  %v9340_v33 = vld [vmem:[#allocation30_spill] sm:$0xff] }
 0x209   : > { %v6825_v29 = vpop.f32.mrb[129].mxu1  ;;  %v6714_v7 = vadd.f32 %v6713_v47, %v6712_v23  ;;  %v6715_v37 = vpop.f32.mrb[130].mxu0 }
 0x20a   : > { %6215 = vst [vmem:[%s8597_s15 + $0xf8] sm:$0xff] %v6023_v15   ;;  %v2653_v62 = vrot.slane %v2652_v16, 4  ;;  %v2722_v39 = vadd.f32 %v2721_v46, %v2691_v0  ;;  %v6826_v18 = vadd.f32 %v6825_v29, %v6824_v11  ;;  %v6827_v35 = vpop.f32.mrb[130].mxu1  ;;  %v6716_v5 = vpop.f32.mrb[131].mxu0  ;;  %v9341_v15 = vld [vmem:[#allocation39_spill] sm:$0xff] }
 0x20b   : > { %v6828_v30 = vpop.f32.mrb[131].mxu1  ;;  %v6717_v14 = vadd.f32 %v6716_v5, %v6715_v37 }
 0x20c   : > { %v2654_v24 = vadd.f32 %v2653_v62, %v2652_v16  ;;  %v2723_v50 = vrot.slane %v2722_v39, 4  ;;  %v3219_v51 = vadd.f32 %v6826_v18, %v6714_v7  ;;  %v6829_v43 = vadd.f32 %v6828_v30, %v6827_v35  ;;  %4001 = vmatmul.mubr.bf16.gmra.mrb[236].mxu0 %v8299_v21 }
 0x20d   : > { %4162 = vmatmul.mubr.bf16.gmra.mrb[236].mxu1 %v9339_v25  ;;  %4008 = vmatprep.mubr.bf16.mxu0 %v8309_v58  ;;  %v1725_v25 = vadd.f32 %v1724_v57, %v1723_v49 }
 0x20e   : > { %v2655_v63 = vrot.slane %v2654_v24, 2  ;;  %v2724_v48 = vadd.f32 %v2723_v50, %v2722_v39  ;;  %4169 = vmatprep.mubr.bf16.mxu1 %v8296_v17  ;;  %v3222_v36 = vadd.f32 %v6829_v43, %v6717_v14  ;;  %v3544_v19 = vmul.f32 %v3219_v51, %v3219_v51  ;;  %v9342_v14 = vld [vmem:[#allocation38_spill] sm:$0xff] }
 0x20f   : > { %v6718_v12 = vpop.f32.mrb[132].mxu0 }
 0x210   : > { %v2656_v6 = vadd.f32 %v2655_v63, %v2654_v24  ;;  %v2725_v22 = vrot.slane %v2724_v48, 2  ;;  %v6830_v52 = vpop.f32.mrb[132].mxu1  ;;  %v6028_v2 = vpack.c.bf16 %v3222_v36, %v3219_v51  ;;  %v3506_v8 = vadd.f32 %v3222_v36, %v3219_v51  ;;  %v6719_v1 = vpop.f32.mrb[133].mxu0 }
 0x211   : > { %v3545_v56 = vmul.f32 %v3222_v36, %v3222_v36  ;;  %v6831_v13 = vpop.f32.mrb[133].mxu1  ;;  %v6720_v42 = vadd.f32 %v6719_v1, %v6718_v12  ;;  %v6721_v20 = vpop.f32.mrb[134].mxu0  ;;  %v3614_v51 = vsel %vm1727_vm1, %v8779_v61, %v2748_v4  ;;  %v3618_v36 = vrot.slane %v8786_v32, 1 }
 0x212   : > { %v2657_v41 = vrot.slane %v2656_v6, 1  ;;  %v2726_v40 = vadd.f32 %v2725_v22, %v2724_v48  ;;  %v6832_v27 = vadd.f32 %v6831_v13, %v6830_v52  ;;  %v6833_v17 = vpop.f32.mrb[134].mxu1  ;;  %6216 = vst [vmem:[%s8597_s15 + $0x100] sm:$0xff] %v6028_v2   ;;  %v6722_v38 = vpop.f32.mrb[135].mxu0  ;;  %v3619_v57 = vrot.slane %v3614_v51, 1 }
 0x213   : > { %v3576_v44 = vadd.f32 %v3545_v56, %v3544_v19  ;;  %v6834_v45 = vpop.f32.mrb[135].mxu1  ;;  %v6723_v26 = vadd.f32 %v6722_v38, %v6721_v20 }
 0x214   : > { %v2658_v31 = vadd.f32 %v2657_v41, %v2656_v6  ;;  %v2727_v59 = vrot.slane %v2726_v40, 1  ;;  %v3227_v10 = vadd.f32 %v6832_v27, %v6720_v42  ;;  %v6835_v34 = vadd.f32 %v6834_v45, %v6833_v17  ;;  %4009 = vmatmul.mubr.bf16.gmra.mrb[240].mxu0 %v9340_v33 }
 0x215   : > { %4170 = vmatmul.mubr.bf16.gmra.mrb[240].mxu1 %v8299_v21  ;;  %4016 = vmatprep.mubr.bf16.mxu0 %v9341_v15  ;;  %v3620_v32 = vsel %vm1745_vm2, %v3618_v36, %v3619_v57 }
 0x216   : > { %v8887_v28 = vadd.f32 %v2658_v31, %v1655_v3  ;;  %v2728_v60 = vadd.f32 %v2727_v59, %v2726_v40  ;;  %v3507_v54 = vadd.f32 %v3506_v8, %v3227_v10  ;;  %v3546_v46 = vmul.f32 %v3227_v10, %v3227_v10  ;;  %4177 = vmatprep.mubr.bf16.mxu1 %v8309_v58  ;;  %v9344_v3 = vld [vmem:[#allocation41_spill] sm:$0xff] }
 0x217   : > { %v3230_v16 = vadd.f32 %v6835_v34, %v6723_v26  ;;  %v6724_v11 = vpop.f32.mrb[136].mxu0 }
 0x218   : > { %v8891_v0 = vadd.f32 %v2728_v60, %v1725_v25  ;;  %v3577_v23 = vadd.f32 %v3576_v44, %v3546_v46  ;;  %v6836_v47 = vpop.f32.mrb[136].mxu1  ;;  %v6725_v21 = vpop.f32.mrb[137].mxu0  ;;  %v7349_v44 = vld [vmem:[%s7526_s29 + $0xcc] sm:$0xff]   ;;  %s5149_s29 = sshll.u32 %s7496_s28, 3  ;;  %s5864_s28 = sshll.u32 (%p7424_p4), %s7412_s18, 7 }
 0x219   : > { %v6033_v29 = vpack.c.bf16 %v3230_v16, %v3227_v10  ;;  %v3508_v62 = vadd.f32 %v3507_v54, %v3230_v16  ;;  %v3547_v39 = vmul.f32 %v3230_v16, %v3230_v16  ;;  %v6837_v7 = vpop.f32.mrb[137].mxu1  ;;  %v6726_v18 = vadd.f32 %v6725_v21, %v6724_v11  ;;  %v6727_v35 = vpop.f32.mrb[138].mxu0  ;;  %s208_s6 = scalar_lea.vmem %s9105_s3, %s5149_s29  ;;  %s212_s9 = scalar_lea.vmem %s9106_s4, %s5149_s29 }
 0x21a   : > { %v6838_v37 = vadd.f32 %v6837_v7, %v6836_v47  ;;  %v6839_v53 = vpop.f32.mrb[138].mxu1  ;;  %v6728_v5 = vpop.f32.mrb[139].mxu0  ;;  %v3615_v38 = vrot.slane %v7349_v44, 1  ;;  %v3616_v10 = vrot.slane %v8801_v55, 1  ;;  %s8965_s12 = scalar_lea.vmem (%p7424_p4), %s9104_s2, %s5864_s28 }
 0x21b   : > { %6217 = vst [vmem:[%s8597_s15 + $0x108] sm:$0xff] %v6033_v29   ;;  %v3578_v49 = vadd.f32 %v3577_v23, %v3547_v39  ;;  %v6840_v30 = vpop.f32.mrb[139].mxu1  ;;  %v6729_v58 = vadd.f32 %v6728_v5, %v6727_v35 }
 0x21c   : > { %v3235_v24 = vadd.f32 %v6838_v37, %v6726_v18  ;;  %v6841_v50 = vadd.f32 %v6840_v30, %v6839_v53  ;;  %4017 = vmatmul.mubr.bf16.gmra.mrb[244].mxu0 %v9342_v14 }
 0x21d   : > { %4178 = vmatmul.mubr.bf16.gmra.mrb[244].mxu1 %v9340_v33  ;;  %4024 = vmatprep.mubr.bf16.mxu0 %v9343_v9 }
 0x21e   : > { %v3509_v43 = vadd.f32 %v3508_v62, %v3235_v24  ;;  %v3548_v63 = vmul.f32 %v3235_v24, %v3235_v24  ;;  %v3238_v48 = vadd.f32 %v6841_v50, %v6729_v58  ;;  %4185 = vmatprep.mubr.bf16.mxu1 %v9341_v15  ;;  %v3617_v62 = vsel %vm1745_vm2, %v3615_v38, %v3616_v10 }
 0x21f   : > { %v6730_v61 = vpop.f32.mrb[140].mxu0 }
 0x220   : > { %v3579_v6 = vadd.f32 %v3578_v49, %v3548_v63  ;;  %v6038_v22 = vpack.c.bf16 %v3238_v48, %v3235_v24  ;;  %v3510_v12 = vadd.f32 %v3509_v43, %v3238_v48  ;;  %v3549_v52 = vmul.f32 %v3238_v48, %v3238_v48  ;;  %v6842_v4 = vpop.f32.mrb[140].mxu1  ;;  %v6731_v19 = vpop.f32.mrb[141].mxu0 }
 0x221   : > { %v6843_v2 = vpop.f32.mrb[141].mxu1  ;;  %v6732_v56 = vadd.f32 %v6731_v19, %v6730_v61  ;;  %v6733_v13 = vpop.f32.mrb[142].mxu0 }
 0x222   : > { %6218 = vst [vmem:[%s8597_s15 + $0x110] sm:$0xff] %v6038_v22   ;;  %v3580_v8 = vadd.f32 %v3579_v6, %v3549_v52  ;;  %v6844_v1 = vadd.f32 %v6843_v2, %v6842_v4  ;;  %v6845_v41 = vpop.f32.mrb[142].mxu1  ;;  %v6734_v40 = vpop.f32.mrb[143].mxu0 }
 0x223   : > { %v6846_v42 = vpop.f32.mrb[143].mxu1  ;;  %v6735_v20 = vadd.f32 %v6734_v40, %v6733_v13 }
 0x224   : > { %v3243_v27 = vadd.f32 %v6844_v1, %v6732_v56  ;;  %v6847_v17 = vadd.f32 %v6846_v42, %v6845_v41  ;;  %4025 = vmatmul.mubr.bf16.gmra.mrb[248].mxu0 %v9344_v3 }
 0x225   : > { %4186 = vmatmul.mubr.bf16.gmra.mrb[248].mxu1 %v9342_v14  ;;  %4032 = vmatprep.mubr.bf16.mxu0 %v3620_v32 }
 0x226   : > { %v3511_v45 = vadd.f32 %v3510_v12, %v3243_v27  ;;  %v3550_v31 = vmul.f32 %v3243_v27, %v3243_v27  ;;  %v3246_v59 = vadd.f32 %v6847_v17, %v6735_v20  ;;  %4193 = vmatprep.mubr.bf16.mxu1 %v9343_v9 }
 0x227   : > { %v6736_v60 = vpop.f32.mrb[144].mxu0 }
 0x228   : > { %v3581_v26 = vadd.f32 %v3580_v8, %v3550_v31  ;;  %v6043_v25 = vpack.c.bf16 %v3246_v59, %v3243_v27  ;;  %v3512_v34 = vadd.f32 %v3511_v45, %v3246_v59  ;;  %v3551_v33 = vmul.f32 %v3246_v59, %v3246_v59  ;;  %v6848_v54 = vpop.f32.mrb[144].mxu1  ;;  %v6737_v46 = vpop.f32.mrb[145].mxu0 }
 0x229   : > { %v6849_v15 = vpop.f32.mrb[145].mxu1  ;;  %v6738_v23 = vadd.f32 %v6737_v46, %v6736_v60  ;;  %v6739_v47 = vpop.f32.mrb[146].mxu0 }
 0x22a   : > { %6219 = vst [vmem:[%s8597_s15 + $0x118] sm:$0xff] %v6043_v25   ;;  %v3582_v16 = vadd.f32 %v3581_v26, %v3551_v33  ;;  %v6850_v11 = vadd.f32 %v6849_v15, %v6848_v54  ;;  %v6851_v29 = vpop.f32.mrb[146].mxu1  ;;  %v6740_v39 = vpop.f32.mrb[147].mxu0 }
 0x22b   : > { %v6852_v21 = vpop.f32.mrb[147].mxu1  ;;  %v6741_v55 = vadd.f32 %v6740_v39, %v6739_v47 }
 0x22c   : > { %v3251_v7 = vadd.f32 %v6850_v11, %v6738_v23  ;;  %v6853_v18 = vadd.f32 %v6852_v21, %v6851_v29  ;;  %4033 = vmatmul.mubr.bf16.gmra.mrb[252].mxu0 %v3617_v62 }
 0x22d   : > { %4194 = vmatmul.mubr.bf16.gmra.mrb[252].mxu1 %v9344_v3 }
 0x22e   : > { %v3513_v37 = vadd.f32 %v3512_v34, %v3251_v7  ;;  %v3552_v35 = vmul.f32 %v3251_v7, %v3251_v7  ;;  %v3254_v53 = vadd.f32 %v6853_v18, %v6741_v55 }
 0x22f   : > { %v6742_v58 = vpop.f32.mrb[148].mxu0 }
 0x230   : > { %v3583_v49 = vadd.f32 %v3582_v16, %v3552_v35  ;;  %v6048_v5 = vpack.c.bf16 %v3254_v53, %v3251_v7  ;;  %v3514_v30 = vadd.f32 %v3513_v37, %v3254_v53  ;;  %v3553_v24 = vmul.f32 %v3254_v53, %v3254_v53  ;;  %v6854_v50 = vpop.f32.mrb[148].mxu1  ;;  %v6743_v51 = vpop.f32.mrb[149].mxu0 }
 0x231   : > { %v6855_v14 = vpop.f32.mrb[149].mxu1  ;;  %v6744_v63 = vadd.f32 %v6743_v51, %v6742_v58  ;;  %v6745_v9 = vpop.f32.mrb[150].mxu0 }
 0x232   : > { %6220 = vst [vmem:[%s8597_s15 + $0x120] sm:$0xff] %v6048_v5   ;;  %v3584_v43 = vadd.f32 %v3583_v49, %v3553_v24  ;;  %v6856_v48 = vadd.f32 %v6855_v14, %v6854_v50  ;;  %v6857_v36 = vpop.f32.mrb[150].mxu1  ;;  %v6746_v57 = vpop.f32.mrb[151].mxu0 }
 0x233   : > { %v6858_v6 = vpop.f32.mrb[151].mxu1  ;;  %v6747_v12 = vadd.f32 %v6746_v57, %v6745_v9 }
 0x234   : > { %v3259_v22 = vadd.f32 %v6856_v48, %v6744_v63  ;;  %v6859_v52 = vadd.f32 %v6858_v6, %v6857_v36 }
 0x236   : > { %v3515_v61 = vadd.f32 %v3514_v30, %v3259_v22  ;;  %v3554_v4 = vmul.f32 %v3259_v22, %v3259_v22  ;;  %v3262_v19 = vadd.f32 %v6859_v52, %v6747_v12 }
 0x237   : > { %v6748_v13 = vpop.f32.mrb[152].mxu0 }
 0x238   : > { %v3585_v2 = vadd.f32 %v3584_v43, %v3554_v4  ;;  %v6053_v8 = vpack.c.bf16 %v3262_v19, %v3259_v22  ;;  %v3516_v56 = vadd.f32 %v3515_v61, %v3262_v19  ;;  %v3555_v1 = vmul.f32 %v3262_v19, %v3262_v19  ;;  %v6860_v41 = vpop.f32.mrb[152].mxu1  ;;  %v6749_v40 = vpop.f32.mrb[153].mxu0 }
 0x239   : > { %v6861_v42 = vpop.f32.mrb[153].mxu1  ;;  %v6750_v27 = vadd.f32 %v6749_v40, %v6748_v13  ;;  %v6751_v17 = vpop.f32.mrb[154].mxu0 }
 0x23a   : > { %6221 = vst [vmem:[%s8597_s15 + $0x128] sm:$0xff] %v6053_v8   ;;  %v3586_v32 = vadd.f32 %v3585_v2, %v3555_v1  ;;  %v6862_v20 = vadd.f32 %v6861_v42, %v6860_v41  ;;  %v6863_v3 = vpop.f32.mrb[154].mxu1  ;;  %v6752_v44 = vpop.f32.mrb[155].mxu0 }
 0x23b   : > { %v6864_v38 = vpop.f32.mrb[155].mxu1  ;;  %v6753_v31 = vadd.f32 %v6752_v44, %v6751_v17 }
 0x23c   : > { %v3267_v45 = vadd.f32 %v6862_v20, %v6750_v27  ;;  %v6865_v59 = vadd.f32 %v6864_v38, %v6863_v3 }
 0x23e   : > { %v3517_v10 = vadd.f32 %v3516_v56, %v3267_v45  ;;  %v3556_v26 = vmul.f32 %v3267_v45, %v3267_v45  ;;  %v3270_v25 = vadd.f32 %v6865_v59, %v6753_v31 }
 0x23f   : > { %v6754_v46 = vpop.f32.mrb[156].mxu0 }
 0x240   : > { %v3587_v34 = vadd.f32 %v3586_v32, %v3556_v26  ;;  %v6058_v33 = vpack.c.bf16 %v3270_v25, %v3267_v45  ;;  %v3518_v60 = vadd.f32 %v3517_v10, %v3270_v25  ;;  %v3557_v54 = vmul.f32 %v3270_v25, %v3270_v25  ;;  %v6866_v15 = vpop.f32.mrb[156].mxu1  ;;  %v6755_v16 = vpop.f32.mrb[157].mxu0 }
 0x241   : > { %v6867_v23 = vpop.f32.mrb[157].mxu1  ;;  %v6756_v47 = vadd.f32 %v6755_v16, %v6754_v46  ;;  %v6757_v62 = vpop.f32.mrb[158].mxu0 }
 0x242   : > { %6222 = vst [vmem:[%s8597_s15 + $0x130] sm:$0xff] %v6058_v33   ;;  %v3588_v11 = vadd.f32 %v3587_v34, %v3557_v54  ;;  %v6868_v29 = vadd.f32 %v6867_v23, %v6866_v15  ;;  %v6869_v39 = vpop.f32.mrb[158].mxu1  ;;  %v6758_v21 = vpop.f32.mrb[159].mxu0 }
 0x243   : > { %v6870_v7 = vpop.f32.mrb[159].mxu1  ;;  %v6759_v18 = vadd.f32 %v6758_v21, %v6757_v62 }
 0x244   : > { %v3275_v55 = vadd.f32 %v6868_v29, %v6756_v47  ;;  %v6871_v37 = vadd.f32 %v6870_v7, %v6869_v39 }
 0x246   : > { %v3519_v35 = vadd.f32 %v3518_v60, %v3275_v55  ;;  %v3558_v53 = vmul.f32 %v3275_v55, %v3275_v55  ;;  %v3278_v49 = vadd.f32 %v6871_v37, %v6759_v18 }
 0x247   : > { %v6760_v50 = vpop.f32.mrb[160].mxu0 }
 0x248   : > { %v3589_v5 = vadd.f32 %v3588_v11, %v3558_v53  ;;  %v6063_v30 = vpack.c.bf16 %v3278_v49, %v3275_v55  ;;  %v3520_v24 = vadd.f32 %v3519_v35, %v3278_v49  ;;  %v3559_v58 = vmul.f32 %v3278_v49, %v3278_v49  ;;  %v6872_v51 = vpop.f32.mrb[160].mxu1  ;;  %v6761_v14 = vpop.f32.mrb[161].mxu0 }
 0x249   : > { %v6873_v43 = vpop.f32.mrb[161].mxu1  ;;  %v6762_v48 = vadd.f32 %v6761_v14, %v6760_v50  ;;  %v6763_v36 = vpop.f32.mrb[162].mxu0 }
 0x24a   : > { %6223 = vst [vmem:[%s8597_s15 + $0x138] sm:$0xff] %v6063_v30   ;;  %v3590_v63 = vadd.f32 %v3589_v5, %v3559_v58  ;;  %v6874_v9 = vadd.f32 %v6873_v43, %v6872_v51  ;;  %v6875_v57 = vpop.f32.mrb[162].mxu1  ;;  %v6764_v6 = vpop.f32.mrb[163].mxu0 }
 0x24b   : > { %v6876_v22 = vpop.f32.mrb[163].mxu1  ;;  %v6765_v52 = vadd.f32 %v6764_v6, %v6763_v36 }
 0x24c   : > { %v3283_v12 = vadd.f32 %v6874_v9, %v6762_v48  ;;  %v6877_v61 = vadd.f32 %v6876_v22, %v6875_v57 }
 0x24e   : > { %v3521_v4 = vadd.f32 %v3520_v24, %v3283_v12  ;;  %v3560_v19 = vmul.f32 %v3283_v12, %v3283_v12  ;;  %v3286_v2 = vadd.f32 %v6877_v61, %v6765_v52 }
 0x24f   : > { %v6766_v41 = vpop.f32.mrb[164].mxu0 }
 0x250   : > { %v3591_v8 = vadd.f32 %v3590_v63, %v3560_v19  ;;  %v6068_v56 = vpack.c.bf16 %v3286_v2, %v3283_v12  ;;  %v3522_v1 = vadd.f32 %v3521_v4, %v3286_v2  ;;  %v3561_v13 = vmul.f32 %v3286_v2, %v3286_v2  ;;  %v6878_v40 = vpop.f32.mrb[164].mxu1  ;;  %v6767_v42 = vpop.f32.mrb[165].mxu0 }
 0x251   : > { %v6879_v32 = vpop.f32.mrb[165].mxu1  ;;  %v6768_v20 = vadd.f32 %v6767_v42, %v6766_v41  ;;  %v6769_v3 = vpop.f32.mrb[166].mxu0 }
 0x252   : > { %6224 = vst [vmem:[%s8597_s15 + $0x140] sm:$0xff] %v6068_v56   ;;  %v3592_v27 = vadd.f32 %v3591_v8, %v3561_v13  ;;  %v6880_v17 = vadd.f32 %v6879_v32, %v6878_v40  ;;  %v6881_v44 = vpop.f32.mrb[166].mxu1  ;;  %v6770_v38 = vpop.f32.mrb[167].mxu0 }
 0x253   : > { %v6882_v45 = vpop.f32.mrb[167].mxu1  ;;  %v6771_v59 = vadd.f32 %v6770_v38, %v6769_v3 }
 0x254   : > { %v3291_v31 = vadd.f32 %v6880_v17, %v6768_v20  ;;  %v6883_v10 = vadd.f32 %v6882_v45, %v6881_v44 }
 0x256   : > { %v3523_v26 = vadd.f32 %v3522_v1, %v3291_v31  ;;  %v3562_v25 = vmul.f32 %v3291_v31, %v3291_v31  ;;  %v3294_v34 = vadd.f32 %v6883_v10, %v6771_v59 }
 0x257   : > { %v6772_v15 = vpop.f32.mrb[168].mxu0 }
 0x258   : > { %v3593_v33 = vadd.f32 %v3592_v27, %v3562_v25  ;;  %v6073_v60 = vpack.c.bf16 %v3294_v34, %v3291_v31  ;;  %v3524_v54 = vadd.f32 %v3523_v26, %v3294_v34  ;;  %v3563_v46 = vmul.f32 %v3294_v34, %v3294_v34  ;;  %v6884_v16 = vpop.f32.mrb[168].mxu1  ;;  %v6773_v23 = vpop.f32.mrb[169].mxu0 }
 0x259   : > { %v6885_v11 = vpop.f32.mrb[169].mxu1  ;;  %v6774_v29 = vadd.f32 %v6773_v23, %v6772_v15  ;;  %v6775_v39 = vpop.f32.mrb[170].mxu0 }
 0x25a   : > { %6225 = vst [vmem:[%s8597_s15 + $0x148] sm:$0xff] %v6073_v60   ;;  %v3594_v47 = vadd.f32 %v3593_v33, %v3563_v46  ;;  %v6886_v62 = vadd.f32 %v6885_v11, %v6884_v16  ;;  %v6887_v21 = vpop.f32.mrb[170].mxu1  ;;  %v6776_v7 = vpop.f32.mrb[171].mxu0 }
 0x25b   : > { %v6888_v55 = vpop.f32.mrb[171].mxu1  ;;  %v6777_v37 = vadd.f32 %v6776_v7, %v6775_v39 }
 0x25c   : > { %v3299_v18 = vadd.f32 %v6886_v62, %v6774_v29  ;;  %v6889_v35 = vadd.f32 %v6888_v55, %v6887_v21 }
 0x25e   : > { %v3525_v53 = vadd.f32 %v3524_v54, %v3299_v18  ;;  %v3564_v49 = vmul.f32 %v3299_v18, %v3299_v18  ;;  %v3302_v5 = vadd.f32 %v6889_v35, %v6777_v37 }
 0x25f   : > { %v6778_v51 = vpop.f32.mrb[172].mxu0 }
 0x260   : > { %v3595_v30 = vadd.f32 %v3594_v47, %v3564_v49  ;;  %v6078_v24 = vpack.c.bf16 %v3302_v5, %v3299_v18  ;;  %v3526_v58 = vadd.f32 %v3525_v53, %v3302_v5  ;;  %v3565_v50 = vmul.f32 %v3302_v5, %v3302_v5  ;;  %v6890_v14 = vpop.f32.mrb[172].mxu1  ;;  %v6779_v43 = vpop.f32.mrb[173].mxu0 }
 0x261   : > { %v6891_v63 = vpop.f32.mrb[173].mxu1  ;;  %v6780_v9 = vadd.f32 %v6779_v43, %v6778_v51  ;;  %v6781_v57 = vpop.f32.mrb[174].mxu0 }
 0x262   : > { %6226 = vst [vmem:[%s8597_s15 + $0x150] sm:$0xff] %v6078_v24   ;;  %v3596_v48 = vadd.f32 %v3595_v30, %v3565_v50  ;;  %v6892_v36 = vadd.f32 %v6891_v63, %v6890_v14  ;;  %v6893_v6 = vpop.f32.mrb[174].mxu1  ;;  %v6782_v22 = vpop.f32.mrb[175].mxu0 }
 0x263   : > { %v6894_v12 = vpop.f32.mrb[175].mxu1  ;;  %v6783_v61 = vadd.f32 %v6782_v22, %v6781_v57 }
 0x264   : > { %v3307_v52 = vadd.f32 %v6892_v36, %v6780_v9  ;;  %v6895_v4 = vadd.f32 %v6894_v12, %v6893_v6 }
 0x266   : > { %v3527_v19 = vadd.f32 %v3526_v58, %v3307_v52  ;;  %v3566_v2 = vmul.f32 %v3307_v52, %v3307_v52  ;;  %v3310_v8 = vadd.f32 %v6895_v4, %v6783_v61 }
 0x267   : > { %v6784_v40 = vpop.f32.mrb[176].mxu0 }
 0x268   : > { %v3597_v56 = vadd.f32 %v3596_v48, %v3566_v2  ;;  %v6083_v1 = vpack.c.bf16 %v3310_v8, %v3307_v52  ;;  %v3528_v13 = vadd.f32 %v3527_v19, %v3310_v8  ;;  %v3567_v41 = vmul.f32 %v3310_v8, %v3310_v8  ;;  %v6896_v42 = vpop.f32.mrb[176].mxu1  ;;  %v6785_v32 = vpop.f32.mrb[177].mxu0 }
 0x269   : > { %v6897_v27 = vpop.f32.mrb[177].mxu1  ;;  %v6786_v17 = vadd.f32 %v6785_v32, %v6784_v40  ;;  %v6787_v44 = vpop.f32.mrb[178].mxu0 }
 0x26a   : > { %6227 = vst [vmem:[%s8597_s15 + $0x158] sm:$0xff] %v6083_v1   ;;  %v3598_v20 = vadd.f32 %v3597_v56, %v3567_v41  ;;  %v6898_v3 = vadd.f32 %v6897_v27, %v6896_v42  ;;  %v6899_v38 = vpop.f32.mrb[178].mxu1  ;;  %v6788_v45 = vpop.f32.mrb[179].mxu0 }
 0x26b   : > { %v6900_v31 = vpop.f32.mrb[179].mxu1  ;;  %v6789_v10 = vadd.f32 %v6788_v45, %v6787_v44 }
 0x26c   : > { %v3315_v59 = vadd.f32 %v6898_v3, %v6786_v17  ;;  %v6901_v26 = vadd.f32 %v6900_v31, %v6899_v38 }
 0x26e   : > { %v3529_v25 = vadd.f32 %v3528_v13, %v3315_v59  ;;  %v3568_v34 = vmul.f32 %v3315_v59, %v3315_v59  ;;  %v3318_v33 = vadd.f32 %v6901_v26, %v6789_v10 }
 0x26f   : > { %v6790_v16 = vpop.f32.mrb[180].mxu0 }
 0x270   : > { %v3599_v60 = vadd.f32 %v3598_v20, %v3568_v34  ;;  %v6088_v54 = vpack.c.bf16 %v3318_v33, %v3315_v59  ;;  %v3530_v46 = vadd.f32 %v3529_v25, %v3318_v33  ;;  %v3569_v15 = vmul.f32 %v3318_v33, %v3318_v33  ;;  %v6902_v23 = vpop.f32.mrb[180].mxu1  ;;  %v6791_v11 = vpop.f32.mrb[181].mxu0 }
 0x271   : > { %v6903_v47 = vpop.f32.mrb[181].mxu1  ;;  %v6792_v62 = vadd.f32 %v6791_v11, %v6790_v16  ;;  %v6793_v21 = vpop.f32.mrb[182].mxu0 }
 0x272   : > { %6228 = vst [vmem:[%s8597_s15 + $0x160] sm:$0xff] %v6088_v54   ;;  %v3600_v29 = vadd.f32 %v3599_v60, %v3569_v15  ;;  %v6904_v39 = vadd.f32 %v6903_v47, %v6902_v23  ;;  %v6905_v7 = vpop.f32.mrb[182].mxu1  ;;  %v6794_v55 = vpop.f32.mrb[183].mxu0 }
 0x273   : > { %v6906_v18 = vpop.f32.mrb[183].mxu1  ;;  %v6795_v35 = vadd.f32 %v6794_v55, %v6793_v21 }
 0x274   : > { %v3323_v37 = vadd.f32 %v6904_v39, %v6792_v62  ;;  %v6907_v53 = vadd.f32 %v6906_v18, %v6905_v7 }
 0x276   : > { %v3531_v49 = vadd.f32 %v3530_v46, %v3323_v37  ;;  %v3570_v5 = vmul.f32 %v3323_v37, %v3323_v37  ;;  %v3326_v30 = vadd.f32 %v6907_v53, %v6795_v35 }
 0x277   : > { %v6796_v14 = vpop.f32.mrb[184].mxu0 }
 0x278   : > { %v3601_v24 = vadd.f32 %v3600_v29, %v3570_v5  ;;  %v6093_v58 = vpack.c.bf16 %v3326_v30, %v3323_v37  ;;  %v3532_v50 = vadd.f32 %v3531_v49, %v3326_v30  ;;  %v3571_v51 = vmul.f32 %v3326_v30, %v3326_v30  ;;  %v6908_v43 = vpop.f32.mrb[184].mxu1  ;;  %v6797_v63 = vpop.f32.mrb[185].mxu0 }
 0x279   : > { %v6909_v48 = vpop.f32.mrb[185].mxu1  ;;  %v6798_v36 = vadd.f32 %v6797_v63, %v6796_v14  ;;  %v6799_v6 = vpop.f32.mrb[186].mxu0 }
 0x27a   : > { %6229 = vst [vmem:[%s8597_s15 + $0x168] sm:$0xff] %v6093_v58   ;;  %v3602_v9 = vadd.f32 %v3601_v24, %v3571_v51  ;;  %v6910_v57 = vadd.f32 %v6909_v48, %v6908_v43  ;;  %v6911_v22 = vpop.f32.mrb[186].mxu1  ;;  %v6800_v12 = vpop.f32.mrb[187].mxu0 }
 0x27b   : > { %v6912_v52 = vpop.f32.mrb[187].mxu1  ;;  %v6801_v4 = vadd.f32 %v6800_v12, %v6799_v6 }
 0x27c   : > { %v3331_v61 = vadd.f32 %v6910_v57, %v6798_v36  ;;  %v6913_v19 = vadd.f32 %v6912_v52, %v6911_v22 }
 0x27e   : > { %v3533_v2 = vadd.f32 %v3532_v50, %v3331_v61  ;;  %v3572_v8 = vmul.f32 %v3331_v61, %v3331_v61  ;;  %v3334_v56 = vadd.f32 %v6913_v19, %v6801_v4 }
 0x27f   : > { %v6802_v42 = vpop.f32.mrb[188].mxu0 }
 0x280   : > { %v3603_v1 = vadd.f32 %v3602_v9, %v3572_v8  ;;  %v6098_v13 = vpack.c.bf16 %v3334_v56, %v3331_v61  ;;  %v3534_v41 = vadd.f32 %v3533_v2, %v3334_v56  ;;  %v3573_v40 = vmul.f32 %v3334_v56, %v3334_v56  ;;  %v6914_v32 = vpop.f32.mrb[188].mxu1  ;;  %v6803_v27 = vpop.f32.mrb[189].mxu0 }
 0x281   : > { %v6915_v20 = vpop.f32.mrb[189].mxu1  ;;  %v6804_v3 = vadd.f32 %v6803_v27, %v6802_v42  ;;  %v6805_v38 = vpop.f32.mrb[190].mxu0 }
 0x282   : > { %6230 = vst [vmem:[%s8597_s15 + $0x170] sm:$0xff] %v6098_v13   ;;  %v3604_v17 = vadd.f32 %v3603_v1, %v3573_v40  ;;  %v6916_v44 = vadd.f32 %v6915_v20, %v6914_v32  ;;  %v6917_v45 = vpop.f32.mrb[190].mxu1  ;;  %v6806_v31 = vpop.f32.mrb[191].mxu0 }
 0x283   : > { %v6918_v59 = vpop.f32.mrb[191].mxu1  ;;  %v6807_v26 = vadd.f32 %v6806_v31, %v6805_v38 }
 0x284   : > { %v3339_v10 = vadd.f32 %v6916_v44, %v6804_v3  ;;  %v6919_v25 = vadd.f32 %v6918_v59, %v6917_v45 }
 0x286   : > { %v3535_v34 = vadd.f32 %v3534_v41, %v3339_v10  ;;  %v3574_v33 = vmul.f32 %v3339_v10, %v3339_v10  ;;  %v3342_v60 = vadd.f32 %v6919_v25, %v6807_v26 }
 0x287   : > { %v6936_v23 = vpop.f32.mrb[192].mxu0 }
 0x288   : > { %v3605_v54 = vadd.f32 %v3604_v17, %v3574_v33  ;;  %v6103_v46 = vpack.c.bf16 %v3342_v60, %v3339_v10  ;;  %v3536_v15 = vadd.f32 %v3535_v34, %v3342_v60  ;;  %v3575_v16 = vmul.f32 %v3342_v60, %v3342_v60  ;;  %v7048_v11 = vpop.f32.mrb[192].mxu1  ;;  %v6937_v47 = vpop.f32.mrb[193].mxu0 }
 0x289   : > { %v7049_v29 = vpop.f32.mrb[193].mxu1  ;;  %v6938_v21 = vadd.f32 %v6937_v47, %v6936_v23  ;;  %v6939_v55 = vpop.f32.mrb[194].mxu0 }
 0x28a   : > { %6231 = vst [vmem:[%s8597_s15 + $0x178] sm:$0xff] %v6103_v46   ;;  %v3537_v62 = vrot.slane %v3536_v15, 4  ;;  %v3606_v39 = vadd.f32 %v3605_v54, %v3575_v16  ;;  %v7050_v7 = vadd.f32 %v7049_v29, %v7048_v11  ;;  %v7051_v18 = vpop.f32.mrb[194].mxu1  ;;  %v6940_v37 = vpop.f32.mrb[195].mxu0 }
 0x28b   : > { %v7052_v35 = vpop.f32.mrb[195].mxu1  ;;  %v6941_v30 = vadd.f32 %v6940_v37, %v6939_v55 }
 0x28c   : > { %v3538_v53 = vadd.f32 %v3537_v62, %v3536_v15  ;;  %v3607_v49 = vrot.slane %v3606_v39, 4  ;;  %v4076_v5 = vadd.f32 %v7050_v7, %v6938_v21  ;;  %v7053_v24 = vadd.f32 %v7052_v35, %v7051_v18 }
 0x28e   : > { %v3539_v58 = vrot.slane %v3538_v53, 2  ;;  %v3608_v50 = vadd.f32 %v3607_v49, %v3606_v39  ;;  %v4079_v51 = vadd.f32 %v7053_v24, %v6941_v30  ;;  %v4401_v9 = vmul.f32 %v4076_v5, %v4076_v5 }
 0x28f   : > { %v6942_v63 = vpop.f32.mrb[196].mxu0 }
 0x290   : > { %v3540_v14 = vadd.f32 %v3539_v58, %v3538_v53  ;;  %v3609_v43 = vrot.slane %v3608_v50, 2  ;;  %v7054_v48 = vpop.f32.mrb[196].mxu1  ;;  %v6108_v36 = vpack.c.bf16 %v4079_v51, %v4076_v5  ;;  %v4363_v57 = vadd.f32 %v4079_v51, %v4076_v5  ;;  %v6943_v22 = vpop.f32.mrb[197].mxu0 }
 0x291   : > { %v4402_v6 = vmul.f32 %v4079_v51, %v4079_v51  ;;  %v7055_v12 = vpop.f32.mrb[197].mxu1  ;;  %v6944_v4 = vadd.f32 %v6943_v22, %v6942_v63  ;;  %v6945_v2 = vpop.f32.mrb[198].mxu0 }
 0x292   : > { %v3541_v52 = vrot.slane %v3540_v14, 1  ;;  %v3610_v61 = vadd.f32 %v3609_v43, %v3608_v50  ;;  %v7056_v19 = vadd.f32 %v7055_v12, %v7054_v48  ;;  %v7057_v8 = vpop.f32.mrb[198].mxu1  ;;  %6232 = vst [vmem:[%s8597_s15 + $0x180] sm:$0xff] %v6108_v36   ;;  %v6946_v1 = vpop.f32.mrb[199].mxu0 }
 0x293   : > { %v4433_v56 = vadd.f32 %v4402_v6, %v4401_v9  ;;  %v7058_v13 = vpop.f32.mrb[199].mxu1  ;;  %v6947_v32 = vadd.f32 %v6946_v1, %v6945_v2 }
 0x294   : > { %v3542_v41 = vadd.f32 %v3541_v52, %v3540_v14  ;;  %v3611_v40 = vrot.slane %v3610_v61, 1  ;;  %v4084_v42 = vadd.f32 %v7056_v19, %v6944_v4  ;;  %v7059_v27 = vadd.f32 %v7058_v13, %v7057_v8 }
 0x296   : > { %v8927_v20 = vadd.f32 %v3542_v41, %v8887_v28  ;;  %v3612_v17 = vadd.f32 %v3611_v40, %v3610_v61  ;;  %v4364_v3 = vadd.f32 %v4363_v57, %v4084_v42  ;;  %v4403_v44 = vmul.f32 %v4084_v42, %v4084_v42 }
 0x297   : > { %v4087_v38 = vadd.f32 %v7059_v27, %v6947_v32  ;;  %v6948_v59 = vpop.f32.mrb[200].mxu0 }
 0x298   : > { %v8930_v45 = vadd.f32 %v3612_v17, %v8891_v0  ;;  %v4434_v31 = vadd.f32 %v4433_v56, %v4403_v44  ;;  %v7060_v10 = vpop.f32.mrb[200].mxu1  ;;  %v6949_v33 = vpop.f32.mrb[201].mxu0 }
 0x299   : > { %v6113_v26 = vpack.c.bf16 %v4087_v38, %v4084_v42  ;;  %v4365_v25 = vadd.f32 %v4364_v3, %v4087_v38  ;;  %v4404_v34 = vmul.f32 %v4087_v38, %v4087_v38  ;;  %v7061_v60 = vpop.f32.mrb[201].mxu1  ;;  %v6950_v54 = vadd.f32 %v6949_v33, %v6948_v59  ;;  %v6951_v28 = vpop.f32.mrb[202].mxu0 }
 0x29a   : > { %v7062_v46 = vadd.f32 %v7061_v60, %v7060_v10  ;;  %v7063_v15 = vpop.f32.mrb[202].mxu1  ;;  %v6952_v23 = vpop.f32.mrb[203].mxu0 }
 0x29b   : > { %6233 = vst [vmem:[%s8597_s15 + $0x188] sm:$0xff] %v6113_v26   ;;  %v4435_v16 = vadd.f32 %v4434_v31, %v4404_v34  ;;  %v7064_v11 = vpop.f32.mrb[203].mxu1  ;;  %v6953_v0 = vadd.f32 %v6952_v23, %v6951_v28 }
 0x29c   : > { %v4092_v47 = vadd.f32 %v7062_v46, %v6950_v54  ;;  %v7065_v29 = vadd.f32 %v7064_v11, %v7063_v15 }
 0x29e   : > { %v4366_v62 = vadd.f32 %v4365_v25, %v4092_v47  ;;  %v4405_v39 = vmul.f32 %v4092_v47, %v4092_v47  ;;  %v4095_v21 = vadd.f32 %v7065_v29, %v6953_v0 }
 0x29f   : > { %v6954_v35 = vpop.f32.mrb[204].mxu0 }
 0x2a0   : > { %v4436_v7 = vadd.f32 %v4435_v16, %v4405_v39  ;;  %v6118_v55 = vpack.c.bf16 %v4095_v21, %v4092_v47  ;;  %v4367_v18 = vadd.f32 %v4366_v62, %v4095_v21  ;;  %v4406_v37 = vmul.f32 %v4095_v21, %v4095_v21  ;;  %v7066_v53 = vpop.f32.mrb[204].mxu1  ;;  %v6955_v49 = vpop.f32.mrb[205].mxu0 }
 0x2a1   : > { %v7067_v5 = vpop.f32.mrb[205].mxu1  ;;  %v6956_v24 = vadd.f32 %v6955_v49, %v6954_v35  ;;  %v6957_v50 = vpop.f32.mrb[206].mxu0 }
 0x2a2   : > { %6234 = vst [vmem:[%s8597_s15 + $0x190] sm:$0xff] %v6118_v55   ;;  %v4437_v30 = vadd.f32 %v4436_v7, %v4406_v37  ;;  %v7068_v58 = vadd.f32 %v7067_v5, %v7066_v53  ;;  %v7069_v51 = vpop.f32.mrb[206].mxu1  ;;  %v6958_v14 = vpop.f32.mrb[207].mxu0 }
 0x2a3   : > { %v7070_v43 = vpop.f32.mrb[207].mxu1  ;;  %v6959_v48 = vadd.f32 %v6958_v14, %v6957_v50 }
 0x2a4   : > { %v4100_v63 = vadd.f32 %v7068_v58, %v6956_v24  ;;  %v7071_v9 = vadd.f32 %v7070_v43, %v7069_v51 }
 0x2a6   : > { %v4368_v36 = vadd.f32 %v4367_v18, %v4100_v63  ;;  %v4407_v57 = vmul.f32 %v4100_v63, %v4100_v63  ;;  %v4103_v6 = vadd.f32 %v7071_v9, %v6959_v48 }
 0x2a7   : > { %v6960_v4 = vpop.f32.mrb[208].mxu0 }
 0x2a8   : > { %v4438_v22 = vadd.f32 %v4437_v30, %v4407_v57  ;;  %v6123_v12 = vpack.c.bf16 %v4103_v6, %v4100_v63  ;;  %v4369_v52 = vadd.f32 %v4368_v36, %v4103_v6  ;;  %v4408_v61 = vmul.f32 %v4103_v6, %v4103_v6  ;;  %v7072_v19 = vpop.f32.mrb[208].mxu1  ;;  %v6961_v2 = vpop.f32.mrb[209].mxu0 }
 0x2a9   : > { %v7073_v8 = vpop.f32.mrb[209].mxu1  ;;  %v6962_v1 = vadd.f32 %v6961_v2, %v6960_v4  ;;  %v6963_v41 = vpop.f32.mrb[210].mxu0 }
 0x2aa   : > { %6235 = vst [vmem:[%s8597_s15 + $0x198] sm:$0xff] %v6123_v12   ;;  %v4439_v56 = vadd.f32 %v4438_v22, %v4408_v61  ;;  %v7074_v13 = vadd.f32 %v7073_v8, %v7072_v19  ;;  %v7075_v40 = vpop.f32.mrb[210].mxu1  ;;  %v6964_v42 = vpop.f32.mrb[211].mxu0 }
 0x2ab   : > { %v7076_v32 = vpop.f32.mrb[211].mxu1  ;;  %v6965_v17 = vadd.f32 %v6964_v42, %v6963_v41 }
 0x2ac   : > { %v4108_v27 = vadd.f32 %v7074_v13, %v6962_v1  ;;  %v7077_v3 = vadd.f32 %v7076_v32, %v7075_v40 }
 0x2ae   : > { %v4370_v44 = vadd.f32 %v4369_v52, %v4108_v27  ;;  %v4409_v38 = vmul.f32 %v4108_v27, %v4108_v27  ;;  %v4111_v31 = vadd.f32 %v7077_v3, %v6965_v17 }
 0x2af   : > { %v6966_v34 = vpop.f32.mrb[212].mxu0 }
 0x2b0   : > { %v4440_v59 = vadd.f32 %v4439_v56, %v4409_v38  ;;  %v6128_v10 = vpack.c.bf16 %v4111_v31, %v4108_v27  ;;  %v4371_v26 = vadd.f32 %v4370_v44, %v4111_v31  ;;  %v4410_v25 = vmul.f32 %v4111_v31, %v4111_v31  ;;  %v7078_v33 = vpop.f32.mrb[212].mxu1  ;;  %v6967_v60 = vpop.f32.mrb[213].mxu0 }
 0x2b1   : > { %v7079_v54 = vpop.f32.mrb[213].mxu1  ;;  %v6968_v28 = vadd.f32 %v6967_v60, %v6966_v34  ;;  %v6969_v16 = vpop.f32.mrb[214].mxu0 }
 0x2b2   : > { %6236 = vst [vmem:[%s8597_s15 + $0x1a0] sm:$0xff] %v6128_v10   ;;  %v4441_v46 = vadd.f32 %v4440_v59, %v4410_v25  ;;  %v7080_v15 = vadd.f32 %v7079_v54, %v7078_v33  ;;  %v7081_v23 = vpop.f32.mrb[214].mxu1  ;;  %v6970_v11 = vpop.f32.mrb[215].mxu0 }
 0x2b3   : > { %v7082_v47 = vpop.f32.mrb[215].mxu1  ;;  %v6971_v29 = vadd.f32 %v6970_v11, %v6969_v16 }
 0x2b4   : > { %v4116_v0 = vadd.f32 %v7080_v15, %v6968_v28  ;;  %v7083_v62 = vadd.f32 %v7082_v47, %v7081_v23 }
 0x2b6   : > { %v4372_v39 = vadd.f32 %v4371_v26, %v4116_v0  ;;  %v4411_v21 = vmul.f32 %v4116_v0, %v4116_v0  ;;  %v4119_v7 = vadd.f32 %v7083_v62, %v6971_v29 }
 0x2b7   : > { %v6972_v53 = vpop.f32.mrb[216].mxu0 }
 0x2b8   : > { %v4442_v55 = vadd.f32 %v4441_v46, %v4411_v21  ;;  %v6133_v18 = vpack.c.bf16 %v4119_v7, %v4116_v0  ;;  %v4373_v37 = vadd.f32 %v4372_v39, %v4119_v7  ;;  %v4412_v35 = vmul.f32 %v4119_v7, %v4119_v7  ;;  %v7084_v49 = vpop.f32.mrb[216].mxu1  ;;  %v6973_v5 = vpop.f32.mrb[217].mxu0 }
 0x2b9   : > { %v7085_v30 = vpop.f32.mrb[217].mxu1  ;;  %v6974_v58 = vadd.f32 %v6973_v5, %v6972_v53  ;;  %v6975_v51 = vpop.f32.mrb[218].mxu0 }
 0x2ba   : > { %6237 = vst [vmem:[%s8597_s15 + $0x1a8] sm:$0xff] %v6133_v18   ;;  %v4443_v24 = vadd.f32 %v4442_v55, %v4412_v35  ;;  %v7086_v50 = vadd.f32 %v7085_v30, %v7084_v49  ;;  %v7087_v14 = vpop.f32.mrb[218].mxu1  ;;  %v6976_v43 = vpop.f32.mrb[219].mxu0 }
 0x2bb   : > { %v7088_v63 = vpop.f32.mrb[219].mxu1  ;;  %v6977_v9 = vadd.f32 %v6976_v43, %v6975_v51 }
 0x2bc   : > { %v4124_v48 = vadd.f32 %v7086_v50, %v6974_v58  ;;  %v7089_v36 = vadd.f32 %v7088_v63, %v7087_v14 }
 0x2be   : > { %v4374_v57 = vadd.f32 %v4373_v37, %v4124_v48  ;;  %v4413_v6 = vmul.f32 %v4124_v48, %v4124_v48  ;;  %v4127_v22 = vadd.f32 %v7089_v36, %v6977_v9 }
 0x2bf   : > { %v6978_v19 = vpop.f32.mrb[220].mxu0 }
 0x2c0   : > { %v4444_v12 = vadd.f32 %v4443_v24, %v4413_v6  ;;  %v6138_v52 = vpack.c.bf16 %v4127_v22, %v4124_v48  ;;  %v4375_v61 = vadd.f32 %v4374_v57, %v4127_v22  ;;  %v4414_v4 = vmul.f32 %v4127_v22, %v4127_v22  ;;  %v7090_v2 = vpop.f32.mrb[220].mxu1  ;;  %v6979_v8 = vpop.f32.mrb[221].mxu0 }
 0x2c1   : > { %v7091_v56 = vpop.f32.mrb[221].mxu1  ;;  %v6980_v13 = vadd.f32 %v6979_v8, %v6978_v19  ;;  %v6981_v40 = vpop.f32.mrb[222].mxu0 }
 0x2c2   : > { %6238 = vst [vmem:[%s8597_s15 + $0x1b0] sm:$0xff] %v6138_v52   ;;  %v4445_v1 = vadd.f32 %v4444_v12, %v4414_v4  ;;  %v7092_v41 = vadd.f32 %v7091_v56, %v7090_v2  ;;  %v7093_v42 = vpop.f32.mrb[222].mxu1  ;;  %v6982_v32 = vpop.f32.mrb[223].mxu0 }
 0x2c3   : > { %v7094_v27 = vpop.f32.mrb[223].mxu1  ;;  %v6983_v3 = vadd.f32 %v6982_v32, %v6981_v40 }
 0x2c4   : > { %v4132_v17 = vadd.f32 %v7092_v41, %v6980_v13  ;;  %v7095_v44 = vadd.f32 %v7094_v27, %v7093_v42 }
 0x2c6   : > { %v4376_v38 = vadd.f32 %v4375_v61, %v4132_v17  ;;  %v4415_v31 = vmul.f32 %v4132_v17, %v4132_v17  ;;  %v4135_v59 = vadd.f32 %v7095_v44, %v6983_v3 }
 0x2c7   : > { %v6984_v33 = vpop.f32.mrb[224].mxu0 }
 0x2c8   : > { %v4446_v10 = vadd.f32 %v4445_v1, %v4415_v31  ;;  %v6143_v26 = vpack.c.bf16 %v4135_v59, %v4132_v17  ;;  %v4377_v25 = vadd.f32 %v4376_v38, %v4135_v59  ;;  %v4416_v34 = vmul.f32 %v4135_v59, %v4135_v59  ;;  %v7096_v60 = vpop.f32.mrb[224].mxu1  ;;  %v6985_v54 = vpop.f32.mrb[225].mxu0 }
 0x2c9   : > { %v7097_v46 = vpop.f32.mrb[225].mxu1  ;;  %v6986_v15 = vadd.f32 %v6985_v54, %v6984_v33  ;;  %v6987_v23 = vpop.f32.mrb[226].mxu0 }
 0x2ca   : > { %6239 = vst [vmem:[%s8597_s15 + $0x1b8] sm:$0xff] %v6143_v26   ;;  %v4447_v28 = vadd.f32 %v4446_v10, %v4416_v34  ;;  %v7098_v16 = vadd.f32 %v7097_v46, %v7096_v60  ;;  %v7099_v11 = vpop.f32.mrb[226].mxu1  ;;  %v6988_v47 = vpop.f32.mrb[227].mxu0 }
 0x2cb   : > { %v7100_v0 = vpop.f32.mrb[227].mxu1  ;;  %v6989_v62 = vadd.f32 %v6988_v47, %v6987_v23 }
 0x2cc   : > { %v4140_v29 = vadd.f32 %v7098_v16, %v6986_v15  ;;  %v7101_v39 = vadd.f32 %v7100_v0, %v7099_v11 }
 0x2ce   : > { %v4378_v21 = vadd.f32 %v4377_v25, %v4140_v29  ;;  %v4417_v7 = vmul.f32 %v4140_v29, %v4140_v29  ;;  %v4143_v55 = vadd.f32 %v7101_v39, %v6989_v62 }
 0x2cf   : > { %v6990_v49 = vpop.f32.mrb[228].mxu0 }
 0x2d0   : > { %v4448_v18 = vadd.f32 %v4447_v28, %v4417_v7  ;;  %v6148_v37 = vpack.c.bf16 %v4143_v55, %v4140_v29  ;;  %v4379_v35 = vadd.f32 %v4378_v21, %v4143_v55  ;;  %v4418_v53 = vmul.f32 %v4143_v55, %v4143_v55  ;;  %v7102_v5 = vpop.f32.mrb[228].mxu1  ;;  %v6991_v30 = vpop.f32.mrb[229].mxu0 }
 0x2d1   : > { %v7103_v24 = vpop.f32.mrb[229].mxu1  ;;  %v6992_v50 = vadd.f32 %v6991_v30, %v6990_v49  ;;  %v6993_v14 = vpop.f32.mrb[230].mxu0 }
 0x2d2   : > { %6240 = vst [vmem:[%s8597_s15 + $0x1c0] sm:$0xff] %v6148_v37   ;;  %v4449_v58 = vadd.f32 %v4448_v18, %v4418_v53  ;;  %v7104_v51 = vadd.f32 %v7103_v24, %v7102_v5  ;;  %v7105_v43 = vpop.f32.mrb[230].mxu1  ;;  %v6994_v63 = vpop.f32.mrb[231].mxu0 }
 0x2d3   : > { %v7106_v48 = vpop.f32.mrb[231].mxu1  ;;  %v6995_v36 = vadd.f32 %v6994_v63, %v6993_v14 }
 0x2d4   : > { %v4148_v9 = vadd.f32 %v7104_v51, %v6992_v50  ;;  %v7107_v57 = vadd.f32 %v7106_v48, %v7105_v43 }
 0x2d6   : > { %v4380_v6 = vadd.f32 %v4379_v35, %v4148_v9  ;;  %v4419_v22 = vmul.f32 %v4148_v9, %v4148_v9  ;;  %v4151_v12 = vadd.f32 %v7107_v57, %v6995_v36 }
 0x2d7   : > { %v6996_v2 = vpop.f32.mrb[232].mxu0 }
 0x2d8   : > { %v4450_v52 = vadd.f32 %v4449_v58, %v4419_v22  ;;  %v6153_v61 = vpack.c.bf16 %v4151_v12, %v4148_v9  ;;  %v4381_v4 = vadd.f32 %v4380_v6, %v4151_v12  ;;  %v4420_v19 = vmul.f32 %v4151_v12, %v4151_v12  ;;  %v7108_v8 = vpop.f32.mrb[232].mxu1  ;;  %v6997_v56 = vpop.f32.mrb[233].mxu0 }
 0x2d9   : > { %v7109_v1 = vpop.f32.mrb[233].mxu1  ;;  %v6998_v41 = vadd.f32 %v6997_v56, %v6996_v2  ;;  %v6999_v42 = vpop.f32.mrb[234].mxu0 }
 0x2da   : > { %6241 = vst [vmem:[%s8597_s15 + $0x1c8] sm:$0xff] %v6153_v61   ;;  %v4451_v13 = vadd.f32 %v4450_v52, %v4420_v19  ;;  %v7110_v40 = vadd.f32 %v7109_v1, %v7108_v8  ;;  %v7111_v32 = vpop.f32.mrb[234].mxu1  ;;  %v7000_v27 = vpop.f32.mrb[235].mxu0 }
 0x2db   : > { %v7112_v17 = vpop.f32.mrb[235].mxu1  ;;  %v7001_v44 = vadd.f32 %v7000_v27, %v6999_v42 }
 0x2dc   : > { %v4156_v3 = vadd.f32 %v7110_v40, %v6998_v41  ;;  %v7113_v38 = vadd.f32 %v7112_v17, %v7111_v32 }
 0x2de   : > { %v4382_v31 = vadd.f32 %v4381_v4, %v4156_v3  ;;  %v4421_v59 = vmul.f32 %v4156_v3, %v4156_v3  ;;  %v4159_v10 = vadd.f32 %v7113_v38, %v7001_v44 }
 0x2df   : > { %v7002_v60 = vpop.f32.mrb[236].mxu0 }
 0x2e0   : > { %v4452_v26 = vadd.f32 %v4451_v13, %v4421_v59  ;;  %v6158_v25 = vpack.c.bf16 %v4159_v10, %v4156_v3  ;;  %v4383_v34 = vadd.f32 %v4382_v31, %v4159_v10  ;;  %v4422_v33 = vmul.f32 %v4159_v10, %v4159_v10  ;;  %v7114_v54 = vpop.f32.mrb[236].mxu1  ;;  %v7003_v46 = vpop.f32.mrb[237].mxu0 }
 0x2e1   : > { %v7115_v28 = vpop.f32.mrb[237].mxu1  ;;  %v7004_v16 = vadd.f32 %v7003_v46, %v7002_v60  ;;  %v7005_v11 = vpop.f32.mrb[238].mxu0 }
 0x2e2   : > { %6242 = vst [vmem:[%s8597_s15 + $0x1d0] sm:$0xff] %v6158_v25   ;;  %v4453_v15 = vadd.f32 %v4452_v26, %v4422_v33  ;;  %v7116_v23 = vadd.f32 %v7115_v28, %v7114_v54  ;;  %v7117_v47 = vpop.f32.mrb[238].mxu1  ;;  %v7006_v0 = vpop.f32.mrb[239].mxu0 }
 0x2e3   : > { %v7118_v29 = vpop.f32.mrb[239].mxu1  ;;  %v7007_v39 = vadd.f32 %v7006_v0, %v7005_v11 }
 0x2e4   : > { %v4164_v62 = vadd.f32 %v7116_v23, %v7004_v16  ;;  %v7119_v21 = vadd.f32 %v7118_v29, %v7117_v47 }
 0x2e6   : > { %v4384_v7 = vadd.f32 %v4383_v34, %v4164_v62  ;;  %v4423_v55 = vmul.f32 %v4164_v62, %v4164_v62  ;;  %v4167_v18 = vadd.f32 %v7119_v21, %v7007_v39 }
 0x2e7   : > { %v7008_v5 = vpop.f32.mrb[240].mxu0 }
 0x2e8   : > { %v4454_v37 = vadd.f32 %v4453_v15, %v4423_v55  ;;  %v6163_v35 = vpack.c.bf16 %v4167_v18, %v4164_v62  ;;  %v4385_v53 = vadd.f32 %v4384_v7, %v4167_v18  ;;  %v4424_v49 = vmul.f32 %v4167_v18, %v4167_v18  ;;  %v7120_v30 = vpop.f32.mrb[240].mxu1  ;;  %v7009_v24 = vpop.f32.mrb[241].mxu0 }
 0x2e9   : > { %v7121_v58 = vpop.f32.mrb[241].mxu1  ;;  %v7010_v51 = vadd.f32 %v7009_v24, %v7008_v5  ;;  %v7011_v43 = vpop.f32.mrb[242].mxu0 }
 0x2ea   : > { %6243 = vst [vmem:[%s8597_s15 + $0x1d8] sm:$0xff] %v6163_v35   ;;  %v4455_v50 = vadd.f32 %v4454_v37, %v4424_v49  ;;  %v7122_v14 = vadd.f32 %v7121_v58, %v7120_v30  ;;  %v7123_v63 = vpop.f32.mrb[242].mxu1  ;;  %v7012_v48 = vpop.f32.mrb[243].mxu0 }
 0x2eb   : > { %v7124_v9 = vpop.f32.mrb[243].mxu1  ;;  %v7013_v57 = vadd.f32 %v7012_v48, %v7011_v43 }
 0x2ec   : > { %v4172_v36 = vadd.f32 %v7122_v14, %v7010_v51  ;;  %v7125_v6 = vadd.f32 %v7124_v9, %v7123_v63 }
 0x2ee   : > { %v4386_v22 = vadd.f32 %v4385_v53, %v4172_v36  ;;  %v4425_v12 = vmul.f32 %v4172_v36, %v4172_v36  ;;  %v4175_v52 = vadd.f32 %v7125_v6, %v7013_v57 }
 0x2ef   : > { %v7014_v8 = vpop.f32.mrb[244].mxu0 }
 0x2f0   : > { %v4456_v61 = vadd.f32 %v4455_v50, %v4425_v12  ;;  %v6168_v4 = vpack.c.bf16 %v4175_v52, %v4172_v36  ;;  %v4387_v19 = vadd.f32 %v4386_v22, %v4175_v52  ;;  %v4426_v2 = vmul.f32 %v4175_v52, %v4175_v52  ;;  %v7126_v56 = vpop.f32.mrb[244].mxu1  ;;  %v7015_v1 = vpop.f32.mrb[245].mxu0 }
 0x2f1   : > { %v7127_v13 = vpop.f32.mrb[245].mxu1  ;;  %v7016_v40 = vadd.f32 %v7015_v1, %v7014_v8  ;;  %v7017_v32 = vpop.f32.mrb[246].mxu0 }
 0x2f2   : > { %6244 = vst [vmem:[%s8597_s15 + $0x1e0] sm:$0xff] %v6168_v4   ;;  %v4457_v41 = vadd.f32 %v4456_v61, %v4426_v2  ;;  %v7128_v42 = vadd.f32 %v7127_v13, %v7126_v56  ;;  %v7129_v27 = vpop.f32.mrb[246].mxu1  ;;  %v7018_v17 = vpop.f32.mrb[247].mxu0 }
 0x2f3   : > { %v7130_v3 = vpop.f32.mrb[247].mxu1  ;;  %v7019_v38 = vadd.f32 %v7018_v17, %v7017_v32 }
 0x2f4   : > { %v4180_v44 = vadd.f32 %v7128_v42, %v7016_v40  ;;  %v7131_v31 = vadd.f32 %v7130_v3, %v7129_v27 }
 0x2f6   : > { %v4388_v59 = vadd.f32 %v4387_v19, %v4180_v44  ;;  %v4427_v10 = vmul.f32 %v4180_v44, %v4180_v44  ;;  %v4183_v26 = vadd.f32 %v7131_v31, %v7019_v38 }
 0x2f7   : > { %v7020_v54 = vpop.f32.mrb[248].mxu0 }
 0x2f8   : > { %v4458_v25 = vadd.f32 %v4457_v41, %v4427_v10  ;;  %v6173_v34 = vpack.c.bf16 %v4183_v26, %v4180_v44  ;;  %v4389_v33 = vadd.f32 %v4388_v59, %v4183_v26  ;;  %v4428_v60 = vmul.f32 %v4183_v26, %v4183_v26  ;;  %v7132_v46 = vpop.f32.mrb[248].mxu1  ;;  %v7021_v28 = vpop.f32.mrb[249].mxu0  ;;  %v4510_v26 = vld [vmem:[%s8597_s15 + $0x8] sm:$0xff] (%p7424_p4)  }
 0x2f9   : > { %v7133_v15 = vpop.f32.mrb[249].mxu1  ;;  %v7022_v23 = vadd.f32 %v7021_v28, %v7020_v54  ;;  %v7023_v47 = vpop.f32.mrb[250].mxu0  ;;  %4511 = vst [vmem:[%s8965_s12 + $0x8] sm:$0xff] (%p7424_p4), %v4510_v26   ;;  %v4534_v54 = vld [vmem:[%s8597_s15 + $0x38] sm:$0xff] (%p7424_p4)   ;;  %v4542_v28 = vld [vmem:[%s8597_s15 + $0x48] sm:$0xff] (%p7424_p4)  }
 0x2fa   : > { %6245 = vst [vmem:[%s8597_s15 + $0x1e8] sm:$0xff] %v6173_v34   ;;  %v4459_v16 = vadd.f32 %v4458_v25, %v4428_v60  ;;  %v7134_v11 = vadd.f32 %v7133_v15, %v7132_v46  ;;  %v7135_v0 = vpop.f32.mrb[250].mxu1  ;;  %v7024_v29 = vpop.f32.mrb[251].mxu0  ;;  %v4514_v25 = vld [vmem:[%s8597_s15 + $0x10] sm:$0xff] (%p7424_p4)   ;;  %v4522_v34 = vld [vmem:[%s8597_s15 + $0x20] sm:$0xff] (%p7424_p4)   ;;  %4535 = vst [vmem:[%s8965_s12 + $0x38] sm:$0xff] (%p7424_p4), %v4534_v54  }
 0x2fb   : > { %v7136_v62 = vpop.f32.mrb[251].mxu1  ;;  %v7025_v21 = vadd.f32 %v7024_v29, %v7023_v47  ;;  %4515 = vst [vmem:[%s8965_s12 + $0x10] sm:$0xff] (%p7424_p4), %v4514_v25   ;;  %4523 = vst [vmem:[%s8965_s12 + $0x20] sm:$0xff] (%p7424_p4), %v4522_v34   ;;  %v4530_v60 = vld [vmem:[%s8597_s15 + $0x30] sm:$0xff] (%p7424_p4)   ;;  %v4538_v46 = vld [vmem:[%s8597_s15 + $0x40] sm:$0xff] (%p7424_p4)  }
 0x2fc   : > { %v4188_v39 = vadd.f32 %v7134_v11, %v7022_v23  ;;  %v7137_v7 = vadd.f32 %v7136_v62, %v7135_v0  ;;  %4531 = vst [vmem:[%s8965_s12 + $0x30] sm:$0xff] (%p7424_p4), %v4530_v60   ;;  %4539 = vst [vmem:[%s8965_s12 + $0x40] sm:$0xff] (%p7424_p4), %v4538_v46   ;;  %v4546_v15 = vld [vmem:[%s8597_s15 + $0x50] sm:$0xff] (%p7424_p4)   ;;  %v4554_v23 = vld [vmem:[%s8597_s15 + $0x60] sm:$0xff] (%p7424_p4)  }
 0x2fd   : > { %4543 = vst [vmem:[%s8965_s12 + $0x48] sm:$0xff] (%p7424_p4), %v4542_v28   ;;  %4547 = vst [vmem:[%s8965_s12 + $0x50] sm:$0xff] (%p7424_p4), %v4546_v15   ;;  %v4558_v11 = vld [vmem:[%s8597_s15 + $0x68] sm:$0xff] (%p7424_p4)   ;;  %v4562_v47 = vld [vmem:[%s8597_s15 + $0x70] sm:$0xff] (%p7424_p4)  }
 0x2fe   : > { %v4390_v55 = vadd.f32 %v4389_v33, %v4188_v39  ;;  %v4429_v18 = vmul.f32 %v4188_v39, %v4188_v39  ;;  %v4191_v37 = vadd.f32 %v7137_v7, %v7025_v21  ;;  %v4526_v33 = vld [vmem:[%s8597_s15 + $0x28] sm:$0xff] (%p7424_p4)   ;;  %4555 = vst [vmem:[%s8965_s12 + $0x60] sm:$0xff] (%p7424_p4), %v4554_v23   ;;  %4559 = vst [vmem:[%s8965_s12 + $0x68] sm:$0xff] (%p7424_p4), %v4558_v11   ;;  %v4566_v0 = vld [vmem:[%s8597_s15 + $0x78] sm:$0xff] (%p7424_p4)  }
 0x2ff   : > { %v7026_v30 = vpop.f32.mrb[252].mxu0  ;;  %4527 = vst [vmem:[%s8965_s12 + $0x28] sm:$0xff] (%p7424_p4), %v4526_v33   ;;  %4563 = vst [vmem:[%s8965_s12 + $0x70] sm:$0xff] (%p7424_p4), %v4562_v47   ;;  %v4570_v29 = vld [vmem:[%s8597_s15 + $0x80] sm:$0xff] (%p7424_p4)   ;;  %v4574_v62 = vld [vmem:[%s8597_s15 + $0x88] sm:$0xff] (%p7424_p4)  }
 0x300   : > { %v4460_v35 = vadd.f32 %v4459_v16, %v4429_v18  ;;  %v6178_v53 = vpack.c.bf16 %v4191_v37, %v4188_v39  ;;  %v4391_v49 = vadd.f32 %v4390_v55, %v4191_v37  ;;  %v4430_v5 = vmul.f32 %v4191_v37, %v4191_v37  ;;  %v7138_v24 = vpop.f32.mrb[252].mxu1  ;;  %v7027_v58 = vpop.f32.mrb[253].mxu0  ;;  %v4550_v16 = vld [vmem:[%s8597_s15 + $0x58] sm:$0xff] (%p7424_p4)   ;;  %4567 = vst [vmem:[%s8965_s12 + $0x78] sm:$0xff] (%p7424_p4), %v4566_v0   ;;  %v4578_v39 = vld [vmem:[%s8597_s15 + $0x90] sm:$0xff] (%p7424_p4)   ;;  %v4586_v7 = vld [vmem:[%s8597_s15 + $0xa0] sm:$0xff] (%p7424_p4)  }
 0x301   : > { %v7139_v50 = vpop.f32.mrb[253].mxu1  ;;  %v7028_v14 = vadd.f32 %v7027_v58, %v7026_v30  ;;  %v7029_v63 = vpop.f32.mrb[254].mxu0  ;;  %4551 = vst [vmem:[%s8965_s12 + $0x58] sm:$0xff] (%p7424_p4), %v4550_v16   ;;  %4571 = vst [vmem:[%s8965_s12 + $0x100] sm:$0xff] (%p7424_p4), %v4570_v29   ;;  %v4582_v21 = vld [vmem:[%s8597_s15 + $0x98] sm:$0xff] (%p7424_p4)   ;;  %v4590_v55 = vld [vmem:[%s8597_s15 + $0xa8] sm:$0xff] (%p7424_p4)  }
 0x302   : > { %6246 = vst [vmem:[%s8597_s15 + $0x1f0] sm:$0xff] %v6178_v53   ;;  %v4461_v51 = vadd.f32 %v4460_v35, %v4430_v5  ;;  %v7140_v43 = vadd.f32 %v7139_v50, %v7138_v24  ;;  %v7141_v48 = vpop.f32.mrb[254].mxu1  ;;  %v7030_v9 = vpop.f32.mrb[255].mxu0  ;;  %4575 = vst [vmem:[%s8965_s12 + $0x108] sm:$0xff] (%p7424_p4), %v4574_v62   ;;  %v4594_v18 = vld [vmem:[%s8597_s15 + $0xb0] sm:$0xff] (%p7424_p4)   ;;  %v4598_v37 = vld [vmem:[%s8597_s15 + $0xb8] sm:$0xff] (%p7424_p4)  }
 0x303   : > { %v7142_v36 = vpop.f32.mrb[255].mxu1  ;;  %v7031_v6 = vadd.f32 %v7030_v9, %v7029_v63  ;;  %4579 = vst [vmem:[%s8965_s12 + $0x110] sm:$0xff] (%p7424_p4), %v4578_v39   ;;  %4583 = vst [vmem:[%s8965_s12 + $0x118] sm:$0xff] (%p7424_p4), %v4582_v21   ;;  %v4602_v35 = vld [vmem:[%s8597_s15 + $0xc0] sm:$0xff] (%p7424_p4)   ;;  %v4606_v53 = vld [vmem:[%s8597_s15 + $0xc8] sm:$0xff] (%p7424_p4)  }
 0x304   : > { %v4196_v57 = vadd.f32 %v7140_v43, %v7028_v14  ;;  %v7143_v22 = vadd.f32 %v7142_v36, %v7141_v48  ;;  %4587 = vst [vmem:[%s8965_s12 + $0x120] sm:$0xff] (%p7424_p4), %v4586_v7   ;;  %4591 = vst [vmem:[%s8965_s12 + $0x128] sm:$0xff] (%p7424_p4), %v4590_v55   ;;  %v4614_v5 = vld [vmem:[%s8597_s15 + $0xd8] sm:$0xff] (%p7424_p4)   ;;  %v4618_v30 = vld [vmem:[%s8597_s15 + $0xe0] sm:$0xff] (%p7424_p4)  }
 0x305   : > { %4595 = vst [vmem:[%s8965_s12 + $0x130] sm:$0xff] (%p7424_p4), %v4594_v18   ;;  %4599 = vst [vmem:[%s8965_s12 + $0x138] sm:$0xff] (%p7424_p4), %v4598_v37   ;;  %v4622_v24 = vld [vmem:[%s8597_s15 + $0xe8] sm:$0xff] (%p7424_p4)   ;;  %v4626_v58 = vld [vmem:[%s8597_s15 + $0xf0] sm:$0xff] (%p7424_p4)  }
 0x306   : > { %v4392_v12 = vadd.f32 %v4391_v49, %v4196_v57  ;;  %v4431_v52 = vmul.f32 %v4196_v57, %v4196_v57  ;;  %v4199_v61 = vadd.f32 %v7143_v22, %v7031_v6  ;;  %v4610_v49 = vld [vmem:[%s8597_s15 + $0xd0] sm:$0xff] (%p7424_p4)   ;;  %4603 = vst [vmem:[%s8965_s12 + $0x140] sm:$0xff] (%p7424_p4), %v4602_v35   ;;  %4607 = vst [vmem:[%s8965_s12 + $0x148] sm:$0xff] (%p7424_p4), %v4606_v53   ;;  %v4630_v50 = vld [vmem:[%s8597_s15 + $0xf8] sm:$0xff] (%p7424_p4)  }
 0x307   : > { %4611 = vst [vmem:[%s8965_s12 + $0x150] sm:$0xff] (%p7424_p4), %v4610_v49   ;;  %4615 = vst [vmem:[%s8965_s12 + $0x158] sm:$0xff] (%p7424_p4), %v4614_v5   ;;  %v4638_v14 = vld [vmem:[%s8597_s15 + $0x108] sm:$0xff] (%p7424_p4)   ;;  %v4642_v43 = vld [vmem:[%s8597_s15 + $0x110] sm:$0xff] (%p7424_p4)  }
 0x308   : > { %v4462_v4 = vadd.f32 %v4461_v51, %v4431_v52  ;;  %v6183_v19 = vpack.c.bf16 %v4199_v61, %v4196_v57  ;;  %v4393_v2 = vadd.f32 %v4392_v12, %v4199_v61  ;;  %v4432_v8 = vmul.f32 %v4199_v61, %v4199_v61  ;;  %4619 = vst [vmem:[%s8965_s12 + $0x160] sm:$0xff] (%p7424_p4), %v4618_v30   ;;  %v4634_v51 = vld [vmem:[%s8597_s15 + $0x100] sm:$0xff] (%p7424_p4)   ;;  %v4646_v63 = vld [vmem:[%s8597_s15 + $0x118] sm:$0xff] (%p7424_p4)   ;;  %v4654_v9 = vld [vmem:[%s8597_s15 + $0x128] sm:$0xff] (%p7424_p4)  }
 0x309   : > { %4623 = vst [vmem:[%s8965_s12 + $0x168] sm:$0xff] (%p7424_p4), %v4622_v24   ;;  %4627 = vst [vmem:[%s8965_s12 + $0x170] sm:$0xff] (%p7424_p4), %v4626_v58   ;;  %v4650_v48 = vld [vmem:[%s8597_s15 + $0x120] sm:$0xff] (%p7424_p4)   ;;  %v4658_v36 = vld [vmem:[%s8597_s15 + $0x130] sm:$0xff] (%p7424_p4)  }
 0x30a   : > { %6247 = vst [vmem:[%s8597_s15 + $0x1f8] sm:$0xff] %v6183_v19   ;;  %v4394_v56 = vrot.slane %v4393_v2, 4  ;;  %v4463_v1 = vadd.f32 %v4462_v4, %v4432_v8  ;;  %4631 = vst [vmem:[%s8965_s12 + $0x178] sm:$0xff] (%p7424_p4), %v4630_v50   ;;  %v4662_v57 = vld [vmem:[%s8597_s15 + $0x138] sm:$0xff] (%p7424_p4)   ;;  %v4666_v6 = vld [vmem:[%s8597_s15 + $0x140] sm:$0xff] (%p7424_p4)  }
 0x30b   : > { %4635 = vst [vmem:[%s8965_s12 + $0x200] sm:$0xff] (%p7424_p4), %v4634_v51   ;;  %4639 = vst [vmem:[%s8965_s12 + $0x208] sm:$0xff] (%p7424_p4), %v4638_v14   ;;  %v4670_v22 = vld [vmem:[%s8597_s15 + $0x148] sm:$0xff] (%p7424_p4)   ;;  %v4674_v12 = vld [vmem:[%s8597_s15 + $0x150] sm:$0xff] (%p7424_p4)  }
 0x30c   : > { %v4395_v13 = vadd.f32 %v4394_v56, %v4393_v2  ;;  %v4464_v41 = vrot.slane %v4463_v1, 4  ;;  %4643 = vst [vmem:[%s8965_s12 + $0x210] sm:$0xff] (%p7424_p4), %v4642_v43   ;;  %4647 = vst [vmem:[%s8965_s12 + $0x218] sm:$0xff] (%p7424_p4), %v4646_v63   ;;  %v4678_v52 = vld [vmem:[%s8597_s15 + $0x158] sm:$0xff] (%p7424_p4)   ;;  %v4682_v61 = vld [vmem:[%s8597_s15 + $0x160] sm:$0xff] (%p7424_p4)  }
 0x30d   : > { %4651 = vst [vmem:[%s8965_s12 + $0x220] sm:$0xff] (%p7424_p4), %v4650_v48   ;;  %4655 = vst [vmem:[%s8965_s12 + $0x228] sm:$0xff] (%p7424_p4), %v4654_v9   ;;  %v4686_v4 = vld [vmem:[%s8597_s15 + $0x168] sm:$0xff] (%p7424_p4)   ;;  %v4690_v19 = vld [vmem:[%s8597_s15 + $0x170] sm:$0xff] (%p7424_p4)  }
 0x30e   : > { %v4396_v40 = vrot.slane %v4395_v13, 2  ;;  %v4465_v42 = vadd.f32 %v4464_v41, %v4463_v1  ;;  %4659 = vst [vmem:[%s8965_s12 + $0x230] sm:$0xff] (%p7424_p4), %v4658_v36   ;;  %4663 = vst [vmem:[%s8965_s12 + $0x238] sm:$0xff] (%p7424_p4), %v4662_v57   ;;  %v4694_v2 = vld [vmem:[%s8597_s15 + $0x178] sm:$0xff] (%p7424_p4)   ;;  %v4698_v8 = vld [vmem:[%s8597_s15 + $0x180] sm:$0xff] (%p7424_p4)  }
 0x30f   : > { %4667 = vst [vmem:[%s8965_s12 + $0x240] sm:$0xff] (%p7424_p4), %v4666_v6   ;;  %4671 = vst [vmem:[%s8965_s12 + $0x248] sm:$0xff] (%p7424_p4), %v4670_v22   ;;  %v4702_v56 = vld [vmem:[%s8597_s15 + $0x188] sm:$0xff] (%p7424_p4)   ;;  %v4706_v1 = vld [vmem:[%s8597_s15 + $0x190] sm:$0xff] (%p7424_p4)  }
 0x310   : > { %v4397_v32 = vadd.f32 %v4396_v40, %v4395_v13  ;;  %v4466_v27 = vrot.slane %v4465_v42, 2  ;;  %4675 = vst [vmem:[%s8965_s12 + $0x250] sm:$0xff] (%p7424_p4), %v4674_v12   ;;  %4679 = vst [vmem:[%s8965_s12 + $0x258] sm:$0xff] (%p7424_p4), %v4678_v52   ;;  %v4710_v13 = vld [vmem:[%s8597_s15 + $0x198] sm:$0xff] (%p7424_p4)   ;;  %v4714_v41 = vld [vmem:[%s8597_s15 + $0x1a0] sm:$0xff] (%p7424_p4)  }
 0x311   : > { %4683 = vst [vmem:[%s8965_s12 + $0x260] sm:$0xff] (%p7424_p4), %v4682_v61   ;;  %4687 = vst [vmem:[%s8965_s12 + $0x268] sm:$0xff] (%p7424_p4), %v4686_v4   ;;  %v4718_v40 = vld [vmem:[%s8597_s15 + $0x1a8] sm:$0xff] (%p7424_p4)  }
 0x312   : > { %v4398_v17 = vrot.slane %v4397_v32, 1  ;;  %v4467_v3 = vadd.f32 %v4466_v27, %v4465_v42  ;;  %4691 = vst [vmem:[%s8965_s12 + $0x270] sm:$0xff] (%p7424_p4), %v4690_v19   ;;  %4695 = vst [vmem:[%s8965_s12 + $0x278] sm:$0xff] (%p7424_p4), %v4694_v2   ;;  %v4722_v42 = vld [vmem:[%s8597_s15 + $0x1b0] sm:$0xff] (%p7424_p4)   ;;  %v4730_v27 = vld [vmem:[%s8597_s15 + $0x1c0] sm:$0xff] (%p7424_p4)  }
 0x313   : > { %4699 = vst [vmem:[%s8965_s12 + $0x300] sm:$0xff] (%p7424_p4), %v4698_v8   ;;  %4703 = vst [vmem:[%s8965_s12 + $0x308] sm:$0xff] (%p7424_p4), %v4702_v56  }
 0x314   : > { %v4399_v44 = vadd.f32 %v4398_v17, %v4397_v32  ;;  %v4468_v38 = vrot.slane %v4467_v3, 1  ;;  %4487 = sbr.rel (!%p7424_p4) target bundleno = 797 (0x31d), region = 32  ;;  %4707 = vst [vmem:[%s8965_s12 + $0x310] sm:$0xff] (%p7424_p4), %v4706_v1   ;;  %4711 = vst [vmem:[%s8965_s12 + $0x318] sm:$0xff] (%p7424_p4), %v4710_v13   ;;  %v4726_v32 = vld [vmem:[%s8597_s15 + $0x1b8] sm:$0xff] (%p7424_p4)   ;;  %v4734_v17 = vld [vmem:[%s8597_s15 + $0x1c8] sm:$0xff] (%p7424_p4)  }
 0x315   : > { %4715 = vst [vmem:[%s8965_s12 + $0x320] sm:$0xff] (%p7424_p4), %v4714_v41   ;;  %4719 = vst [vmem:[%s8965_s12 + $0x328] sm:$0xff] (%p7424_p4), %v4718_v40  }
 0x316   : > { %v4400_v31 = vadd.f32 %v4399_v44, %v8927_v20  ;;  %v4469_v59 = vadd.f32 %v4468_v38, %v4467_v3  ;;  %v4506_v20 = vld [vmem:[%s8597_s15] sm:$0xff] (%p7424_p4)   ;;  %4723 = vst [vmem:[%s8965_s12 + $0x330] sm:$0xff] (%p7424_p4), %v4722_v42   ;;  %4727 = vst [vmem:[%s8965_s12 + $0x338] sm:$0xff] (%p7424_p4), %v4726_v32   ;;  %v4738_v3 = vld [vmem:[%s8597_s15 + $0x1d0] sm:$0xff] (%p7424_p4)  }
 0x317   : > { %4507 = vst [vmem:[%s8965_s12] sm:$0xff] (%p7424_p4), %v4506_v20   ;;  %4731 = vst [vmem:[%s8965_s12 + $0x340] sm:$0xff] (%p7424_p4), %v4730_v27   ;;  %v4742_v44 = vld [vmem:[%s8597_s15 + $0x1d8] sm:$0xff] (%p7424_p4)   ;;  %v4746_v38 = vld [vmem:[%s8597_s15 + $0x1e0] sm:$0xff] (%p7424_p4)  }
 0x318   : > { %v4470_v10 = vadd.f32 %v4469_v59, %v8930_v45  ;;  %4471 = vst [vmem:[%s208_s6] sm:$0xff] %v4400_v31  ;;  %v4518_v45 = vld [vmem:[%s8597_s15 + $0x18] sm:$0xff] (%p7424_p4)   ;;  %4735 = vst [vmem:[%s8965_s12 + $0x348] sm:$0xff] (%p7424_p4), %v4734_v17   ;;  %v4750_v31 = vld [vmem:[%s8597_s15 + $0x1e8] sm:$0xff] (%p7424_p4)  }
 0x319   : > { %4519 = vst [vmem:[%s8965_s12 + $0x18] sm:$0xff] (%p7424_p4), %v4518_v45   ;;  %4739 = vst [vmem:[%s8965_s12 + $0x350] sm:$0xff] (%p7424_p4), %v4738_v3   ;;  %v4754_v59 = vld [vmem:[%s8597_s15 + $0x1f0] sm:$0xff] (%p7424_p4)  }
 0x31a   : > { %4472 = vst [vmem:[%s212_s9] sm:$0xff] %v4470_v10  ;;  %4743 = vst [vmem:[%s8965_s12 + $0x358] sm:$0xff] (%p7424_p4), %v4742_v44   ;;  %v4758_v10 = vld [vmem:[%s8597_s15 + $0x1f8] sm:$0xff] (%p7424_p4)  }
 0x31b   : > { %4747 = vst [vmem:[%s8965_s12 + $0x360] sm:$0xff] %v4746_v38   ;;  %4751 = vst [vmem:[%s8965_s12 + $0x368] sm:$0xff] %v4750_v31  }
 0x31c   : > { %4755 = vst [vmem:[%s8965_s12 + $0x370] sm:$0xff] %v4754_v59   ;;  %4759 = vst [vmem:[%s8965_s12 + $0x378] sm:$0xff] %v4758_v10  }
 0x31d PF: > { %p12_p8 = scmp.ge.s32.totalorder %s7414_s19, 4   ;;  %s9345_s15 = smov %s7368_s16 }
 0x31e   : > { %s9346_s16 = smov %s7422_s22  ;;  %s9347_s17 = smov %s7414_s19 }
 0x31f   :  { %14 = sbr.rel (!%p12_p8) target bundleno = 2 (0x2), region = 129 }

</bundles_post_ra>
